<compile_context>
chip_gen: v6e
topology: v6e:2x2x1
jax: 0.10.0
libtpu: 0.0.40
codegen_flags: <defaults>
</compile_context>

<pallas_src>
import functools

import jax
import jax.numpy as jnp
from jax.experimental import pallas as pl
from jax.experimental.pallas import tpu as pltpu

EPS = 1e-5
LANE = 128


def _round_up(x, m):
    return (x + m - 1) // m * m


def _down_kernel(bb, hp, wp, cp,
                 x_ref, w1_ref, b1_ref, w2_ref, b2_ref,
                 o_ref, pad_ref, col_ref):
    """One batch-block per grid step.

    x_ref  : (bb, hp, 2, wp, 2, cp) bf16  pre-split 2x2 pooling windows
    w*_ref : (9*cp, cp) bf16              BN-scale-folded im2col weights
    b*_ref : (1, cp) f32                  folded bias (conv bias + BN shift)
    o_ref  : (bb, hp, wp, cp) f32
    pad_ref: (bb, hp+2, wpad, cp) bf16    zero-bordered activation scratch
    col_ref: (bb*hp*wp, 9*cp) bf16        im2col slab
    """
    m = bb * hp * wp

    # Zero the padded scratch once; borders stay zero (never written again)
    # and the interior is fully overwritten for every conv on every step.
    @pl.when(pl.program_id(0) == 0)
    def _():
        pad_ref[...] = jnp.zeros(pad_ref.shape, pad_ref.dtype)

    # ---- MaxPool2d(2): reduce over the two explicit window axes ------------
    xw = x_ref[...]                                   # (bb, hp, 2, wp, 2, cp)
    pooled = jnp.max(jnp.max(xw, axis=4), axis=2)     # (bb, hp, wp, cp)

    def conv_bias_relu(inp, w_ref, b_ref):
        # SAME padding=1: write the interior of the persistent scratch.
        pad_ref[:, 1:1 + hp, 1:1 + wp, :] = inp.astype(pad_ref.dtype)
        # im2col: the 9 shifted windows become 128-lane-aligned column slabs,
        # so the whole conv is a single MXU matmul with K = 9*cp.
        for dy in range(3):
            for dx in range(3):
                tap = dy * 3 + dx
                sl = pad_ref[:, dy:dy + hp, dx:dx + wp, :]   # (bb,hp,wp,cp)
                col_ref[:, tap * cp:(tap + 1) * cp] = sl.reshape(m, cp)
        acc = jnp.dot(col_ref[...], w_ref[...],
                      preferred_element_type=jnp.float32)    # (m, cp) f32
        # BN scale already folded into the weights: epilogue = bias + ReLU.
        return jnp.maximum(acc + b_ref[...], 0.0)

    y1 = conv_bias_relu(pooled, w1_ref, b1_ref)
    y2 = conv_bias_relu(y1.reshape(bb, hp, wp, cp), w2_ref, b2_ref)
    o_ref[...] = y2.reshape(bb, hp, wp, cp).astype(o_ref.dtype)


def down_forward(x_nchw, w1, bc1, g1, be1, m1, v1, w2, bc2, g2, be2, m2, v2):
    """down(in_ch, out_ch).forward(x); x NCHW -> NCHW. Weights are HWIO."""
    n, cin, h, w = x_nchw.shape
    assert h % 2 == 0 and w % 2 == 0
    hp, wp = h // 2, w // 2
    cout = w1.shape[-1]

    # Lane-dense channel width.
    cp = _round_up(max(cin, cout, LANE), LANE)

    # Fold BN (eval mode) + conv bias: y = conv(x, w*s) + (be + (bc - m)*s)
    s1 = g1 / jnp.sqrt(v1 + EPS)
    s2 = g2 / jnp.sqrt(v2 + EPS)
    bias1 = be1 + (bc1 - m1) * s1
    bias2 = be2 + (bc2 - m2) * s2
    w1f = (w1 * s1).astype(jnp.float32)
    w2f = (w2 * s2).astype(jnp.float32)

    def pack_w(wf, ci, co):
        buf = jnp.zeros((3, 3, cp, cp), jnp.float32)
        buf = buf.at[:, :, :ci, :co].set(wf)
        # Flatten (dy, dx, cin) tap-major to match the im2col slab layout.
        return buf.reshape(9 * cp, cp).astype(jnp.bfloat16)

    def pack_b(b, co):
        return jnp.zeros((1, cp), jnp.float32).at[0, :co].set(b)

    w1c, w2c = pack_w(w1f, cin, cout), pack_w(w2f, cout, cout)
    b1c, b2c = pack_b(bias1, cout), pack_b(bias2, cout)

    # NCHW -> NHWC, zero-pad channels to the lane width, bf16, and expose the
    # 2x2 pooling windows as explicit axes.
    x_nhwc = jnp.transpose(x_nchw, (0, 2, 3, 1)).astype(jnp.float32)
    x_nhwc = jnp.pad(x_nhwc, ((0, 0), (0, 0), (0, 0), (0, cp - cin)))
    x6 = x_nhwc.astype(jnp.bfloat16).reshape(n, hp, 2, wp, 2, cp)

    # Batch-block so the matmul M dim (bb*hp*wp) is >= ~256 where possible.
    bb = min(n, max(1, -(-256 // (hp * wp))))
    while n % bb:
        bb -= 1
    m = bb * hp * wp
    wpad = _round_up(wp + 2, 8)   # sublane-aligned padded-scratch width

    kernel = functools.partial(_down_kernel, bb, hp, wp, cp)

    grid_spec = pltpu.PrefetchScalarGridSpec(
        num_scalar_prefetch=0,
        grid=(n // bb,),
        in_specs=[
            pl.BlockSpec((bb, hp, 2, wp, 2, cp),
                         lambda i: (i, 0, 0, 0, 0, 0)),
            pl.BlockSpec((9 * cp, cp), lambda i: (0, 0)),
            pl.BlockSpec((1, cp), lambda i: (0, 0)),
            pl.BlockSpec((9 * cp, cp), lambda i: (0, 0)),
            pl.BlockSpec((1, cp), lambda i: (0, 0)),
        ],
        out_specs=pl.BlockSpec((bb, hp, wp, cp), lambda i: (i, 0, 0, 0)),
        scratch_shapes=[
            pltpu.VMEM((bb, hp + 2, wpad, cp), jnp.bfloat16),  # padded act
            pltpu.VMEM((m, 9 * cp), jnp.bfloat16),             # im2col slab
        ],
    )

    out_nhwc = pl.pallas_call(
        kernel,
        out_shape=jax.ShapeDtypeStruct((n, hp, wp, cp), jnp.float32),
        grid_spec=grid_spec,
        compiler_params=pltpu.CompilerParams(
            dimension_semantics=("parallel",)),
    )(x6, w1c, b1c, w2c, b2c)

    out_nhwc = out_nhwc[:, :, :, :cout]
    return jnp.transpose(out_nhwc, (0, 3, 1, 2))


def reference_down(x_nchw, w1, bc1, g1, be1, m1, v1, w2, bc2, g2, be2, m2, v2):
    """Pure-JAX f32/HIGHEST reference (lax conv / reduce_window)."""
    x = jnp.transpose(x_nchw, (0, 2, 3, 1))
    p = jax.lax.reduce_window(x, -jnp.inf, jax.lax.max,
                              (1, 2, 2, 1), (1, 2, 2, 1), "VALID")

    def cbr(inp, w, bc, g, be, mu, var):
        y = jax.lax.conv_general_dilated(
            inp, w, window_strides=(1, 1), padding="SAME",
            dimension_numbers=("NHWC", "HWIO", "NHWC"),
            precision=jax.lax.Precision.HIGHEST) + bc
        y = (y - mu) * (g / jnp.sqrt(var + EPS)) + be
        return jnp.maximum(y, 0.0)

    y = cbr(p, w1, bc1, g1, be1, m1, v1)
    y = cbr(y, w2, bc2, g2, be2, m2, v2)
    return jnp.transpose(y, (0, 3, 1, 2))


if __name__ == "__main__":
    N, CIN, H, W = 2, 4, 16, 16
    COUT = 8

    keys = jax.random.split(jax.random.PRNGKey(0), 13)
    x = jax.random.normal(keys[0], (N, CIN, H, W), jnp.float32)

    # conv1 (+bias) + BN1 parameters (synthetic, eval-mode stats)
    w1 = 0.2 * jax.random.normal(keys[1], (3, 3, CIN, COUT), jnp.float32)
    bc1 = 0.1 * jax.random.normal(keys[2], (COUT,), jnp.float32)
    g1 = 1.0 + 0.1 * jax.random.normal(keys[3], (COUT,), jnp.float32)
    be1 = 0.1 * jax.random.normal(keys[4], (COUT,), jnp.float32)
    m1 = 0.1 * jax.random.normal(keys[5], (COUT,), jnp.float32)
    v1 = 1.0 + 0.1 * jnp.abs(jax.random.normal(keys[6], (COUT,), jnp.float32))

    # conv2 (+bias) + BN2 parameters
    w2 = 0.2 * jax.random.normal(keys[7], (3, 3, COUT, COUT), jnp.float32)
    bc2 = 0.1 * jax.random.normal(keys[8], (COUT,), jnp.float32)
    g2 = 1.0 + 0.1 * jax.random.normal(keys[9], (COUT,), jnp.float32)
    be2 = 0.1 * jax.random.normal(keys[10], (COUT,), jnp.float32)
    m2 = 0.1 * jax.random.normal(keys[11], (COUT,), jnp.float32)
    v2 = 1.0 + 0.1 * jnp.abs(jax.random.normal(keys[12], (COUT,), jnp.float32))

    out = down_forward(x, w1, bc1, g1, be1, m1, v1, w2, bc2, g2, be2, m2, v2)
    out = jax.block_until_ready(out)

    ref = reference_down(x, w1, bc1, g1, be1, m1, v1,
                         w2, bc2, g2, be2, m2, v2)
    assert out.shape == (N, COUT, H // 2, W // 2), out.shape
    # Tolerance accounts for bf16 MXU operands vs the f32 HIGHEST reference.
    assert jnp.allclose(out, ref, atol=2e-2, rtol=2e-2), \
        float(jnp.max(jnp.abs(out - ref)))

    print("KERNEL_OK")
</pallas_src>

<mosaic_0001>
module attributes {stable_mosaic.version = 11 : i64} {
  func.func @_down_kernel(%arg0: i32, %arg1: memref<2x8x2x8x2x128xbf16, #tpu.memory_space<vmem>>, %arg2: memref<1152x128xbf16, #tpu.memory_space<vmem>>, %arg3: memref<1x128xf32, #tpu.memory_space<vmem>>, %arg4: memref<1152x128xbf16, #tpu.memory_space<vmem>>, %arg5: memref<1x128xf32, #tpu.memory_space<vmem>>, %arg6: memref<2x8x8x128xf32, #tpu.memory_space<vmem>>, %arg7: memref<2x10x16x128xbf16, #tpu.memory_space<vmem>>, %arg8: memref<128x1152xbf16, #tpu.memory_space<vmem>>) attributes {dimension_semantics = [#tpu.dimension_semantics<parallel>], iteration_bounds = array<i64: 1>, scalar_prefetch = 0 : i64, scratch_operands = 2 : i64, tpu.core_type = #tpu.core_type<tc>, window_params = [{transform_indices = @transform_0, window_bounds = array<i64: 2, 8, 2, 8, 2, 128>}, {pipeline_mode = #tpu.pipeline_mode<synchronous>, transform_indices = @transform_1, window_bounds = array<i64: 1152, 128>}, {pipeline_mode = #tpu.pipeline_mode<synchronous>, transform_indices = @transform_2, window_bounds = array<i64: 1, 128>}, {pipeline_mode = #tpu.pipeline_mode<synchronous>, transform_indices = @transform_3, window_bounds = array<i64: 1152, 128>}, {pipeline_mode = #tpu.pipeline_mode<synchronous>, transform_indices = @transform_4, window_bounds = array<i64: 1, 128>}, {transform_indices = @transform_5, window_bounds = array<i64: 2, 8, 8, 128>}]} {
    %c0_i32 = arith.constant 0 : i32
    %0 = arith.cmpi eq, %arg0, %c0_i32 : i32
    %1 = arith.extui %0 : i1 to i32
    %c0_i32_0 = arith.constant 0 : i32
    %2 = arith.cmpi ne, %1, %c0_i32_0 : i32
    scf.if %2 {
      %cst_133 = arith.constant 0.000000e+00 : bf16
      %82 = vector.broadcast %cst_133 : bf16 to vector<2x10x16x128xbf16>
      %c0_134 = arith.constant 0 : index
      %c0_135 = arith.constant 0 : index
      %c0_136 = arith.constant 0 : index
      %c0_137 = arith.constant 0 : index
      %83 = vector.load %arg7[%c0_134, %c0_135, %c0_136, %c0_137] : memref<2x10x16x128xbf16, #tpu.memory_space<vmem>>, vector<2x10x16x128xbf16>
      tpu.vector_store %arg7[%c0_134, %c0_135, %c0_136, %c0_137], %82 {strides = array<i32>} : memref<2x10x16x128xbf16, #tpu.memory_space<vmem>>, vector<2x10x16x128xbf16>,
    } else {
    }
    %c0 = arith.constant 0 : index
    %c0_1 = arith.constant 0 : index
    %c0_2 = arith.constant 0 : index
    %c0_3 = arith.constant 0 : index
    %c0_4 = arith.constant 0 : index
    %c0_5 = arith.constant 0 : index
    %3 = vector.load %arg1[%c0, %c0_1, %c0_2, %c0_3, %c0_4, %c0_5] : memref<2x8x2x8x2x128xbf16, #tpu.memory_space<vmem>>, vector<2x8x2x8x2x128xbf16>
    %cst = arith.constant dense<0xFF80> : vector<2x8x2x8x128xbf16>
    %4 = vector.multi_reduction <maximumf>, %3, %cst [4] : vector<2x8x2x8x2x128xbf16> to vector<2x8x2x8x128xbf16>
    %cst_6 = arith.constant dense<0xFF80> : vector<2x8x8x128xbf16>
    %5 = vector.multi_reduction <maximumf>, %4, %cst_6 [2] : vector<2x8x2x8x128xbf16> to vector<2x8x8x128xbf16>
    %c0_7 = arith.constant 0 : index
    %c1 = arith.constant 1 : index
    %c1_8 = arith.constant 1 : index
    %c0_9 = arith.constant 0 : index
    %6 = vector.load %arg7[%c0_7, %c1, %c1_8, %c0_9] : memref<2x10x16x128xbf16, #tpu.memory_space<vmem>>, vector<2x8x8x128xbf16>
    tpu.vector_store %arg7[%c0_7, %c1, %c1_8, %c0_9], %5 {strides = array<i32>} : memref<2x10x16x128xbf16, #tpu.memory_space<vmem>>, vector<2x8x8x128xbf16>,
    %c0_10 = arith.constant 0 : index
    %c0_11 = arith.constant 0 : index
    %c0_12 = arith.constant 0 : index
    %c0_13 = arith.constant 0 : index
    %7 = vector.load %arg7[%c0_10, %c0_11, %c0_12, %c0_13] : memref<2x10x16x128xbf16, #tpu.memory_space<vmem>>, vector<2x8x8x128xbf16>
    %8 = vector.shape_cast %7 : vector<2x8x8x128xbf16> to vector<128x128xbf16>
    %c0_14 = arith.constant 0 : index
    %c0_15 = arith.constant 0 : index
    %9 = vector.load %arg8[%c0_14, %c0_15] : memref<128x1152xbf16, #tpu.memory_space<vmem>>, vector<128x128xbf16>
    tpu.vector_store %arg8[%c0_14, %c0_15], %8 {strides = array<i32>} : memref<128x1152xbf16, #tpu.memory_space<vmem>>, vector<128x128xbf16>,
    %c0_16 = arith.constant 0 : index
    %c0_17 = arith.constant 0 : index
    %c1_18 = arith.constant 1 : index
    %c0_19 = arith.constant 0 : index
    %10 = vector.load %arg7[%c0_16, %c0_17, %c1_18, %c0_19] : memref<2x10x16x128xbf16, #tpu.memory_space<vmem>>, vector<2x8x8x128xbf16>
    %11 = vector.shape_cast %10 : vector<2x8x8x128xbf16> to vector<128x128xbf16>
    %c0_20 = arith.constant 0 : index
    %c128 = arith.constant 128 : index
    %12 = vector.load %arg8[%c0_20, %c128] : memref<128x1152xbf16, #tpu.memory_space<vmem>>, vector<128x128xbf16>
    tpu.vector_store %arg8[%c0_20, %c128], %11 {strides = array<i32>} : memref<128x1152xbf16, #tpu.memory_space<vmem>>, vector<128x128xbf16>,
    %c0_21 = arith.constant 0 : index
    %c0_22 = arith.constant 0 : index
    %c2 = arith.constant 2 : index
    %c0_23 = arith.constant 0 : index
    %13 = vector.load %arg7[%c0_21, %c0_22, %c2, %c0_23] : memref<2x10x16x128xbf16, #tpu.memory_space<vmem>>, vector<2x8x8x128xbf16>
    %14 = vector.shape_cast %13 : vector<2x8x8x128xbf16> to vector<128x128xbf16>
    %c0_24 = arith.constant 0 : index
    %c256 = arith.constant 256 : index
    %15 = vector.load %arg8[%c0_24, %c256] : memref<128x1152xbf16, #tpu.memory_space<vmem>>, vector<128x128xbf16>
    tpu.vector_store %arg8[%c0_24, %c256], %14 {strides = array<i32>} : memref<128x1152xbf16, #tpu.memory_space<vmem>>, vector<128x128xbf16>,
    %c0_25 = arith.constant 0 : index
    %c1_26 = arith.constant 1 : index
    %c0_27 = arith.constant 0 : index
    %c0_28 = arith.constant 0 : index
    %16 = vector.load %arg7[%c0_25, %c1_26, %c0_27, %c0_28] : memref<2x10x16x128xbf16, #tpu.memory_space<vmem>>, vector<2x8x8x128xbf16>
    %17 = vector.shape_cast %16 : vector<2x8x8x128xbf16> to vector<128x128xbf16>
    %c0_29 = arith.constant 0 : index
    %c384 = arith.constant 384 : index
    %18 = vector.load %arg8[%c0_29, %c384] : memref<128x1152xbf16, #tpu.memory_space<vmem>>, vector<128x128xbf16>
    tpu.vector_store %arg8[%c0_29, %c384], %17 {strides = array<i32>} : memref<128x1152xbf16, #tpu.memory_space<vmem>>, vector<128x128xbf16>,
    %c0_30 = arith.constant 0 : index
    %c1_31 = arith.constant 1 : index
    %c1_32 = arith.constant 1 : index
    %c0_33 = arith.constant 0 : index
    %19 = vector.load %arg7[%c0_30, %c1_31, %c1_32, %c0_33] : memref<2x10x16x128xbf16, #tpu.memory_space<vmem>>, vector<2x8x8x128xbf16>
    %20 = vector.shape_cast %19 : vector<2x8x8x128xbf16> to vector<128x128xbf16>
    %c0_34 = arith.constant 0 : index
    %c512 = arith.constant 512 : index
    %21 = vector.load %arg8[%c0_34, %c512] : memref<128x1152xbf16, #tpu.memory_space<vmem>>, vector<128x128xbf16>
    tpu.vector_store %arg8[%c0_34, %c512], %20 {strides = array<i32>} : memref<128x1152xbf16, #tpu.memory_space<vmem>>, vector<128x128xbf16>,
    %c0_35 = arith.constant 0 : index
    %c1_36 = arith.constant 1 : index
    %c2_37 = arith.constant 2 : index
    %c0_38 = arith.constant 0 : index
    %22 = vector.load %arg7[%c0_35, %c1_36, %c2_37, %c0_38] : memref<2x10x16x128xbf16, #tpu.memory_space<vmem>>, vector<2x8x8x128xbf16>
    %23 = vector.shape_cast %22 : vector<2x8x8x128xbf16> to vector<128x128xbf16>
    %c0_39 = arith.constant 0 : index
    %c640 = arith.constant 640 : index
    %24 = vector.load %arg8[%c0_39, %c640] : memref<128x1152xbf16, #tpu.memory_space<vmem>>, vector<128x128xbf16>
    tpu.vector_store %arg8[%c0_39, %c640], %23 {strides = array<i32>} : memref<128x1152xbf16, #tpu.memory_space<vmem>>, vector<128x128xbf16>,
    %c0_40 = arith.constant 0 : index
    %c2_41 = arith.constant 2 : index
    %c0_42 = arith.constant 0 : index
    %c0_43 = arith.constant 0 : index
    %25 = vector.load %arg7[%c0_40, %c2_41, %c0_42, %c0_43] : memref<2x10x16x128xbf16, #tpu.memory_space<vmem>>, vector<2x8x8x128xbf16>
    %26 = vector.shape_cast %25 : vector<2x8x8x128xbf16> to vector<128x128xbf16>
    %c0_44 = arith.constant 0 : index
    %c768 = arith.constant 768 : index
    %27 = vector.load %arg8[%c0_44, %c768] : memref<128x1152xbf16, #tpu.memory_space<vmem>>, vector<128x128xbf16>
    tpu.vector_store %arg8[%c0_44, %c768], %26 {strides = array<i32>} : memref<128x1152xbf16, #tpu.memory_space<vmem>>, vector<128x128xbf16>,
    %c0_45 = arith.constant 0 : index
    %c2_46 = arith.constant 2 : index
    %c1_47 = arith.constant 1 : index
    %c0_48 = arith.constant 0 : index
    %28 = vector.load %arg7[%c0_45, %c2_46, %c1_47, %c0_48] : memref<2x10x16x128xbf16, #tpu.memory_space<vmem>>, vector<2x8x8x128xbf16>
    %29 = vector.shape_cast %28 : vector<2x8x8x128xbf16> to vector<128x128xbf16>
    %c0_49 = arith.constant 0 : index
    %c896 = arith.constant 896 : index
    %30 = vector.load %arg8[%c0_49, %c896] : memref<128x1152xbf16, #tpu.memory_space<vmem>>, vector<128x128xbf16>
    tpu.vector_store %arg8[%c0_49, %c896], %29 {strides = array<i32>} : memref<128x1152xbf16, #tpu.memory_space<vmem>>, vector<128x128xbf16>,
    %c0_50 = arith.constant 0 : index
    %c2_51 = arith.constant 2 : index
    %c2_52 = arith.constant 2 : index
    %c0_53 = arith.constant 0 : index
    %31 = vector.load %arg7[%c0_50, %c2_51, %c2_52, %c0_53] : memref<2x10x16x128xbf16, #tpu.memory_space<vmem>>, vector<2x8x8x128xbf16>
    %32 = vector.shape_cast %31 : vector<2x8x8x128xbf16> to vector<128x128xbf16>
    %c0_54 = arith.constant 0 : index
    %c1024 = arith.constant 1024 : index
    %33 = vector.load %arg8[%c0_54, %c1024] : memref<128x1152xbf16, #tpu.memory_space<vmem>>, vector<128x128xbf16>
    tpu.vector_store %arg8[%c0_54, %c1024], %32 {strides = array<i32>} : memref<128x1152xbf16, #tpu.memory_space<vmem>>, vector<128x128xbf16>,
    %c0_55 = arith.constant 0 : index
    %c0_56 = arith.constant 0 : index
    %34 = vector.load %arg8[%c0_55, %c0_56] : memref<128x1152xbf16, #tpu.memory_space<vmem>>, vector<128x1152xbf16>
    %c0_57 = arith.constant 0 : index
    %c0_58 = arith.constant 0 : index
    %35 = vector.load %arg2[%c0_57, %c0_58] : memref<1152x128xbf16, #tpu.memory_space<vmem>>, vector<1152x128xbf16>
    %cst_59 = arith.constant dense<0.000000e+00> : vector<128x128xf32>
    %36 = tpu.matmul %34, %35, %cst_59 {dimension_numbers = #tpu.dot_dimension_numbers<[1], [0], [0], [1], [0, 0, 1, 1], [], []>} : vector<128x1152xbf16>, vector<1152x128xbf16>, vector<128x128xf32> -> vector<128x128xf32>
    %c0_60 = arith.constant 0 : index
    %c0_61 = arith.constant 0 : index
    %37 = vector.load %arg3[%c0_60, %c0_61] : memref<1x128xf32, #tpu.memory_space<vmem>>, vector<1x128xf32>
    %38 = vector.broadcast %37 : vector<1x128xf32> to vector<128x128xf32>
    %39 = arith.addf %36, %38 : vector<128x128xf32>
    %cst_62 = arith.constant 0.000000e+00 : f32
    %40 = vector.broadcast %cst_62 : f32 to vector<128x128xf32>
    %41 = arith.maximumf %39, %40 : vector<128x128xf32>
    %42 = vector.shape_cast %41 : vector<128x128xf32> to vector<2x8x8x128xf32>
    %43 = arith.truncf %42 : vector<2x8x8x128xf32> to vector<2x8x8x128xbf16>
    %c0_63 = arith.constant 0 : index
    %c1_64 = arith.constant 1 : index
    %c1_65 = arith.constant 1 : index
    %c0_66 = arith.constant 0 : index
    %44 = vector.load %arg7[%c0_63, %c1_64, %c1_65, %c0_66] : memref<2x10x16x128xbf16, #tpu.memory_space<vmem>>, vector<2x8x8x128xbf16>
    tpu.vector_store %arg7[%c0_63, %c1_64, %c1_65, %c0_66], %43 {strides = array<i32>} : memref<2x10x16x128xbf16, #tpu.memory_space<vmem>>, vector<2x8x8x128xbf16>,
    %c0_67 = arith.constant 0 : index
    %c0_68 = arith.constant 0 : index
    %c0_69 = arith.constant 0 : index
    %c0_70 = arith.constant 0 : index
    %45 = vector.load %arg7[%c0_67, %c0_68, %c0_69, %c0_70] : memref<2x10x16x128xbf16, #tpu.memory_space<vmem>>, vector<2x8x8x128xbf16>
    %46 = vector.shape_cast %45 : vector<2x8x8x128xbf16> to vector<128x128xbf16>
    %c0_71 = arith.constant 0 : index
    %c0_72 = arith.constant 0 : index
    %47 = vector.load %arg8[%c0_71, %c0_72] : memref<128x1152xbf16, #tpu.memory_space<vmem>>, vector<128x128xbf16>
    tpu.vector_store %arg8[%c0_71, %c0_72], %46 {strides = array<i32>} : memref<128x1152xbf16, #tpu.memory_space<vmem>>, vector<128x128xbf16>,
    %c0_73 = arith.constant 0 : index
    %c0_74 = arith.constant 0 : index
    %c1_75 = arith.constant 1 : index
    %c0_76 = arith.constant 0 : index
    %48 = vector.load %arg7[%c0_73, %c0_74, %c1_75, %c0_76] : memref<2x10x16x128xbf16, #tpu.memory_space<vmem>>, vector<2x8x8x128xbf16>
    %49 = vector.shape_cast %48 : vector<2x8x8x128xbf16> to vector<128x128xbf16>
    %c0_77 = arith.constant 0 : index
    %c128_78 = arith.constant 128 : index
    %50 = vector.load %arg8[%c0_77, %c128_78] : memref<128x1152xbf16, #tpu.memory_space<vmem>>, vector<128x128xbf16>
    tpu.vector_store %arg8[%c0_77, %c128_78], %49 {strides = array<i32>} : memref<128x1152xbf16, #tpu.memory_space<vmem>>, vector<128x128xbf16>,
    %c0_79 = arith.constant 0 : index
    %c0_80 = arith.constant 0 : index
    %c2_81 = arith.constant 2 : index
    %c0_82 = arith.constant 0 : index
    %51 = vector.load %arg7[%c0_79, %c0_80, %c2_81, %c0_82] : memref<2x10x16x128xbf16, #tpu.memory_space<vmem>>, vector<2x8x8x128xbf16>
    %52 = vector.shape_cast %51 : vector<2x8x8x128xbf16> to vector<128x128xbf16>
    %c0_83 = arith.constant 0 : index
    %c256_84 = arith.constant 256 : index
    %53 = vector.load %arg8[%c0_83, %c256_84] : memref<128x1152xbf16, #tpu.memory_space<vmem>>, vector<128x128xbf16>
    tpu.vector_store %arg8[%c0_83, %c256_84], %52 {strides = array<i32>} : memref<128x1152xbf16, #tpu.memory_space<vmem>>, vector<128x128xbf16>,
    %c0_85 = arith.constant 0 : index
    %c1_86 = arith.constant 1 : index
    %c0_87 = arith.constant 0 : index
    %c0_88 = arith.constant 0 : index
    %54 = vector.load %arg7[%c0_85, %c1_86, %c0_87, %c0_88] : memref<2x10x16x128xbf16, #tpu.memory_space<vmem>>, vector<2x8x8x128xbf16>
    %55 = vector.shape_cast %54 : vector<2x8x8x128xbf16> to vector<128x128xbf16>
    %c0_89 = arith.constant 0 : index
    %c384_90 = arith.constant 384 : index
    %56 = vector.load %arg8[%c0_89, %c384_90] : memref<128x1152xbf16, #tpu.memory_space<vmem>>, vector<128x128xbf16>
    tpu.vector_store %arg8[%c0_89, %c384_90], %55 {strides = array<i32>} : memref<128x1152xbf16, #tpu.memory_space<vmem>>, vector<128x128xbf16>,
    %c0_91 = arith.constant 0 : index
    %c1_92 = arith.constant 1 : index
    %c1_93 = arith.constant 1 : index
    %c0_94 = arith.constant 0 : index
    %57 = vector.load %arg7[%c0_91, %c1_92, %c1_93, %c0_94] : memref<2x10x16x128xbf16, #tpu.memory_space<vmem>>, vector<2x8x8x128xbf16>
    %58 = vector.shape_cast %57 : vector<2x8x8x128xbf16> to vector<128x128xbf16>
    %c0_95 = arith.constant 0 : index
    %c512_96 = arith.constant 512 : index
    %59 = vector.load %arg8[%c0_95, %c512_96] : memref<128x1152xbf16, #tpu.memory_space<vmem>>, vector<128x128xbf16>
    tpu.vector_store %arg8[%c0_95, %c512_96], %58 {strides = array<i32>} : memref<128x1152xbf16, #tpu.memory_space<vmem>>, vector<128x128xbf16>,
    %c0_97 = arith.constant 0 : index
    %c1_98 = arith.constant 1 : index
    %c2_99 = arith.constant 2 : index
    %c0_100 = arith.constant 0 : index
    %60 = vector.load %arg7[%c0_97, %c1_98, %c2_99, %c0_100] : memref<2x10x16x128xbf16, #tpu.memory_space<vmem>>, vector<2x8x8x128xbf16>
    %61 = vector.shape_cast %60 : vector<2x8x8x128xbf16> to vector<128x128xbf16>
    %c0_101 = arith.constant 0 : index
    %c640_102 = arith.constant 640 : index
    %62 = vector.load %arg8[%c0_101, %c640_102] : memref<128x1152xbf16, #tpu.memory_space<vmem>>, vector<128x128xbf16>
    tpu.vector_store %arg8[%c0_101, %c640_102], %61 {strides = array<i32>} : memref<128x1152xbf16, #tpu.memory_space<vmem>>, vector<128x128xbf16>,
    %c0_103 = arith.constant 0 : index
    %c2_104 = arith.constant 2 : index
    %c0_105 = arith.constant 0 : index
    %c0_106 = arith.constant 0 : index
    %63 = vector.load %arg7[%c0_103, %c2_104, %c0_105, %c0_106] : memref<2x10x16x128xbf16, #tpu.memory_space<vmem>>, vector<2x8x8x128xbf16>
    %64 = vector.shape_cast %63 : vector<2x8x8x128xbf16> to vector<128x128xbf16>
    %c0_107 = arith.constant 0 : index
    %c768_108 = arith.constant 768 : index
    %65 = vector.load %arg8[%c0_107, %c768_108] : memref<128x1152xbf16, #tpu.memory_space<vmem>>, vector<128x128xbf16>
    tpu.vector_store %arg8[%c0_107, %c768_108], %64 {strides = array<i32>} : memref<128x1152xbf16, #tpu.memory_space<vmem>>, vector<128x128xbf16>,
    %c0_109 = arith.constant 0 : index
    %c2_110 = arith.constant 2 : index
    %c1_111 = arith.constant 1 : index
    %c0_112 = arith.constant 0 : index
    %66 = vector.load %arg7[%c0_109, %c2_110, %c1_111, %c0_112] : memref<2x10x16x128xbf16, #tpu.memory_space<vmem>>, vector<2x8x8x128xbf16>
    %67 = vector.shape_cast %66 : vector<2x8x8x128xbf16> to vector<128x128xbf16>
    %c0_113 = arith.constant 0 : index
    %c896_114 = arith.constant 896 : index
    %68 = vector.load %arg8[%c0_113, %c896_114] : memref<128x1152xbf16, #tpu.memory_space<vmem>>, vector<128x128xbf16>
    tpu.vector_store %arg8[%c0_113, %c896_114], %67 {strides = array<i32>} : memref<128x1152xbf16, #tpu.memory_space<vmem>>, vector<128x128xbf16>,
    %c0_115 = arith.constant 0 : index
    %c2_116 = arith.constant 2 : index
    %c2_117 = arith.constant 2 : index
    %c0_118 = arith.constant 0 : index
    %69 = vector.load %arg7[%c0_115, %c2_116, %c2_117, %c0_118] : memref<2x10x16x128xbf16, #tpu.memory_space<vmem>>, vector<2x8x8x128xbf16>
    %70 = vector.shape_cast %69 : vector<2x8x8x128xbf16> to vector<128x128xbf16>
    %c0_119 = arith.constant 0 : index
    %c1024_120 = arith.constant 1024 : index
    %71 = vector.load %arg8[%c0_119, %c1024_120] : memref<128x1152xbf16, #tpu.memory_space<vmem>>, vector<128x128xbf16>
    tpu.vector_store %arg8[%c0_119, %c1024_120], %70 {strides = array<i32>} : memref<128x1152xbf16, #tpu.memory_space<vmem>>, vector<128x128xbf16>,
    %c0_121 = arith.constant 0 : index
    %c0_122 = arith.constant 0 : index
    %72 = vector.load %arg8[%c0_121, %c0_122] : memref<128x1152xbf16, #tpu.memory_space<vmem>>, vector<128x1152xbf16>
    %c0_123 = arith.constant 0 : index
    %c0_124 = arith.constant 0 : index
    %73 = vector.load %arg4[%c0_123, %c0_124] : memref<1152x128xbf16, #tpu.memory_space<vmem>>, vector<1152x128xbf16>
    %cst_125 = arith.constant dense<0.000000e+00> : vector<128x128xf32>
    %74 = tpu.matmul %72, %73, %cst_125 {dimension_numbers = #tpu.dot_dimension_numbers<[1], [0], [0], [1], [0, 0, 1, 1], [], []>} : vector<128x1152xbf16>, vector<1152x128xbf16>, vector<128x128xf32> -> vector<128x128xf32>
    %c0_126 = arith.constant 0 : index
    %c0_127 = arith.constant 0 : index
    %75 = vector.load %arg5[%c0_126, %c0_127] : memref<1x128xf32, #tpu.memory_space<vmem>>, vector<1x128xf32>
    %76 = vector.broadcast %75 : vector<1x128xf32> to vector<128x128xf32>
    %77 = arith.addf %74, %76 : vector<128x128xf32>
    %cst_128 = arith.constant 0.000000e+00 : f32
    %78 = vector.broadcast %cst_128 : f32 to vector<128x128xf32>
    %79 = arith.maximumf %77, %78 : vector<128x128xf32>
    %80 = vector.shape_cast %79 : vector<128x128xf32> to vector<2x8x8x128xf32>
    %c0_129 = arith.constant 0 : index
    %c0_130 = arith.constant 0 : index
    %c0_131 = arith.constant 0 : index
    %c0_132 = arith.constant 0 : index
    %81 = vector.load %arg6[%c0_129, %c0_130, %c0_131, %c0_132] : memref<2x8x8x128xf32, #tpu.memory_space<vmem>>, vector<2x8x8x128xf32>
    tpu.vector_store %arg6[%c0_129, %c0_130, %c0_131, %c0_132], %80 {strides = array<i32>} : memref<2x8x8x128xf32, #tpu.memory_space<vmem>>, vector<2x8x8x128xf32>,
    return
  }
  func.func @transform_0(%arg0: i32) -> (i32, i32, i32, i32, i32, i32) {
    %c0_i32 = arith.constant 0 : i32
    %c0_i32_0 = arith.constant 0 : i32
    %c0_i32_1 = arith.constant 0 : i32
    %c0_i32_2 = arith.constant 0 : i32
    %c0_i32_3 = arith.constant 0 : i32
    %c0_i32_4 = arith.constant 0 : i32
    return %arg0, %c0_i32, %c0_i32_0, %c0_i32_1, %c0_i32_2, %c0_i32_3 : i32, i32, i32, i32, i32, i32
  }
  func.func @transform_1(%arg0: i32) -> (i32, i32) {
    %c0_i32 = arith.constant 0 : i32
    %c0_i32_0 = arith.constant 0 : i32
    %c0_i32_1 = arith.constant 0 : i32
    return %c0_i32, %c0_i32_0 : i32, i32
  }
  func.func @transform_2(%arg0: i32) -> (i32, i32) {
    %c0_i32 = arith.constant 0 : i32
    %c0_i32_0 = arith.constant 0 : i32
    %c0_i32_1 = arith.constant 0 : i32
    return %c0_i32, %c0_i32_0 : i32, i32
  }
  func.func @transform_3(%arg0: i32) -> (i32, i32) {
    %c0_i32 = arith.constant 0 : i32
    %c0_i32_0 = arith.constant 0 : i32
    %c0_i32_1 = arith.constant 0 : i32
    return %c0_i32, %c0_i32_0 : i32, i32
  }
  func.func @transform_4(%arg0: i32) -> (i32, i32) {
    %c0_i32 = arith.constant 0 : i32
    %c0_i32_0 = arith.constant 0 : i32
    %c0_i32_1 = arith.constant 0 : i32
    return %c0_i32, %c0_i32_0 : i32, i32
  }
  func.func @transform_5(%arg0: i32) -> (i32, i32, i32, i32) {
    %c0_i32 = arith.constant 0 : i32
    %c0_i32_0 = arith.constant 0 : i32
    %c0_i32_1 = arith.constant 0 : i32
    %c0_i32_2 = arith.constant 0 : i32
    return %arg0, %c0_i32, %c0_i32_0, %c0_i32_1 : i32, i32, i32, i32
  }
}

</mosaic_0001>

<bundles_post_ra>
// kernel: tpu_custom_call.1
= control target key start
LH: loop header
LB: loop body
LE: loop exit
PB: predicated region body
PF: predicated region fallthrough
CT: control target
= control target key end

     0   :  { %10 = vsyncpa [#allocation5], 0  ;;  %s15118_s0 = inlined_call_operand.hbm [shape: bf16[2,8,2,8,2,128], index: 0, kind: input, shape index: {}]   ;;  %s15119_s1 = inlined_call_operand.hbm [shape: bf16[1152,128], index: 1, kind: input, shape index: {}]   ;;  %s15120_s2 = inlined_call_operand.vmem [shape: f32[1,128], index: 2, kind: input, shape index: {}]   ;;  %s15121_s3 = inlined_call_operand.hbm [shape: bf16[1152,128], index: 3, kind: input, shape index: {}]   ;;  %s15122_s4 = inlined_call_operand.vmem [shape: f32[1,128], index: 4, kind: input, shape index: {}]   ;;  %s15123_s5 = inlined_call_operand.hbm [shape: f32[2,8,8,128], index: 5, kind: output, shape index: {}]  }
   0x1   :  { %11 = vsyncpa [#allocation8], 0 }
   0x2   :  { %12 = vsyncpa [#allocation6], 0  ;;  %s12532_s18 = smov [#allocation7]  }
   0x3   :  { %s30_s19 = sshll.u32 %s12532_s18, 4  ;;  %s31_s19 = int_to_ptr.vmem [resolvable:$true] %s30_s19 }
   0x4   :  { %s12454_s20 = scalar_lea.vmem %s31_s19, 9216  ;;  %p12459_p1 = scmp.lt.s32.totalorder %s31_s19, %s31_s19 }
   0x5   :  { %p12455_p0 = scmp.ne.s32.totalorder %s31_s19, %s12454_s20  ;;  %p12460_p2 = scmp.lt.s32.totalorder %s12454_s20, %s12454_s20 }
   0x7   :  { %p12461_p3 = por %p12460_p2, %p12459_p1 }
   0x9   :  { %p12462_p4 = pnand %p12461_p3, %p12455_p0 }
   0xb   :  { %12465 = shalt.err (!%p12462_p4)
}
   0xc   :  { %s12533_s21 = smov 64   ;;  %s12534_s22 = smov 4  }
   0xd   :  { %36 = dma.hbm_to_vmem [thread:$0]  %s15119_s1, 9216, %s31_s19, [#allocation8], %s12533_s21, %s12533_s21, %s12534_s22  }
   0xe   :  { %s12535_s25 = smov [#allocation4]  }
   0xf   :  { %s18_s26 = sshll.u32 %s12535_s25, 4  ;;  %s19_s26 = int_to_ptr.vmem [resolvable:$true] %s18_s26 }
  0x10   :  { %s12474_s27 = scalar_lea.vmem %s19_s26, 4096  ;;  %p12479_p6 = scmp.lt.s32.totalorder %s19_s26, %s19_s26 }
  0x11   :  { %p12475_p5 = scmp.ne.s32.totalorder %s19_s26, %s12474_s27  ;;  %p12480_p7 = scmp.lt.s32.totalorder %s12474_s27, %s12474_s27 }
  0x13   :  { %p12481_p8 = por %p12480_p7, %p12479_p6 }
  0x15   :  { %p12482_p9 = pnand %p12481_p8, %p12475_p5 }
  0x17   :  { %12485 = shalt.err (!%p12482_p9)
}
  0x18   :  { %s12536_s28 = smov 16   ;;  %s12537_s29 = smov 1  }
  0x19   :  { %24 = dma.hbm_to_vmem [thread:$0]  %s15118_s0, 4096, %s19_s26, [#allocation5], %s12536_s28, %s12536_s28, %s12537_s29  }
  0x1a   :  { %s12538_s7 = smov [#allocation9]  }
  0x1b   :  { %s44_s8 = sshll.u32 %s12538_s7, 4  ;;  %s45_s8 = int_to_ptr.vmem [resolvable:$true] %s44_s8 }
  0x1c   :  { %s12494_s1 = scalar_lea.vmem %s45_s8, 9216  ;;  %p12499_p11 = scmp.lt.s32.totalorder %s45_s8, %s45_s8 }
  0x1d   :  { %p12495_p10 = scmp.ne.s32.totalorder %s45_s8, %s12494_s1  ;;  %p12500_p12 = scmp.lt.s32.totalorder %s12494_s1, %s12494_s1 }
  0x1f   :  { %p12501_p13 = por %p12500_p12, %p12499_p11 }
  0x21   :  { %p12502_p0 = pnand %p12501_p13, %p12495_p10 }
  0x23   :  { %12505 = shalt.err (!%p12502_p0)
}
  0x24   :  { %50 = dma.hbm_to_vmem [thread:$0]  %s15121_s3, 9216, %s45_s8, [#allocation8], %s12533_s21, %s12533_s21, %s12534_s22  }
  0x25   :  { %12526 = dma.done.wait [#allocation5], 4096  }
  0x26   :  { %12527 = vsyncadd [#allocation5], 4294963200 }
  0x27   :  { %12528 = dma.done.wait [#allocation8], 18432  }
  0x28   :  { %12529 = vsyncadd [#allocation8], 4294948864  ;;  %v12539_v0 = vmov 0   ;;  %v12105_v1 = vld [vmem:[#allocation7 + $0x78] sm:$0xff]   ;;  %v12108_v4 = vld [vmem:[#allocation7 + $0x70] sm:$0xff]   ;;  %vm364_vm0 = vcmask 1040384  }
  0x29   :  { %68 = vst [vmem:[#allocation2] sm:$0xf] %v12539_v0  ;;  %69 = vst [vmem:[#allocation2 + $0x4] sm:$0xf] %v12539_v0  ;;  %v12106_v2 = vld [vmem:[#allocation7 + $0x38] sm:$0xff]   ;;  %11486 = vmatprep.subr.bf16.mxu0 %v12105_v1  ;;  %v12110_v6 = vld [vmem:[#allocation7 + $0x30] sm:$0xff]  }
  0x2a   :  { %70 = vst [vmem:[#allocation2 + $0x8] sm:$0xf] %v12539_v0  ;;  %71 = vst [vmem:[#allocation2 + $0xc] sm:$0xf] %v12539_v0  ;;  %v12107_v3 = vld [vmem:[#allocation7 + $0xf8] sm:$0xff]   ;;  %11487 = vmatpush3.bf16.msra.mxu0 %v12106_v2  ;;  %v12111_v7 = vld [vmem:[#allocation7 + $0xf0] sm:$0xff]  }
  0x2b   :  { %72 = vst [vmem:[#allocation2 + $0x10] sm:$0xf] %v12539_v0  ;;  %73 = vst [vmem:[#allocation2 + $0x14] sm:$0xf] %v12539_v0  ;;  %11550 = vmatprep.subr.bf16.mxu1 %v12107_v3  ;;  %v12109_v5 = vld [vmem:[#allocation7 + $0xb8] sm:$0xff]   ;;  %11488 = vmatprep.subr.bf16.mxu0 %v12108_v4  ;;  %v12112_v8 = vld [vmem:[#allocation7 + $0x68] sm:$0xff]  }
  0x2c   :  { %74 = vst [vmem:[#allocation2 + $0x18] sm:$0xf] %v12539_v0  ;;  %75 = vst [vmem:[#allocation2 + $0x1c] sm:$0xf] %v12539_v0  ;;  %11551 = vmatpush3.bf16.msra.mxu1 %v12109_v5  ;;  %v12113_v9 = vld [vmem:[#allocation7 + $0xb0] sm:$0xff]   ;;  %v12114_v10 = vld [vmem:[#allocation7 + $0x28] sm:$0xff]  }
  0x2d   :  { %76 = vst [vmem:[#allocation2 + $0x20] sm:$0xf] %v12539_v0  ;;  %77 = vst [vmem:[#allocation2 + $0x24] sm:$0xf] %v12539_v0  ;;  %11552 = vmatprep.subr.bf16.mxu1 %v12111_v7  ;;  %v12115_v11 = vld [vmem:[#allocation7 + $0xe8] sm:$0xff]   ;;  %v12116_v12 = vld [vmem:[#allocation7 + $0x60] sm:$0xff]  }
  0x2e   :  { %78 = vst [vmem:[#allocation2 + $0x28] sm:$0xf] %v12539_v0  ;;  %79 = vst [vmem:[#allocation2 + $0x2c] sm:$0xf] %v12539_v0  ;;  %11489 = vmatpush3.bf16.msra.mxu0 %v12110_v6  ;;  %v12117_v13 = vld [vmem:[#allocation7 + $0xa8] sm:$0xff]   ;;  %v12118_v14 = vld [vmem:[#allocation7 + $0x20] sm:$0xff]  }
  0x2f   :  { %80 = vst [vmem:[#allocation2 + $0x30] sm:$0xf] %v12539_v0  ;;  %81 = vst [vmem:[#allocation2 + $0x34] sm:$0xf] %v12539_v0  ;;  %11490 = vmatprep.subr.bf16.mxu0 %v12112_v8  ;;  %v12119_v15 = vld [vmem:[#allocation7 + $0xe0] sm:$0xff]   ;;  %v12120_v16 = vld [vmem:[#allocation7 + $0x58] sm:$0xff]  }
  0x30   :  { %82 = vst [vmem:[#allocation2 + $0x38] sm:$0xf] %v12539_v0  ;;  %83 = vst [vmem:[#allocation2 + $0x3c] sm:$0xf] %v12539_v0  ;;  %11553 = vmatpush3.bf16.msra.mxu1 %v12113_v9  ;;  %v12121_v17 = vld [vmem:[#allocation7 + $0xa0] sm:$0xff]   ;;  %v12122_v18 = vld [vmem:[#allocation7 + $0x18] sm:$0xff]  }
  0x31   :  { %84 = vst [vmem:[#allocation2 + $0x40] sm:$0xf] %v12539_v0  ;;  %85 = vst [vmem:[#allocation2 + $0x44] sm:$0xf] %v12539_v0  ;;  %11554 = vmatprep.subr.bf16.mxu1 %v12115_v11  ;;  %v12123_v19 = vld [vmem:[#allocation7 + $0xd8] sm:$0xff]   ;;  %v12124_v20 = vld [vmem:[#allocation7 + $0x50] sm:$0xff]  }
  0x32   :  { %86 = vst [vmem:[#allocation2 + $0x48] sm:$0xf] %v12539_v0  ;;  %87 = vst [vmem:[#allocation2 + $0x4c] sm:$0xf] %v12539_v0  ;;  %11491 = vmatpush3.bf16.msra.mxu0 %v12114_v10  ;;  %v12125_v21 = vld [vmem:[#allocation7 + $0x98] sm:$0xff]   ;;  %v12126_v22 = vld [vmem:[#allocation7 + $0x10] sm:$0xff]  }
  0x33   :  { %88 = vst [vmem:[#allocation2 + $0x50] sm:$0xf] %v12539_v0  ;;  %89 = vst [vmem:[#allocation2 + $0x54] sm:$0xf] %v12539_v0  ;;  %11492 = vmatprep.subr.bf16.mxu0 %v12116_v12  ;;  %v12127_v23 = vld [vmem:[#allocation7 + $0xd0] sm:$0xff]   ;;  %v12128_v24 = vld [vmem:[#allocation7 + $0x48] sm:$0xff]  }
  0x34   :  { %90 = vst [vmem:[#allocation2 + $0x58] sm:$0xf] %v12539_v0  ;;  %91 = vst [vmem:[#allocation2 + $0x5c] sm:$0xf] %v12539_v0  ;;  %11555 = vmatpush3.bf16.msra.mxu1 %v12117_v13  ;;  %v12129_v25 = vld [vmem:[#allocation7 + $0x90] sm:$0xff]   ;;  %v12130_v26 = vld [vmem:[#allocation7 + $0x8] sm:$0xff]  }
  0x35   :  { %92 = vst [vmem:[#allocation2 + $0x60] sm:$0xf] %v12539_v0  ;;  %93 = vst [vmem:[#allocation2 + $0x64] sm:$0xf] %v12539_v0  ;;  %11556 = vmatprep.subr.bf16.mxu1 %v12119_v15  ;;  %v12131_v27 = vld [vmem:[#allocation7 + $0xc8] sm:$0xff]   ;;  %v12132_v28 = vld [vmem:[#allocation7 + $0x40] sm:$0xff]  }
  0x36   :  { %94 = vst [vmem:[#allocation2 + $0x68] sm:$0xf] %v12539_v0  ;;  %95 = vst [vmem:[#allocation2 + $0x6c] sm:$0xf] %v12539_v0  ;;  %11493 = vmatpush3.bf16.msra.mxu0 %v12118_v14  ;;  %v12133_v29 = vld [vmem:[#allocation7 + $0x88] sm:$0xff]   ;;  %v12134_v30 = vld [vmem:[#allocation7] sm:$0xff]  }
  0x37   :  { %96 = vst [vmem:[#allocation2 + $0x70] sm:$0xf] %v12539_v0  ;;  %97 = vst [vmem:[#allocation2 + $0x74] sm:$0xf] %v12539_v0  ;;  %11494 = vmatprep.subr.bf16.mxu0 %v12120_v16  ;;  %v12135_v31 = vld [vmem:[#allocation7 + $0xc0] sm:$0xff]   ;;  %v12139_v7 = vld [vmem:[#allocation7 + $0x178] sm:$0xff]  }
  0x38   :  { %98 = vst [vmem:[#allocation2 + $0x78] sm:$0xf] %v12539_v0  ;;  %99 = vst [vmem:[#allocation2 + $0x7c] sm:$0xf] %v12539_v0  ;;  %11557 = vmatpush3.bf16.msra.mxu1 %v12121_v17  ;;  %v108_v32 = vld [vmem:[#allocation4] sm:$0x1] }
  0x39   :  { %100 = vst [vmem:[#allocation2 + $0x80] sm:$0xf] %v12539_v0  ;;  %101 = vst [vmem:[#allocation2 + $0x84] sm:$0xf] %v12539_v0  ;;  %11558 = vmatprep.subr.bf16.mxu1 %v12123_v19  ;;  %v109_v33 = vld [vmem:[#allocation4 + $0x1] sm:$0x1] }
  0x3a   :  { %102 = vst [vmem:[#allocation2 + $0x88] sm:$0xf] %v12539_v0  ;;  %103 = vst [vmem:[#allocation2 + $0x8c] sm:$0xf] %v12539_v0  ;;  %11495 = vmatpush3.bf16.msra.mxu0 %v12122_v18  ;;  %v110_v34 = vld [vmem:[#allocation4 + $0x2] sm:$0x1] }
  0x3b   :  { %104 = vst [vmem:[#allocation2 + $0x90] sm:$0xf] %v12539_v0  ;;  %105 = vst [vmem:[#allocation2 + $0x94] sm:$0xf] %v12539_v0  ;;  %11496 = vmatprep.subr.bf16.mxu0 %v12124_v20  ;;  %v111_v35 = vld [vmem:[#allocation4 + $0x3] sm:$0x1] }
  0x3c   :  { %106 = vst [vmem:[#allocation2 + $0x98] sm:$0xf] %v12539_v0  ;;  %107 = vst [vmem:[#allocation2 + $0x9c] sm:$0xf] %v12539_v0  ;;  %11559 = vmatpush3.bf16.msra.mxu1 %v12125_v21  ;;  %v112_v36 = vld [vmem:[#allocation4 + $0x4] sm:$0x1] }
  0x3d   :  { %11560 = vmatprep.subr.bf16.mxu1 %v12127_v23  ;;  %v367_v37 = vsel %vm364_vm0, %v108_v32, 4286644096  ;;  %v380_v38 = vsel %vm364_vm0, %v109_v33, 4286644096  ;;  %v113_v39 = vld [vmem:[#allocation4 + $0x5] sm:$0x1] }
  0x3e   :  { %11497 = vmatpush3.bf16.msra.mxu0 %v12126_v22  ;;  %v369_v40 = vunpack.i.l.bf16 %v367_v37  ;;  %v370_v41 = vunpack.i.h.bf16 %v367_v37  ;;  %v382_v42 = vunpack.i.l.bf16 %v380_v38  ;;  %v383_v43 = vunpack.i.h.bf16 %v380_v38  ;;  %v4603_v44 = vld [vmem:[#allocation2] sm:$0xf]  ;;  %v114_v52 = vld [vmem:[#allocation4 + $0x6] sm:$0x1]  ;;  %v115_v57 = vld [vmem:[#allocation4 + $0x7] sm:$0x1] }
  0x3f   :  { %11498 = vmatprep.subr.bf16.mxu0 %v12128_v24  ;;  %v393_v45 = vsel %vm364_vm0, %v110_v34, 4286644096  ;;  %v406_v46 = vsel %vm364_vm0, %v111_v35, 4286644096  ;;  %v419_v47 = vsel %vm364_vm0, %v112_v36, 4286644096 }
  0x40   :  { %11561 = vmatpush3.bf16.msra.mxu1 %v12129_v25  ;;  %4619 = vst [vmem:[#allocation3] sm:$0xf] %v4603_v44  ;;  %v371_v48 = vmax.f32 %v369_v40, %v370_v41  ;;  %v384_v49 = vmax.f32 %v382_v42, %v383_v43  ;;  %v395_v50 = vunpack.i.l.bf16 %v393_v45  ;;  %v396_v51 = vunpack.i.h.bf16 %v393_v45  ;;  %v12138_v2 = vld [vmem:[#allocation7 + $0x80] sm:$0xff]   ;;  %v116_v40 = vld [vmem:[#allocation4 + $0x8] sm:$0x1] }
  0x41   :  { %11562 = vmatprep.subr.bf16.mxu1 %v12131_v27  ;;  %v408_v53 = vunpack.i.l.bf16 %v406_v46  ;;  %v409_v54 = vunpack.i.h.bf16 %v406_v46  ;;  %v421_v55 = vunpack.i.l.bf16 %v419_v47  ;;  %v422_v56 = vunpack.i.h.bf16 %v419_v47  ;;  %v117_v41 = vld [vmem:[#allocation4 + $0x9] sm:$0x1] }
  0x42   :  { %11499 = vmatpush3.bf16.msra.mxu0 %v12130_v26  ;;  %v372_v58 = vrot.slane %v371_v48, 4  ;;  %v385_v59 = vrot.slane %v384_v49, 4  ;;  %v397_v60 = vmax.f32 %v395_v50, %v396_v51  ;;  %v432_v61 = vsel %vm364_vm0, %v113_v39, 4286644096 }
  0x43   :  { %11500 = vmatprep.subr.bf16.mxu0 %v12132_v28  ;;  %v410_v62 = vmax.f32 %v408_v53, %v409_v54  ;;  %v423_v63 = vmax.f32 %v421_v55, %v422_v56  ;;  %v434_v0 = vunpack.i.l.bf16 %v432_v61  ;;  %v435_v1 = vunpack.i.h.bf16 %v432_v61  ;;  %v118_v54 = vld [vmem:[#allocation4 + $0xa] sm:$0x1] }
  0x44   :  { %11563 = vmatpush3.bf16.msra.mxu1 %v12133_v29  ;;  %v373_v3 = vmax.f32 %v371_v48, %v372_v58  ;;  %v386_v4 = vmax.f32 %v384_v49, %v385_v59  ;;  %v398_v5 = vrot.slane %v397_v60, 4  ;;  %v445_v6 = vsel %vm364_vm0, %v114_v52, 4286644096 }
  0x45   :  { %11564 = vmatprep.subr.bf16.mxu1 %v12135_v31  ;;  %v411_v8 = vrot.slane %v410_v62, 4  ;;  %v424_v9 = vrot.slane %v423_v63, 4  ;;  %v436_v10 = vmax.f32 %v434_v0, %v435_v1  ;;  %v447_v11 = vunpack.i.l.bf16 %v445_v6  ;;  %v120_v0 = vld [vmem:[#allocation4 + $0xc] sm:$0x1] }
  0x46   :  { %11501 = vmatpush3.bf16.msra.mxu0 %v12134_v30  ;;  %v374_v12 = vrot.slane %v373_v3, 2  ;;  %v387_v13 = vrot.slane %v386_v4, 2  ;;  %v399_v14 = vmax.f32 %v397_v60, %v398_v5  ;;  %v448_v15 = vunpack.i.h.bf16 %v445_v6 }
  0x47   :  { %11614 = vmatprep.subr.bf16.mxu0 %v12139_v7  ;;  %v412_v16 = vmax.f32 %v410_v62, %v411_v8  ;;  %v425_v17 = vmax.f32 %v423_v63, %v424_v9  ;;  %v437_v18 = vrot.slane %v436_v10, 4  ;;  %v458_v19 = vsel %vm364_vm0, %v115_v57, 4286644096  ;;  %v119_v63 = vld [vmem:[#allocation4 + $0xb] sm:$0x1] }
  0x48   :  { %11565 = vmatpush3.bf16.msra.mxu1 %v12138_v2  ;;  %v375_v20 = vmax.f32 %v373_v3, %v374_v12  ;;  %v388_v21 = vmax.f32 %v386_v4, %v387_v13  ;;  %v400_v22 = vrot.slane %v399_v14, 2  ;;  %v449_v23 = vmax.f32 %v447_v11, %v448_v15  ;;  %v121_v13 = vld [vmem:[#allocation4 + $0xd] sm:$0x1] }
  0x49   :  { %v413_v24 = vrot.slane %v412_v16, 2  ;;  %v426_v25 = vrot.slane %v425_v17, 2  ;;  %v438_v26 = vmax.f32 %v436_v10, %v437_v18  ;;  %v460_v27 = vunpack.i.l.bf16 %v458_v19 }
  0x4a   :  { %v376_v28 = vrot.slane %v375_v20, 1  ;;  %v389_v29 = vrot.slane %v388_v21, 1  ;;  %v401_v30 = vmax.f32 %v399_v14, %v400_v22  ;;  %v450_v31 = vrot.slane %v449_v23, 4 }
  0x4b   :  { %v414_v32 = vmax.f32 %v412_v16, %v413_v24  ;;  %v427_v33 = vmax.f32 %v425_v17, %v426_v25  ;;  %v439_v34 = vrot.slane %v438_v26, 2  ;;  %v461_v35 = vunpack.i.h.bf16 %v458_v19 }
  0x4c   :  { %v12590_v36 = vmax.f32 %v375_v20, %v376_v28  ;;  %v12592_v37 = vmax.f32 %v388_v21, %v389_v29  ;;  %v402_v38 = vrot.slane %v401_v30, 1  ;;  %v451_v39 = vmax.f32 %v449_v23, %v450_v31 }
  0x4d   :  { %v415_v42 = vrot.slane %v414_v32, 1  ;;  %v428_v43 = vrot.slane %v427_v33, 1  ;;  %v440_v44 = vmax.f32 %v438_v26, %v439_v34  ;;  %v462_v45 = vmax.f32 %v460_v27, %v461_v35  ;;  %v122_v26 = vld [vmem:[#allocation4 + $0xe] sm:$0x1] }
  0x4e   :  { %v378_v46 = vpack.i.bf16 %v12590_v36, %v12590_v36  ;;  %v391_v47 = vpack.i.bf16 %v12592_v37, %v12592_v37  ;;  %v12598_v48 = vmax.f32 %v401_v30, %v402_v38  ;;  %v452_v49 = vrot.slane %v451_v39, 2 }
  0x4f   :  { %v12600_v50 = vmax.f32 %v414_v32, %v415_v42  ;;  %v12602_v51 = vmax.f32 %v427_v33, %v428_v43  ;;  %v441_v52 = vrot.slane %v440_v44, 1  ;;  %v463_v53 = vrot.slane %v462_v45, 4 }
  0x50   :  { %v404_v55 = vpack.i.bf16 %v12598_v48, %v12598_v48  ;;  %v453_v56 = vmax.f32 %v451_v39, %v452_v49  ;;  %v471_v57 = vsel %vm364_vm0, %v116_v40, 4286644096  ;;  %v484_v58 = vsel %vm364_vm0, %v117_v41, 4286644096 }
  0x51   :  { %v417_v59 = vpack.i.bf16 %v12600_v50, %v12600_v50  ;;  %v430_v60 = vpack.i.bf16 %v12602_v51, %v12602_v51  ;;  %v12612_v61 = vmax.f32 %v440_v44, %v441_v52  ;;  %v464_v62 = vmax.f32 %v462_v45, %v463_v53  ;;  %v123_v45 = vld [vmem:[#allocation4 + $0xf] sm:$0x1] }
  0x52   :  { %v454_v1 = vrot.slane %v453_v56, 1  ;;  %v473_v2 = vunpack.i.l.bf16 %v471_v57  ;;  %v474_v3 = vunpack.i.h.bf16 %v471_v57  ;;  %v486_v4 = vunpack.i.l.bf16 %v484_v58 }
  0x53   :  { %v443_v5 = vpack.i.bf16 %v12612_v61, %v12612_v61  ;;  %v465_v6 = vrot.slane %v464_v62, 2  ;;  %v487_v7 = vunpack.i.h.bf16 %v484_v58  ;;  %v497_v8 = vsel %vm364_vm0, %v118_v54, 4286644096 }
  0x54   :  { %v12617_v9 = vmax.f32 %v453_v56, %v454_v1  ;;  %v475_v10 = vmax.f32 %v473_v2, %v474_v3  ;;  %v499_v11 = vunpack.i.l.bf16 %v497_v8  ;;  %v500_v12 = vunpack.i.h.bf16 %v497_v8 }
  0x55   :  { %v466_v14 = vmax.f32 %v464_v62, %v465_v6  ;;  %v488_v15 = vmax.f32 %v486_v4, %v487_v7  ;;  %v510_v16 = vsel %vm364_vm0, %v119_v63, 4286644096  ;;  %v523_v17 = vsel %vm364_vm0, %v120_v0, 4286644096 }
  0x56   :  { %v456_v18 = vpack.i.bf16 %v12617_v9, %v12617_v9  ;;  %v476_v19 = vrot.slane %v475_v10, 4  ;;  %v501_v20 = vmax.f32 %v499_v11, %v500_v12  ;;  %v512_v21 = vunpack.i.l.bf16 %v510_v16 }
  0x57   :  { %v467_v22 = vrot.slane %v466_v14, 1  ;;  %v489_v23 = vrot.slane %v488_v15, 4  ;;  %v513_v24 = vunpack.i.h.bf16 %v510_v16  ;;  %v525_v25 = vunpack.i.l.bf16 %v523_v17 }
  0x58   :  { %v477_v27 = vmax.f32 %v475_v10, %v476_v19  ;;  %v502_v28 = vrot.slane %v501_v20, 4  ;;  %v526_v29 = vunpack.i.h.bf16 %v523_v17  ;;  %v536_v30 = vsel %vm364_vm0, %v121_v13, 4286644096 }
  0x59   :  { %v12624_v31 = vmax.f32 %v466_v14, %v467_v22  ;;  %v490_v32 = vmax.f32 %v488_v15, %v489_v23  ;;  %v514_v33 = vmax.f32 %v512_v21, %v513_v24  ;;  %v538_v34 = vunpack.i.l.bf16 %v536_v30 }
  0x5a   :  { %v478_v35 = vrot.slane %v477_v27, 2  ;;  %v503_v38 = vmax.f32 %v501_v20, %v502_v28  ;;  %v527_v39 = vmax.f32 %v525_v25, %v526_v29  ;;  %v539_v40 = vunpack.i.h.bf16 %v536_v30 }
  0x5b   :  { %v469_v41 = vpack.i.bf16 %v12624_v31, %v12624_v31  ;;  %v491_v42 = vrot.slane %v490_v32, 2  ;;  %v515_v43 = vrot.slane %v514_v33, 4  ;;  %v549_v44 = vsel %vm364_vm0, %v122_v26, 4286644096 }
  0x5c   :  { %v479_v49 = vmax.f32 %v477_v27, %v478_v35  ;;  %v504_v52 = vrot.slane %v503_v38, 2  ;;  %v528_v53 = vrot.slane %v527_v39, 4  ;;  %v540_v54 = vmax.f32 %v538_v34, %v539_v40  ;;  %v4635_v35 = vld [vmem:[#allocation2] sm:$0xf] }
  0x5d   :  { %v492_v56 = vmax.f32 %v490_v32, %v491_v42  ;;  %v516_v57 = vmax.f32 %v514_v33, %v515_v43  ;;  %v551_v58 = vunpack.i.l.bf16 %v549_v44  ;;  %v552_v62 = vunpack.i.h.bf16 %v549_v44 }
  0x5e   :  { %v480_v63 = vrot.slane %v479_v49, 1  ;;  %v505_v0 = vmax.f32 %v503_v38, %v504_v52  ;;  %v529_v1 = vmax.f32 %v527_v39, %v528_v53  ;;  %v541_v2 = vrot.slane %v540_v54, 4 }
  0x5f   :  { %v493_v3 = vrot.slane %v492_v56, 1  ;;  %v517_v4 = vrot.slane %v516_v57, 2  ;;  %v553_v6 = vmax.f32 %v551_v58, %v552_v62  ;;  %v562_v7 = vsel %vm364_vm0, %v123_v45, 4286644096 }
  0x60   :  { %v481_v8 = vmax.f32 %v479_v49, %v480_v63  ;;  %v506_v10 = vrot.slane %v505_v0, 1  ;;  %v530_v11 = vrot.slane %v529_v1, 2  ;;  %v542_v12 = vmax.f32 %v540_v54, %v541_v2 }
  0x61   :  { %vm4334_vm1 = vcmask 1042434   ;;  %v494_v13 = vmax.f32 %v492_v56, %v493_v3  ;;  %v518_v14 = vmax.f32 %v516_v57, %v517_v4  ;;  %v554_v15 = vrot.slane %v553_v6, 4  ;;  %v7934_v56 = vld [vmem:[#allocation2] sm:$0xf] }
  0x62   :  { %v564_v16 = vunpack.i.l.bf16 %v562_v7  ;;  %vm4336_vm2 = vcmask 1043459   ;;  %v482_v17 = vpack.i.bf16 %v481_v8, %v481_v8  ;;  %v507_v19 = vmax.f32 %v505_v0, %v506_v10  ;;  %v7935_v10 = vld [vmem:[#allocation2 + $0x4] sm:$0x1] }
  0x63   :  { %v531_v20 = vmax.f32 %v529_v1, %v530_v11  ;;  %v543_v21 = vrot.slane %v542_v12, 2  ;;  %v495_v22 = vpack.i.bf16 %v494_v13, %v494_v13  ;;  %v519_v23 = vrot.slane %v518_v14, 1  ;;  %v124_v11 = vld [vmem:[#allocation4 + $0x10] sm:$0x1] }
  0x64   :  { %v555_v24 = vmax.f32 %v553_v6, %v554_v15  ;;  %v565_v25 = vunpack.i.h.bf16 %v562_v7  ;;  %v508_v26 = vpack.i.bf16 %v507_v19, %v507_v19  ;;  %v3694_v29 = vmax.bf16 %v482_v17, %v378_v46 }
  0x65   :  { %v532_v27 = vrot.slane %v531_v20, 1  ;;  %v544_v28 = vmax.f32 %v542_v12, %v543_v21  ;;  %vm4338_vm3 = vcmask 1044484   ;;  %v520_v30 = vmax.f32 %v518_v14, %v519_v23  ;;  %v125_v12 = vld [vmem:[#allocation4 + $0x11] sm:$0x1] }
  0x66   :  { %v556_v32 = vrot.slane %v555_v24, 2  ;;  %v566_v33 = vmax.f32 %v564_v16, %v565_v25  ;;  %v3695_v34 = vmax.bf16 %v495_v22, %v391_v47  ;;  %vm4340_vm4 = vcmask 1045509  }
  0x67   :  { %v533_v38 = vmax.f32 %v531_v20, %v532_v27  ;;  %v545_v39 = vrot.slane %v544_v28, 1  ;;  %v3696_v40 = vmax.bf16 %v508_v26, %v404_v55  ;;  %v10908_v42 = vcombine.low %v3694_v29, %v3694_v29  ;;  %v4636_v55 = vld [vmem:[#allocation2 + $0x4] sm:$0x1] }
  0x68   :  { %v521_v43 = vpack.i.bf16 %v520_v30, %v520_v30  ;;  %v557_v36 = vmax.f32 %v555_v24, %v556_v32  ;;  %v567_v46 = vrot.slane %v566_v33, 4  ;;  %v10909_v44 = vcombine.low %v3695_v34, %v3695_v34 }
  0x69   :  { %vm4342_vm5 = vcmask 1046534   ;;  %vm4667_vm6 = vsmask.f32 3328  ;;  %vm4668_vm7 = vsmask.f32 7440  ;;  %v534_v45 = vpack.i.bf16 %v533_v38, %v533_v38 }
  0x6a   :  { %v546_v49 = vmax.f32 %v544_v28, %v545_v39  ;;  %v10910_v37 = vcombine.low %v3696_v40, %v3696_v40  ;;  %v4206_v47 = vunpack.c.l.b16 %v10908_v42  ;;  %v558_v52 = vrot.slane %v557_v36, 1  ;;  %v126_v28 = vld [vmem:[#allocation4 + $0x12] sm:$0x1]  ;;  %vm12658_vm12 = vmor %vm4667_vm6, %vm4668_vm7  ;;  %v127_v40 = vld [vmem:[#allocation4 + $0x13] sm:$0x1] }
  0x6b   :  { %v568_v53 = vmax.f32 %v566_v33, %v567_v46  ;;  %v3697_v54 = vmax.bf16 %v521_v43, %v417_v59  ;;  %v4207_v48 = vunpack.c.l.b16 %v10909_v44  ;;  %vm4501_vm8 = vcmask 1043456   ;;  %v4510_v43 = vld [vmem:[#allocation2 + $0xc] sm:$0x1] }
  0x6c   :  { %vm4502_vm9 = vsmask.f32 7938  ;;  %v547_v57 = vpack.i.bf16 %v546_v49, %v546_v49  ;;  %v3698_v58 = vmax.bf16 %v534_v45, %v430_v60  ;;  %v4208_v62 = vunpack.c.l.b16 %v10910_v37 }
  0x6d   :  { %vm4344_vm10 = vcmask 1047559   ;;  %v4671_v63 = vshrl.u32 %v4635_v35, 16  ;;  %v559_v0 = vmax.f32 %v557_v36, %v558_v52  ;;  %v569_v1 = vrot.slane %v568_v53, 2  ;;  %vm12666_vm13 = vmand %vm4501_vm8, %vm4502_vm9 }
  0x6e   :  { %v10911_v2 = vcombine.low %v3697_v54, %v3697_v54  ;;  %v4335_v3 = vsel %vm4334_vm1, %v4207_v48, %v4206_v47  ;;  %vm4508_vm11 = vsmask.f32 256  ;;  %v3699_v50 = vmax.bf16 %v547_v57, %v443_v5 }
  0x6f   :  { %v10912_v59 = vcombine.low %v3698_v58, %v3698_v58  ;;  %v4337_v4 = vsel %vm4336_vm2, %v4208_v62, %v4335_v3  ;;  %v4673_v6 = vrot.slane %v4671_v63, 4  ;;  %v560_v7 = vpack.i.bf16 %v559_v0, %v559_v0  ;;  %vm12680_vm14 = vmand %vm364_vm0, %vm4508_vm11 }
  0x70   :  { %v570_v51 = vmax.f32 %v568_v53, %v569_v1  ;;  %v4209_v60 = vunpack.c.l.b16 %v10911_v2  ;;  %v4674_v8 = vshll.u32 %v4635_v35, 16  ;;  %v10913_v13 = vcombine.low %v3699_v50, %v3699_v50  ;;  %v4504_v35 = vld [vmem:[#allocation2 + $0x8] sm:$0xf]  ;;  %v128_v53 = vld [vmem:[#allocation4 + $0x14] sm:$0x1] }
  0x71   :  { %v4210_v14 = vunpack.c.l.b16 %v10912_v59  ;;  %v4680_v15 = vshll.u32 %v4636_v55, 16  ;;  %v7967_v16 = vshrl.u32 %v7934_v56, 16  ;;  %v3700_v61 = vmax.bf16 %v560_v7, %v456_v18  ;;  %v129_v55 = vld [vmem:[#allocation4 + $0x15] sm:$0x1]  ;;  %v130_v1 = vld [vmem:[#allocation4 + $0x16] sm:$0x1] }
  0x72   :  { %v571_v17 = vrot.slane %v570_v51, 1  ;;  %v4339_v5 = vsel %vm4338_vm3, %v4209_v60, %v4337_v4  ;;  %v4676_v19 = vrot.slane %v4674_v8, 5  ;;  %v4211_v20 = vunpack.c.l.b16 %v10913_v13 }
  0x73   :  { %v4341_v21 = vsel %vm4340_vm4, %v4210_v14, %v4339_v5  ;;  %v4682_v22 = vrot.slane %v4680_v15, 5  ;;  %v7969_v23 = vrot.slane %v7967_v16, 4  ;;  %v10914_v25 = vcombine.low %v3700_v61, %v3700_v61 }
  0x74   :  { %v572_v24 = vmax.f32 %v570_v51, %v571_v17  ;;  %v4677_v26 = vor.u32 %v4676_v19, %v4673_v6  ;;  %v7970_v27 = vshll.u32 %v7934_v56, 16  ;;  %v4343_v29 = vsel %vm4342_vm5, %v4211_v20, %v4341_v21 }
  0x75   :  { %v15132_v9 = vmov 0  ;;  %v7976_v18 = vshll.u32 %v7935_v10, 16  ;;  %v575_v30 = vsel %vm364_vm0, %v124_v11, 4286644096  ;;  %v588_v32 = vsel %vm364_vm0, %v125_v12, 4286644096 }
  0x76   :  { %v15133_v9 = vsel %vm12658_vm12, 4294967295, %v15132_v9  ;;  %v573_v33 = vpack.i.bf16 %v572_v24, %v572_v24  ;;  %v4212_v34 = vunpack.c.l.b16 %v10914_v25  ;;  %v4678_v38 = vrot.slane %v4677_v26, 4 }
  0x77   :  { %15134 = vst [vmem:[#allocation14_spill] sm:$0xff] %v15133_v9  ;;  %v7972_v39 = vrot.slane %v7970_v27, 5  ;;  %v15135_v42 = vmov 0  ;;  %v12670_v36 = vrot.slane %v7976_v18, 5  ;;  %v577_v46 = vunpack.i.l.bf16 %v575_v30 }
  0x78   :  { %v15136_v42 = vsel %vm12666_vm13, 4294967295, %v15135_v42  ;;  %v578_v44 = vunpack.i.h.bf16 %v575_v30  ;;  %v590_v45 = vunpack.i.l.bf16 %v588_v32  ;;  %v3701_v49 = vmax.bf16 %v573_v33, %v469_v41 }
  0x79   :  { %15137 = vst [vmem:[#allocation15_spill] sm:$0xff] %v15136_v42  ;;  %v4345_v37 = vsel %vm4344_vm10, %v4212_v34, %v4343_v29  ;;  %v4683_v47 = vsel %vm12658_vm12, %v4678_v38, %v4682_v22  ;;  %v7973_v52 = vor.u32 %v7972_v39, %v7969_v23  ;;  %v15138_v48 = vmov 0  ;;  %v12699_v22 = vld [vmem:[#allocation2] sm:$0xe] }
  0x7a   :  { %v4436_v54 = vpack.c.b16 %v4345_v37, %v4345_v37  ;;  %v15139_v48 = vsel %vm12680_vm14, 4294967295, %v15138_v48  ;;  %4910 = vst [vmem:[#allocation3 + $0x4] sm:$0xf] %v4683_v47  ;;  %v579_v56 = vmax.f32 %v577_v46, %v578_v44  ;;  %v591_v57 = vunpack.i.h.bf16 %v588_v32 }
  0x7b   :  { %15140 = vst [vmem:[#allocation16_spill] sm:$0xff] %v15139_v48  ;;  %v601_v31 = vsel %vm364_vm0, %v126_v28, 4286644096  ;;  %v11454_v41 = vcombine.low %v3701_v49, %v3701_v49  ;;  %v12685_v58 = vrot.slane %v7973_v52, 4  ;;  %v614_v50 = vsel %vm364_vm0, %v127_v40, 4286644096 }
  0x7c   :  { %v603_v62 = vunpack.i.l.bf16 %v601_v31  ;;  %v604_v63 = vunpack.i.h.bf16 %v601_v31  ;;  %v4505_v0 = vsel %vm12666_vm13, %v4436_v54, %v4504_v35  ;;  %v580_v2 = vrot.slane %v579_v56, 4  ;;  %v132_v49 = vld [vmem:[#allocation4 + $0x18] sm:$0x1] }
  0x7d   :  { %v592_v3 = vmax.f32 %v590_v45, %v591_v57  ;;  %4506 = vst [vmem:[#allocation2 + $0x8] sm:$0xf] %v4505_v0  ;;  %v4511_v59 = vsel %vm12680_vm14, %v11454_v41, %v4510_v43  ;;  %v7979_v4 = vsel %vm12658_vm12, %v12685_v58, %v12670_v36  ;;  %v616_v7 = vunpack.i.l.bf16 %v614_v50 }
  0x7e   :  { %v605_v6 = vmax.f32 %v603_v62, %v604_v63  ;;  %4512 = vst [vmem:[#allocation2 + $0xc] sm:$0x1] %v4511_v59  ;;  %v581_v51 = vmax.f32 %v579_v56, %v580_v2  ;;  %v617_v8 = vunpack.i.h.bf16 %v614_v50  ;;  %v627_v10 = vsel %vm364_vm0, %v128_v53, 4286644096  ;;  %v133_v50 = vld [vmem:[#allocation4 + $0x19] sm:$0x1] }
  0x7f   :  { %v593_v60 = vrot.slane %v592_v3, 4  ;;  %v629_v12 = vunpack.i.l.bf16 %v627_v10  ;;  %v630_v13 = vunpack.i.h.bf16 %v627_v10  ;;  %v640_v14 = vsel %vm364_vm0, %v129_v55, 4286644096 }
  0x80   :  { %v606_v11 = vrot.slane %v605_v6, 4  ;;  %v582_v15 = vrot.slane %v581_v51, 2  ;;  %v618_v17 = vmax.f32 %v616_v7, %v617_v8  ;;  %v642_v61 = vunpack.i.l.bf16 %v640_v14 }
  0x81   :  { %v594_v16 = vmax.f32 %v592_v3, %v593_v60  ;;  %v631_v19 = vmax.f32 %v629_v12, %v630_v13  ;;  %v643_v20 = vunpack.i.h.bf16 %v640_v14  ;;  %v653_v21 = vsel %vm364_vm0, %v130_v1, 4286644096  ;;  %v134_v12 = vld [vmem:[#allocation4 + $0x1a] sm:$0x1]  ;;  %v135_v13 = vld [vmem:[#allocation4 + $0x1b] sm:$0x1] }
  0x82   :  { %v607_v5 = vmax.f32 %v605_v6, %v606_v11  ;;  %v583_v23 = vmax.f32 %v581_v51, %v582_v15  ;;  %v619_v25 = vrot.slane %v618_v17, 4  ;;  %v655_v26 = vunpack.i.l.bf16 %v653_v21 }
  0x83   :  { %v595_v24 = vrot.slane %v594_v16, 2  ;;  %v632_v28 = vrot.slane %v631_v19, 4  ;;  %v644_v29 = vmax.f32 %v642_v61, %v643_v20  ;;  %v656_v18 = vunpack.i.h.bf16 %v653_v21 }
  0x84   :  { %v608_v27 = vrot.slane %v607_v5, 2  ;;  %v4604_v30 = vld [vmem:[#allocation2 + $0x8] sm:$0xf]  ;;  %v584_v33 = vrot.slane %v583_v23, 1  ;;  %v620_v35 = vmax.f32 %v618_v17, %v619_v25  ;;  %v11052_v38 = vrot.slane %v12699_v22, 9 }
  0x85   :  { %v4637_v32 = vld [vmem:[#allocation2 + $0x8] sm:$0xf]  ;;  %v596_v34 = vmax.f32 %v594_v16, %v595_v24  ;;  %4620 = vst [vmem:[#allocation3 + $0x24] sm:$0xf] %v4604_v30  ;;  %v4638_v39 = vld [vmem:[#allocation2 + $0xc] sm:$0x1]  ;;  %v633_v44 = vmax.f32 %v631_v19, %v632_v28  ;;  %v657_v7 = vmax.f32 %v655_v26, %v656_v18 }
  0x86   :  { %v4685_v40 = vshrl.u32 %v4637_v32, 16  ;;  %v4688_v43 = vshll.u32 %v4637_v32, 16  ;;  %v609_v46 = vmax.f32 %v607_v5, %v608_v27  ;;  %v4694_v45 = vshll.u32 %v4638_v39, 16  ;;  %v5089_v57 = vld [vmem:[#allocation2 + $0x8] sm:$0xf] }
  0x87   :  { %v12702_v37 = vmax.f32 %v583_v23, %v584_v33  ;;  %v597_v47 = vrot.slane %v596_v34, 1  ;;  %v621_v52 = vrot.slane %v620_v35, 2  ;;  %v634_v56 = vrot.slane %v633_v44, 2  ;;  %5105 = vst [vmem:[#allocation3 + $0xc] sm:$0xf] %v5089_v57 }
  0x88   :  { %v4687_v53 = vrot.slane %v4685_v40, 4  ;;  %v4690_v54 = vrot.slane %v4688_v43, 5  ;;  %v610_v55 = vrot.slane %v609_v46, 1  ;;  %v4696_v31 = vrot.slane %v4694_v45, 5  ;;  %v136_v5 = vld [vmem:[#allocation4 + $0x1c] sm:$0x1] }
  0x89   :  { %v586_v41 = vpack.i.bf16 %v12702_v37, %v12702_v37  ;;  %v12706_v62 = vmax.f32 %v596_v34, %v597_v47  ;;  %v622_v63 = vmax.f32 %v620_v35, %v621_v52  ;;  %v635_v2 = vmax.f32 %v633_v44, %v634_v56  ;;  %v137_v30 = vld [vmem:[#allocation4 + $0x1d] sm:$0x1]  ;;  %v7902_v39 = vld [vmem:[#allocation2] sm:$0xf]  ;;  %v8223_v37 = vld [vmem:[#allocation2 + $0x4] sm:$0x1] }
  0x8a   :  { %v4691_v0 = vor.u32 %v4690_v54, %v4687_v53  ;;  %v12708_v1 = vmax.f32 %v609_v46, %v610_v55  ;;  %v645_v3 = vrot.slane %v644_v29, 4  ;;  %v679_v51 = vsel %vm364_vm0, %v132_v49, 4286644096  ;;  %v6050_v53 = vld [vmem:[#allocation3] sm:$0xff] }
  0x8b   :  { %v599_v59 = vpack.i.bf16 %v12706_v62, %v12706_v62  ;;  %v623_v6 = vrot.slane %v622_v63, 1  ;;  %v636_v10 = vrot.slane %v635_v2, 1  ;;  %v658_v15 = vrot.slane %v657_v7, 4  ;;  %7918 = vst [vmem:[#allocation3] sm:$0xf] %v7902_v39 }
  0x8c   :  { %v4692_v60 = vrot.slane %v4691_v0, 4  ;;  %v612_v8 = vpack.i.bf16 %v12708_v1, %v12708_v1  ;;  %v646_v11 = vmax.f32 %v644_v29, %v645_v3  ;;  %v681_v16 = vunpack.i.l.bf16 %v679_v51 }
  0x8d   :  { %v12715_v14 = vmax.f32 %v622_v63, %v623_v6  ;;  %v682_v17 = vunpack.i.h.bf16 %v679_v51  ;;  %v12719_v19 = vmax.f32 %v635_v2, %v636_v10  ;;  %v692_v21 = vsel %vm364_vm0, %v133_v50, 4286644096  ;;  %v138_v63 = vld [vmem:[#allocation4 + $0x1e] sm:$0x1] }
  0x8e   :  { %v4697_v61 = vsel %vm12658_vm12, %v4692_v60, %v4696_v31  ;;  %v647_v20 = vrot.slane %v646_v11, 2  ;;  %v659_v24 = vmax.f32 %v657_v7, %v658_v15  ;;  %v694_v26 = vunpack.i.l.bf16 %v692_v21  ;;  %v12140_v31 = vld [vmem:[#allocation7 + $0x138] sm:$0xff]  }
  0x8f   :  { %4911 = vst [vmem:[#allocation3 + $0x28] sm:$0xf] %v4697_v61  ;;  %v625_v23 = vpack.i.bf16 %v12715_v14, %v12715_v14  ;;  %v683_v25 = vmax.f32 %v681_v16, %v682_v17  ;;  %v638_v27 = vpack.i.bf16 %v12719_v19, %v12719_v19  ;;  %v695_v29 = vunpack.i.h.bf16 %v692_v21 }
  0x90   :  { %v648_v28 = vmax.f32 %v646_v11, %v647_v20  ;;  %v705_v18 = vsel %vm364_vm0, %v134_v12, 4286644096  ;;  %v660_v32 = vrot.slane %v659_v24, 2  ;;  %vm4990_vm15 = vcmask 1042432   ;;  %v12145_v12 = vld [vmem:[#allocation7 + $0x170] sm:$0xff]  }
  0x91   :  { %v684_v33 = vrot.slane %v683_v25, 4  ;;  %v707_v34 = vunpack.i.l.bf16 %v705_v18  ;;  %v708_v35 = vunpack.i.h.bf16 %v705_v18  ;;  %vm4991_vm6 = vcmask 1046532  }
  0x92   :  { %v649_v40 = vrot.slane %v648_v28, 1  ;;  %v696_v43 = vmax.f32 %v694_v26, %v695_v29  ;;  %v718_v46 = vsel %vm364_vm0, %v135_v13, 4286644096  ;;  %v731_v44 = vsel %vm364_vm0, %v136_v5, 4286644096  ;;  %vm12746_vm7 = vmor %vm4990_vm15, %vm4991_vm6 }
  0x93   :  { %v661_v45 = vmax.f32 %v659_v24, %v660_v32  ;;  %v685_v49 = vmax.f32 %v683_v25, %v684_v33  ;;  %v709_v47 = vmax.f32 %v707_v34, %v708_v35  ;;  %v720_v52 = vunpack.i.l.bf16 %v718_v46  ;;  %v4927_v24 = vld [vmem:[#allocation2 + $0x4] sm:$0x1] }
  0x94   :  { %v12729_v54 = vmax.f32 %v648_v28, %v649_v40  ;;  %v697_v55 = vrot.slane %v696_v43, 4  ;;  %v721_v56 = vunpack.i.h.bf16 %v718_v46  ;;  %v733_v57 = vunpack.i.l.bf16 %v731_v44 }
  0x95   :  { %v662_v0 = vrot.slane %v661_v45, 1  ;;  %v686_v2 = vrot.slane %v685_v49, 2  ;;  %v710_v3 = vrot.slane %v709_v47, 4  ;;  %v734_v50 = vunpack.i.h.bf16 %v731_v44  ;;  %v4928_v44 = vld [vmem:[#allocation2 + $0x8] sm:$0xe] }
  0x96   :  { %v6055_v6 = vld [vmem:[#allocation3 + $0x24] sm:$0xff]  ;;  %v651_v51 = vpack.i.bf16 %v12729_v54, %v12729_v54  ;;  %v698_v60 = vmax.f32 %v696_v43, %v697_v55  ;;  %v722_v10 = vmax.f32 %v720_v52, %v721_v56  ;;  %v744_v11 = vsel %vm364_vm0, %v137_v30, 4286644096  ;;  %v12147_v30 = vld [vmem:[#allocation7 + $0x130] sm:$0xff]  }
  0x97   :  { %v12136_v7 = vld [vmem:[#allocation3 + $0x4] ss:$36 sps:$4 sm:$0xff]   ;;  %v11101_v13 = vcombine.low %v6050_v53, %v6055_v6  ;;  %v12739_v15 = vmax.f32 %v661_v45, %v662_v0  ;;  %v687_v16 = vmax.f32 %v685_v49, %v686_v2  ;;  %v711_v17 = vmax.f32 %v709_v47, %v710_v3 }
  0x98   :  { %8206 = vst [vmem:[#allocation3 + $0x4] sm:$0xf] %v7979_v4  ;;  %7113 = vmatprep.mubr.bf16.mxu0 %v12136_v7  ;;  %v699_v61 = vrot.slane %v698_v60, 2  ;;  %v723_v5 = vrot.slane %v722_v10, 4  ;;  %v735_v20 = vmax.f32 %v733_v57, %v734_v50  ;;  %v746_v21 = vunpack.i.l.bf16 %v744_v11 }
  0x99   :  { %7114 = vmatmul.mubr.bf16.vlgmr.msra.gmra.mxu0 %v11101_v13  ;;  %v664_v25 = vpack.i.bf16 %v12739_v15, %v12739_v15  ;;  %v688_v26 = vrot.slane %v687_v16, 1  ;;  %v712_v28 = vrot.slane %v711_v17, 2  ;;  %v747_v29 = vunpack.i.h.bf16 %v744_v11  ;;  %v8222_v11 = vld [vmem:[#allocation2] sm:$0xe] }
  0x9a   :  { %11615 = vmatpush3.bf16.msra.mxu0 %v12140_v31  ;;  %v700_v36 = vmax.f32 %v698_v60, %v699_v61  ;;  %v724_v58 = vmax.f32 %v722_v10, %v723_v5  ;;  %v736_v4 = vrot.slane %v735_v20, 4  ;;  %v757_v18 = vsel %vm364_vm0, %v138_v63, 4286644096  ;;  %v4929_v63 = vld [vmem:[#allocation2 + $0xc] sm:$0x1] }
  0x9b   :  { %v689_v32 = vmax.f32 %v687_v16, %v688_v26  ;;  %v713_v33 = vmax.f32 %v711_v17, %v712_v28  ;;  %v748_v34 = vmax.f32 %v746_v21, %v747_v29  ;;  %v759_v35 = vunpack.i.l.bf16 %v757_v18  ;;  %11616 = vmatprep.subr.bf16.mxu0 %v12145_v12 }
  0x9c   :  { %v701_v39 = vrot.slane %v700_v36, 1  ;;  %v725_v40 = vrot.slane %v724_v58, 2  ;;  %v737_v43 = vmax.f32 %v735_v20, %v736_v4  ;;  %v760_v46 = vunpack.i.h.bf16 %v757_v18 }
  0x9d   :  { %v15141_v45 = vmov 0  ;;  %v690_v49 = vpack.i.bf16 %v689_v32, %v689_v32  ;;  %v714_v47 = vrot.slane %v713_v33, 1  ;;  %v749_v52 = vrot.slane %v748_v34, 4 }
  0x9e   :  { %v15142_v45 = vsel %vm12746_vm7, 4294967295, %v15141_v45  ;;  %v4995_v53 = vrot.slane %v4927_v24, 5  ;;  %v702_v55 = vmax.f32 %v700_v36, %v701_v39  ;;  %v726_v56 = vmax.f32 %v724_v58, %v725_v40  ;;  %11617 = vmatpush3.bf16.msra.mxu0 %v12147_v30 }
  0x9f   :  { %15143 = vst [vmem:[#allocation17_spill] sm:$0xff] %v15142_v45  ;;  %v738_v57 = vrot.slane %v737_v43, 2  ;;  %v761_v31 = vmax.f32 %v759_v35, %v760_v46  ;;  %v715_v0 = vmax.f32 %v713_v33, %v714_v47  ;;  %v750_v2 = vmax.f32 %v748_v34, %v749_v52  ;;  %v140_v34 = vld [vmem:[#allocation4 + $0x20] sm:$0x1]  ;;  %v141_v35 = vld [vmem:[#allocation4 + $0x21] sm:$0x1] }
  0xa0   :  { %v3702_v3 = vmax.bf16 %v690_v49, %v586_v41  ;;  %v4996_v50 = vsel %vm12746_vm7, %v11052_v38, %v4995_v53  ;;  %v703_v6 = vpack.i.bf16 %v702_v55, %v702_v55  ;;  %v727_v7 = vrot.slane %v726_v56, 1  ;;  %v131_v41 = vld [vmem:[#allocation4 + $0x17] sm:$0x1] }
  0xa1   :  { %v739_v60 = vmax.f32 %v737_v43, %v738_v57  ;;  %v762_v10 = vrot.slane %v761_v31, 4  ;;  %5073 = vst [vmem:[#allocation3 + $0x8] sm:$0xf] %v4996_v50  ;;  %v716_v12 = vpack.i.bf16 %v715_v0, %v715_v0  ;;  %v751_v13 = vrot.slane %v750_v2, 2 }
  0xa2   :  { %v10916_v16 = vcombine.low %v3702_v3, %v3702_v3  ;;  %v11053_v17 = vrot.slane %v4928_v44, 9  ;;  %v728_v61 = vmax.f32 %v726_v56, %v727_v7  ;;  %v3703_v22 = vmax.bf16 %v703_v6, %v599_v59 }
  0xa3   :  { %v740_v5 = vrot.slane %v739_v60, 1  ;;  %v763_v20 = vmax.f32 %v761_v31, %v762_v10  ;;  %v752_v38 = vmax.f32 %v750_v2, %v751_v13  ;;  %v3704_v21 = vmax.bf16 %v716_v12, %v612_v8  ;;  %v139_v8 = vld [vmem:[#allocation4 + $0x1f] sm:$0x1] }
  0xa4   :  { %v4214_v24 = vunpack.c.l.b16 %v10916_v16  ;;  %v4999_v26 = vrot.slane %v4929_v63, 5  ;;  %v729_v28 = vpack.i.bf16 %v728_v61, %v728_v61  ;;  %v10917_v58 = vcombine.low %v3703_v22, %v3703_v22  ;;  %v143_v16 = vld [vmem:[#allocation4 + $0x23] sm:$0x1] }
  0xa5   :  { %v741_v29 = vmax.f32 %v739_v60, %v740_v5  ;;  %v764_v36 = vrot.slane %v763_v20, 2  ;;  %v753_v4 = vrot.slane %v752_v38, 1  ;;  %v10918_v18 = vcombine.low %v3704_v21, %v3704_v21 }
  0xa6   :  { %v5000_v30 = vsel %vm12746_vm7, %v11053_v17, %v4999_v26  ;;  %v11261_v62 = vrot.slane %v8222_v11, 9  ;;  %v3705_v33 = vmax.bf16 %v729_v28, %v625_v23  ;;  %v4215_v1 = vunpack.c.l.b16 %v10917_v58  ;;  %v144_v17 = vld [vmem:[#allocation4 + $0x24] sm:$0x1]  ;;  %v4513_v58 = vld [vmem:[#allocation2 + $0x10] sm:$0xf] }
  0xa7   :  { %v742_v59 = vpack.i.bf16 %v741_v29, %v741_v29  ;;  %v765_v32 = vmax.f32 %v763_v20, %v764_v36  ;;  %5074 = vst [vmem:[#allocation3 + $0x2c] sm:$0xf] %v5000_v30  ;;  %v754_v39 = vmax.f32 %v752_v38, %v753_v4  ;;  %v4216_v40 = vunpack.c.l.b16 %v10918_v18 }
  0xa8   :  { %v8288_v43 = vrot.slane %v8223_v37, 5  ;;  %v666_v46 = vsel %vm364_vm0, %v131_v41, 4286644096  ;;  %v10919_v47 = vcombine.low %v3705_v33, %v3705_v33  ;;  %v4346_v52 = vsel %vm4334_vm1, %v4215_v1, %v4214_v24 }
  0xa9   :  { %v766_v44 = vrot.slane %v765_v32, 1  ;;  %v3706_v49 = vmax.bf16 %v742_v59, %v638_v27  ;;  %v755_v14 = vpack.i.bf16 %v754_v39, %v754_v39  ;;  %v4347_v23 = vsel %vm4336_vm2, %v4216_v40, %v4346_v52  ;;  %v142_v27 = vld [vmem:[#allocation4 + $0x22] sm:$0x1] }
  0xaa   :  { %v12776_v53 = vsel %vm12746_vm7, %v11261_v62, %v8288_v43  ;;  %v668_v55 = vunpack.i.l.bf16 %v666_v46  ;;  %v4217_v31 = vunpack.c.l.b16 %v10919_v47  ;;  %v669_v63 = vunpack.i.h.bf16 %v666_v46 }
  0xab   :  { %v767_v56 = vmax.f32 %v765_v32, %v766_v44  ;;  %v10920_v57 = vcombine.low %v3706_v49, %v3706_v49  ;;  %v3707_v19 = vmax.bf16 %v755_v14, %v651_v51  ;;  %v770_v0 = vsel %vm364_vm0, %v139_v8, 4286644096  ;;  %v145_v8 = vld [vmem:[#allocation4 + $0x25] sm:$0x1] }
  0xac   :  { %v783_v2 = vsel %vm364_vm0, %v140_v34, 4286644096  ;;  %v796_v3 = vsel %vm364_vm0, %v141_v35, 4286644096  ;;  %v4348_v7 = vsel %vm4338_vm3, %v4217_v31, %v4347_v23  ;;  %v670_v60 = vmax.f32 %v668_v55, %v669_v63  ;;  %v146_v31 = vld [vmem:[#allocation4 + $0x26] sm:$0x1] }
  0xad   :  { %v768_v50 = vpack.i.bf16 %v767_v56, %v767_v56  ;;  %v4218_v6 = vunpack.c.l.b16 %v10920_v57  ;;  %v10921_v10 = vcombine.low %v3707_v19, %v3707_v19  ;;  %v772_v11 = vunpack.i.l.bf16 %v770_v0 }
  0xae   :  { %v773_v12 = vunpack.i.h.bf16 %v770_v0  ;;  %v785_v13 = vunpack.i.l.bf16 %v783_v2  ;;  %v671_v61 = vrot.slane %v670_v60, 4  ;;  %v786_v5 = vunpack.i.h.bf16 %v783_v2 }
  0xaf   :  { %v3708_v54 = vmax.bf16 %v768_v50, %v664_v25  ;;  %v4349_v51 = vsel %vm4340_vm4, %v4218_v6, %v4348_v7  ;;  %v4219_v20 = vunpack.c.l.b16 %v10921_v10  ;;  %v798_v37 = vunpack.i.l.bf16 %v796_v3 }
  0xb0   :  { %v774_v22 = vmax.f32 %v772_v11, %v773_v12  ;;  %v799_v41 = vunpack.i.h.bf16 %v796_v3  ;;  %v672_v21 = vmax.f32 %v670_v60, %v671_v61  ;;  %v787_v24 = vmax.f32 %v785_v13, %v786_v5  ;;  %v147_v12 = vld [vmem:[#allocation4 + $0x27] sm:$0x1] }
  0xb1   :  { %v10922_v38 = vcombine.low %v3708_v54, %v3708_v54  ;;  %v809_v26 = vsel %vm364_vm0, %v142_v27, 4286644096  ;;  %v4350_v28 = vsel %vm4342_vm5, %v4219_v20, %v4349_v51  ;;  %v822_v32 = vsel %vm364_vm0, %v143_v16, 4286644096 }
  0xb2   :  { %v775_v29 = vrot.slane %v774_v22, 4  ;;  %v800_v15 = vmax.f32 %v798_v37, %v799_v41  ;;  %v811_v25 = vunpack.i.l.bf16 %v809_v26  ;;  %v673_v4 = vrot.slane %v672_v21, 2 }
  0xb3   :  { %v4220_v36 = vunpack.c.l.b16 %v10922_v38  ;;  %v788_v18 = vrot.slane %v787_v24, 4  ;;  %v812_v30 = vunpack.i.h.bf16 %v809_v26  ;;  %v835_v33 = vsel %vm364_vm0, %v144_v17, 4286644096 }
  0xb4   :  { %v776_v62 = vmax.f32 %v774_v22, %v775_v29  ;;  %v801_v59 = vrot.slane %v800_v15, 4  ;;  %v674_v34 = vmax.f32 %v672_v21, %v673_v4  ;;  %v824_v44 = vunpack.i.l.bf16 %v822_v32 }
  0xb5   :  { %v4351_v1 = vsel %vm4344_vm10, %v4220_v36, %v4350_v28  ;;  %v789_v35 = vmax.f32 %v787_v24, %v788_v18  ;;  %v813_v39 = vmax.f32 %v811_v25, %v812_v30  ;;  %v825_v14 = vunpack.i.h.bf16 %v822_v32  ;;  %v149_v30 = vld [vmem:[#allocation4 + $0x29] sm:$0x1] }
  0xb6   :  { %v4438_v40 = vpack.c.b16 %v4351_v1, %v4351_v1  ;;  %v777_v43 = vrot.slane %v776_v62, 2  ;;  %v802_v46 = vmax.f32 %v800_v15, %v801_v59  ;;  %v675_v49 = vrot.slane %v674_v34, 1  ;;  %v148_v15 = vld [vmem:[#allocation4 + $0x28] sm:$0x1] }
  0xb7   :  { %v790_v47 = vrot.slane %v789_v35, 2  ;;  %v814_v52 = vrot.slane %v813_v39, 4  ;;  %v837_v57 = vunpack.i.l.bf16 %v835_v33  ;;  %v826_v0 = vmax.f32 %v824_v44, %v825_v14  ;;  %v150_v14 = vld [vmem:[#allocation4 + $0x2a] sm:$0x1] }
  0xb8   :  { %v4514_v23 = vsel %vm12666_vm13, %v4438_v40, %v4513_v58  ;;  %v778_v55 = vmax.f32 %v776_v62, %v777_v43  ;;  %v803_v56 = vrot.slane %v802_v46, 2  ;;  %v12796_v63 = vmax.f32 %v674_v34, %v675_v49 }
  0xb9   :  { %4515 = vst [vmem:[#allocation2 + $0x10] sm:$0xf] %v4514_v23  ;;  %v791_v19 = vmax.f32 %v789_v35, %v790_v47  ;;  %v815_v27 = vmax.f32 %v813_v39, %v814_v52  ;;  %v838_v50 = vunpack.i.h.bf16 %v835_v33  ;;  %v848_v6 = vsel %vm364_vm0, %v145_v8, 4286644096 }
  0xba   :  { %v779_v2 = vrot.slane %v778_v55, 1  ;;  %v804_v3 = vmax.f32 %v802_v46, %v803_v56  ;;  %v677_v7 = vpack.i.bf16 %v12796_v63, %v12796_v63  ;;  %v827_v11 = vrot.slane %v826_v0, 4 }
  0xbb   :  { %v792_v60 = vrot.slane %v791_v19, 1  ;;  %v816_v10 = vrot.slane %v815_v27, 2  ;;  %v839_v51 = vmax.f32 %v837_v57, %v838_v50  ;;  %v850_v16 = vunpack.i.l.bf16 %v848_v6 }
  0xbc   :  { %v12801_v13 = vmax.f32 %v778_v55, %v779_v2  ;;  %v805_v54 = vrot.slane %v804_v3, 1  ;;  %v828_v5 = vmax.f32 %v826_v0, %v827_v11  ;;  %v851_v20 = vunpack.i.h.bf16 %v848_v6 }
  0xbd   :  { %v12803_v17 = vmax.f32 %v791_v19, %v792_v60  ;;  %v817_v61 = vmax.f32 %v815_v27, %v816_v10  ;;  %v840_v41 = vrot.slane %v839_v51, 4  ;;  %v861_v38 = vsel %vm364_vm0, %v146_v31, 4286644096  ;;  %v6051_v31 = vld [vmem:[#allocation3 + $0x8] sm:$0xff] }
  0xbe   :  { %v781_v22 = vpack.i.bf16 %v12801_v13, %v12801_v13  ;;  %v12807_v37 = vmax.f32 %v804_v3, %v805_v54  ;;  %v829_v26 = vrot.slane %v828_v5, 2  ;;  %v852_v28 = vmax.f32 %v850_v16, %v851_v20  ;;  %8366 = vst [vmem:[#allocation3 + $0x8] sm:$0xf] %v12776_v53  ;;  %v152_v20 = vld [vmem:[#allocation4 + $0x2c] sm:$0x1] }
  0xbf   :  { %v794_v21 = vpack.i.bf16 %v12803_v17, %v12803_v17  ;;  %v818_v24 = vrot.slane %v817_v61, 1  ;;  %v841_v36 = vmax.f32 %v839_v51, %v840_v41  ;;  %v863_v58 = vunpack.i.l.bf16 %v861_v38 }
  0xc0   :  { %v5090_v29 = vld [vmem:[#allocation2 + $0x10] sm:$0xf]  ;;  %v807_v25 = vpack.i.bf16 %v12807_v37, %v12807_v37  ;;  %v864_v4 = vunpack.i.h.bf16 %v861_v38  ;;  %v830_v59 = vmax.f32 %v828_v5, %v829_v26  ;;  %v853_v32 = vrot.slane %v852_v28, 4  ;;  %v151_v5 = vld [vmem:[#allocation4 + $0x2b] sm:$0x1] }
  0xc1   :  { %v4605_v18 = vld [vmem:[#allocation2 + $0x10] sm:$0xf]  ;;  %5106 = vst [vmem:[#allocation3 + $0x30] sm:$0xf] %v5090_v29  ;;  %v12814_v62 = vmax.f32 %v817_v61, %v818_v24  ;;  %v874_v33 = vsel %vm364_vm0, %v147_v12, 4286644096 }
  0xc2   :  { %4621 = vst [vmem:[#allocation3 + $0x48] sm:$0xf] %v4605_v18  ;;  %v842_v1 = vrot.slane %v841_v36, 2  ;;  %v865_v8 = vmax.f32 %v863_v58, %v864_v4  ;;  %v876_v34 = vunpack.i.l.bf16 %v874_v33  ;;  %v877_v35 = vunpack.i.h.bf16 %v874_v33  ;;  %v153_v33 = vld [vmem:[#allocation4 + $0x2d] sm:$0x1] }
  0xc3   :  { %v820_v39 = vpack.i.bf16 %v12814_v62, %v12814_v62  ;;  %v831_v40 = vrot.slane %v830_v59, 1  ;;  %v854_v43 = vmax.f32 %v852_v28, %v853_v32  ;;  %v887_v46 = vsel %vm364_vm0, %v148_v15, 4286644096  ;;  %v4639_v62 = vld [vmem:[#allocation2 + $0x10] sm:$0xf] }
  0xc4   :  { %v843_v44 = vmax.f32 %v841_v36, %v842_v1  ;;  %v866_v49 = vrot.slane %v865_v8, 4  ;;  %v878_v47 = vmax.f32 %v876_v34, %v877_v35  ;;  %v889_v52 = vunpack.i.l.bf16 %v887_v46 }
  0xc5   :  { %v12820_v23 = vmax.f32 %v830_v59, %v831_v40  ;;  %v855_v55 = vrot.slane %v854_v43, 2  ;;  %v890_v56 = vunpack.i.h.bf16 %v887_v46  ;;  %v900_v57 = vsel %vm364_vm0, %v149_v30, 4286644096 }
  0xc6   :  { %v844_v19 = vrot.slane %v843_v44, 1  ;;  %v867_v27 = vmax.f32 %v865_v8, %v866_v49  ;;  %v879_v0 = vrot.slane %v878_v47, 4  ;;  %v902_v2 = vunpack.i.l.bf16 %v900_v57  ;;  %v154_v49 = vld [vmem:[#allocation4 + $0x2e] sm:$0x1] }
  0xc7   :  { %v833_v3 = vpack.i.bf16 %v12820_v23, %v12820_v23  ;;  %v856_v50 = vmax.f32 %v854_v43, %v855_v55  ;;  %v891_v6 = vmax.f32 %v889_v52, %v890_v56  ;;  %v903_v60 = vunpack.i.h.bf16 %v900_v57 }
  0xc8   :  { %v6056_v10 = vld [vmem:[#allocation3 + $0x2c] sm:$0xff]  ;;  %v12825_v12 = vmax.f32 %v843_v44, %v844_v19  ;;  %v868_v54 = vrot.slane %v867_v27, 2  ;;  %v880_v51 = vmax.f32 %v878_v47, %v879_v0  ;;  %v913_v16 = vsel %vm364_vm0, %v150_v14, 4286644096 }
  0xc9   :  { %v12141_v11 = vld [vmem:[#allocation3 + $0xc] ss:$36 sps:$4 sm:$0xff]   ;;  %v11103_v61 = vcombine.low %v6051_v31, %v6056_v10  ;;  %v857_v41 = vrot.slane %v856_v50, 1  ;;  %v892_v38 = vrot.slane %v891_v6, 4  ;;  %v904_v24 = vmax.f32 %v902_v2, %v903_v60 }
  0xca   :  { %7210 = vmatprep.mubr.bf16.mxu1 %v12141_v11  ;;  %v846_v26 = vpack.i.bf16 %v12825_v12, %v12825_v12  ;;  %v869_v28 = vmax.f32 %v867_v27, %v868_v54  ;;  %v881_v29 = vrot.slane %v880_v51, 2  ;;  %v915_v15 = vunpack.i.l.bf16 %v913_v16  ;;  %v155_v47 = vld [vmem:[#allocation4 + $0x2f] sm:$0x1] }
  0xcb   :  { %7211 = vmatmul.mubr.bf16.vlgmr.msra.gmra.mxu1 %v11103_v61  ;;  %v12831_v36 = vmax.f32 %v856_v50, %v857_v41  ;;  %v893_v58 = vmax.f32 %v891_v6, %v892_v38  ;;  %v905_v4 = vrot.slane %v904_v24, 4  ;;  %v916_v18 = vunpack.i.h.bf16 %v913_v16 }
  0xcc   :  { %v870_v53 = vrot.slane %v869_v28, 1  ;;  %v882_v30 = vmax.f32 %v880_v51, %v881_v29  ;;  %v926_v59 = vsel %vm364_vm0, %v151_v5, 4286644096  ;;  %v939_v32 = vsel %vm364_vm0, %v152_v20, 4286644096 }
  0xcd   :  { %v859_v1 = vpack.i.bf16 %v12831_v36, %v12831_v36  ;;  %v894_v8 = vrot.slane %v893_v58, 2  ;;  %v906_v34 = vmax.f32 %v904_v24, %v905_v4  ;;  %v917_v35 = vmax.f32 %v915_v15, %v916_v18 }
  0xce   :  { %v12837_v40 = vmax.f32 %v869_v28, %v870_v53  ;;  %v883_v43 = vrot.slane %v882_v30, 1  ;;  %v928_v46 = vunpack.i.l.bf16 %v926_v59  ;;  %v929_v44 = vunpack.i.h.bf16 %v926_v59 }
  0xcf   :  { %v895_v52 = vmax.f32 %v893_v58, %v894_v8  ;;  %v907_v14 = vrot.slane %v906_v34, 2  ;;  %v918_v55 = vrot.slane %v917_v35, 4  ;;  %v941_v56 = vunpack.i.l.bf16 %v939_v32 }
  0xd0   :  { %v872_v57 = vpack.i.bf16 %v12837_v40, %v12837_v40  ;;  %v12841_v31 = vmax.f32 %v882_v30, %v883_v43  ;;  %v930_v19 = vmax.f32 %v928_v46, %v929_v44  ;;  %v942_v27 = vunpack.i.h.bf16 %v939_v32 }
  0xd1   :  { %v896_v0 = vrot.slane %v895_v52, 1  ;;  %v908_v2 = vmax.f32 %v906_v34, %v907_v14  ;;  %v919_v50 = vmax.f32 %v917_v35, %v918_v55  ;;  %v952_v6 = vsel %vm364_vm0, %v153_v33, 4286644096 }
  0xd2   :  { %v885_v60 = vpack.i.bf16 %v12841_v31, %v12841_v31  ;;  %v931_v10 = vrot.slane %v930_v19, 4  ;;  %v943_v11 = vmax.f32 %v941_v56, %v942_v27  ;;  %v954_v54 = vunpack.i.l.bf16 %v952_v6 }
  0xd3   :  { %v897_v51 = vmax.f32 %v895_v52, %v896_v0  ;;  %v909_v16 = vrot.slane %v908_v2, 1  ;;  %v920_v61 = vrot.slane %v919_v50, 2  ;;  %v955_v5 = vunpack.i.h.bf16 %v952_v6 }
  0xd4   :  { %v932_v20 = vmax.f32 %v930_v19, %v931_v10  ;;  %v944_v41 = vrot.slane %v943_v11, 4  ;;  %v965_v38 = vsel %vm364_vm0, %v154_v49, 4286644096  ;;  %v978_v24 = vsel %vm364_vm0, %v155_v47, 4286644096 }
  0xd5   :  { %v898_v28 = vpack.i.bf16 %v897_v51, %v897_v51  ;;  %v910_v29 = vmax.f32 %v908_v2, %v909_v16  ;;  %v921_v15 = vmax.f32 %v919_v50, %v920_v61  ;;  %v956_v58 = vmax.f32 %v954_v54, %v955_v5 }
  0xd6   :  { %v933_v4 = vrot.slane %v932_v20, 2  ;;  %v945_v18 = vmax.f32 %v943_v11, %v944_v41  ;;  %v967_v53 = vunpack.i.l.bf16 %v965_v38  ;;  %v968_v30 = vunpack.i.h.bf16 %v965_v38  ;;  %v4516_v11 = vld [vmem:[#allocation2 + $0x14] sm:$0x1] }
  0xd7   :  { %v911_v59 = vpack.i.bf16 %v910_v29, %v910_v29  ;;  %v922_v32 = vrot.slane %v921_v15, 1  ;;  %v957_v33 = vrot.slane %v956_v58, 4  ;;  %v980_v8 = vunpack.i.l.bf16 %v978_v24 }
  0xd8   :  { %v934_v34 = vmax.f32 %v932_v20, %v933_v4  ;;  %v946_v35 = vrot.slane %v945_v18, 2  ;;  %v969_v43 = vmax.f32 %v967_v53, %v968_v30  ;;  %v981_v46 = vunpack.i.h.bf16 %v978_v24 }
  0xd9   :  { %v923_v44 = vmax.f32 %v921_v15, %v922_v32  ;;  %v958_v49 = vmax.f32 %v956_v58, %v957_v33  ;;  %v3709_v47 = vmax.bf16 %v781_v22, %v677_v7  ;;  %v3710_v52 = vmax.bf16 %v898_v28, %v794_v21 }
  0xda   :  { %v935_v14 = vrot.slane %v934_v34, 1  ;;  %v947_v55 = vmax.f32 %v945_v18, %v946_v35  ;;  %v970_v56 = vrot.slane %v969_v43, 4  ;;  %v982_v19 = vmax.f32 %v980_v8, %v981_v46  ;;  %v157_v8 = vld [vmem:[#allocation4 + $0x31] sm:$0x1] }
  0xdb   :  { %v924_v27 = vpack.i.bf16 %v923_v44, %v923_v44  ;;  %v959_v0 = vrot.slane %v958_v49, 2  ;;  %v3711_v2 = vmax.bf16 %v911_v59, %v807_v25  ;;  %v10924_v50 = vcombine.low %v3710_v52, %v3710_v52 }
  0xdc   :  { %v936_v63 = vmax.f32 %v934_v34, %v935_v14  ;;  %v948_v6 = vrot.slane %v947_v55, 1  ;;  %v971_v10 = vmax.f32 %v969_v43, %v970_v56  ;;  %v983_v13 = vrot.slane %v982_v19, 4  ;;  %v158_v56 = vld [vmem:[#allocation4 + $0x32] sm:$0x1] }
  0xdd   :  { %v960_v7 = vmax.f32 %v958_v49, %v959_v0  ;;  %v3712_v17 = vmax.bf16 %v924_v27, %v820_v39  ;;  %v10925_v22 = vcombine.low %v3711_v2, %v3711_v2  ;;  %v4222_v21 = vunpack.c.l.b16 %v10924_v50  ;;  %v156_v39 = vld [vmem:[#allocation4 + $0x30] sm:$0x1] }
  0xde   :  { %v937_v54 = vpack.i.bf16 %v936_v63, %v936_v63  ;;  %v949_v51 = vmax.f32 %v947_v55, %v948_v6  ;;  %v972_v16 = vrot.slane %v971_v10, 2  ;;  %v984_v61 = vmax.f32 %v982_v19, %v983_v13  ;;  %v159_v19 = vld [vmem:[#allocation4 + $0x33] sm:$0x1]  ;;  %v4522_v13 = vld [vmem:[#allocation2 + $0x1c] sm:$0x1] }
  0xdf   :  { %v961_v5 = vrot.slane %v960_v7, 1  ;;  %v10926_v37 = vcombine.low %v3712_v17, %v3712_v17  ;;  %v4223_v25 = vunpack.c.l.b16 %v10925_v22  ;;  %v11455_v20 = vcombine.low %v3709_v47, %v3709_v47 }
  0xe0   :  { %v950_v41 = vpack.i.bf16 %v949_v51, %v949_v51  ;;  %v973_v38 = vmax.f32 %v971_v10, %v972_v16  ;;  %v985_v24 = vrot.slane %v984_v61, 2  ;;  %v3713_v28 = vmax.bf16 %v937_v54, %v833_v3 }
  0xe1   :  { %v962_v29 = vmax.f32 %v960_v7, %v961_v5  ;;  %v4224_v15 = vunpack.c.l.b16 %v10926_v37  ;;  %v4352_v58 = vsel %vm4334_vm1, %v4223_v25, %v4222_v21  ;;  %v4517_v4 = vsel %vm12680_vm14, %v11455_v20, %v4516_v11  ;;  %v162_v5 = vld [vmem:[#allocation4 + $0x36] sm:$0x1] }
  0xe2   :  { %v974_v18 = vrot.slane %v973_v38, 1  ;;  %v986_v53 = vmax.f32 %v984_v61, %v985_v24  ;;  %v3714_v30 = vmax.bf16 %v950_v41, %v846_v26  ;;  %v10927_v59 = vcombine.low %v3713_v28, %v3713_v28  ;;  %4518 = vst [vmem:[#allocation2 + $0x14] sm:$0x1] %v4517_v4  ;;  %v161_v61 = vld [vmem:[#allocation4 + $0x35] sm:$0x1] }
  0xe3   :  { %v963_v32 = vpack.i.bf16 %v962_v29, %v962_v29  ;;  %v4353_v23 = vsel %vm4336_vm2, %v4224_v15, %v4352_v58  ;;  %v4699_v3 = vshrl.u32 %v4639_v62, 16  ;;  %v4702_v33 = vshll.u32 %v4639_v62, 16  ;;  %v4519_v24 = vld [vmem:[#allocation2 + $0x18] sm:$0xf] }
  0xe4   :  { %v975_v34 = vmax.f32 %v973_v38, %v974_v18  ;;  %v987_v35 = vrot.slane %v986_v53, 1  ;;  %v10928_v43 = vcombine.low %v3714_v30, %v3714_v30  ;;  %v4225_v46 = vunpack.c.l.b16 %v10927_v59 }
  0xe5   :  { %v3715_v44 = vmax.bf16 %v963_v32, %v859_v1  ;;  %v4701_v49 = vrot.slane %v4699_v3, 4  ;;  %v4704_v47 = vrot.slane %v4702_v33, 5  ;;  %v991_v12 = vsel %vm364_vm0, %v156_v39, 4286644096 }
  0xe6   :  { %v976_v26 = vpack.i.bf16 %v975_v34, %v975_v34  ;;  %v988_v52 = vmax.f32 %v986_v53, %v987_v35  ;;  %v4226_v14 = vunpack.c.l.b16 %v10928_v43  ;;  %v4354_v55 = vsel %vm4338_vm3, %v4225_v46, %v4353_v23 }
  0xe7   :  { %v10929_v27 = vcombine.low %v3715_v44, %v3715_v44  ;;  %v4705_v0 = vor.u32 %v4704_v47, %v4701_v49  ;;  %v993_v2 = vunpack.i.l.bf16 %v991_v12  ;;  %v994_v50 = vunpack.i.h.bf16 %v991_v12 }
  0xe8   :  { %v989_v63 = vpack.i.bf16 %v988_v52, %v988_v52  ;;  %v3716_v36 = vmax.bf16 %v976_v26, %v872_v57  ;;  %v4355_v1 = vsel %vm4340_vm4, %v4226_v14, %v4354_v55  ;;  %v1004_v6 = vsel %vm364_vm0, %v157_v8, 4286644096  ;;  %v160_v57 = vld [vmem:[#allocation4 + $0x34] sm:$0x1] }
  0xe9   :  { %v4227_v10 = vunpack.c.l.b16 %v10929_v27  ;;  %v4640_v7 = vld [vmem:[#allocation2 + $0x14] sm:$0x1]  ;;  %v4706_v17 = vrot.slane %v4705_v0, 4  ;;  %v995_v22 = vmax.f32 %v993_v2, %v994_v50  ;;  %v1006_v21 = vunpack.i.l.bf16 %v1004_v6 }
  0xea   :  { %v3717_v11 = vmax.bf16 %v989_v63, %v885_v60  ;;  %v10930_v54 = vcombine.low %v3716_v36, %v3716_v36  ;;  %v4708_v51 = vshll.u32 %v4640_v7, 16  ;;  %v1007_v16 = vunpack.i.h.bf16 %v1004_v6 }
  0xeb   :  { %v4356_v40 = vsel %vm4342_vm5, %v4227_v10, %v4355_v1  ;;  %v996_v37 = vrot.slane %v995_v22, 4  ;;  %v1017_v25 = vsel %vm364_vm0, %v158_v56, 4286644096  ;;  %v1030_v20 = vsel %vm364_vm0, %v159_v19, 4286644096 }
  0xec   :  { %v4228_v41 = vunpack.c.l.b16 %v10930_v54  ;;  %v11456_v38 = vcombine.low %v3717_v11, %v3717_v11  ;;  %v4710_v28 = vrot.slane %v4708_v51, 5  ;;  %v1008_v62 = vmax.f32 %v1006_v21, %v1007_v16  ;;  %v12901_v1 = vld [vmem:[#allocation2 + $0x10] sm:$0xe]  ;;  %v164_v11 = vld [vmem:[#allocation4 + $0x38] sm:$0x1] }
  0xed   :  { %v997_v31 = vmax.f32 %v995_v22, %v996_v37  ;;  %v1019_v60 = vunpack.i.l.bf16 %v1017_v25  ;;  %v1020_v39 = vunpack.i.h.bf16 %v1017_v25  ;;  %v1032_v29 = vunpack.i.l.bf16 %v1030_v20 }
  0xee   :  { %v4357_v15 = vsel %vm4344_vm10, %v4228_v41, %v4356_v40  ;;  %v4523_v58 = vsel %vm12680_vm14, %v11456_v38, %v4522_v13  ;;  %v4711_v4 = vsel %vm12658_vm12, %v4706_v17, %v4710_v28  ;;  %v1009_v18 = vrot.slane %v1008_v62, 4 }
  0xef   :  { %v4440_v53 = vpack.c.b16 %v4357_v15, %v4357_v15  ;;  %4524 = vst [vmem:[#allocation2 + $0x1c] sm:$0x1] %v4523_v58  ;;  %4912 = vst [vmem:[#allocation3 + $0x4c] sm:$0xf] %v4711_v4  ;;  %v998_v30 = vrot.slane %v997_v31, 2  ;;  %v1021_v59 = vmax.f32 %v1019_v60, %v1020_v39  ;;  %v1033_v32 = vunpack.i.h.bf16 %v1030_v20  ;;  %v12155_v58 = vld [vmem:[#allocation7 + $0x128] sm:$0xff]  }
  0xf0   :  { %v1010_v23 = vmax.f32 %v1008_v62, %v1009_v18  ;;  %v1043_v3 = vsel %vm364_vm0, %v160_v57, 4286644096  ;;  %v1056_v33 = vsel %vm364_vm0, %v161_v61, 4286644096  ;;  %v1069_v8 = vsel %vm364_vm0, %v162_v5, 4286644096 }
  0xf1   :  { %v4520_v34 = vsel %vm12666_vm13, %v4440_v53, %v4519_v24  ;;  %v999_v35 = vmax.f32 %v997_v31, %v998_v30  ;;  %v1022_v43 = vrot.slane %v1021_v59, 4  ;;  %v1034_v46 = vmax.f32 %v1032_v29, %v1033_v32  ;;  %v12153_v62 = vld [vmem:[#allocation7 + $0x168] sm:$0xff]   ;;  %v165_v53 = vld [vmem:[#allocation4 + $0x39] sm:$0x1] }
  0xf2   :  { %4521 = vst [vmem:[#allocation2 + $0x18] sm:$0xf] %v4520_v34  ;;  %v1011_v44 = vrot.slane %v1010_v23, 2  ;;  %v1045_v49 = vunpack.i.l.bf16 %v1043_v3  ;;  %v1046_v47 = vunpack.i.h.bf16 %v1043_v3  ;;  %v1058_v12 = vunpack.i.l.bf16 %v1056_v33  ;;  %11618 = vmatprep.subr.bf16.mxu0 %v12153_v62  ;;  %v166_v34 = vld [vmem:[#allocation4 + $0x3a] sm:$0x1] }
  0xf3   :  { %v1000_v26 = vrot.slane %v999_v35, 1  ;;  %v1023_v52 = vmax.f32 %v1021_v59, %v1022_v43  ;;  %v1035_v14 = vrot.slane %v1034_v46, 4  ;;  %v1059_v55 = vunpack.i.h.bf16 %v1056_v33  ;;  %11619 = vmatpush3.bf16.msra.mxu0 %v12155_v58 }
  0xf4   :  { %v1012_v56 = vmax.f32 %v1010_v23, %v1011_v44  ;;  %v1047_v19 = vmax.f32 %v1045_v49, %v1046_v47  ;;  %v1071_v27 = vunpack.i.l.bf16 %v1069_v8  ;;  %v1072_v0 = vunpack.i.h.bf16 %v1069_v8  ;;  %v167_v44 = vld [vmem:[#allocation4 + $0x3b] sm:$0x1]  ;;  %v168_v49 = vld [vmem:[#allocation4 + $0x3c] sm:$0x1] }
  0xf5   :  { %v12899_v2 = vmax.f32 %v999_v35, %v1000_v26  ;;  %v1024_v50 = vrot.slane %v1023_v52, 2  ;;  %v1036_v63 = vmax.f32 %v1034_v46, %v1035_v14  ;;  %v1060_v36 = vmax.f32 %v1058_v12, %v1059_v55  ;;  %v169_v55 = vld [vmem:[#allocation4 + $0x3d] sm:$0x1] }
  0xf6   :  { %v4642_v6 = vld [vmem:[#allocation2 + $0x1c] sm:$0x1]  ;;  %v1013_v10 = vrot.slane %v1012_v56, 1  ;;  %v1048_v13 = vrot.slane %v1047_v19, 4  ;;  %v1073_v7 = vmax.f32 %v1071_v27, %v1072_v0  ;;  %v11054_v40 = vrot.slane %v12901_v1, 9 }
  0xf7   :  { %v4722_v17 = vshll.u32 %v4642_v6, 16  ;;  %v1025_v22 = vmax.f32 %v1023_v52, %v1024_v50  ;;  %v1037_v21 = vrot.slane %v1036_v63, 2  ;;  %v1061_v51 = vrot.slane %v1060_v36, 4 }
  0xf8   :  { %v1049_v54 = vmax.f32 %v1047_v19, %v1048_v13  ;;  %v1074_v16 = vrot.slane %v1073_v7, 4  ;;  %v1002_v5 = vpack.i.bf16 %v12899_v2, %v12899_v2  ;;  %v12906_v37 = vmax.f32 %v1012_v56, %v1013_v10 }
  0xf9   :  { %v4606_v57 = vld [vmem:[#allocation2 + $0x18] sm:$0xf]  ;;  %v1026_v25 = vrot.slane %v1025_v22, 1  ;;  %v1038_v20 = vmax.f32 %v1036_v63, %v1037_v21  ;;  %v4724_v24 = vrot.slane %v4722_v17, 5  ;;  %v1062_v39 = vmax.f32 %v1060_v36, %v1061_v51 }
  0xfa   :  { %v4641_v61 = vld [vmem:[#allocation2 + $0x18] sm:$0xf]  ;;  %4622 = vst [vmem:[#allocation3 + $0x6c] sm:$0xf] %v4606_v57  ;;  %v1050_v28 = vrot.slane %v1049_v54, 2  ;;  %v1075_v29 = vmax.f32 %v1073_v7, %v1074_v16  ;;  %v1015_v32 = vpack.i.bf16 %v12906_v37, %v12906_v37 }
  0xfb   :  { %v4713_v41 = vshrl.u32 %v4641_v61, 16  ;;  %v4716_v38 = vshll.u32 %v4641_v61, 16  ;;  %v12908_v31 = vmax.f32 %v1025_v22, %v1026_v25  ;;  %v1039_v60 = vrot.slane %v1038_v20, 1  ;;  %v5091_v15 = vld [vmem:[#allocation2 + $0x18] sm:$0xf] }
  0xfc   :  { %v1051_v30 = vmax.f32 %v1049_v54, %v1050_v28  ;;  %v1095_v59 = vsel %vm364_vm0, %v164_v11, 4286644096  ;;  %5107 = vst [vmem:[#allocation3 + $0x54] sm:$0xf] %v5091_v15  ;;  %v1063_v3 = vrot.slane %v1062_v39, 2  ;;  %v1076_v33 = vrot.slane %v1075_v29, 2 }
  0xfd   :  { %v4715_v4 = vrot.slane %v4713_v41, 4  ;;  %v4718_v18 = vrot.slane %v4716_v38, 5  ;;  %v12913_v23 = vmax.f32 %v1038_v20, %v1039_v60  ;;  %v1097_v43 = vunpack.i.l.bf16 %v1095_v59  ;;  %v170_v61 = vld [vmem:[#allocation4 + $0x3e] sm:$0x1] }
  0xfe   :  { %v1052_v35 = vrot.slane %v1051_v30, 1  ;;  %v1098_v46 = vunpack.i.h.bf16 %v1095_v59  ;;  %v1028_v47 = vpack.i.bf16 %v12908_v31, %v12908_v31  ;;  %v1064_v12 = vmax.f32 %v1062_v39, %v1063_v3 }
  0xff   :  { %v4719_v8 = vor.u32 %v4718_v18, %v4715_v4  ;;  %v1077_v26 = vmax.f32 %v1075_v29, %v1076_v33  ;;  %v1108_v52 = vsel %vm364_vm0, %v165_v53, 4286644096  ;;  %v1121_v36 = vsel %vm364_vm0, %v166_v34, 4286644096  ;;  %v4931_v34 = vld [vmem:[#allocation2 + $0x14] sm:$0x1] }
 0x100   :  { %v12918_v56 = vmax.f32 %v1051_v30, %v1052_v35  ;;  %v1099_v19 = vmax.f32 %v1097_v43, %v1098_v46  ;;  %v1110_v27 = vunpack.i.l.bf16 %v1108_v52  ;;  %v1065_v0 = vrot.slane %v1064_v12, 1 }
 0x101   :  { %v4720_v14 = vrot.slane %v4719_v8, 4  ;;  %v1078_v50 = vrot.slane %v1077_v26, 1  ;;  %v1111_v63 = vunpack.i.h.bf16 %v1108_v52  ;;  %v1041_v10 = vpack.i.bf16 %v12913_v23, %v12913_v23  ;;  %v12146_v43 = vld [vmem:[#allocation3 + $0x48] ss:$36 sps:$4 sm:$0xff]  }
 0x102   :  { %v1100_v13 = vrot.slane %v1099_v19, 4  ;;  %v1123_v7 = vunpack.i.l.bf16 %v1121_v36  ;;  %v1054_v17 = vpack.i.bf16 %v12918_v56, %v12918_v56  ;;  %v12927_v22 = vmax.f32 %v1064_v12, %v1065_v0 }
 0x103   :  { %v4725_v6 = vsel %vm12658_vm12, %v4720_v14, %v4724_v24  ;;  %v1112_v21 = vmax.f32 %v1110_v27, %v1111_v63  ;;  %v1124_v11 = vunpack.i.h.bf16 %v1121_v36  ;;  %v1134_v51 = vsel %vm364_vm0, %v167_v44, 4286644096 }
 0x104   :  { %4913 = vst [vmem:[#allocation3 + $0x70] sm:$0xf] %v4725_v6  ;;  %v1101_v54 = vmax.f32 %v1099_v19, %v1100_v13  ;;  %v1147_v16 = vsel %vm364_vm0, %v168_v49, 4286644096  ;;  %v1160_v57 = vsel %vm364_vm0, %v169_v55, 4286644096  ;;  %v1067_v25 = vpack.i.bf16 %v12927_v22, %v12927_v22 }
 0x105   :  { %v12934_v20 = vmax.f32 %v1077_v26, %v1078_v50  ;;  %v1113_v41 = vrot.slane %v1112_v21, 4  ;;  %v1125_v38 = vmax.f32 %v1123_v7, %v1124_v11  ;;  %v1136_v28 = vunpack.i.l.bf16 %v1134_v51  ;;  %v4932_v7 = vld [vmem:[#allocation2 + $0x18] sm:$0xe] }
 0x106   :  { %v1102_v24 = vrot.slane %v1101_v54, 2  ;;  %v1137_v62 = vunpack.i.h.bf16 %v1134_v51  ;;  %v1149_v60 = vunpack.i.l.bf16 %v1147_v16  ;;  %v1150_v15 = vunpack.i.h.bf16 %v1147_v16 }
 0x107   :  { %v1114_v39 = vmax.f32 %v1112_v21, %v1113_v41  ;;  %v1126_v29 = vrot.slane %v1125_v38, 4  ;;  %v1162_v58 = vunpack.i.l.bf16 %v1160_v57  ;;  %v1163_v53 = vunpack.i.h.bf16 %v1160_v57 }
 0x108   :  { %v1103_v4 = vmax.f32 %v1101_v54, %v1102_v24  ;;  %v1138_v18 = vmax.f32 %v1136_v28, %v1137_v62  ;;  %v1173_v30 = vsel %vm364_vm0, %v170_v61, 4286644096  ;;  %v1151_v33 = vmax.f32 %v1149_v60, %v1150_v15 }
 0x109   :  { %v1115_v59 = vrot.slane %v1114_v39, 2  ;;  %v1127_v3 = vmax.f32 %v1125_v38, %v1126_v29  ;;  %v1175_v8 = vunpack.i.l.bf16 %v1173_v30  ;;  %v1080_v46 = vpack.i.bf16 %v12934_v20, %v12934_v20  ;;  %v4933_v38 = vld [vmem:[#allocation2 + $0x1c] sm:$0x1] }
 0x10a   :  { %v1104_v44 = vrot.slane %v1103_v4, 1  ;;  %v1164_v49 = vmax.f32 %v1162_v58, %v1163_v53  ;;  %v1176_v12 = vunpack.i.h.bf16 %v1173_v30  ;;  %v1139_v14 = vrot.slane %v1138_v18, 4 }
 0x10b   :  { %v12143_v35 = vld [vmem:[#allocation3 + $0x4c] ss:$36 sps:$4 sm:$0xff]   ;;  %v1116_v26 = vmax.f32 %v1114_v39, %v1115_v59  ;;  %v1128_v52 = vrot.slane %v1127_v3, 2  ;;  %v1152_v55 = vrot.slane %v1151_v33, 4  ;;  %v5003_v50 = vrot.slane %v4931_v34, 5 }
 0x10c   :  { %7121 = vmatprep.mubr.bf16.mxu0 %v12143_v35  ;;  %v1105_v19 = vmax.f32 %v1103_v4, %v1104_v44  ;;  %v1165_v27 = vrot.slane %v1164_v49, 4  ;;  %v1177_v0 = vmax.f32 %v1175_v8, %v1176_v12  ;;  %v1140_v6 = vmax.f32 %v1138_v18, %v1139_v14  ;;  %v171_v8 = vld [vmem:[#allocation4 + $0x3f] sm:$0x1] }
 0x10d   :  { %7122 = vmatmul.mubr.bf16.gmra.mxu0 %v12146_v43  ;;  %v1117_v63 = vrot.slane %v1116_v26, 1  ;;  %v1129_v36 = vmax.f32 %v1127_v3, %v1128_v52  ;;  %v1153_v13 = vmax.f32 %v1151_v33, %v1152_v55  ;;  %v5004_v51 = vsel %vm12746_vm7, %v11054_v40, %v5003_v50  ;;  %v163_v33 = vld [vmem:[#allocation4 + $0x37] sm:$0x1] }
 0x10e   :  { %v1106_v21 = vpack.i.bf16 %v1105_v19, %v1105_v19  ;;  %v1166_v11 = vmax.f32 %v1164_v49, %v1165_v27  ;;  %v1178_v54 = vrot.slane %v1177_v0, 4  ;;  %v1141_v61 = vrot.slane %v1140_v6, 2  ;;  %5075 = vst [vmem:[#allocation3 + $0x50] sm:$0xf] %v5004_v51 }
 0x10f   :  { %v1118_v16 = vmax.f32 %v1116_v26, %v1117_v63  ;;  %v1130_v57 = vrot.slane %v1129_v36, 1  ;;  %v1154_v41 = vrot.slane %v1153_v13, 2  ;;  %v11055_v60 = vrot.slane %v4932_v7, 9  ;;  %v172_v7 = vld [vmem:[#allocation4 + $0x40] sm:$0x1] }
 0x110   :  { %v1167_v24 = vrot.slane %v1166_v11, 2  ;;  %v1179_v28 = vmax.f32 %v1177_v0, %v1178_v54  ;;  %v3718_v62 = vmax.bf16 %v1106_v21, %v1002_v5  ;;  %v1142_v15 = vmax.f32 %v1140_v6, %v1141_v61 }
 0x111   :  { %v1119_v39 = vpack.i.bf16 %v1118_v16, %v1118_v16  ;;  %v1131_v29 = vmax.f32 %v1129_v36, %v1130_v57  ;;  %v1155_v1 = vmax.f32 %v1153_v13, %v1154_v41  ;;  %v5007_v18 = vrot.slane %v4933_v38, 5  ;;  %v174_v41 = vld [vmem:[#allocation4 + $0x42] sm:$0x1] }
 0x112   :  { %v1168_v58 = vmax.f32 %v1166_v11, %v1167_v24  ;;  %v1180_v4 = vrot.slane %v1179_v28, 2  ;;  %v10932_v40 = vcombine.low %v3718_v62, %v3718_v62  ;;  %v1143_v30 = vrot.slane %v1142_v15, 1 }
 0x113   :  { %v1132_v53 = vpack.i.bf16 %v1131_v29, %v1131_v29  ;;  %v1156_v59 = vrot.slane %v1155_v1, 1  ;;  %v3719_v3 = vmax.bf16 %v1119_v39, %v1015_v32  ;;  %v5008_v35 = vsel %vm12746_vm7, %v11055_v60, %v5007_v18 }
 0x114   :  { %v1169_v2 = vrot.slane %v1168_v58, 1  ;;  %v1181_v5 = vmax.f32 %v1179_v28, %v1180_v4  ;;  %v4230_v34 = vunpack.c.l.b16 %v10932_v40  ;;  %v1144_v43 = vmax.f32 %v1142_v15, %v1143_v30  ;;  %5076 = vst [vmem:[#allocation3 + $0x74] sm:$0xf] %v5008_v35 }
 0x115   :  { %v1157_v44 = vmax.f32 %v1155_v1, %v1156_v59  ;;  %v3720_v49 = vmax.bf16 %v1132_v53, %v1028_v47  ;;  %v10933_v12 = vcombine.low %v3719_v3, %v3719_v3  ;;  %v1082_v37 = vsel %vm364_vm0, %v163_v33, 4286644096  ;;  %v175_v59 = vld [vmem:[#allocation4 + $0x43] sm:$0x1]  ;;  %v176_v3 = vld [vmem:[#allocation4 + $0x44] sm:$0x1] }
 0x116   :  { %v1170_v26 = vmax.f32 %v1168_v58, %v1169_v2  ;;  %v1182_v52 = vrot.slane %v1181_v5, 1  ;;  %v1186_v32 = vsel %vm364_vm0, %v171_v8, 4286644096  ;;  %v1145_v14 = vpack.i.bf16 %v1144_v43, %v1144_v43 }
 0x117   :  { %v1158_v55 = vpack.i.bf16 %v1157_v44, %v1157_v44  ;;  %v10934_v19 = vcombine.low %v3720_v49, %v3720_v49  ;;  %v4231_v27 = vunpack.c.l.b16 %v10933_v12  ;;  %v1084_v63 = vunpack.i.l.bf16 %v1082_v37 }
 0x118   :  { %v1171_v0 = vpack.i.bf16 %v1170_v26, %v1170_v26  ;;  %v1183_v50 = vmax.f32 %v1181_v5, %v1182_v52  ;;  %v1085_v36 = vunpack.i.h.bf16 %v1082_v37  ;;  %v3721_v31 = vmax.bf16 %v1145_v14, %v1041_v10  ;;  %v173_v10 = vld [vmem:[#allocation4 + $0x41] sm:$0x1] }
 0x119   :  { %v3722_v47 = vmax.bf16 %v1158_v55, %v1054_v17  ;;  %v4232_v6 = vunpack.c.l.b16 %v10934_v19  ;;  %v4358_v13 = vsel %vm4334_vm1, %v4231_v27, %v4230_v34  ;;  %v1188_v51 = vunpack.i.l.bf16 %v1186_v32  ;;  %v4525_v34 = vld [vmem:[#allocation2 + $0x20] sm:$0xf] }
 0x11a   :  { %v1184_v21 = vpack.i.bf16 %v1183_v50, %v1183_v50  ;;  %v3723_v11 = vmax.bf16 %v1171_v0, %v1067_v25  ;;  %v1086_v54 = vmax.f32 %v1084_v63, %v1085_v36  ;;  %v10935_v16 = vcombine.low %v3721_v31, %v3721_v31  ;;  %v177_v63 = vld [vmem:[#allocation4 + $0x45] sm:$0x1] }
 0x11b   :  { %v10936_v57 = vcombine.low %v3722_v47, %v3722_v47  ;;  %v4359_v23 = vsel %vm4336_vm2, %v4232_v6, %v4358_v13  ;;  %v1189_v61 = vunpack.i.h.bf16 %v1186_v32  ;;  %v1199_v24 = vsel %vm364_vm0, %v172_v7, 4286644096 }
 0x11c   :  { %v3724_v56 = vmax.bf16 %v1184_v21, %v1080_v46  ;;  %v10937_v17 = vcombine.low %v3723_v11, %v3723_v11  ;;  %v1087_v38 = vrot.slane %v1086_v54, 4  ;;  %v4233_v28 = vunpack.c.l.b16 %v10935_v16 }
 0x11d   :  { %v4234_v22 = vunpack.c.l.b16 %v10936_v57  ;;  %v1190_v25 = vmax.f32 %v1188_v51, %v1189_v61  ;;  %v1201_v62 = vunpack.i.l.bf16 %v1199_v24  ;;  %v1202_v15 = vunpack.i.h.bf16 %v1199_v24  ;;  %v178_v57 = vld [vmem:[#allocation4 + $0x46] sm:$0x1] }
 0x11e   :  { %v10938_v60 = vcombine.low %v3724_v56, %v3724_v56  ;;  %v4235_v39 = vunpack.c.l.b16 %v10937_v17  ;;  %v1088_v29 = vmax.f32 %v1086_v54, %v1087_v38  ;;  %v4360_v1 = vsel %vm4338_vm3, %v4233_v28, %v4359_v23 }
 0x11f   :  { %v1191_v58 = vrot.slane %v1190_v25, 4  ;;  %v1212_v4 = vsel %vm364_vm0, %v173_v10, 4286644096  ;;  %v1225_v20 = vsel %vm364_vm0, %v174_v41, 4286644096  ;;  %v4361_v40 = vsel %vm4340_vm4, %v4234_v22, %v4360_v1 }
 0x120   :  { %v4236_v46 = vunpack.c.l.b16 %v10938_v60  ;;  %v1089_v18 = vrot.slane %v1088_v29, 2  ;;  %v1203_v53 = vmax.f32 %v1201_v62, %v1202_v15  ;;  %v4362_v30 = vsel %vm4342_vm5, %v4235_v39, %v4361_v40  ;;  %v179_v60 = vld [vmem:[#allocation4 + $0x47] sm:$0x1] }
 0x121   :  { %v1192_v33 = vmax.f32 %v1190_v25, %v1191_v58  ;;  %v1214_v8 = vunpack.i.l.bf16 %v1212_v4  ;;  %v1215_v2 = vunpack.i.h.bf16 %v1212_v4  ;;  %v1227_v44 = vunpack.i.l.bf16 %v1225_v20 }
 0x122   :  { %v4363_v5 = vsel %vm4344_vm10, %v4236_v46, %v4362_v30  ;;  %v1090_v35 = vmax.f32 %v1088_v29, %v1089_v18  ;;  %v1204_v43 = vrot.slane %v1203_v53, 4  ;;  %v1228_v52 = vunpack.i.h.bf16 %v1225_v20 }
 0x123   :  { %v4442_v49 = vpack.c.b16 %v4363_v5, %v4363_v5  ;;  %v1193_v12 = vrot.slane %v1192_v33, 2  ;;  %v1216_v26 = vmax.f32 %v1214_v8, %v1215_v2  ;;  %v1238_v14 = vsel %vm364_vm0, %v175_v59, 4286644096 }
 0x124   :  { %v1091_v37 = vrot.slane %v1090_v35, 1  ;;  %v1205_v32 = vmax.f32 %v1203_v53, %v1204_v43  ;;  %v1251_v55 = vsel %vm364_vm0, %v176_v3, 4286644096  ;;  %v1229_v50 = vmax.f32 %v1227_v44, %v1228_v52 }
 0x125   :  { %v4526_v19 = vsel %vm12666_vm13, %v4442_v49, %v4525_v34  ;;  %v1194_v27 = vmax.f32 %v1192_v33, %v1193_v12  ;;  %v1217_v0 = vrot.slane %v1216_v26, 4  ;;  %v1240_v47 = vunpack.i.l.bf16 %v1238_v14  ;;  %v180_v33 = vld [vmem:[#allocation4 + $0x48] sm:$0x1] }
 0x126   :  { %4527 = vst [vmem:[#allocation2 + $0x20] sm:$0xf] %v4526_v19  ;;  %v12981_v36 = vmax.f32 %v1090_v35, %v1091_v37  ;;  %v1206_v31 = vrot.slane %v1205_v32, 2  ;;  %v1241_v6 = vunpack.i.h.bf16 %v1238_v14  ;;  %v1230_v21 = vrot.slane %v1229_v50, 4 }
 0x127   :  { %v1195_v13 = vrot.slane %v1194_v27, 1  ;;  %v1218_v7 = vmax.f32 %v1216_v26, %v1217_v0  ;;  %v1253_v11 = vunpack.i.l.bf16 %v1251_v55  ;;  %v1254_v16 = vunpack.i.h.bf16 %v1251_v55 }
 0x128   :  { %v1207_v54 = vmax.f32 %v1205_v32, %v1206_v31  ;;  %v1242_v51 = vmax.f32 %v1240_v47, %v1241_v6  ;;  %v1231_v61 = vmax.f32 %v1229_v50, %v1230_v21  ;;  %v1264_v56 = vsel %vm364_vm0, %v177_v63, 4286644096  ;;  %v182_v31 = vld [vmem:[#allocation4 + $0x4a] sm:$0x1] }
 0x129   :  { %v1196_v23 = vmax.f32 %v1194_v27, %v1195_v13  ;;  %v1219_v10 = vrot.slane %v1218_v7, 2  ;;  %v1255_v38 = vmax.f32 %v1253_v11, %v1254_v16  ;;  %v1266_v24 = vunpack.i.l.bf16 %v1264_v56  ;;  %v12150_v11 = vld [vmem:[#allocation3 + $0x50] ss:$36 sps:$4 sm:$0xff]  }
 0x12a   :  { %v1208_v17 = vrot.slane %v1207_v54, 1  ;;  %v1243_v41 = vrot.slane %v1242_v51, 4  ;;  %v1093_v28 = vpack.i.bf16 %v12981_v36, %v12981_v36  ;;  %v1232_v25 = vrot.slane %v1231_v61, 2  ;;  %v181_v36 = vld [vmem:[#allocation4 + $0x49] sm:$0x1] }
 0x12b   :  { %v1220_v22 = vmax.f32 %v1218_v7, %v1219_v10  ;;  %v1267_v62 = vunpack.i.h.bf16 %v1264_v56  ;;  %v1256_v15 = vrot.slane %v1255_v38, 4  ;;  %v1277_v1 = vsel %vm364_vm0, %v178_v57, 4286644096 }
 0x12c   :  { %v12986_v39 = vmax.f32 %v1207_v54, %v1208_v17  ;;  %v1244_v29 = vmax.f32 %v1242_v51, %v1243_v41  ;;  %v1233_v20 = vmax.f32 %v1231_v61, %v1232_v25  ;;  %v1279_v40 = vunpack.i.l.bf16 %v1277_v1 }
 0x12d   :  { %v5092_v58 = vld [vmem:[#allocation2 + $0x20] sm:$0xf]  ;;  %v1221_v4 = vrot.slane %v1220_v22, 1  ;;  %v1268_v46 = vmax.f32 %v1266_v24, %v1267_v62  ;;  %v1197_v53 = vpack.i.bf16 %v1196_v23, %v1196_v23  ;;  %v1257_v59 = vmax.f32 %v1255_v38, %v1256_v15  ;;  %v183_v23 = vld [vmem:[#allocation4 + $0x4b] sm:$0x1] }
 0x12e   :  { %v4607_v18 = vld [vmem:[#allocation2 + $0x20] sm:$0xf]  ;;  %5108 = vst [vmem:[#allocation3 + $0x78] sm:$0xf] %v5092_v58  ;;  %v1245_v30 = vrot.slane %v1244_v29, 2  ;;  %v1280_v3 = vunpack.i.h.bf16 %v1277_v1  ;;  %v1234_v2 = vrot.slane %v1233_v20, 1  ;;  %v1210_v12 = vpack.i.bf16 %v12986_v39, %v12986_v39 }
 0x12f   :  { %4623 = vst [vmem:[#allocation3 + $0x90] sm:$0xf] %v4607_v18  ;;  %v12989_v8 = vmax.f32 %v1220_v22, %v1221_v4  ;;  %v1269_v5 = vrot.slane %v1268_v46, 4  ;;  %v1290_v34 = vsel %vm364_vm0, %v179_v60, 4286644096  ;;  %v1258_v43 = vrot.slane %v1257_v59, 2 }
 0x130   :  { %v1246_v35 = vmax.f32 %v1244_v29, %v1245_v30  ;;  %v1281_v44 = vmax.f32 %v1279_v40, %v1280_v3  ;;  %v1292_v49 = vunpack.i.l.bf16 %v1290_v34  ;;  %v12994_v26 = vmax.f32 %v1233_v20, %v1234_v2  ;;  %v184_v29 = vld [vmem:[#allocation4 + $0x4c] sm:$0x1]  ;;  %v185_v20 = vld [vmem:[#allocation4 + $0x4d] sm:$0x1] }
 0x131   :  { %v1270_v52 = vmax.f32 %v1268_v46, %v1269_v5  ;;  %v1293_v37 = vunpack.i.h.bf16 %v1290_v34  ;;  %v1259_v14 = vmax.f32 %v1257_v59, %v1258_v43  ;;  %v1303_v19 = vsel %vm364_vm0, %v180_v33, 4286644096 }
 0x132   :  { %v1247_v32 = vrot.slane %v1246_v35, 1  ;;  %v1282_v55 = vrot.slane %v1281_v44, 4  ;;  %v1223_v27 = vpack.i.bf16 %v12989_v8, %v12989_v8  ;;  %v1305_v63 = vunpack.i.l.bf16 %v1303_v19 }
 0x133   :  { %v1271_v0 = vrot.slane %v1270_v52, 2  ;;  %v1294_v50 = vmax.f32 %v1292_v49, %v1293_v37  ;;  %v1260_v6 = vrot.slane %v1259_v14, 1  ;;  %v1306_v7 = vunpack.i.h.bf16 %v1303_v19  ;;  %v186_v19 = vld [vmem:[#allocation4 + $0x4e] sm:$0x1] }
 0x134   :  { %v12999_v47 = vmax.f32 %v1246_v35, %v1247_v32  ;;  %v1283_v13 = vmax.f32 %v1281_v44, %v1282_v55  ;;  %v1236_v54 = vpack.i.bf16 %v12994_v26, %v12994_v26  ;;  %v13003_v57 = vmax.bf16 %v1197_v53, %v1093_v28 }
 0x135   :  { %v12148_v21 = vld [vmem:[#allocation3 + $0x54] ss:$36 sps:$4 sm:$0xff]   ;;  %v1272_v51 = vmax.f32 %v1270_v52, %v1271_v0  ;;  %v1295_v16 = vrot.slane %v1294_v50, 4  ;;  %v13007_v61 = vmax.f32 %v1259_v14, %v1260_v6  ;;  %v1307_v17 = vmax.f32 %v1305_v63, %v1306_v7 }
 0x136   :  { %v1249_v10 = vpack.i.bf16 %v12999_v47, %v12999_v47  ;;  %v1284_v56 = vrot.slane %v1283_v13, 2  ;;  %7218 = vmatprep.mubr.bf16.mxu1 %v12148_v21  ;;  %v1316_v24 = vsel %vm364_vm0, %v181_v36, 4286644096  ;;  %v1329_v22 = vsel %vm364_vm0, %v182_v31, 4286644096 }
 0x137   :  { %v1273_v41 = vrot.slane %v1272_v51, 1  ;;  %v1296_v38 = vmax.f32 %v1294_v50, %v1295_v16  ;;  %7219 = vmatmul.mubr.bf16.gmra.mxu1 %v12150_v11  ;;  %v1262_v28 = vpack.i.bf16 %v13007_v61, %v13007_v61  ;;  %v1308_v62 = vrot.slane %v1307_v17, 4 }
 0x138   :  { %v1285_v25 = vmax.f32 %v1283_v13, %v1284_v56  ;;  %v1318_v60 = vunpack.i.l.bf16 %v1316_v24  ;;  %v1319_v58 = vunpack.i.h.bf16 %v1316_v24  ;;  %v1331_v4 = vunpack.i.l.bf16 %v1329_v22 }
 0x139   :  { %v13013_v15 = vmax.f32 %v1272_v51, %v1273_v41  ;;  %v1297_v1 = vrot.slane %v1296_v38, 2  ;;  %v1309_v40 = vmax.f32 %v1307_v17, %v1308_v62  ;;  %v1332_v18 = vunpack.i.h.bf16 %v1329_v22 }
 0x13a   :  { %v1286_v46 = vrot.slane %v1285_v25, 1  ;;  %v1342_v53 = vsel %vm364_vm0, %v183_v23, 4286644096  ;;  %v1320_v3 = vmax.f32 %v1318_v60, %v1319_v58  ;;  %v1355_v49 = vsel %vm364_vm0, %v184_v29, 4286644096 }
 0x13b   :  { %v1275_v30 = vpack.i.bf16 %v13013_v15, %v13013_v15  ;;  %v1298_v59 = vmax.f32 %v1296_v38, %v1297_v1  ;;  %v1344_v33 = vunpack.i.l.bf16 %v1342_v53  ;;  %v1310_v5 = vrot.slane %v1309_v40, 2  ;;  %v187_v23 = vld [vmem:[#allocation4 + $0x4f] sm:$0x1] }
 0x13c   :  { %v13018_v2 = vmax.f32 %v1285_v25, %v1286_v46  ;;  %v1333_v34 = vmax.f32 %v1331_v4, %v1332_v18  ;;  %v1345_v35 = vunpack.i.h.bf16 %v1342_v53  ;;  %v1321_v44 = vrot.slane %v1320_v3, 4 }
 0x13d   :  { %v1299_v43 = vrot.slane %v1298_v59, 1  ;;  %v1368_v52 = vsel %vm364_vm0, %v185_v20, 4286644096  ;;  %v1311_v32 = vmax.f32 %v1309_v40, %v1310_v5  ;;  %v1357_v63 = vunpack.i.l.bf16 %v1355_v49 }
 0x13e   :  { %v1288_v37 = vpack.i.bf16 %v13018_v2, %v13018_v2  ;;  %v1334_v14 = vrot.slane %v1333_v34, 4  ;;  %v1346_v55 = vmax.f32 %v1344_v33, %v1345_v35  ;;  %v1322_v50 = vmax.f32 %v1320_v3, %v1321_v44 }
 0x13f   :  { %v13024_v0 = vmax.f32 %v1298_v59, %v1299_v43  ;;  %v1358_v36 = vunpack.i.h.bf16 %v1355_v49  ;;  %v1312_v31 = vrot.slane %v1311_v32, 1  ;;  %v1370_v7 = vunpack.i.l.bf16 %v1368_v52 }
 0x140   :  { %v1335_v6 = vmax.f32 %v1333_v34, %v1334_v14  ;;  %v1347_v13 = vrot.slane %v1346_v55, 4  ;;  %v1323_v11 = vrot.slane %v1322_v50, 2  ;;  %v1371_v16 = vunpack.i.h.bf16 %v1368_v52 }
 0x141   :  { %v1301_v21 = vpack.i.bf16 %v13024_v0, %v13024_v0  ;;  %v1359_v51 = vmax.f32 %v1357_v63, %v1358_v36  ;;  %v1313_v56 = vmax.f32 %v1311_v32, %v1312_v31  ;;  %v1381_v38 = vsel %vm364_vm0, %v186_v19, 4286644096 }
 0x142   :  { %v1336_v17 = vrot.slane %v1335_v6, 2  ;;  %v1348_v41 = vmax.f32 %v1346_v55, %v1347_v13  ;;  %v1324_v24 = vmax.f32 %v1322_v50, %v1323_v11  ;;  %v1372_v25 = vmax.f32 %v1370_v7, %v1371_v16 }
 0x143   :  { %v1360_v22 = vrot.slane %v1359_v51, 4  ;;  %v1383_v62 = vunpack.i.l.bf16 %v1381_v38  ;;  %v1314_v60 = vpack.i.bf16 %v1313_v56, %v1313_v56  ;;  %v1384_v58 = vunpack.i.h.bf16 %v1381_v38  ;;  %v4528_v38 = vld [vmem:[#allocation2 + $0x24] sm:$0x1] }
 0x144   :  { %v1337_v29 = vmax.f32 %v1335_v6, %v1336_v17  ;;  %v1349_v1 = vrot.slane %v1348_v41, 2  ;;  %v1325_v4 = vrot.slane %v1324_v24, 1  ;;  %v1373_v46 = vrot.slane %v1372_v25, 4 }
 0x145   :  { %v1361_v20 = vmax.f32 %v1359_v51, %v1360_v22  ;;  %v1394_v40 = vsel %vm364_vm0, %v187_v23, 4286644096  ;;  %v1385_v59 = vmax.f32 %v1383_v62, %v1384_v58  ;;  %v3726_v52 = vmax.bf16 %v1314_v60, %v1210_v12 }
 0x146   :  { %v1338_v18 = vrot.slane %v1337_v29, 1  ;;  %v1350_v53 = vmax.f32 %v1348_v41, %v1349_v1  ;;  %v1396_v3 = vunpack.i.l.bf16 %v1394_v40  ;;  %v1326_v33 = vmax.f32 %v1324_v24, %v1325_v4 }
 0x147   :  { %v1362_v5 = vrot.slane %v1361_v20, 2  ;;  %v1374_v34 = vmax.f32 %v1372_v25, %v1373_v46  ;;  %v1397_v35 = vunpack.i.h.bf16 %v1394_v40  ;;  %v1386_v49 = vrot.slane %v1385_v59, 4 }
 0x148   :  { %v1339_v43 = vmax.f32 %v1337_v29, %v1338_v18  ;;  %v1351_v44 = vrot.slane %v1350_v53, 1  ;;  %v1327_v32 = vpack.i.bf16 %v1326_v33, %v1326_v33  ;;  %v10940_v31 = vcombine.low %v3726_v52, %v3726_v52 }
 0x149   :  { %v1363_v14 = vmax.f32 %v1361_v20, %v1362_v5  ;;  %v1375_v55 = vrot.slane %v1374_v34, 2  ;;  %v1398_v19 = vmax.f32 %v1396_v3, %v1397_v35  ;;  %v1387_v36 = vmax.f32 %v1385_v59, %v1386_v49  ;;  %v189_v35 = vld [vmem:[#allocation4 + $0x51] sm:$0x1] }
 0x14a   :  { %v1340_v50 = vpack.i.bf16 %v1339_v43, %v1339_v43  ;;  %v1352_v63 = vmax.f32 %v1350_v53, %v1351_v44  ;;  %v3727_v11 = vmax.bf16 %v1327_v32, %v1223_v27  ;;  %v4238_v12 = vunpack.c.l.b16 %v10940_v31 }
 0x14b   :  { %v1364_v6 = vrot.slane %v1363_v14, 1  ;;  %v1376_v13 = vmax.f32 %v1374_v34, %v1375_v55  ;;  %v1399_v7 = vrot.slane %v1398_v19, 4  ;;  %v1388_v16 = vrot.slane %v1387_v36, 2 }
 0x14c   :  { %v1353_v51 = vpack.i.bf16 %v1352_v63, %v1352_v63  ;;  %v3728_v39 = vmax.bf16 %v1340_v50, %v1236_v54  ;;  %v10941_v41 = vcombine.low %v3727_v11, %v3727_v11  ;;  %v11457_v8 = vcombine.low %v13003_v57, %v13003_v57  ;;  %v4643_v54 = vld [vmem:[#allocation2 + $0x20] sm:$0xf]  ;;  %v188_v57 = vld [vmem:[#allocation4 + $0x50] sm:$0x1] }
 0x14d   :  { %v1365_v23 = vmax.f32 %v1363_v14, %v1364_v6  ;;  %v1377_v56 = vrot.slane %v1376_v13, 1  ;;  %v1400_v17 = vmax.f32 %v1398_v19, %v1399_v7  ;;  %v1389_v24 = vmax.f32 %v1387_v36, %v1388_v16  ;;  %v190_v6 = vld [vmem:[#allocation4 + $0x52] sm:$0x1] }
 0x14e   :  { %v3729_v22 = vmax.bf16 %v1353_v51, %v1249_v10  ;;  %v10942_v25 = vcombine.low %v3728_v39, %v3728_v39  ;;  %v4239_v26 = vunpack.c.l.b16 %v10941_v41  ;;  %v4529_v4 = vsel %vm12680_vm14, %v11457_v8, %v4528_v38  ;;  %v192_v8 = vld [vmem:[#allocation4 + $0x54] sm:$0x1] }
 0x14f   :  { %v1366_v27 = vpack.i.bf16 %v1365_v23, %v1365_v23  ;;  %v1378_v62 = vmax.f32 %v1376_v13, %v1377_v56  ;;  %v1401_v60 = vrot.slane %v1400_v17, 2  ;;  %v1390_v29 = vrot.slane %v1389_v24, 1  ;;  %4530 = vst [vmem:[#allocation2 + $0x24] sm:$0x1] %v4529_v4  ;;  %v191_v23 = vld [vmem:[#allocation4 + $0x53] sm:$0x1] }
 0x150   :  { %v10943_v1 = vcombine.low %v3729_v22, %v3729_v22  ;;  %v4240_v58 = vunpack.c.l.b16 %v10942_v25  ;;  %v4364_v10 = vsel %vm4334_vm1, %v4239_v26, %v4238_v12  ;;  %v4727_v59 = vshrl.u32 %v4643_v54, 16 }
 0x151   :  { %v1379_v20 = vpack.i.bf16 %v1378_v62, %v1378_v62  ;;  %v1402_v46 = vmax.f32 %v1400_v17, %v1401_v60  ;;  %v3730_v47 = vmax.bf16 %v1366_v27, %v1262_v28  ;;  %v1391_v40 = vmax.f32 %v1389_v24, %v1390_v29  ;;  %v4534_v17 = vld [vmem:[#allocation2 + $0x2c] sm:$0x1]  ;;  %v193_v27 = vld [vmem:[#allocation4 + $0x55] sm:$0x1] }
 0x152   :  { %v4241_v18 = vunpack.c.l.b16 %v10943_v1  ;;  %v4365_v53 = vsel %vm4336_vm2, %v4240_v58, %v4364_v10  ;;  %v4730_v34 = vshll.u32 %v4643_v54, 16  ;;  %v4729_v28 = vrot.slane %v4727_v59, 4 }
 0x153   :  { %v1403_v3 = vrot.slane %v1402_v46, 1  ;;  %v3731_v33 = vmax.bf16 %v1379_v20, %v1275_v30  ;;  %v10944_v5 = vcombine.low %v3730_v47, %v3730_v47  ;;  %v1392_v43 = vpack.i.bf16 %v1391_v40, %v1391_v40 }
 0x154   :  { %v4366_v61 = vsel %vm4338_vm3, %v4241_v18, %v4365_v53  ;;  %v1407_v44 = vsel %vm364_vm0, %v188_v57, 4286644096  ;;  %v4732_v14 = vrot.slane %v4730_v34, 5  ;;  %v1420_v30 = vsel %vm364_vm0, %v189_v35, 4286644096 }
 0x155   :  { %v1404_v49 = vmax.f32 %v1402_v46, %v1403_v3  ;;  %v10945_v52 = vcombine.low %v3731_v33, %v3731_v33  ;;  %v4242_v32 = vunpack.c.l.b16 %v10944_v5  ;;  %v3732_v55 = vmax.bf16 %v1392_v43, %v1288_v37  ;;  %v194_v46 = vld [vmem:[#allocation4 + $0x56] sm:$0x1] }
 0x156   :  { %v1409_v19 = vunpack.i.l.bf16 %v1407_v44  ;;  %v1410_v15 = vunpack.i.h.bf16 %v1407_v44  ;;  %v4733_v31 = vor.u32 %v4732_v14, %v4729_v28  ;;  %v4644_v7 = vld [vmem:[#allocation2 + $0x24] sm:$0x1]  ;;  %v1422_v51 = vunpack.i.l.bf16 %v1420_v30 }
 0x157   :  { %v1405_v50 = vpack.i.bf16 %v1404_v49, %v1404_v49  ;;  %v4243_v63 = vunpack.c.l.b16 %v10945_v52  ;;  %v4367_v36 = vsel %vm4340_vm4, %v4242_v32, %v4366_v61  ;;  %v10946_v13 = vcombine.low %v3732_v55, %v3732_v55 }
 0x158   :  { %v1411_v11 = vmax.f32 %v1409_v19, %v1410_v15  ;;  %v1423_v16 = vunpack.i.h.bf16 %v1420_v30  ;;  %v4734_v39 = vrot.slane %v4733_v31, 4  ;;  %v4736_v12 = vshll.u32 %v4644_v7, 16 }
 0x159   :  { %v3733_v2 = vmax.bf16 %v1405_v50, %v1301_v21  ;;  %v4368_v37 = vsel %vm4342_vm5, %v4243_v63, %v4367_v36  ;;  %v4244_v56 = vunpack.c.l.b16 %v10946_v13  ;;  %v1433_v24 = vsel %vm364_vm0, %v190_v6, 4286644096  ;;  %v4531_v21 = vld [vmem:[#allocation2 + $0x28] sm:$0xf]  ;;  %v13077_v50 = vld [vmem:[#allocation2 + $0x20] sm:$0xe] }
 0x15a   :  { %v1412_v41 = vrot.slane %v1411_v11, 4  ;;  %v1424_v38 = vmax.f32 %v1422_v51, %v1423_v16  ;;  %v4738_v25 = vrot.slane %v4736_v12, 5  ;;  %v1435_v62 = vunpack.i.l.bf16 %v1433_v24 }
 0x15b   :  { %v11458_v22 = vcombine.low %v3733_v2, %v3733_v2  ;;  %v1436_v60 = vunpack.i.h.bf16 %v1433_v24  ;;  %v4369_v0 = vsel %vm4344_vm10, %v4244_v56, %v4368_v37  ;;  %v1446_v29 = vsel %vm364_vm0, %v191_v23, 4286644096  ;;  %v196_v2 = vld [vmem:[#allocation4 + $0x58] sm:$0x1] }
 0x15c   :  { %v1413_v26 = vmax.f32 %v1411_v11, %v1412_v41  ;;  %v1425_v54 = vrot.slane %v1424_v38, 4  ;;  %v4444_v1 = vpack.c.b16 %v4369_v0, %v4369_v0  ;;  %v4739_v4 = vsel %vm12658_vm12, %v4734_v39, %v4738_v25  ;;  %v197_v25 = vld [vmem:[#allocation4 + $0x59] sm:$0x1] }
 0x15d   :  { %v4535_v58 = vsel %vm12680_vm14, %v11458_v22, %v4534_v17  ;;  %v1437_v20 = vmax.f32 %v1435_v62, %v1436_v60  ;;  %4914 = vst [vmem:[#allocation3 + $0x94] sm:$0xf] %v4739_v4  ;;  %v1448_v57 = vunpack.i.l.bf16 %v1446_v29  ;;  %v1449_v40 = vunpack.i.h.bf16 %v1446_v29 }
 0x15e   :  { %4536 = vst [vmem:[#allocation2 + $0x2c] sm:$0x1] %v4535_v58  ;;  %v1414_v47 = vrot.slane %v1413_v26, 2  ;;  %v1426_v10 = vmax.f32 %v1424_v38, %v1425_v54  ;;  %v4532_v18 = vsel %vm12666_vm13, %v4444_v1, %v4531_v21  ;;  %v1459_v59 = vsel %vm364_vm0, %v192_v8, 4286644096  ;;  %v12161_v54 = vld [vmem:[#allocation7 + $0x160] sm:$0xff]  }
 0x15f   :  { %v1438_v53 = vrot.slane %v1437_v20, 4  ;;  %v1472_v3 = vsel %vm364_vm0, %v193_v27, 4286644096  ;;  %4533 = vst [vmem:[#allocation2 + $0x28] sm:$0xf] %v4532_v18  ;;  %v1450_v34 = vmax.f32 %v1448_v57, %v1449_v40  ;;  %v1461_v35 = vunpack.i.l.bf16 %v1459_v59  ;;  %11620 = vmatprep.subr.bf16.mxu0 %v12161_v54 }
 0x160   :  { %v1415_v33 = vmax.f32 %v1413_v26, %v1414_v47  ;;  %v1427_v5 = vrot.slane %v1426_v10, 2  ;;  %v1462_v61 = vunpack.i.h.bf16 %v1459_v59  ;;  %v1474_v28 = vunpack.i.l.bf16 %v1472_v3 }
 0x161   :  { %v1439_v43 = vmax.f32 %v1437_v20, %v1438_v53  ;;  %v1475_v44 = vunpack.i.h.bf16 %v1472_v3  ;;  %v1451_v32 = vrot.slane %v1450_v34, 4  ;;  %v1485_v14 = vsel %vm364_vm0, %v194_v46, 4286644096  ;;  %v12163_v20 = vld [vmem:[#allocation7 + $0x120] sm:$0xff]   ;;  %v198_v3 = vld [vmem:[#allocation4 + $0x5a] sm:$0x1] }
 0x162   :  { %v1416_v49 = vrot.slane %v1415_v33, 1  ;;  %v1428_v52 = vmax.f32 %v1426_v10, %v1427_v5  ;;  %v1463_v19 = vmax.f32 %v1461_v35, %v1462_v61  ;;  %v1487_v30 = vunpack.i.l.bf16 %v1485_v14  ;;  %11621 = vmatpush3.bf16.msra.mxu0 %v12163_v20 }
 0x163   :  { %v1440_v55 = vrot.slane %v1439_v43, 2  ;;  %v1476_v15 = vmax.f32 %v1474_v28, %v1475_v44  ;;  %v1452_v31 = vmax.f32 %v1450_v34, %v1451_v32  ;;  %v1488_v6 = vunpack.i.h.bf16 %v1485_v14 }
 0x164   :  { %v13079_v63 = vmax.f32 %v1415_v33, %v1416_v49  ;;  %v1429_v36 = vrot.slane %v1428_v52, 1  ;;  %v1464_v11 = vrot.slane %v1463_v19, 4  ;;  %v11056_v39 = vrot.slane %v13077_v50, 9  ;;  %v199_v49 = vld [vmem:[#allocation4 + $0x5b] sm:$0x1] }
 0x165   :  { %v4646_v13 = vld [vmem:[#allocation2 + $0x2c] sm:$0x1]  ;;  %v1441_v7 = vmax.f32 %v1439_v43, %v1440_v55  ;;  %v1477_v51 = vrot.slane %v1476_v15, 4  ;;  %v1453_v37 = vrot.slane %v1452_v31, 2  ;;  %v1489_v38 = vmax.f32 %v1487_v30, %v1488_v6 }
 0x166   :  { %v4750_v16 = vshll.u32 %v4646_v13, 16  ;;  %v4608_v12 = vld [vmem:[#allocation2 + $0x28] sm:$0xf]  ;;  %v1465_v17 = vmax.f32 %v1463_v19, %v1464_v11  ;;  %v1418_v8 = vpack.i.bf16 %v13079_v63, %v13079_v63  ;;  %v13084_v27 = vmax.f32 %v1428_v52, %v1429_v36  ;;  %v195_v63 = vld [vmem:[#allocation4 + $0x57] sm:$0x1] }
 0x167   :  { %v4645_v23 = vld [vmem:[#allocation2 + $0x28] sm:$0xf]  ;;  %v1442_v56 = vrot.slane %v1441_v7, 1  ;;  %v1478_v41 = vmax.f32 %v1476_v15, %v1477_v51  ;;  %4624 = vst [vmem:[#allocation3 + $0xb4] sm:$0xf] %v4608_v12  ;;  %v1454_v60 = vmax.f32 %v1452_v31, %v1453_v37  ;;  %v1490_v58 = vrot.slane %v1489_v38, 4 }
 0x168   :  { %v4741_v24 = vshrl.u32 %v4645_v23, 16  ;;  %v4744_v22 = vshll.u32 %v4645_v23, 16  ;;  %v4752_v62 = vrot.slane %v4750_v16, 5  ;;  %v1466_v0 = vrot.slane %v1465_v17, 2  ;;  %v5093_v26 = vld [vmem:[#allocation2 + $0x28] sm:$0xf] }
 0x169   :  { %v1479_v21 = vrot.slane %v1478_v41, 2  ;;  %v1511_v4 = vsel %vm364_vm0, %v196_v2, 4286644096  ;;  %5109 = vst [vmem:[#allocation3 + $0x9c] sm:$0xf] %v5093_v26  ;;  %v13087_v46 = vmax.f32 %v1441_v7, %v1442_v56  ;;  %v1455_v47 = vrot.slane %v1454_v60, 1 }
 0x16a   :  { %v4743_v29 = vrot.slane %v4741_v24, 4  ;;  %v4746_v1 = vrot.slane %v4744_v22, 5  ;;  %v1467_v10 = vmax.f32 %v1465_v17, %v1466_v0  ;;  %v1491_v18 = vmax.f32 %v1489_v38, %v1490_v58  ;;  %v200_v15 = vld [vmem:[#allocation4 + $0x5c] sm:$0x1]  ;;  %v201_v51 = vld [vmem:[#allocation4 + $0x5d] sm:$0x1] }
 0x16b   :  { %v1480_v57 = vmax.f32 %v1478_v41, %v1479_v21  ;;  %v1513_v53 = vunpack.i.l.bf16 %v1511_v4  ;;  %v1514_v59 = vunpack.i.h.bf16 %v1511_v4  ;;  %v13089_v33 = vmax.f32 %v1454_v60, %v1455_v47  ;;  %v202_v58 = vld [vmem:[#allocation4 + $0x5e] sm:$0x1] }
 0x16c   :  { %v4747_v40 = vor.u32 %v4746_v1, %v4743_v29  ;;  %v1468_v5 = vrot.slane %v1467_v10, 1  ;;  %v1524_v35 = vsel %vm364_vm0, %v197_v25, 4286644096  ;;  %v1492_v61 = vrot.slane %v1491_v18, 2 }
 0x16d   :  { %v1481_v34 = vrot.slane %v1480_v57, 1  ;;  %v1515_v28 = vmax.f32 %v1513_v53, %v1514_v59  ;;  %v1526_v44 = vunpack.i.l.bf16 %v1524_v35  ;;  %v1431_v52 = vpack.i.bf16 %v13084_v27, %v13084_v27 }
 0x16e   :  { %v4748_v43 = vrot.slane %v4747_v40, 4  ;;  %v1444_v32 = vpack.i.bf16 %v13087_v46, %v13087_v46  ;;  %v1457_v14 = vpack.i.bf16 %v13089_v33, %v13089_v33  ;;  %v1527_v55 = vunpack.i.h.bf16 %v1524_v35 }
 0x16f   :  { %v1493_v30 = vmax.f32 %v1491_v18, %v1492_v61  ;;  %v1516_v36 = vrot.slane %v1515_v28, 4  ;;  %v1537_v31 = vsel %vm364_vm0, %v198_v3, 4286644096  ;;  %v13101_v6 = vmax.f32 %v1467_v10, %v1468_v5  ;;  %v12154_v18 = vld [vmem:[#allocation3 + $0x90] ss:$36 sps:$4 sm:$0xff]  }
 0x170   :  { %v4753_v19 = vsel %vm12658_vm12, %v4748_v43, %v4752_v62  ;;  %v13103_v13 = vmax.f32 %v1480_v57, %v1481_v34  ;;  %v1528_v7 = vmax.f32 %v1526_v44, %v1527_v55  ;;  %v1539_v11 = vunpack.i.l.bf16 %v1537_v31  ;;  %v4935_v57 = vld [vmem:[#allocation2 + $0x24] sm:$0x1] }
 0x171   :  { %4915 = vst [vmem:[#allocation3 + $0xb8] sm:$0xf] %v4753_v19  ;;  %v1494_v16 = vrot.slane %v1493_v30, 1  ;;  %v1517_v2 = vmax.f32 %v1515_v28, %v1516_v36  ;;  %v1540_v37 = vunpack.i.h.bf16 %v1537_v31  ;;  %v1550_v12 = vsel %vm364_vm0, %v199_v49, 4286644096 }
 0x172   :  { %v1529_v23 = vrot.slane %v1528_v7, 4  ;;  %v1552_v56 = vunpack.i.l.bf16 %v1550_v12  ;;  %v1553_v17 = vunpack.i.h.bf16 %v1550_v12  ;;  %v1563_v41 = vsel %vm364_vm0, %v200_v15, 4286644096 }
 0x173   :  { %v13107_v38 = vmax.f32 %v1493_v30, %v1494_v16  ;;  %v1518_v24 = vrot.slane %v1517_v2, 2  ;;  %v1541_v22 = vmax.f32 %v1539_v11, %v1540_v37  ;;  %v1565_v25 = vunpack.i.l.bf16 %v1563_v41 }
 0x174   :  { %v1530_v62 = vmax.f32 %v1528_v7, %v1529_v23  ;;  %v1554_v60 = vmax.f32 %v1552_v56, %v1553_v17  ;;  %v1566_v0 = vunpack.i.h.bf16 %v1563_v41  ;;  %v1576_v21 = vsel %vm364_vm0, %v201_v51, 4286644096  ;;  %v4936_v23 = vld [vmem:[#allocation2 + $0x28] sm:$0xe] }
 0x175   :  { %v1470_v26 = vpack.i.bf16 %v13101_v6, %v13101_v6  ;;  %v1519_v54 = vmax.f32 %v1517_v2, %v1518_v24  ;;  %v1542_v29 = vrot.slane %v1541_v22, 4  ;;  %v1578_v1 = vunpack.i.l.bf16 %v1576_v21 }
 0x176   :  { %v1531_v4 = vrot.slane %v1530_v62, 2  ;;  %v1555_v20 = vrot.slane %v1554_v60, 4  ;;  %v1567_v47 = vmax.f32 %v1565_v25, %v1566_v0  ;;  %v1579_v10 = vunpack.i.h.bf16 %v1576_v21  ;;  %v4937_v0 = vld [vmem:[#allocation2 + $0x2c] sm:$0x1] }
 0x177   :  { %v1483_v53 = vpack.i.bf16 %v13103_v13, %v13103_v13  ;;  %v1496_v59 = vpack.i.bf16 %v13107_v38, %v13107_v38  ;;  %v1520_v3 = vrot.slane %v1519_v54, 1  ;;  %v1543_v5 = vmax.f32 %v1541_v22, %v1542_v29 }
 0x178   :  { %v12151_v40 = vld [vmem:[#allocation3 + $0x94] ss:$36 sps:$4 sm:$0xff]   ;;  %v1532_v34 = vmax.f32 %v1530_v62, %v1531_v4  ;;  %v1556_v35 = vmax.f32 %v1554_v60, %v1555_v20  ;;  %v1568_v43 = vrot.slane %v1567_v47, 4  ;;  %v1580_v61 = vmax.f32 %v1578_v1, %v1579_v10 }
 0x179   :  { %7129 = vmatprep.mubr.bf16.mxu0 %v12151_v40  ;;  %v1521_v28 = vmax.f32 %v1519_v54, %v1520_v3  ;;  %v1544_v44 = vrot.slane %v1543_v5, 2  ;;  %v1589_v49 = vsel %vm364_vm0, %v202_v58, 4286644096  ;;  %v5011_v55 = vrot.slane %v4935_v57, 5 }
 0x17a   :  { %7130 = vmatmul.mubr.bf16.gmra.mxu0 %v12154_v18  ;;  %v1533_v19 = vrot.slane %v1532_v34, 1  ;;  %v1557_v15 = vrot.slane %v1556_v35, 2  ;;  %v1569_v30 = vmax.f32 %v1567_v47, %v1568_v43  ;;  %v1581_v36 = vrot.slane %v1580_v61, 4 }
 0x17b   :  { %v1522_v31 = vpack.i.bf16 %v1521_v28, %v1521_v28  ;;  %v1545_v7 = vmax.f32 %v1543_v5, %v1544_v44  ;;  %v1591_v11 = vunpack.i.l.bf16 %v1589_v49  ;;  %v1592_v51 = vunpack.i.h.bf16 %v1589_v49  ;;  %v203_v44 = vld [vmem:[#allocation4 + $0x5f] sm:$0x1] }
 0x17c   :  { %v1534_v16 = vmax.f32 %v1532_v34, %v1533_v19  ;;  %v1558_v2 = vmax.f32 %v1556_v35, %v1557_v15  ;;  %v1570_v37 = vrot.slane %v1569_v30, 2  ;;  %v1582_v12 = vmax.f32 %v1580_v61, %v1581_v36 }
 0x17d   :  { %v1546_v56 = vrot.slane %v1545_v7, 1  ;;  %v1593_v17 = vmax.f32 %v1591_v11, %v1592_v51  ;;  %v3734_v41 = vmax.bf16 %v1522_v31, %v1418_v8  ;;  %v5012_v24 = vsel %vm12746_vm7, %v11056_v39, %v5011_v55  ;;  %v204_v11 = vld [vmem:[#allocation4 + $0x60] sm:$0x1] }
 0x17e   :  { %v1535_v22 = vpack.i.bf16 %v1534_v16, %v1534_v16  ;;  %v1559_v25 = vrot.slane %v1558_v2, 1  ;;  %v1571_v62 = vmax.f32 %v1569_v30, %v1570_v37  ;;  %v1583_v60 = vrot.slane %v1582_v12, 2  ;;  %5077 = vst [vmem:[#allocation3 + $0x98] sm:$0xf] %v5012_v24 }
 0x17f   :  { %v1547_v21 = vmax.f32 %v1545_v7, %v1546_v56  ;;  %v1594_v54 = vrot.slane %v1593_v17, 4  ;;  %v10948_v29 = vcombine.low %v3734_v41, %v3734_v41  ;;  %v11057_v1 = vrot.slane %v4936_v23, 9 }
 0x180   :  { %v1560_v58 = vmax.f32 %v1558_v2, %v1559_v25  ;;  %v1572_v4 = vrot.slane %v1571_v62, 1  ;;  %v1584_v20 = vmax.f32 %v1582_v12, %v1583_v60  ;;  %v3735_v50 = vmax.bf16 %v1535_v22, %v1431_v52 }
 0x181   :  { %v1548_v8 = vpack.i.bf16 %v1547_v21, %v1547_v21  ;;  %v1595_v39 = vmax.f32 %v1593_v17, %v1594_v54  ;;  %v4246_v47 = vunpack.c.l.b16 %v10948_v29  ;;  %v5015_v10 = vrot.slane %v4937_v0, 5 }
 0x182   :  { %v1561_v57 = vpack.i.bf16 %v1560_v58, %v1560_v58  ;;  %v1573_v40 = vmax.f32 %v1571_v62, %v1572_v4  ;;  %v1585_v18 = vrot.slane %v1584_v20, 1  ;;  %v10949_v3 = vcombine.low %v3735_v50, %v3735_v50  ;;  %v206_v62 = vld [vmem:[#allocation4 + $0x62] sm:$0x1]  ;;  %v207_v58 = vld [vmem:[#allocation4 + $0x63] sm:$0x1] }
 0x183   :  { %v1596_v5 = vrot.slane %v1595_v39, 2  ;;  %v3736_v34 = vmax.bf16 %v1548_v8, %v1444_v32  ;;  %v5016_v35 = vsel %vm12746_vm7, %v11057_v1, %v5015_v10  ;;  %v1498_v27 = vsel %vm364_vm0, %v195_v63, 4286644096 }
 0x184   :  { %v1574_v52 = vpack.i.bf16 %v1573_v40, %v1573_v40  ;;  %v1586_v43 = vmax.f32 %v1584_v20, %v1585_v18  ;;  %v3737_v61 = vmax.bf16 %v1561_v57, %v1457_v14  ;;  %v4247_v28 = vunpack.c.l.b16 %v10949_v3  ;;  %5078 = vst [vmem:[#allocation3 + $0xbc] sm:$0xf] %v5016_v35  ;;  %v208_v3 = vld [vmem:[#allocation4 + $0x64] sm:$0x1] }
 0x185   :  { %v1597_v49 = vmax.f32 %v1595_v39, %v1596_v5  ;;  %v10950_v55 = vcombine.low %v3736_v34, %v3736_v34  ;;  %v1500_v19 = vunpack.i.l.bf16 %v1498_v27  ;;  %v1501_v15 = vunpack.i.h.bf16 %v1498_v27 }
 0x186   :  { %v1587_v46 = vpack.i.bf16 %v1586_v43, %v1586_v43  ;;  %v3738_v32 = vmax.bf16 %v1574_v52, %v1470_v26  ;;  %v10951_v30 = vcombine.low %v3737_v61, %v3737_v61  ;;  %v4370_v36 = vsel %vm4334_vm1, %v4247_v28, %v4246_v47  ;;  %v205_v26 = vld [vmem:[#allocation4 + $0x61] sm:$0x1] }
 0x187   :  { %v1598_v31 = vrot.slane %v1597_v49, 1  ;;  %v4248_v7 = vunpack.c.l.b16 %v10950_v55  ;;  %v1502_v33 = vmax.f32 %v1500_v19, %v1501_v15  ;;  %v1602_v14 = vsel %vm364_vm0, %v203_v44, 4286644096  ;;  %v4537_v19 = vld [vmem:[#allocation2 + $0x30] sm:$0xf] }
 0x188   :  { %v3739_v51 = vmax.bf16 %v1587_v46, %v1483_v53  ;;  %v10952_v16 = vcombine.low %v3738_v32, %v3738_v32  ;;  %v4249_v2 = vunpack.c.l.b16 %v10951_v30  ;;  %v1604_v37 = vunpack.i.l.bf16 %v1602_v14 }
 0x189   :  { %v1599_v12 = vmax.f32 %v1597_v49, %v1598_v31  ;;  %v4371_v6 = vsel %vm4336_vm2, %v4248_v7, %v4370_v36  ;;  %v1503_v23 = vrot.slane %v1502_v33, 4  ;;  %v1605_v56 = vunpack.i.h.bf16 %v1602_v14  ;;  %v209_v36 = vld [vmem:[#allocation4 + $0x65] sm:$0x1] }
 0x18a   :  { %v10953_v17 = vcombine.low %v3739_v51, %v3739_v51  ;;  %v4250_v41 = vunpack.c.l.b16 %v10952_v16  ;;  %v4372_v24 = vsel %vm4338_vm3, %v4249_v2, %v4371_v6  ;;  %v1615_v22 = vsel %vm364_vm0, %v204_v11, 4286644096 }
 0x18b   :  { %v1600_v25 = vpack.i.bf16 %v1599_v12, %v1599_v12  ;;  %v1504_v60 = vmax.f32 %v1502_v33, %v1503_v23  ;;  %v1606_v13 = vmax.f32 %v1604_v37, %v1605_v56  ;;  %v1617_v53 = vunpack.i.l.bf16 %v1615_v22 }
 0x18c   :  { %v4251_v0 = vunpack.c.l.b16 %v10953_v17  ;;  %v4373_v21 = vsel %vm4340_vm4, %v4250_v41, %v4372_v24  ;;  %v1618_v54 = vunpack.i.h.bf16 %v1615_v22  ;;  %v1628_v29 = vsel %vm364_vm0, %v205_v26, 4286644096  ;;  %v210_v26 = vld [vmem:[#allocation4 + $0x66] sm:$0x1] }
 0x18d   :  { %v3740_v1 = vmax.bf16 %v1600_v25, %v1496_v59  ;;  %v1505_v4 = vrot.slane %v1504_v60, 2  ;;  %v1607_v20 = vrot.slane %v1606_v13, 4  ;;  %v1630_v50 = vunpack.i.l.bf16 %v1628_v29 }
 0x18e   :  { %v4374_v63 = vsel %vm4342_vm5, %v4251_v0, %v4373_v21  ;;  %v1619_v8 = vmax.f32 %v1617_v53, %v1618_v54  ;;  %v1631_v39 = vunpack.i.h.bf16 %v1628_v29  ;;  %v1641_v47 = vsel %vm364_vm0, %v206_v62, 4286644096  ;;  %v211_v21 = vld [vmem:[#allocation4 + $0x67] sm:$0x1] }
 0x18f   :  { %v10954_v10 = vcombine.low %v3740_v1, %v3740_v1  ;;  %v1506_v57 = vmax.f32 %v1504_v60, %v1505_v4  ;;  %v1608_v40 = vmax.f32 %v1606_v13, %v1607_v20  ;;  %v1643_v18 = vunpack.i.l.bf16 %v1641_v47 }
 0x190   :  { %v1620_v5 = vrot.slane %v1619_v8, 4  ;;  %v1632_v34 = vmax.f32 %v1630_v50, %v1631_v39  ;;  %v1644_v35 = vunpack.i.h.bf16 %v1641_v47  ;;  %v1654_v38 = vsel %vm364_vm0, %v207_v58, 4286644096 }
 0x191   :  { %v4252_v59 = vunpack.c.l.b16 %v10954_v10  ;;  %v1507_v27 = vrot.slane %v1506_v57, 1  ;;  %v1609_v52 = vrot.slane %v1608_v40, 2  ;;  %v1656_v43 = vunpack.i.l.bf16 %v1654_v38 }
 0x192   :  { %v1621_v61 = vmax.f32 %v1619_v8, %v1620_v5  ;;  %v1633_v28 = vrot.slane %v1632_v34, 4  ;;  %v1645_v44 = vmax.f32 %v1643_v18, %v1644_v35  ;;  %v1657_v49 = vunpack.i.h.bf16 %v1654_v38  ;;  %v212_v8 = vld [vmem:[#allocation4 + $0x68] sm:$0x1] }
 0x193   :  { %v4375_v55 = vsel %vm4344_vm10, %v4252_v59, %v4374_v63  ;;  %v13156_v15 = vmax.f32 %v1506_v57, %v1507_v27  ;;  %v1610_v46 = vmax.f32 %v1608_v40, %v1609_v52  ;;  %v1667_v32 = vsel %vm364_vm0, %v208_v3, 4286644096  ;;  %v213_v40 = vld [vmem:[#allocation4 + $0x69] sm:$0x1] }
 0x194   :  { %v4446_v30 = vpack.c.b16 %v4375_v55, %v4375_v55  ;;  %v1622_v31 = vrot.slane %v1621_v61, 2  ;;  %v1634_v7 = vmax.f32 %v1632_v34, %v1633_v28  ;;  %v1646_v11 = vrot.slane %v1645_v44, 4 }
 0x195   :  { %v1509_v33 = vpack.i.bf16 %v13156_v15, %v13156_v15  ;;  %v1611_v14 = vrot.slane %v1610_v46, 1  ;;  %v1658_v51 = vmax.f32 %v1656_v43, %v1657_v49  ;;  %v1669_v16 = vunpack.i.l.bf16 %v1667_v32 }
 0x196   :  { %v4538_v2 = vsel %vm12666_vm13, %v4446_v30, %v4537_v19  ;;  %v1623_v37 = vmax.f32 %v1621_v61, %v1622_v31  ;;  %v1635_v12 = vrot.slane %v1634_v7, 2  ;;  %v1647_v6 = vmax.f32 %v1645_v44, %v1646_v11  ;;  %v214_v30 = vld [vmem:[#allocation4 + $0x6a] sm:$0x1] }
 0x197   :  { %4539 = vst [vmem:[#allocation2 + $0x30] sm:$0xf] %v4538_v2  ;;  %v13163_v23 = vmax.f32 %v1610_v46, %v1611_v14  ;;  %v1659_v56 = vrot.slane %v1658_v51, 4  ;;  %v1670_v17 = vunpack.i.h.bf16 %v1667_v32  ;;  %v1680_v41 = vsel %vm364_vm0, %v209_v36, 4286644096 }
 0x198   :  { %v1624_v24 = vrot.slane %v1623_v37, 1  ;;  %v1636_v22 = vmax.f32 %v1634_v7, %v1635_v12  ;;  %v1648_v25 = vrot.slane %v1647_v6, 2  ;;  %v1682_v62 = vunpack.i.l.bf16 %v1680_v41 }
 0x199   :  { %v1613_v60 = vpack.i.bf16 %v13163_v23, %v13163_v23  ;;  %v1660_v13 = vmax.f32 %v1658_v51, %v1659_v56  ;;  %v1671_v53 = vmax.f32 %v1669_v16, %v1670_v17  ;;  %v1683_v0 = vunpack.i.h.bf16 %v1680_v41  ;;  %v215_v56 = vld [vmem:[#allocation4 + $0x6b] sm:$0x1] }
 0x19a   :  { %v13168_v54 = vmax.f32 %v1623_v37, %v1624_v24  ;;  %v1637_v29 = vrot.slane %v1636_v22, 1  ;;  %v1649_v1 = vmax.f32 %v1647_v6, %v1648_v25  ;;  %v1693_v58 = vsel %vm364_vm0, %v210_v26, 4286644096 }
 0x19b   :  { %v1661_v4 = vrot.slane %v1660_v13, 2  ;;  %v1672_v20 = vrot.slane %v1671_v53, 4  ;;  %v1684_v50 = vmax.f32 %v1682_v62, %v1683_v0  ;;  %v1695_v63 = vunpack.i.l.bf16 %v1693_v58 }
 0x19c   :  { %v1626_v39 = vpack.i.bf16 %v13168_v54, %v13168_v54  ;;  %v13173_v47 = vmax.f32 %v1636_v22, %v1637_v29  ;;  %v1650_v10 = vrot.slane %v1649_v1, 1  ;;  %v1696_v57 = vunpack.i.h.bf16 %v1693_v58 }
 0x19d   :  { %v1662_v18 = vmax.f32 %v1660_v13, %v1661_v4  ;;  %v1673_v3 = vmax.f32 %v1671_v53, %v1672_v20  ;;  %v1685_v5 = vrot.slane %v1684_v50, 4  ;;  %v1706_v34 = vsel %vm364_vm0, %v211_v21, 4286644096  ;;  %v12158_v21 = vld [vmem:[#allocation3 + $0x98] ss:$36 sps:$4 sm:$0xff]  }
 0x19e   :  { %v5094_v35 = vld [vmem:[#allocation2 + $0x30] sm:$0xf]  ;;  %v1639_v38 = vpack.i.bf16 %v13173_v47, %v13173_v47  ;;  %v13178_v59 = vmax.f32 %v1649_v1, %v1650_v10  ;;  %v1697_v27 = vmax.f32 %v1695_v63, %v1696_v57  ;;  %v1708_v52 = vunpack.i.l.bf16 %v1706_v34  ;;  %v216_v10 = vld [vmem:[#allocation4 + $0x6c] sm:$0x1]  ;;  %v217_v57 = vld [vmem:[#allocation4 + $0x6d] sm:$0x1] }
 0x19f   :  { %v4609_v43 = vld [vmem:[#allocation2 + $0x30] sm:$0xf]  ;;  %5110 = vst [vmem:[#allocation3 + $0xc0] sm:$0xf] %v5094_v35  ;;  %v1663_v61 = vrot.slane %v1662_v18, 1  ;;  %v1674_v28 = vrot.slane %v1673_v3, 2  ;;  %v1686_v44 = vmax.f32 %v1684_v50, %v1685_v5  ;;  %v1709_v49 = vunpack.i.h.bf16 %v1706_v34 }
 0x1a0   :  { %4625 = vst [vmem:[#allocation3 + $0xd8] sm:$0xf] %v4609_v43  ;;  %v1652_v55 = vpack.i.bf16 %v13178_v59, %v13178_v59  ;;  %v1698_v19 = vrot.slane %v1697_v27, 4  ;;  %v1719_v46 = vsel %vm364_vm0, %v212_v8, 4286644096 }
 0x1a1   :  { %v1732_v32 = vsel %vm364_vm0, %v213_v40, 4286644096  ;;  %v13184_v36 = vmax.f32 %v1662_v18, %v1663_v61  ;;  %v1675_v31 = vmax.f32 %v1673_v3, %v1674_v28  ;;  %v1687_v7 = vrot.slane %v1686_v44, 2 }
 0x1a2   :  { %v1710_v11 = vmax.f32 %v1708_v52, %v1709_v49  ;;  %v1699_v14 = vmax.f32 %v1697_v27, %v1698_v19  ;;  %v1721_v51 = vunpack.i.l.bf16 %v1719_v46  ;;  %v1722_v16 = vunpack.i.h.bf16 %v1719_v46 }
 0x1a3   :  { %v1734_v2 = vunpack.i.l.bf16 %v1732_v32  ;;  %v1665_v37 = vpack.i.bf16 %v13184_v36, %v13184_v36  ;;  %v1676_v12 = vrot.slane %v1675_v31, 1  ;;  %v1688_v6 = vmax.f32 %v1686_v44, %v1687_v7 }
 0x1a4   :  { %v1711_v26 = vrot.slane %v1710_v11, 4  ;;  %v1700_v17 = vrot.slane %v1699_v14, 2  ;;  %v1723_v41 = vmax.f32 %v1721_v51, %v1722_v16  ;;  %v1735_v24 = vunpack.i.h.bf16 %v1732_v32 }
 0x1a5   :  { %v1745_v22 = vsel %vm364_vm0, %v214_v30, 4286644096  ;;  %v13189_v25 = vmax.f32 %v1675_v31, %v1676_v12  ;;  %v1689_v62 = vrot.slane %v1688_v6, 1  ;;  %v1758_v8 = vsel %vm364_vm0, %v215_v56, 4286644096 }
 0x1a6   :  { %v1712_v13 = vmax.f32 %v1710_v11, %v1711_v26  ;;  %v1747_v53 = vunpack.i.l.bf16 %v1745_v22  ;;  %v12156_v0 = vld [vmem:[#allocation3 + $0x9c] ss:$36 sps:$4 sm:$0xff]   ;;  %v1701_v29 = vmax.f32 %v1699_v14, %v1700_v17  ;;  %v1724_v1 = vrot.slane %v1723_v41, 4  ;;  %v218_v14 = vld [vmem:[#allocation4 + $0x6e] sm:$0x1] }
 0x1a7   :  { %v1736_v58 = vmax.f32 %v1734_v2, %v1735_v24  ;;  %v1748_v4 = vunpack.i.h.bf16 %v1745_v22  ;;  %v1678_v20 = vpack.i.bf16 %v13189_v25, %v13189_v25  ;;  %v13193_v50 = vmax.f32 %v1688_v6, %v1689_v62  ;;  %7226 = vmatprep.mubr.bf16.mxu1 %v12156_v0 }
 0x1a8   :  { %v1713_v63 = vrot.slane %v1712_v13, 2  ;;  %v1702_v40 = vrot.slane %v1701_v29, 1  ;;  %v1725_v18 = vmax.f32 %v1723_v41, %v1724_v1  ;;  %7227 = vmatmul.mubr.bf16.gmra.mxu1 %v12158_v21  ;;  %v1760_v27 = vunpack.i.l.bf16 %v1758_v8 }
 0x1a9   :  { %v1737_v3 = vrot.slane %v1736_v58, 4  ;;  %v1749_v5 = vmax.f32 %v1747_v53, %v1748_v4  ;;  %v1691_v34 = vpack.i.bf16 %v13193_v50, %v13193_v50  ;;  %v1761_v52 = vunpack.i.h.bf16 %v1758_v8 }
 0x1aa   :  { %v1714_v35 = vmax.f32 %v1712_v13, %v1713_v63  ;;  %v13198_v43 = vmax.f32 %v1701_v29, %v1702_v40  ;;  %v1726_v61 = vrot.slane %v1725_v18, 2  ;;  %v1771_v46 = vsel %vm364_vm0, %v216_v10, 4286644096  ;;  %v219_v13 = vld [vmem:[#allocation4 + $0x6f] sm:$0x1] }
 0x1ab   :  { %v1738_v28 = vmax.f32 %v1736_v58, %v1737_v3  ;;  %v1750_v44 = vrot.slane %v1749_v5, 4  ;;  %v1762_v19 = vmax.f32 %v1760_v27, %v1761_v52  ;;  %v1784_v32 = vsel %vm364_vm0, %v217_v57, 4286644096 }
 0x1ac   :  { %v1715_v49 = vrot.slane %v1714_v35, 1  ;;  %v1704_v30 = vpack.i.bf16 %v13198_v43, %v13198_v43  ;;  %v1727_v31 = vmax.f32 %v1725_v18, %v1726_v61  ;;  %v1773_v2 = vunpack.i.l.bf16 %v1771_v46 }
 0x1ad   :  { %v1739_v7 = vrot.slane %v1738_v28, 2  ;;  %v1751_v11 = vmax.f32 %v1749_v5, %v1750_v44  ;;  %v1763_v16 = vrot.slane %v1762_v19, 4  ;;  %v1774_v12 = vunpack.i.h.bf16 %v1771_v46 }
 0x1ae   :  { %v13204_v51 = vmax.f32 %v1714_v35, %v1715_v49  ;;  %v1728_v6 = vrot.slane %v1727_v31, 1  ;;  %v1786_v17 = vunpack.i.l.bf16 %v1784_v32  ;;  %v1787_v62 = vunpack.i.h.bf16 %v1784_v32 }
 0x1af   :  { %v1740_v26 = vmax.f32 %v1738_v28, %v1739_v7  ;;  %v1752_v56 = vrot.slane %v1751_v11, 2  ;;  %v1764_v24 = vmax.f32 %v1762_v19, %v1763_v16  ;;  %v1775_v22 = vmax.f32 %v1773_v2, %v1774_v12 }
 0x1b0   :  { %v1717_v41 = vpack.i.bf16 %v13204_v51, %v13204_v51  ;;  %v1729_v53 = vmax.f32 %v1727_v31, %v1728_v6  ;;  %v1797_v29 = vsel %vm364_vm0, %v218_v14, 4286644096  ;;  %v1788_v4 = vmax.f32 %v1786_v17, %v1787_v62  ;;  %v4611_v14 = vld [vmem:[#allocation2 + $0x50] sm:$0xf] }
 0x1b1   :  { %v1741_v0 = vrot.slane %v1740_v26, 1  ;;  %v1753_v21 = vmax.f32 %v1751_v11, %v1752_v56  ;;  %v1765_v1 = vrot.slane %v1764_v24, 2  ;;  %v1776_v58 = vrot.slane %v1775_v22, 4  ;;  %4627 = vst [vmem:[#allocation3 + $0x120] sm:$0xf] %v4611_v14 }
 0x1b2   :  { %v1799_v63 = vunpack.i.l.bf16 %v1797_v29  ;;  %v1730_v8 = vpack.i.bf16 %v1729_v53, %v1729_v53  ;;  %v1800_v40 = vunpack.i.h.bf16 %v1797_v29  ;;  %v1789_v5 = vrot.slane %v1788_v4, 4 }
 0x1b3   :  { %v1742_v10 = vmax.f32 %v1740_v26, %v1741_v0  ;;  %v1754_v57 = vrot.slane %v1753_v21, 1  ;;  %v1766_v18 = vmax.f32 %v1764_v24, %v1765_v1  ;;  %v1777_v3 = vmax.f32 %v1775_v22, %v1776_v58 }
 0x1b4   :  { %v1810_v35 = vsel %vm364_vm0, %v219_v13, 4286644096  ;;  %v1801_v61 = vmax.f32 %v1799_v63, %v1800_v40  ;;  %v1790_v19 = vmax.f32 %v1788_v4, %v1789_v5  ;;  %v3741_v7 = vmax.bf16 %v1613_v60, %v1509_v33 }
 0x1b5   :  { %v1743_v27 = vpack.i.bf16 %v1742_v10, %v1742_v10  ;;  %v1755_v52 = vmax.f32 %v1753_v21, %v1754_v57  ;;  %v1812_v28 = vunpack.i.l.bf16 %v1810_v35  ;;  %v1767_v44 = vrot.slane %v1766_v18, 1  ;;  %v4647_v21 = vld [vmem:[#allocation2 + $0x30] sm:$0xf] }
 0x1b6   :  { %v1778_v49 = vrot.slane %v1777_v3, 2  ;;  %v1813_v46 = vunpack.i.h.bf16 %v1810_v35  ;;  %v1802_v31 = vrot.slane %v1801_v61, 4  ;;  %v3742_v11 = vmax.bf16 %v1730_v8, %v1626_v39  ;;  %v220_v35 = vld [vmem:[#allocation4 + $0x70] sm:$0x1] }
 0x1b7   :  { %v1756_v32 = vpack.i.bf16 %v1755_v52, %v1755_v52  ;;  %v1768_v16 = vmax.f32 %v1766_v18, %v1767_v44  ;;  %v1791_v12 = vrot.slane %v1790_v19, 2  ;;  %v3743_v56 = vmax.bf16 %v1743_v27, %v1639_v38  ;;  %v4540_v38 = vld [vmem:[#allocation2 + $0x34] sm:$0x1]  ;;  %v221_v27 = vld [vmem:[#allocation4 + $0x71] sm:$0x1] }
 0x1b8   :  { %v1779_v2 = vmax.f32 %v1777_v3, %v1778_v49  ;;  %v1814_v6 = vmax.f32 %v1812_v28, %v1813_v46  ;;  %v1803_v26 = vmax.f32 %v1801_v61, %v1802_v31  ;;  %v10956_v33 = vcombine.low %v3742_v11, %v3742_v11 }
 0x1b9   :  { %v3744_v15 = vmax.bf16 %v1756_v32, %v1652_v55  ;;  %v1769_v23 = vpack.i.bf16 %v1768_v16, %v1768_v16  ;;  %v1792_v54 = vmax.f32 %v1790_v19, %v1791_v12  ;;  %v10957_v24 = vcombine.low %v3743_v56, %v3743_v56 }
 0x1ba   :  { %v1780_v60 = vrot.slane %v1779_v2, 1  ;;  %v1815_v39 = vrot.slane %v1814_v6, 4  ;;  %v1804_v17 = vrot.slane %v1803_v26, 2  ;;  %v4254_v62 = vunpack.c.l.b16 %v10956_v33 }
 0x1bb   :  { %v10958_v22 = vcombine.low %v3744_v15, %v3744_v15  ;;  %v1793_v53 = vrot.slane %v1792_v54, 1  ;;  %v3745_v47 = vmax.bf16 %v1769_v23, %v1665_v37  ;;  %v4255_v55 = vunpack.c.l.b16 %v10957_v24  ;;  %v223_v23 = vld [vmem:[#allocation4 + $0x73] sm:$0x1] }
 0x1bc   :  { %v1781_v13 = vmax.f32 %v1779_v2, %v1780_v60  ;;  %v1816_v0 = vmax.f32 %v1814_v6, %v1815_v39  ;;  %v1805_v59 = vmax.f32 %v1803_v26, %v1804_v17  ;;  %v11459_v1 = vcombine.low %v3741_v7, %v3741_v7  ;;  %v222_v2 = vld [vmem:[#allocation4 + $0x72] sm:$0x1] }
 0x1bd   :  { %v4256_v29 = vunpack.c.l.b16 %v10958_v22  ;;  %v1794_v4 = vmax.f32 %v1792_v54, %v1793_v53  ;;  %v10959_v8 = vcombine.low %v3745_v47, %v3745_v47  ;;  %v4376_v57 = vsel %vm4334_vm1, %v4255_v55, %v4254_v62 }
 0x1be   :  { %v1782_v58 = vpack.i.bf16 %v1781_v13, %v1781_v13  ;;  %v1817_v63 = vrot.slane %v1816_v0, 2  ;;  %v1806_v10 = vrot.slane %v1805_v59, 1  ;;  %v4541_v40 = vsel %vm12680_vm14, %v11459_v1, %v4540_v38 }
 0x1bf   :  { %v4755_v18 = vshrl.u32 %v4647_v21, 16  ;;  %v1795_v3 = vpack.i.bf16 %v1794_v4, %v1794_v4  ;;  %v4257_v5 = vunpack.c.l.b16 %v10959_v8  ;;  %4542 = vst [vmem:[#allocation2 + $0x34] sm:$0x1] %v4541_v40  ;;  %v4377_v61 = vsel %vm4336_vm2, %v4256_v29, %v4376_v57  ;;  %v224_v29 = vld [vmem:[#allocation4 + $0x74] sm:$0x1] }
 0x1c0   :  { %v1818_v36 = vmax.f32 %v1816_v0, %v1817_v63  ;;  %v3746_v37 = vmax.bf16 %v1782_v58, %v1678_v20  ;;  %v1807_v52 = vmax.f32 %v1805_v59, %v1806_v10  ;;  %v4758_v44 = vshll.u32 %v4647_v21, 16  ;;  %v4546_v0 = vld [vmem:[#allocation2 + $0x3c] sm:$0x1]  ;;  %v4543_v63 = vld [vmem:[#allocation2 + $0x38] sm:$0xf] }
 0x1c1   :  { %v4757_v28 = vrot.slane %v4755_v18, 4  ;;  %v3747_v19 = vmax.bf16 %v1795_v3, %v1691_v34  ;;  %v4378_v32 = vsel %vm4338_vm3, %v4257_v5, %v4377_v61  ;;  %v1823_v20 = vsel %vm364_vm0, %v220_v35, 4286644096  ;;  %v225_v18 = vld [vmem:[#allocation4 + $0x75] sm:$0x1] }
 0x1c2   :  { %v1819_v49 = vrot.slane %v1818_v36, 1  ;;  %v10960_v46 = vcombine.low %v3746_v37, %v3746_v37  ;;  %v1808_v31 = vpack.i.bf16 %v1807_v52, %v1807_v52  ;;  %v4760_v25 = vrot.slane %v4758_v44, 5  ;;  %v226_v52 = vld [vmem:[#allocation4 + $0x76] sm:$0x1] }
 0x1c3   :  { %v1836_v7 = vsel %vm364_vm0, %v221_v27, 4286644096  ;;  %v10961_v14 = vcombine.low %v3747_v19, %v3747_v19  ;;  %v1825_v12 = vunpack.i.l.bf16 %v1823_v20  ;;  %v1826_v34 = vunpack.i.h.bf16 %v1823_v20 }
 0x1c4   :  { %v1820_v11 = vmax.f32 %v1818_v36, %v1819_v49  ;;  %v4258_v16 = vunpack.c.l.b16 %v10960_v46  ;;  %v3748_v6 = vmax.bf16 %v1808_v31, %v1704_v30  ;;  %v4761_v50 = vor.u32 %v4760_v25, %v4757_v28  ;;  %v228_v31 = vld [vmem:[#allocation4 + $0x78] sm:$0x1] }
 0x1c5   :  { %v1838_v26 = vunpack.i.l.bf16 %v1836_v7  ;;  %v4259_v15 = vunpack.c.l.b16 %v10961_v14  ;;  %v1839_v60 = vunpack.i.h.bf16 %v1836_v7  ;;  %v1827_v24 = vmax.f32 %v1825_v12, %v1826_v34 }
 0x1c6   :  { %v1821_v56 = vpack.i.bf16 %v1820_v11, %v1820_v11  ;;  %v4379_v33 = vsel %vm4340_vm4, %v4258_v16, %v4378_v32  ;;  %v10962_v54 = vcombine.low %v3748_v6, %v3748_v6  ;;  %v4648_v39 = vld [vmem:[#allocation2 + $0x34] sm:$0x1]  ;;  %v4762_v17 = vrot.slane %v4761_v50, 4  ;;  %v12169_v6 = vld [vmem:[#allocation7 + $0x158] sm:$0xff]  }
 0x1c7   :  { %v1849_v22 = vsel %vm364_vm0, %v222_v2, 4286644096  ;;  %v4380_v30 = vsel %vm4342_vm5, %v4259_v15, %v4379_v33  ;;  %v4764_v62 = vshll.u32 %v4648_v39, 16  ;;  %v1840_v13 = vmax.f32 %v1838_v26, %v1839_v60  ;;  %11622 = vmatprep.subr.bf16.mxu0 %v12169_v6 }
 0x1c8   :  { %v3749_v43 = vmax.bf16 %v1821_v56, %v1717_v41  ;;  %v4260_v53 = vunpack.c.l.b16 %v10962_v54  ;;  %v1828_v47 = vrot.slane %v1827_v24, 4  ;;  %v1851_v38 = vunpack.i.l.bf16 %v1849_v22  ;;  %v12170_v54 = vld [vmem:[#allocation7 + $0x118] sm:$0xff]  }
 0x1c9   :  { %v1852_v21 = vunpack.i.h.bf16 %v1849_v22  ;;  %v4766_v55 = vrot.slane %v4764_v62, 5  ;;  %v1841_v1 = vrot.slane %v1840_v13, 4  ;;  %v1862_v58 = vsel %vm364_vm0, %v223_v23, 4286644096  ;;  %11623 = vmatpush3.bf16.msra.mxu0 %v12170_v54 }
 0x1ca   :  { %v11460_v59 = vcombine.low %v3749_v43, %v3749_v43  ;;  %v4381_v4 = vsel %vm4344_vm10, %v4260_v53, %v4380_v30  ;;  %v1829_v51 = vmax.f32 %v1827_v24, %v1828_v47  ;;  %v1864_v8 = vunpack.i.l.bf16 %v1862_v58 }
 0x1cb   :  { %v1853_v41 = vmax.f32 %v1851_v38, %v1852_v21  ;;  %v4448_v10 = vpack.c.b16 %v4381_v4, %v4381_v4  ;;  %v4767_v40 = vsel %vm12658_vm12, %v4762_v17, %v4766_v55  ;;  %v1842_v3 = vmax.f32 %v1840_v13, %v1841_v1  ;;  %v229_v4 = vld [vmem:[#allocation4 + $0x79] sm:$0x1] }
 0x1cc   :  { %v4547_v57 = vsel %vm12680_vm14, %v11460_v59, %v4546_v0  ;;  %4916 = vst [vmem:[#allocation3 + $0xdc] sm:$0xf] %v4767_v40  ;;  %v1830_v36 = vrot.slane %v1829_v51, 2  ;;  %v1865_v5 = vunpack.i.h.bf16 %v1862_v58  ;;  %v1875_v35 = vsel %vm364_vm0, %v224_v29, 4286644096 }
 0x1cd   :  { %4548 = vst [vmem:[#allocation2 + $0x3c] sm:$0x1] %v4547_v57  ;;  %v1854_v37 = vrot.slane %v1853_v41, 4  ;;  %v4544_v27 = vsel %vm12666_vm13, %v4448_v10, %v4543_v63  ;;  %v1843_v61 = vrot.slane %v1842_v3, 2  ;;  %v1877_v28 = vunpack.i.l.bf16 %v1875_v35 }
 0x1ce   :  { %v1878_v44 = vunpack.i.h.bf16 %v1875_v35  ;;  %4545 = vst [vmem:[#allocation2 + $0x38] sm:$0xf] %v4544_v27  ;;  %v1831_v49 = vmax.f32 %v1829_v51, %v1830_v36  ;;  %v1866_v46 = vmax.f32 %v1864_v8, %v1865_v5  ;;  %v1888_v32 = vsel %vm364_vm0, %v225_v18, 4286644096  ;;  %v230_v51 = vld [vmem:[#allocation4 + $0x7a] sm:$0x1] }
 0x1cf   :  { %v1855_v19 = vmax.f32 %v1853_v41, %v1854_v37  ;;  %v1844_v25 = vmax.f32 %v1842_v3, %v1843_v61  ;;  %v1890_v7 = vunpack.i.l.bf16 %v1888_v32  ;;  %v1891_v11 = vunpack.i.h.bf16 %v1888_v32 }
 0x1d0   :  { %v1879_v20 = vmax.f32 %v1877_v28, %v1878_v44  ;;  %v1832_v14 = vrot.slane %v1831_v49, 1  ;;  %v1867_v2 = vrot.slane %v1866_v46, 4  ;;  %v1901_v12 = vsel %vm364_vm0, %v226_v52, 4286644096 }
 0x1d1   :  { %v1856_v16 = vrot.slane %v1855_v19, 2  ;;  %v1845_v50 = vrot.slane %v1844_v25, 1  ;;  %v1892_v26 = vmax.f32 %v1890_v7, %v1891_v11  ;;  %v1903_v56 = vunpack.i.l.bf16 %v1901_v12 }
 0x1d2   :  { %v1880_v34 = vrot.slane %v1879_v20, 4  ;;  %v13261_v15 = vmax.f32 %v1831_v49, %v1832_v14  ;;  %v1868_v23 = vmax.f32 %v1866_v46, %v1867_v2  ;;  %v1904_v60 = vunpack.i.h.bf16 %v1901_v12 }
 0x1d3   :  { %v1857_v33 = vmax.f32 %v1855_v19, %v1856_v16  ;;  %v13263_v17 = vmax.f32 %v1844_v25, %v1845_v50  ;;  %v1893_v22 = vrot.slane %v1892_v26, 4  ;;  %v1927_v43 = vsel %vm364_vm0, %v228_v31, 4286644096 }
 0x1d4   :  { %v4650_v39 = vld [vmem:[#allocation2 + $0x3c] sm:$0x1]  ;;  %v1881_v24 = vmax.f32 %v1879_v20, %v1880_v34  ;;  %v1834_v62 = vpack.i.bf16 %v13261_v15, %v13261_v15  ;;  %v1869_v53 = vrot.slane %v1868_v23, 2  ;;  %v1905_v55 = vmax.f32 %v1903_v56, %v1904_v60  ;;  %v231_v20 = vld [vmem:[#allocation4 + $0x7b] sm:$0x1] }
 0x1d5   :  { %v4778_v30 = vshll.u32 %v4650_v39, 16  ;;  %v1858_v13 = vrot.slane %v1857_v33, 1  ;;  %v4610_v0 = vld [vmem:[#allocation2 + $0x38] sm:$0xf]  ;;  %v1847_v38 = vpack.i.bf16 %v13263_v17, %v13263_v17  ;;  %v1894_v59 = vmax.f32 %v1892_v26, %v1893_v22  ;;  %v232_v34 = vld [vmem:[#allocation4 + $0x7c] sm:$0x1] }
 0x1d6   :  { %v4649_v47 = vld [vmem:[#allocation2 + $0x38] sm:$0xf]  ;;  %v1882_v21 = vrot.slane %v1881_v24, 2  ;;  %4626 = vst [vmem:[#allocation3 + $0xfc] sm:$0xf] %v4610_v0  ;;  %v1870_v41 = vmax.f32 %v1868_v23, %v1869_v53  ;;  %v1906_v57 = vrot.slane %v1905_v55, 4  ;;  %v1929_v37 = vunpack.i.l.bf16 %v1927_v43 }
 0x1d7   :  { %v4769_v29 = vshrl.u32 %v4649_v47, 16  ;;  %v4772_v1 = vshll.u32 %v4649_v47, 16  ;;  %v4780_v58 = vrot.slane %v4778_v30, 5  ;;  %v13270_v63 = vmax.f32 %v1857_v33, %v1858_v13  ;;  %v5095_v40 = vld [vmem:[#allocation2 + $0x38] sm:$0xf] }
 0x1d8   :  { %v1883_v8 = vmax.f32 %v1881_v24, %v1882_v21  ;;  %v1895_v10 = vrot.slane %v1894_v59, 2  ;;  %5111 = vst [vmem:[#allocation3 + $0xe4] sm:$0xf] %v5095_v40  ;;  %v1871_v5 = vrot.slane %v1870_v41, 1  ;;  %v1907_v52 = vmax.f32 %v1905_v55, %v1906_v57  ;;  %v233_v26 = vld [vmem:[#allocation4 + $0x7d] sm:$0x1] }
 0x1d9   :  { %v4771_v18 = vrot.slane %v4769_v29, 4  ;;  %v4774_v3 = vrot.slane %v4772_v1, 5  ;;  %v1860_v36 = vpack.i.bf16 %v13270_v63, %v13270_v63  ;;  %v1930_v28 = vunpack.i.h.bf16 %v1927_v43 }
 0x1da   :  { %v1884_v35 = vrot.slane %v1883_v8, 1  ;;  %v1896_v27 = vmax.f32 %v1894_v59, %v1895_v10  ;;  %v1940_v44 = vsel %vm364_vm0, %v229_v4, 4286644096  ;;  %v1953_v49 = vsel %vm364_vm0, %v230_v51, 4286644096 }
 0x1db   :  { %v4775_v61 = vor.u32 %v4774_v3, %v4771_v18  ;;  %v13276_v19 = vmax.f32 %v1870_v41, %v1871_v5  ;;  %v1908_v31 = vrot.slane %v1907_v52, 2  ;;  %v1931_v7 = vmax.f32 %v1929_v37, %v1930_v28  ;;  %v234_v59 = vld [vmem:[#allocation4 + $0x7e] sm:$0x1]  ;;  %v4938_v4 = vld [vmem:[#allocation2 + $0x30] sm:$0xe] }
 0x1dc   :  { %v13278_v46 = vmax.f32 %v1883_v8, %v1884_v35  ;;  %v1897_v32 = vrot.slane %v1896_v27, 1  ;;  %v1942_v11 = vunpack.i.l.bf16 %v1940_v44  ;;  %v1943_v14 = vunpack.i.h.bf16 %v1940_v44 }
 0x1dd   :  { %v4776_v25 = vrot.slane %v4775_v61, 4  ;;  %v1873_v16 = vpack.i.bf16 %v13276_v19, %v13276_v19  ;;  %v1909_v6 = vmax.f32 %v1907_v52, %v1908_v31  ;;  %v1932_v56 = vrot.slane %v1931_v7, 4  ;;  %v12162_v28 = vld [vmem:[#allocation3 + $0xd8] ss:$36 sps:$4 sm:$0xff]  }
 0x1de   :  { %v1886_v2 = vpack.i.bf16 %v13278_v46, %v13278_v46  ;;  %v13284_v12 = vmax.f32 %v1896_v27, %v1897_v32  ;;  %v1944_v33 = vmax.f32 %v1942_v11, %v1943_v14  ;;  %v1955_v23 = vunpack.i.l.bf16 %v1953_v49  ;;  %v4939_v27 = vld [vmem:[#allocation2 + $0x34] sm:$0x1] }
 0x1df   :  { %v4781_v50 = vsel %vm12658_vm12, %v4776_v25, %v4780_v58  ;;  %v1910_v54 = vrot.slane %v1909_v6, 1  ;;  %v1956_v39 = vunpack.i.h.bf16 %v1953_v49  ;;  %v1966_v24 = vsel %vm364_vm0, %v231_v20, 4286644096 }
 0x1e0   :  { %4917 = vst [vmem:[#allocation3 + $0x100] sm:$0xf] %v4781_v50  ;;  %v1899_v60 = vpack.i.bf16 %v13284_v12, %v13284_v12  ;;  %v1933_v22 = vmax.f32 %v1931_v7, %v1932_v56  ;;  %v1945_v43 = vrot.slane %v1944_v33, 4  ;;  %v1968_v30 = vunpack.i.l.bf16 %v1966_v24 }
 0x1e1   :  { %v1969_v13 = vunpack.i.h.bf16 %v1966_v24  ;;  %v13291_v53 = vmax.f32 %v1909_v6, %v1910_v54  ;;  %v1957_v0 = vmax.f32 %v1955_v23, %v1956_v39  ;;  %v1979_v47 = vsel %vm364_vm0, %v232_v34, 4286644096 }
 0x1e2   :  { %v1992_v21 = vsel %vm364_vm0, %v233_v26, 4286644096  ;;  %v1934_v55 = vrot.slane %v1933_v22, 2  ;;  %v1946_v29 = vmax.f32 %v1944_v33, %v1945_v43  ;;  %v1981_v58 = vunpack.i.l.bf16 %v1979_v47  ;;  %v4940_v43 = vld [vmem:[#allocation2 + $0x38] sm:$0xe] }
 0x1e3   :  { %v1970_v1 = vmax.f32 %v1968_v30, %v1969_v13  ;;  %v1912_v51 = vpack.i.bf16 %v13291_v53, %v13291_v53  ;;  %v1958_v41 = vrot.slane %v1957_v0, 4  ;;  %v1982_v8 = vunpack.i.h.bf16 %v1979_v47 }
 0x1e4   :  { %v1994_v10 = vunpack.i.l.bf16 %v1992_v21  ;;  %v1935_v57 = vmax.f32 %v1933_v22, %v1934_v55  ;;  %v1947_v40 = vrot.slane %v1946_v29, 2  ;;  %v1995_v3 = vunpack.i.h.bf16 %v1992_v21 }
 0x1e5   :  { %v1971_v18 = vrot.slane %v1970_v1, 4  ;;  %v1959_v37 = vmax.f32 %v1957_v0, %v1958_v41  ;;  %v1983_v5 = vmax.f32 %v1981_v58, %v1982_v8  ;;  %v2005_v35 = vsel %vm364_vm0, %v234_v59, 4286644096 }
 0x1e6   :  { %v11058_v52 = vrot.slane %v4938_v4, 9  ;;  %v1936_v44 = vrot.slane %v1935_v57, 1  ;;  %v1948_v49 = vmax.f32 %v1946_v29, %v1947_v40  ;;  %v1996_v31 = vmax.f32 %v1994_v10, %v1995_v3 }
 0x1e7   :  { %v12159_v61 = vld [vmem:[#allocation3 + $0xdc] ss:$36 sps:$4 sm:$0xff]   ;;  %v1972_v32 = vmax.f32 %v1970_v1, %v1971_v18  ;;  %v1960_v25 = vrot.slane %v1959_v37, 2  ;;  %v1984_v20 = vrot.slane %v1983_v5, 4  ;;  %v2007_v7 = vunpack.i.l.bf16 %v2005_v35 }
 0x1e8   :  { %v2008_v11 = vunpack.i.h.bf16 %v2005_v35  ;;  %7137 = vmatprep.mubr.bf16.mxu0 %v12159_v61  ;;  %v1937_v14 = vmax.f32 %v1935_v57, %v1936_v44  ;;  %v1949_v6 = vrot.slane %v1948_v49, 1  ;;  %v1997_v34 = vrot.slane %v1996_v31, 4  ;;  %v4941_v1 = vld [vmem:[#allocation2 + $0x3c] sm:$0x1] }
 0x1e9   :  { %v1973_v50 = vrot.slane %v1972_v32, 2  ;;  %7138 = vmatmul.mubr.bf16.gmra.mxu0 %v12162_v28  ;;  %v1961_v26 = vmax.f32 %v1959_v37, %v1960_v25  ;;  %v1985_v56 = vmax.f32 %v1983_v5, %v1984_v20  ;;  %v5019_v23 = vrot.slane %v4939_v27, 5  ;;  %v236_v27 = vld [vmem:[#allocation4 + $0x80] sm:$0x1]  ;;  %v237_v25 = vld [vmem:[#allocation4 + $0x81] sm:$0x1] }
 0x1ea   :  { %v2009_v33 = vmax.f32 %v2007_v7, %v2008_v11  ;;  %v1938_v54 = vpack.i.bf16 %v1937_v14, %v1937_v14  ;;  %v1950_v39 = vmax.f32 %v1948_v49, %v1949_v6  ;;  %v1998_v22 = vmax.f32 %v1996_v31, %v1997_v34 }
 0x1eb   :  { %v1974_v24 = vmax.f32 %v1972_v32, %v1973_v50  ;;  %v1962_v30 = vrot.slane %v1961_v26, 1  ;;  %v1986_v13 = vrot.slane %v1985_v56, 2  ;;  %v5020_v47 = vsel %vm12746_vm7, %v11058_v52, %v5019_v23 }
 0x1ec   :  { %v2010_v0 = vrot.slane %v2009_v33, 4  ;;  %v1951_v21 = vpack.i.bf16 %v1950_v39, %v1950_v39  ;;  %v1999_v55 = vrot.slane %v1998_v22, 2  ;;  %v3750_v29 = vmax.bf16 %v1938_v54, %v1834_v62  ;;  %5079 = vst [vmem:[#allocation3 + $0xe0] sm:$0xf] %v5020_v47 }
 0x1ed   :  { %v1975_v59 = vrot.slane %v1974_v24, 1  ;;  %v1963_v58 = vmax.f32 %v1961_v26, %v1962_v30  ;;  %v1987_v4 = vmax.f32 %v1985_v56, %v1986_v13  ;;  %v11059_v8 = vrot.slane %v4940_v43, 9  ;;  %v238_v56 = vld [vmem:[#allocation4 + $0x82] sm:$0x1]  ;;  %v239_v13 = vld [vmem:[#allocation4 + $0x83] sm:$0x1] }
 0x1ee   :  { %v2011_v41 = vmax.f32 %v2009_v33, %v2010_v0  ;;  %v2000_v57 = vmax.f32 %v1998_v22, %v1999_v55  ;;  %v3751_v40 = vmax.bf16 %v1951_v21, %v1847_v38  ;;  %v10964_v18 = vcombine.low %v3750_v29, %v3750_v29 }
 0x1ef   :  { %v1976_v10 = vmax.f32 %v1974_v24, %v1975_v59  ;;  %v1964_v3 = vpack.i.bf16 %v1963_v58, %v1963_v58  ;;  %v1988_v37 = vrot.slane %v1987_v4, 1  ;;  %v5023_v35 = vrot.slane %v4941_v1, 5  ;;  %v240_v1 = vld [vmem:[#allocation4 + $0x84] sm:$0x1]  ;;  %v241_v58 = vld [vmem:[#allocation4 + $0x85] sm:$0x1] }
 0x1f0   :  { %v2012_v5 = vrot.slane %v2011_v41, 2  ;;  %v2001_v62 = vrot.slane %v2000_v57, 1  ;;  %v10965_v52 = vcombine.low %v3751_v40, %v3751_v40  ;;  %v4262_v61 = vunpack.c.l.b16 %v10964_v18 }
 0x1f1   :  { %v1977_v15 = vpack.i.bf16 %v1976_v10, %v1976_v10  ;;  %v1989_v28 = vmax.f32 %v1987_v4, %v1988_v37  ;;  %v3752_v49 = vmax.bf16 %v1964_v3, %v1860_v36  ;;  %v5024_v17 = vsel %vm12746_vm7, %v11059_v8, %v5023_v35 }
 0x1f2   :  { %v2013_v44 = vmax.f32 %v2011_v41, %v2012_v5  ;;  %v2002_v38 = vmax.f32 %v2000_v57, %v2001_v62  ;;  %v4263_v31 = vunpack.c.l.b16 %v10965_v52  ;;  %5080 = vst [vmem:[#allocation3 + $0x104] sm:$0xf] %v5024_v17  ;;  %v2031_v20 = vsel %vm364_vm0, %v236_v27, 4286644096  ;;  %v242_v62 = vld [vmem:[#allocation4 + $0x86] sm:$0x1] }
 0x1f3   :  { %v3753_v32 = vmax.bf16 %v1977_v15, %v1873_v16  ;;  %v1990_v7 = vpack.i.bf16 %v1989_v28, %v1989_v28  ;;  %v10966_v14 = vcombine.low %v3752_v49, %v3752_v49  ;;  %v2033_v6 = vunpack.i.l.bf16 %v2031_v20  ;;  %v4549_v17 = vld [vmem:[#allocation2 + $0x40] sm:$0xf] }
 0x1f4   :  { %v2014_v11 = vrot.slane %v2013_v44, 1  ;;  %v2003_v50 = vpack.i.bf16 %v2002_v38, %v2002_v38  ;;  %v4382_v36 = vsel %vm4334_vm1, %v4263_v31, %v4262_v61  ;;  %v2034_v34 = vunpack.i.h.bf16 %v2031_v20 }
 0x1f5   :  { %v10967_v63 = vcombine.low %v3753_v32, %v3753_v32  ;;  %v3754_v19 = vmax.bf16 %v1990_v7, %v1886_v2  ;;  %v4264_v16 = vunpack.c.l.b16 %v10966_v14  ;;  %v2044_v33 = vsel %vm364_vm0, %v237_v25, 4286644096  ;;  %v12173_v14 = vld [vmem:[#allocation7 + $0x1f8] sm:$0xff]  }
 0x1f6   :  { %v2015_v26 = vmax.f32 %v2013_v44, %v2014_v11  ;;  %v3755_v23 = vmax.bf16 %v2003_v50, %v1899_v60  ;;  %v2035_v39 = vmax.f32 %v2033_v6, %v2034_v34  ;;  %v2046_v24 = vunpack.i.l.bf16 %v2044_v33  ;;  %v12174_v6 = vld [vmem:[#allocation7 + $0x1b8] sm:$0xff]   ;;  %v12175_v50 = vld [vmem:[#allocation7 + $0x1f0] sm:$0xff]   ;;  %11678 = vmatprep.subr.bf16.mxu1 %v12173_v14 }
 0x1f7   :  { %v4265_v54 = vunpack.c.l.b16 %v10967_v63  ;;  %v10968_v43 = vcombine.low %v3754_v19, %v3754_v19  ;;  %v4383_v30 = vsel %vm4336_vm2, %v4264_v16, %v4382_v36  ;;  %v2047_v0 = vunpack.i.h.bf16 %v2044_v33  ;;  %v243_v16 = vld [vmem:[#allocation4 + $0x87] sm:$0x1]  ;;  %11679 = vmatpush3.bf16.msra.mxu1 %v12174_v6 }
 0x1f8   :  { %v2016_v22 = vpack.i.bf16 %v2015_v26, %v2015_v26  ;;  %v10969_v47 = vcombine.low %v3755_v23, %v3755_v23  ;;  %v2036_v2 = vrot.slane %v2035_v39, 4  ;;  %v2057_v21 = vsel %vm364_vm0, %v238_v56, 4286644096  ;;  %11680 = vmatprep.subr.bf16.mxu1 %v12175_v50 }
 0x1f9   :  { %v4384_v46 = vsel %vm4338_vm3, %v4265_v54, %v4383_v30  ;;  %v4266_v60 = vunpack.c.l.b16 %v10968_v43  ;;  %v2048_v59 = vmax.f32 %v2046_v24, %v2047_v0  ;;  %v2059_v55 = vunpack.i.l.bf16 %v2057_v21 }
 0x1fa   :  { %v3756_v12 = vmax.bf16 %v2016_v22, %v1912_v51  ;;  %v4267_v29 = vunpack.c.l.b16 %v10969_v47  ;;  %v2037_v4 = vmax.f32 %v2035_v39, %v2036_v2  ;;  %v2060_v41 = vunpack.i.h.bf16 %v2057_v21  ;;  %v244_v47 = vld [vmem:[#allocation4 + $0x88] sm:$0x1] }
 0x1fb   :  { %v2070_v8 = vsel %vm364_vm0, %v239_v13, 4286644096  ;;  %v4385_v57 = vsel %vm4340_vm4, %v4266_v60, %v4384_v46  ;;  %v2049_v40 = vrot.slane %v2048_v59, 4  ;;  %v2083_v27 = vsel %vm364_vm0, %v240_v1, 4286644096 }
 0x1fc   :  { %v10970_v10 = vcombine.low %v3756_v12, %v3756_v12  ;;  %v2072_v18 = vunpack.i.l.bf16 %v2070_v8  ;;  %v4386_v3 = vsel %vm4342_vm5, %v4267_v29, %v4385_v57  ;;  %v2038_v37 = vrot.slane %v2037_v4, 2 }
 0x1fd   :  { %v2061_v53 = vmax.f32 %v2059_v55, %v2060_v41  ;;  %v2073_v51 = vunpack.i.h.bf16 %v2070_v8  ;;  %v2050_v35 = vmax.f32 %v2048_v59, %v2049_v40  ;;  %v2096_v15 = vsel %vm364_vm0, %v241_v58, 4286644096  ;;  %v245_v8 = vld [vmem:[#allocation4 + $0x89] sm:$0x1] }
 0x1fe   :  { %v4268_v5 = vunpack.c.l.b16 %v10970_v10  ;;  %v2039_v52 = vmax.f32 %v2037_v4, %v2038_v37  ;;  %v2085_v44 = vunpack.i.l.bf16 %v2083_v27  ;;  %v2086_v32 = vunpack.i.h.bf16 %v2083_v27 }
 0x1ff   :  { %v2062_v61 = vrot.slane %v2061_v53, 4  ;;  %v2074_v28 = vmax.f32 %v2072_v18, %v2073_v51  ;;  %v2051_v38 = vrot.slane %v2050_v35, 2  ;;  %v2098_v31 = vunpack.i.l.bf16 %v2096_v15 }
 0x200   :  { %v4387_v49 = vsel %vm4344_vm10, %v4268_v5, %v4386_v3  ;;  %v2040_v20 = vrot.slane %v2039_v52, 1  ;;  %v2087_v36 = vmax.f32 %v2085_v44, %v2086_v32  ;;  %v2099_v34 = vunpack.i.h.bf16 %v2096_v15 }
 0x201   :  { %v4450_v25 = vpack.c.b16 %v4387_v49, %v4387_v49  ;;  %v2063_v7 = vmax.f32 %v2061_v53, %v2062_v61  ;;  %v2075_v11 = vrot.slane %v2074_v28, 4  ;;  %v2052_v63 = vmax.f32 %v2050_v35, %v2051_v38  ;;  %v246_v35 = vld [vmem:[#allocation4 + $0x8a] sm:$0x1]  ;;  %v247_v61 = vld [vmem:[#allocation4 + $0x8b] sm:$0x1] }
 0x202   :  { %v2109_v26 = vsel %vm364_vm0, %v242_v62, 4286644096  ;;  %v13338_v56 = vmax.f32 %v2039_v52, %v2040_v20  ;;  %v2088_v39 = vrot.slane %v2087_v36, 4  ;;  %v2100_v24 = vmax.f32 %v2098_v31, %v2099_v34 }
 0x203   :  { %v4550_v19 = vsel %vm12666_vm13, %v4450_v25, %v4549_v17  ;;  %v2064_v33 = vrot.slane %v2063_v7, 2  ;;  %v2076_v23 = vmax.f32 %v2074_v28, %v2075_v11  ;;  %v2053_v54 = vrot.slane %v2052_v63, 1 }
 0x204   :  { %4551 = vst [vmem:[#allocation2 + $0x40] sm:$0xf] %v4550_v19  ;;  %v2111_v22 = vunpack.i.l.bf16 %v2109_v26  ;;  %v2042_v43 = vpack.i.bf16 %v13338_v56, %v13338_v56  ;;  %v2112_v0 = vunpack.i.h.bf16 %v2109_v26  ;;  %v2089_v2 = vmax.f32 %v2087_v36, %v2088_v39 }
 0x205   :  { %v2065_v30 = vmax.f32 %v2063_v7, %v2064_v33  ;;  %v2077_v13 = vrot.slane %v2076_v23, 2  ;;  %v13342_v46 = vmax.f32 %v2052_v63, %v2053_v54  ;;  %v2101_v21 = vrot.slane %v2100_v24, 4  ;;  %v248_v33 = vld [vmem:[#allocation4 + $0x8c] sm:$0x1] }
 0x206   :  { %v2122_v12 = vsel %vm364_vm0, %v243_v16, 4286644096  ;;  %v2113_v55 = vmax.f32 %v2111_v22, %v2112_v0  ;;  %v2090_v58 = vrot.slane %v2089_v2, 2  ;;  %v2135_v18 = vsel %vm364_vm0, %v244_v47, 4286644096 }
 0x207   :  { %v2066_v60 = vrot.slane %v2065_v30, 1  ;;  %v2078_v59 = vmax.f32 %v2076_v23, %v2077_v13  ;;  %v2124_v29 = vunpack.i.l.bf16 %v2122_v12  ;;  %v2055_v1 = vpack.i.bf16 %v13342_v46, %v13342_v46  ;;  %v249_v23 = vld [vmem:[#allocation4 + $0x8d] sm:$0x1] }
 0x208   :  { %v2102_v4 = vmax.f32 %v2100_v24, %v2101_v21  ;;  %v2125_v41 = vunpack.i.h.bf16 %v2122_v12  ;;  %v2114_v40 = vrot.slane %v2113_v55, 4  ;;  %v2091_v3 = vmax.f32 %v2089_v2, %v2090_v58  ;;  %v12166_v21 = vld [vmem:[#allocation3 + $0xe0] ss:$36 sps:$4 sm:$0xff]  }
 0x209   :  { %v13347_v10 = vmax.f32 %v2065_v30, %v2066_v60  ;;  %v2079_v57 = vrot.slane %v2078_v59, 1  ;;  %v2137_v51 = vunpack.i.l.bf16 %v2135_v18  ;;  %v2138_v52 = vunpack.i.h.bf16 %v2135_v18 }
 0x20a   :  { %v2103_v37 = vrot.slane %v2102_v4, 2  ;;  %v2126_v53 = vmax.f32 %v2124_v29, %v2125_v41  ;;  %v2115_v62 = vmax.f32 %v2113_v55, %v2114_v40  ;;  %v2092_v28 = vrot.slane %v2091_v3, 1 }
 0x20b   :  { %v5096_v5 = vld [vmem:[#allocation2 + $0x40] sm:$0xf]  ;;  %v2068_v27 = vpack.i.bf16 %v13347_v10, %v13347_v10  ;;  %v13352_v15 = vmax.f32 %v2078_v59, %v2079_v57  ;;  %v2148_v17 = vsel %vm364_vm0, %v245_v8, 4286644096  ;;  %v2139_v31 = vmax.f32 %v2137_v51, %v2138_v52 }
 0x20c   :  { %5112 = vst [vmem:[#allocation3 + $0x108] sm:$0xf] %v5096_v5  ;;  %v2104_v44 = vmax.f32 %v2102_v4, %v2103_v37  ;;  %v2127_v49 = vrot.slane %v2126_v53, 4  ;;  %v2116_v32 = vrot.slane %v2115_v62, 2  ;;  %v2150_v25 = vunpack.i.l.bf16 %v2148_v17 }
 0x20d   :  { %v2081_v38 = vpack.i.bf16 %v13352_v15, %v13352_v15  ;;  %v13357_v20 = vmax.f32 %v2091_v3, %v2092_v28  ;;  %v2151_v14 = vunpack.i.h.bf16 %v2148_v17  ;;  %v2140_v50 = vrot.slane %v2139_v31, 4  ;;  %v250_v3 = vld [vmem:[#allocation4 + $0x8e] sm:$0x1] }
 0x20e   :  { %v2105_v7 = vrot.slane %v2104_v44, 1  ;;  %v2128_v11 = vmax.f32 %v2126_v53, %v2127_v49  ;;  %v2117_v6 = vmax.f32 %v2115_v62, %v2116_v32  ;;  %v2161_v63 = vsel %vm364_vm0, %v246_v35, 4286644096  ;;  %v251_v32 = vld [vmem:[#allocation4 + $0x8f] sm:$0x1] }
 0x20f   :  { %v2174_v36 = vsel %vm364_vm0, %v247_v61, 4286644096  ;;  %v2094_v34 = vpack.i.bf16 %v13357_v20, %v13357_v20  ;;  %v2152_v16 = vmax.f32 %v2150_v25, %v2151_v14  ;;  %v2141_v39 = vmax.f32 %v2139_v31, %v2140_v50 }
 0x210   :  { %v13363_v26 = vmax.f32 %v2104_v44, %v2105_v7  ;;  %v2129_v19 = vrot.slane %v2128_v11, 2  ;;  %v2118_v54 = vrot.slane %v2117_v6, 1  ;;  %v2163_v24 = vunpack.i.l.bf16 %v2161_v63 }
 0x211   :  { %v2164_v22 = vunpack.i.h.bf16 %v2161_v63  ;;  %v2153_v0 = vrot.slane %v2152_v16, 4  ;;  %v2176_v47 = vunpack.i.l.bf16 %v2174_v36  ;;  %v2142_v60 = vrot.slane %v2141_v39, 2 }
 0x212   :  { %v2107_v30 = vpack.i.bf16 %v13363_v26, %v13363_v26  ;;  %v2130_v13 = vmax.f32 %v2128_v11, %v2129_v19  ;;  %v13367_v12 = vmax.f32 %v2117_v6, %v2118_v54  ;;  %v2177_v55 = vunpack.i.h.bf16 %v2174_v36 }
 0x213   :  { %v12164_v2 = vld [vmem:[#allocation3 + $0xe4] ss:$36 sps:$4 sm:$0xff]   ;;  %v2165_v59 = vmax.f32 %v2163_v24, %v2164_v22  ;;  %v2154_v58 = vmax.f32 %v2152_v16, %v2153_v0  ;;  %v2187_v4 = vsel %vm364_vm0, %v248_v33, 4286644096  ;;  %v2200_v41 = vsel %vm364_vm0, %v249_v23, 4286644096 }
 0x214   :  { %v2131_v29 = vrot.slane %v2130_v13, 1  ;;  %7234 = vmatprep.mubr.bf16.mxu1 %v12164_v2  ;;  %v2120_v8 = vpack.i.bf16 %v13367_v12, %v13367_v12  ;;  %v2143_v57 = vmax.f32 %v2141_v39, %v2142_v60  ;;  %v2178_v18 = vmax.f32 %v2176_v47, %v2177_v55 }
 0x215   :  { %v2166_v40 = vrot.slane %v2165_v59, 4  ;;  %7235 = vmatmul.mubr.bf16.gmra.mxu1 %v12166_v21  ;;  %v2155_v53 = vrot.slane %v2154_v58, 2  ;;  %v2189_v51 = vunpack.i.l.bf16 %v2187_v4  ;;  %v2190_v5 = vunpack.i.h.bf16 %v2187_v4 }
 0x216   :  { %v13373_v37 = vmax.f32 %v2130_v13, %v2131_v29  ;;  %v2144_v35 = vrot.slane %v2143_v57, 1  ;;  %v2179_v52 = vrot.slane %v2178_v18, 4  ;;  %v2202_v61 = vunpack.i.l.bf16 %v2200_v41 }
 0x217   :  { %v2167_v62 = vmax.f32 %v2165_v59, %v2166_v40  ;;  %v2156_v44 = vmax.f32 %v2154_v58, %v2155_v53  ;;  %v2191_v49 = vmax.f32 %v2189_v51, %v2190_v5  ;;  %v2203_v17 = vunpack.i.h.bf16 %v2200_v41 }
 0x218   :  { %v2133_v28 = vpack.i.bf16 %v13373_v37, %v13373_v37  ;;  %v2145_v31 = vmax.f32 %v2143_v57, %v2144_v35  ;;  %v2180_v7 = vmax.f32 %v2178_v18, %v2179_v52  ;;  %v2213_v11 = vsel %vm364_vm0, %v250_v3, 4286644096 }
 0x219   :  { %v2168_v25 = vrot.slane %v2167_v62, 2  ;;  %v2157_v14 = vrot.slane %v2156_v44, 1  ;;  %v2192_v6 = vrot.slane %v2191_v49, 4  ;;  %v2204_v50 = vmax.f32 %v2202_v61, %v2203_v17 }
 0x21a   :  { %v2215_v63 = vunpack.i.l.bf16 %v2213_v11  ;;  %v2146_v36 = vpack.i.bf16 %v2145_v31, %v2145_v31  ;;  %v2181_v16 = vrot.slane %v2180_v7, 2  ;;  %v2216_v33 = vunpack.i.h.bf16 %v2213_v11 }
 0x21b   :  { %v2169_v19 = vmax.f32 %v2167_v62, %v2168_v25  ;;  %v2158_v23 = vmax.f32 %v2156_v44, %v2157_v14  ;;  %v2193_v54 = vmax.f32 %v2191_v49, %v2192_v6  ;;  %v2205_v39 = vrot.slane %v2204_v50, 4  ;;  %v4651_v44 = vld [vmem:[#allocation2 + $0x50] sm:$0xf] }
 0x21c   :  { %v2226_v24 = vsel %vm364_vm0, %v251_v32, 4286644096  ;;  %v2182_v13 = vmax.f32 %v2180_v7, %v2181_v16  ;;  %v2217_v0 = vmax.f32 %v2215_v63, %v2216_v33  ;;  %v3758_v4 = vmax.bf16 %v2146_v36, %v2042_v43 }
 0x21d   :  { %v2170_v22 = vrot.slane %v2169_v19, 1  ;;  %v2228_v47 = vunpack.i.l.bf16 %v2226_v24  ;;  %v2159_v2 = vpack.i.bf16 %v2158_v23, %v2158_v23  ;;  %v2194_v21 = vrot.slane %v2193_v54, 2 }
 0x21e   :  { %v2206_v60 = vmax.f32 %v2204_v50, %v2205_v39  ;;  %v2229_v59 = vunpack.i.h.bf16 %v2226_v24  ;;  %v2183_v29 = vrot.slane %v2182_v13, 1  ;;  %v2218_v58 = vrot.slane %v2217_v0, 4 }
 0x21f   :  { %v2171_v55 = vmax.f32 %v2169_v19, %v2170_v22  ;;  %v2195_v41 = vmax.f32 %v2193_v54, %v2194_v21  ;;  %v3759_v18 = vmax.bf16 %v2159_v2, %v2055_v1  ;;  %v10972_v5 = vcombine.low %v3758_v4, %v3758_v4  ;;  %v4652_v19 = vld [vmem:[#allocation2 + $0x54] sm:$0x1] }
 0x220   :  { %v2207_v57 = vrot.slane %v2206_v60, 2  ;;  %v2230_v40 = vmax.f32 %v2228_v47, %v2229_v59  ;;  %v2184_v53 = vmax.f32 %v2182_v13, %v2183_v29  ;;  %v2219_v51 = vmax.f32 %v2217_v0, %v2218_v58  ;;  %v7951_v59 = vld [vmem:[#allocation2 + $0x54] sm:$0x1] }
 0x221   :  { %v2172_v3 = vpack.i.bf16 %v2171_v55, %v2171_v55  ;;  %v2196_v35 = vrot.slane %v2195_v41, 1  ;;  %v10973_v61 = vcombine.low %v3759_v18, %v3759_v18  ;;  %v4270_v43 = vunpack.c.l.b16 %v10972_v5 }
 0x222   :  { %v2208_v62 = vmax.f32 %v2206_v60, %v2207_v57  ;;  %v2231_v52 = vrot.slane %v2230_v40, 4  ;;  %v2185_v49 = vpack.i.bf16 %v2184_v53, %v2184_v53  ;;  %v2220_v17 = vrot.slane %v2219_v51, 2 }
 0x223   :  { %v3760_v56 = vmax.bf16 %v2172_v3, %v2068_v27  ;;  %v2197_v32 = vmax.f32 %v2195_v41, %v2196_v35  ;;  %v4271_v1 = vunpack.c.l.b16 %v10973_v61  ;;  %v4783_v14 = vshrl.u32 %v4651_v44, 16 }
 0x224   :  { %v2209_v31 = vrot.slane %v2208_v62, 1  ;;  %v2232_v46 = vmax.f32 %v2230_v40, %v2231_v52  ;;  %v2221_v25 = vmax.f32 %v2219_v51, %v2220_v17  ;;  %v3761_v7 = vmax.bf16 %v2185_v49, %v2081_v38  ;;  %v7950_v38 = vld [vmem:[#allocation2 + $0x50] sm:$0xf] }
 0x225   :  { %v10974_v11 = vcombine.low %v3760_v56, %v3760_v56  ;;  %v2198_v6 = vpack.i.bf16 %v2197_v32, %v2197_v32  ;;  %v4388_v36 = vsel %vm4334_vm1, %v4271_v1, %v4270_v43  ;;  %v4785_v33 = vrot.slane %v4783_v14, 4  ;;  %v252_v40 = vld [vmem:[#allocation4 + $0x90] sm:$0x1]  ;;  %v254_v49 = vld [vmem:[#allocation4 + $0x92] sm:$0x1] }
 0x226   :  { %v2210_v50 = vmax.f32 %v2208_v62, %v2209_v31  ;;  %v2233_v63 = vrot.slane %v2232_v46, 2  ;;  %v2222_v10 = vrot.slane %v2221_v25, 1  ;;  %v10975_v27 = vcombine.low %v3761_v7, %v3761_v7  ;;  %v253_v62 = vld [vmem:[#allocation4 + $0x91] sm:$0x1]  ;;  %v4558_v31 = vld [vmem:[#allocation2 + $0x5c] sm:$0x1] }
 0x227   :  { %v4272_v16 = vunpack.c.l.b16 %v10974_v11  ;;  %v3762_v39 = vmax.bf16 %v2198_v6, %v2094_v34  ;;  %v4786_v15 = vshll.u32 %v4651_v44, 16  ;;  %v4792_v0 = vshll.u32 %v4652_v19, 16  ;;  %v255_v11 = vld [vmem:[#allocation4 + $0x93] sm:$0x1]  ;;  %v256_v14 = vld [vmem:[#allocation4 + $0x94] sm:$0x1] }
 0x228   :  { %v2211_v23 = vpack.i.bf16 %v2210_v50, %v2210_v50  ;;  %v2234_v54 = vmax.f32 %v2232_v46, %v2233_v63  ;;  %v2223_v24 = vmax.f32 %v2221_v25, %v2222_v10  ;;  %v4273_v22 = vunpack.c.l.b16 %v10975_v27  ;;  %v4555_v63 = vld [vmem:[#allocation2 + $0x58] sm:$0xf] }
 0x229   :  { %v4389_v13 = vsel %vm4336_vm2, %v4272_v16, %v4388_v36  ;;  %v10976_v21 = vcombine.low %v3762_v39, %v3762_v39  ;;  %v4788_v60 = vrot.slane %v4786_v15, 5  ;;  %v4794_v20 = vrot.slane %v4792_v0, 5 }
 0x22a   :  { %v2235_v47 = vrot.slane %v2234_v54, 1  ;;  %v3763_v2 = vmax.bf16 %v2211_v23, %v2107_v30  ;;  %v2224_v55 = vpack.i.bf16 %v2223_v24, %v2223_v24  ;;  %v4390_v29 = vsel %vm4338_vm3, %v4273_v22, %v4389_v13  ;;  %v258_v23 = vld [vmem:[#allocation4 + $0x96] sm:$0x1] }
 0x22b   :  { %v8079_v34 = vshrl.u32 %v7950_v38, 16  ;;  %v4274_v41 = vunpack.c.l.b16 %v10976_v21  ;;  %v4789_v57 = vor.u32 %v4788_v60, %v4785_v33  ;;  %v8082_v26 = vshll.u32 %v7950_v38, 16  ;;  %v257_v33 = vld [vmem:[#allocation4 + $0x95] sm:$0x1] }
 0x22c   :  { %v2236_v58 = vmax.f32 %v2234_v54, %v2235_v47  ;;  %v10977_v4 = vcombine.low %v3763_v2, %v3763_v2  ;;  %v3764_v18 = vmax.bf16 %v2224_v55, %v2120_v8  ;;  %v8088_v30 = vshll.u32 %v7951_v59, 16 }
 0x22d   :  { %v8081_v3 = vrot.slane %v8079_v34, 4  ;;  %v4391_v5 = vsel %vm4340_vm4, %v4274_v41, %v4390_v29  ;;  %v4790_v35 = vrot.slane %v4789_v57, 4  ;;  %v8084_v61 = vrot.slane %v8082_v26, 5 }
 0x22e   :  { %v2237_v53 = vpack.i.bf16 %v2236_v58, %v2236_v58  ;;  %v4275_v51 = vunpack.c.l.b16 %v10977_v4  ;;  %v10978_v52 = vcombine.low %v3764_v18, %v3764_v18  ;;  %v13404_v44 = vrot.slane %v8088_v30, 5  ;;  %v260_v4 = vld [vmem:[#allocation4 + $0x98] sm:$0x1] }
 0x22f   :  { %v2239_v17 = vsel %vm364_vm0, %v252_v40, 4286644096  ;;  %v4795_v56 = vsel %vm12658_vm12, %v4790_v35, %v4794_v20  ;;  %v8085_v46 = vor.u32 %v8084_v61, %v8081_v3  ;;  %v2252_v25 = vsel %vm364_vm0, %v253_v62, 4286644096 }
 0x230   :  { %v3765_v12 = vmax.bf16 %v2237_v53, %v2133_v28  ;;  %v4392_v8 = vsel %vm4342_vm5, %v4275_v51, %v4391_v5  ;;  %v2241_v43 = vunpack.i.l.bf16 %v2239_v17  ;;  %v4276_v32 = vunpack.c.l.b16 %v10978_v52  ;;  %4918 = vst [vmem:[#allocation3 + $0x124] sm:$0xf] %v4795_v56 }
 0x231   :  { %v2242_v1 = vunpack.i.h.bf16 %v2239_v17  ;;  %v2254_v6 = vunpack.i.l.bf16 %v2252_v25  ;;  %v2255_v50 = vunpack.i.h.bf16 %v2252_v25  ;;  %v2265_v37 = vsel %vm364_vm0, %v254_v49, 4286644096 }
 0x232   :  { %v11462_v7 = vcombine.low %v3765_v12, %v3765_v12  ;;  %v4393_v28 = vsel %vm4344_vm10, %v4276_v32, %v4392_v8  ;;  %v13416_v36 = vrot.slane %v8085_v46, 4  ;;  %v2267_v10 = vunpack.i.l.bf16 %v2265_v37 }
 0x233   :  { %v2243_v19 = vmax.f32 %v2241_v43, %v2242_v1  ;;  %v4452_v27 = vpack.c.b16 %v4393_v28, %v4393_v28  ;;  %v2256_v54 = vmax.f32 %v2254_v6, %v2255_v50  ;;  %v2268_v39 = vunpack.i.h.bf16 %v2265_v37 }
 0x234   :  { %v4559_v16 = vsel %vm12680_vm14, %v11462_v7, %v4558_v31  ;;  %v8091_v15 = vsel %vm12658_vm12, %v13416_v36, %v13404_v44  ;;  %v2278_v24 = vsel %vm364_vm0, %v255_v11, 4286644096  ;;  %v2291_v22 = vsel %vm364_vm0, %v256_v14, 4286644096 }
 0x235   :  { %4560 = vst [vmem:[#allocation2 + $0x5c] sm:$0x1] %v4559_v16  ;;  %v2244_v38 = vrot.slane %v2243_v19, 4  ;;  %v4556_v13 = vsel %vm12666_vm13, %v4452_v27, %v4555_v63  ;;  %v2257_v0 = vrot.slane %v2256_v54, 4  ;;  %v2269_v47 = vmax.f32 %v2267_v10, %v2268_v39  ;;  %v12179_v39 = vld [vmem:[#allocation7 + $0x1b0] sm:$0xff]  }
 0x236   :  { %v2280_v2 = vunpack.i.l.bf16 %v2278_v24  ;;  %4557 = vst [vmem:[#allocation2 + $0x58] sm:$0xf] %v4556_v13  ;;  %v2281_v60 = vunpack.i.h.bf16 %v2278_v24  ;;  %v2293_v59 = vunpack.i.l.bf16 %v2291_v22  ;;  %v2294_v55 = vunpack.i.h.bf16 %v2291_v22  ;;  %11681 = vmatpush3.bf16.msra.mxu1 %v12179_v39 }
 0x237   :  { %v2245_v21 = vmax.f32 %v2243_v19, %v2244_v38  ;;  %v2258_v29 = vmax.f32 %v2256_v54, %v2257_v0  ;;  %v2270_v20 = vrot.slane %v2269_v47, 4  ;;  %v2304_v34 = vsel %vm364_vm0, %v257_v33, 4286644096  ;;  %v261_v38 = vld [vmem:[#allocation4 + $0x99] sm:$0x1] }
 0x238   :  { %v2317_v58 = vsel %vm364_vm0, %v258_v23, 4286644096  ;;  %v2282_v57 = vmax.f32 %v2280_v2, %v2281_v60  ;;  %v2295_v40 = vmax.f32 %v2293_v59, %v2294_v55  ;;  %v2306_v18 = vunpack.i.l.bf16 %v2304_v34  ;;  %v12178_v59 = vld [vmem:[#allocation7 + $0x150] sm:$0xff]  }
 0x239   :  { %v2246_v41 = vrot.slane %v2245_v21, 2  ;;  %v2259_v3 = vrot.slane %v2258_v29, 2  ;;  %v2271_v26 = vmax.f32 %v2269_v47, %v2270_v20  ;;  %v2307_v30 = vunpack.i.h.bf16 %v2304_v34  ;;  %11624 = vmatprep.subr.bf16.mxu0 %v12178_v59 }
 0x23a   :  { %v2319_v53 = vunpack.i.l.bf16 %v2317_v58  ;;  %v2283_v5 = vrot.slane %v2282_v57, 4  ;;  %v2296_v35 = vrot.slane %v2295_v40, 4  ;;  %v2320_v62 = vunpack.i.h.bf16 %v2317_v58  ;;  %v12181_v58 = vld [vmem:[#allocation7 + $0x110] sm:$0xff]  }
 0x23b   :  { %v2247_v51 = vmax.f32 %v2245_v21, %v2246_v41  ;;  %v2260_v61 = vmax.f32 %v2258_v29, %v2259_v3  ;;  %v2272_v49 = vrot.slane %v2271_v26, 2  ;;  %v2308_v17 = vmax.f32 %v2306_v18, %v2307_v30  ;;  %v262_v41 = vld [vmem:[#allocation4 + $0x9a] sm:$0x1]  ;;  %11625 = vmatpush3.bf16.msra.mxu0 %v12181_v58 }
 0x23c   :  { %v4654_v52 = vld [vmem:[#allocation2 + $0x5c] sm:$0x1]  ;;  %v2343_v12 = vsel %vm364_vm0, %v260_v4, 4286644096  ;;  %v2284_v43 = vmax.f32 %v2282_v57, %v2283_v5  ;;  %v2297_v32 = vmax.f32 %v2295_v40, %v2296_v35  ;;  %v2321_v11 = vmax.f32 %v2319_v53, %v2320_v62  ;;  %v263_v5 = vld [vmem:[#allocation4 + $0x9b] sm:$0x1] }
 0x23d   :  { %v4806_v8 = vshll.u32 %v4654_v52, 16  ;;  %v2248_v56 = vrot.slane %v2247_v51, 1  ;;  %v4612_v31 = vld [vmem:[#allocation2 + $0x58] sm:$0xf]  ;;  %v2261_v1 = vrot.slane %v2260_v61, 1  ;;  %v2273_v25 = vmax.f32 %v2271_v26, %v2272_v49 }
 0x23e   :  { %v4653_v46 = vld [vmem:[#allocation2 + $0x58] sm:$0xf]  ;;  %v2309_v7 = vrot.slane %v2308_v17, 4  ;;  %4628 = vst [vmem:[#allocation3 + $0x144] sm:$0xf] %v4612_v31  ;;  %v2285_v19 = vrot.slane %v2284_v43, 2  ;;  %v2345_v60 = vunpack.i.l.bf16 %v2343_v12  ;;  %v2346_v34 = vunpack.i.h.bf16 %v2343_v12 }
 0x23f   :  { %v4797_v14 = vshrl.u32 %v4653_v46, 16  ;;  %v4800_v6 = vshll.u32 %v4653_v46, 16  ;;  %v4808_v50 = vrot.slane %v4806_v8, 5  ;;  %v13431_v37 = vmax.f32 %v2247_v51, %v2248_v56  ;;  %v5097_v27 = vld [vmem:[#allocation2 + $0x58] sm:$0xf] }
 0x240   :  { %v13433_v28 = vmax.f32 %v2260_v61, %v2261_v1  ;;  %v2274_v63 = vrot.slane %v2273_v25, 1  ;;  %v2298_v10 = vrot.slane %v2297_v32, 2  ;;  %v2310_v54 = vmax.f32 %v2308_v17, %v2309_v7  ;;  %5113 = vst [vmem:[#allocation3 + $0x12c] sm:$0xf] %v5097_v27  ;;  %v264_v35 = vld [vmem:[#allocation4 + $0x9c] sm:$0x1] }
 0x241   :  { %v4799_v16 = vrot.slane %v4797_v14, 4  ;;  %v4802_v33 = vrot.slane %v4800_v6, 5  ;;  %v2250_v23 = vpack.i.bf16 %v13431_v37, %v13431_v37  ;;  %v2286_v13 = vmax.f32 %v2284_v43, %v2285_v19  ;;  %v265_v46 = vld [vmem:[#allocation4 + $0x9d] sm:$0x1] }
 0x242   :  { %v2263_v24 = vpack.i.bf16 %v13433_v28, %v13433_v28  ;;  %v13439_v22 = vmax.f32 %v2273_v25, %v2274_v63  ;;  %v2299_v0 = vmax.f32 %v2297_v32, %v2298_v10  ;;  %v2311_v2 = vrot.slane %v2310_v54, 2 }
 0x243   :  { %v4803_v47 = vor.u32 %v4802_v33, %v4799_v16  ;;  %v2322_v21 = vrot.slane %v2321_v11, 4  ;;  %v2287_v29 = vrot.slane %v2286_v13, 1  ;;  %v2356_v18 = vsel %vm364_vm0, %v261_v38, 4286644096  ;;  %v6090_v33 = vld [vmem:[#allocation3 + $0x120] sm:$0xff] }
 0x244   :  { %v2276_v55 = vpack.i.bf16 %v13439_v22, %v13439_v22  ;;  %v2300_v20 = vrot.slane %v2299_v0, 1  ;;  %v2312_v57 = vmax.f32 %v2310_v54, %v2311_v2  ;;  %v2347_v30 = vmax.f32 %v2345_v60, %v2346_v34  ;;  %v7910_v54 = vld [vmem:[#allocation2 + $0x50] sm:$0xf] }
 0x245   :  { %v4804_v4 = vrot.slane %v4803_v47, 4  ;;  %v2323_v40 = vmax.f32 %v2321_v11, %v2322_v21  ;;  %v13444_v3 = vmax.f32 %v2286_v13, %v2287_v29  ;;  %v2358_v53 = vunpack.i.l.bf16 %v2356_v18  ;;  %v266_v47 = vld [vmem:[#allocation4 + $0x9e] sm:$0x1]  ;;  %7926 = vst [vmem:[#allocation3 + $0x120] sm:$0xf] %v7910_v54 }
 0x246   :  { %v13446_v26 = vmax.f32 %v2299_v0, %v2300_v20  ;;  %v2313_v62 = vrot.slane %v2312_v57, 1  ;;  %v2359_v61 = vunpack.i.h.bf16 %v2356_v18  ;;  %v2348_v12 = vrot.slane %v2347_v30, 4 }
 0x247   :  { %v4809_v51 = vsel %vm12658_vm12, %v4804_v4, %v4808_v50  ;;  %v2324_v52 = vrot.slane %v2323_v40, 2  ;;  %v2289_v49 = vpack.i.bf16 %v13444_v3, %v13444_v3  ;;  %v2369_v8 = vsel %vm364_vm0, %v262_v41, 4286644096 }
 0x248   :  { %4919 = vst [vmem:[#allocation3 + $0x148] sm:$0xf] %v4809_v51  ;;  %v2302_v17 = vpack.i.bf16 %v13446_v26, %v13446_v26  ;;  %v13455_v56 = vmax.f32 %v2312_v57, %v2313_v62  ;;  %v2360_v32 = vmax.f32 %v2358_v53, %v2359_v61  ;;  %v2371_v31 = vunpack.i.l.bf16 %v2369_v8  ;;  %v4942_v62 = vld [vmem:[#allocation2 + $0x50] sm:$0xe]  ;;  %v268_v26 = vld [vmem:[#allocation4 + $0xa0] sm:$0x1] }
 0x249   :  { %v2325_v43 = vmax.f32 %v2323_v40, %v2324_v52  ;;  %v2349_v1 = vmax.f32 %v2347_v30, %v2348_v12  ;;  %v2372_v25 = vunpack.i.h.bf16 %v2369_v8  ;;  %v2382_v7 = vsel %vm364_vm0, %v263_v5, 4286644096 }
 0x24a   :  { %v2395_v11 = vsel %vm364_vm0, %v264_v35, 4286644096  ;;  %v2315_v14 = vpack.i.bf16 %v13455_v56, %v13455_v56  ;;  %v2361_v50 = vrot.slane %v2360_v32, 4  ;;  %v2384_v63 = vunpack.i.l.bf16 %v2382_v7 }
 0x24b   :  { %v2326_v6 = vrot.slane %v2325_v43, 1  ;;  %v2350_v19 = vrot.slane %v2349_v1, 2  ;;  %v2373_v10 = vmax.f32 %v2371_v31, %v2372_v25  ;;  %v2385_v27 = vunpack.i.h.bf16 %v2382_v7 }
 0x24c   :  { %v2397_v16 = vunpack.i.l.bf16 %v2395_v11  ;;  %v2362_v38 = vmax.f32 %v2360_v32, %v2361_v50  ;;  %v2398_v13 = vunpack.i.h.bf16 %v2395_v11  ;;  %v2408_v0 = vsel %vm364_vm0, %v265_v46, 4286644096 }
 0x24d   :  { %v13461_v39 = vmax.f32 %v2325_v43, %v2326_v6  ;;  %v2351_v2 = vmax.f32 %v2349_v1, %v2350_v19  ;;  %v2374_v21 = vrot.slane %v2373_v10, 4  ;;  %v2386_v60 = vmax.f32 %v2384_v63, %v2385_v27 }
 0x24e   :  { %v2410_v59 = vunpack.i.l.bf16 %v2408_v0  ;;  %v2363_v58 = vrot.slane %v2362_v38, 2  ;;  %v2399_v4 = vmax.f32 %v2397_v16, %v2398_v13  ;;  %v2411_v41 = vunpack.i.h.bf16 %v2408_v0  ;;  %v4944_v13 = vld [vmem:[#allocation2 + $0x58] sm:$0xe] }
 0x24f   :  { %v6095_v29 = vld [vmem:[#allocation3 + $0x144] sm:$0xff]  ;;  %v2328_v34 = vpack.i.bf16 %v13461_v39, %v13461_v39  ;;  %v2352_v40 = vrot.slane %v2351_v2, 1  ;;  %v2375_v18 = vmax.f32 %v2373_v10, %v2374_v21  ;;  %v2387_v30 = vrot.slane %v2386_v60, 4 }
 0x250   :  { %v12167_v20 = vld [vmem:[#allocation3 + $0x124] ss:$36 sps:$4 sm:$0xff]   ;;  %v11137_v57 = vcombine.low %v6090_v33, %v6095_v29  ;;  %v2364_v53 = vmax.f32 %v2362_v38, %v2363_v58  ;;  %v2400_v51 = vrot.slane %v2399_v4, 4  ;;  %v2412_v5 = vmax.f32 %v2410_v59, %v2411_v41 }
 0x251   :  { %8214 = vst [vmem:[#allocation3 + $0x124] sm:$0xf] %v8091_v15  ;;  %7145 = vmatprep.mubr.bf16.mxu0 %v12167_v20  ;;  %v2421_v35 = vsel %vm364_vm0, %v266_v47, 4286644096  ;;  %v2353_v52 = vmax.f32 %v2351_v2, %v2352_v40  ;;  %v2376_v61 = vrot.slane %v2375_v18, 2  ;;  %v2388_v12 = vmax.f32 %v2386_v60, %v2387_v30 }
 0x252   :  { %7146 = vmatmul.mubr.bf16.gmra.mxu0 %v11137_v57  ;;  %v2423_v8 = vunpack.i.l.bf16 %v2421_v35  ;;  %v2365_v43 = vrot.slane %v2364_v53, 1  ;;  %v2401_v32 = vmax.f32 %v2399_v4, %v2400_v51  ;;  %v2413_v44 = vrot.slane %v2412_v5, 4  ;;  %v4943_v15 = vld [vmem:[#allocation2 + $0x54] sm:$0x1]  ;;  %v8238_v20 = vld [vmem:[#allocation2 + $0x50] sm:$0xe] }
 0x253   :  { %v2424_v36 = vunpack.i.h.bf16 %v2421_v35  ;;  %v2354_v31 = vpack.i.bf16 %v2353_v52, %v2353_v52  ;;  %v2377_v46 = vmax.f32 %v2375_v18, %v2376_v61  ;;  %v2389_v1 = vrot.slane %v2388_v12, 2  ;;  %v8239_v51 = vld [vmem:[#allocation2 + $0x54] sm:$0x1] }
 0x254   :  { %v11060_v25 = vrot.slane %v4942_v62, 9  ;;  %v2366_v7 = vmax.f32 %v2364_v53, %v2365_v43  ;;  %v2402_v11 = vrot.slane %v2401_v32, 2  ;;  %v2414_v6 = vmax.f32 %v2412_v5, %v2413_v44 }
 0x255   :  { %v2425_v50 = vmax.f32 %v2423_v8, %v2424_v36  ;;  %v2378_v63 = vrot.slane %v2377_v46, 1  ;;  %v2390_v19 = vmax.f32 %v2388_v12, %v2389_v1  ;;  %v3766_v10 = vmax.bf16 %v2354_v31, %v2250_v23  ;;  %v4945_v23 = vld [vmem:[#allocation2 + $0x5c] sm:$0x1]  ;;  %v259_v8 = vld [vmem:[#allocation4 + $0x97] sm:$0x1] }
 0x256   :  { %v5027_v27 = vrot.slane %v4943_v15, 5  ;;  %v2367_v16 = vpack.i.bf16 %v2366_v7, %v2366_v7  ;;  %v2403_v33 = vmax.f32 %v2401_v32, %v2402_v11  ;;  %v2415_v54 = vrot.slane %v2414_v6, 2 }
 0x257   :  { %v2426_v38 = vrot.slane %v2425_v50, 4  ;;  %v2379_v0 = vmax.f32 %v2377_v46, %v2378_v63  ;;  %v2391_v47 = vrot.slane %v2390_v19, 1  ;;  %v10980_v2 = vcombine.low %v3766_v10, %v3766_v10  ;;  %v267_v46 = vld [vmem:[#allocation4 + $0x9f] sm:$0x1] }
 0x258   :  { %v5028_v21 = vsel %vm12746_vm7, %v11060_v25, %v5027_v27  ;;  %v2404_v60 = vrot.slane %v2403_v33, 1  ;;  %v2416_v59 = vmax.f32 %v2414_v6, %v2415_v54  ;;  %v3767_v37 = vmax.bf16 %v2367_v16, %v2263_v24  ;;  %v269_v54 = vld [vmem:[#allocation4 + $0xa1] sm:$0x1] }
 0x259   :  { %v2427_v29 = vmax.f32 %v2425_v50, %v2426_v38  ;;  %5081 = vst [vmem:[#allocation3 + $0x128] sm:$0xf] %v5028_v21  ;;  %v2380_v58 = vpack.i.bf16 %v2379_v0, %v2379_v0  ;;  %v2392_v4 = vmax.f32 %v2390_v19, %v2391_v47  ;;  %v4278_v41 = vunpack.c.l.b16 %v10980_v2 }
 0x25a   :  { %v11061_v57 = vrot.slane %v4944_v13, 9  ;;  %v2405_v40 = vmax.f32 %v2403_v33, %v2404_v60  ;;  %v2417_v18 = vrot.slane %v2416_v59, 1  ;;  %v10981_v53 = vcombine.low %v3767_v37, %v3767_v37  ;;  %v270_v60 = vld [vmem:[#allocation4 + $0xa2] sm:$0x1] }
 0x25b   :  { %v2428_v30 = vrot.slane %v2427_v29, 2  ;;  %v2393_v5 = vpack.i.bf16 %v2392_v4, %v2392_v4  ;;  %v3768_v35 = vmax.bf16 %v2380_v58, %v2276_v55  ;;  %v5031_v62 = vrot.slane %v4945_v23, 5 }
 0x25c   :  { %v11269_v28 = vrot.slane %v8238_v20, 9  ;;  %v2406_v24 = vpack.i.bf16 %v2405_v40, %v2405_v40  ;;  %v2418_v52 = vmax.f32 %v2416_v59, %v2417_v18  ;;  %v4279_v12 = vunpack.c.l.b16 %v10981_v53 }
 0x25d   :  { %v2429_v61 = vmax.f32 %v2427_v29, %v2428_v30  ;;  %v3769_v43 = vmax.bf16 %v2393_v5, %v2289_v49  ;;  %v10982_v32 = vcombine.low %v3768_v35, %v3768_v35  ;;  %v5032_v44 = vsel %vm12746_vm7, %v11061_v57, %v5031_v62  ;;  %v272_v62 = vld [vmem:[#allocation4 + $0xa4] sm:$0x1] }
 0x25e   :  { %v8320_v36 = vrot.slane %v8239_v51, 5  ;;  %v2419_v15 = vpack.i.bf16 %v2418_v52, %v2418_v52  ;;  %v3770_v22 = vmax.bf16 %v2406_v24, %v2302_v17  ;;  %v4394_v55 = vsel %vm4334_vm1, %v4279_v12, %v4278_v41  ;;  %5082 = vst [vmem:[#allocation3 + $0x14c] sm:$0xf] %v5032_v44  ;;  %v271_v41 = vld [vmem:[#allocation4 + $0xa3] sm:$0x1] }
 0x25f   :  { %v2430_v31 = vrot.slane %v2429_v61, 1  ;;  %v10983_v1 = vcombine.low %v3769_v43, %v3769_v43  ;;  %v4280_v25 = vunpack.c.l.b16 %v10982_v32  ;;  %v2330_v49 = vsel %vm364_vm0, %v259_v8, 4286644096  ;;  %v4561_v8 = vld [vmem:[#allocation2 + $0x60] sm:$0xf] }
 0x260   :  { %v13494_v3 = vsel %vm12746_vm7, %v11269_v28, %v8320_v36  ;;  %v3771_v11 = vmax.bf16 %v2419_v15, %v2315_v14  ;;  %v10984_v6 = vcombine.low %v3770_v22, %v3770_v22  ;;  %v2332_v17 = vunpack.i.l.bf16 %v2330_v49 }
 0x261   :  { %v2431_v7 = vmax.f32 %v2429_v61, %v2430_v31  ;;  %v4281_v50 = vunpack.c.l.b16 %v10983_v1  ;;  %v4395_v63 = vsel %vm4336_vm2, %v4280_v25, %v4394_v55  ;;  %v2333_v19 = vunpack.i.h.bf16 %v2330_v49 }
 0x262   :  { %v2434_v10 = vsel %vm364_vm0, %v267_v46, 4286644096  ;;  %v10985_v16 = vcombine.low %v3771_v11, %v3771_v11  ;;  %v4282_v33 = vunpack.c.l.b16 %v10984_v6  ;;  %v2447_v56 = vsel %vm364_vm0, %v268_v26, 4286644096 }
 0x263   :  { %v2432_v27 = vpack.i.bf16 %v2431_v7, %v2431_v7  ;;  %v2436_v38 = vunpack.i.l.bf16 %v2434_v10  ;;  %v4396_v13 = vsel %vm4338_vm3, %v4281_v50, %v4395_v63  ;;  %v2334_v0 = vmax.f32 %v2332_v17, %v2333_v19  ;;  %v273_v7 = vld [vmem:[#allocation4 + $0xa5] sm:$0x1] }
 0x264   :  { %v2437_v47 = vunpack.i.h.bf16 %v2434_v10  ;;  %v4283_v2 = vunpack.c.l.b16 %v10985_v16  ;;  %v4397_v21 = vsel %vm4340_vm4, %v4282_v33, %v4396_v13  ;;  %v2449_v59 = vunpack.i.l.bf16 %v2447_v56  ;;  %v12187_v13 = vld [vmem:[#allocation7 + $0x1e0] sm:$0xff]  }
 0x265   :  { %v3772_v14 = vmax.bf16 %v2432_v27, %v2328_v34  ;;  %v2335_v29 = vrot.slane %v2334_v0, 4  ;;  %v2450_v23 = vunpack.i.h.bf16 %v2447_v56  ;;  %v2460_v20 = vsel %vm364_vm0, %v269_v54, 4286644096  ;;  %v12185_v54 = vld [vmem:[#allocation7 + $0x1e8] sm:$0xff]  }
 0x266   :  { %v2438_v37 = vmax.f32 %v2436_v38, %v2437_v47  ;;  %v4398_v4 = vsel %vm4342_vm5, %v4283_v2, %v4397_v21  ;;  %v2462_v57 = vunpack.i.l.bf16 %v2460_v20  ;;  %v2463_v40 = vunpack.i.h.bf16 %v2460_v20  ;;  %v12186_v38 = vld [vmem:[#allocation7 + $0x1a8] sm:$0xff]   ;;  %v274_v2 = vld [vmem:[#allocation4 + $0xa6] sm:$0x1]  ;;  %11682 = vmatprep.subr.bf16.mxu1 %v12185_v54 }
 0x267   :  { %v10986_v58 = vcombine.low %v3772_v14, %v3772_v14  ;;  %v2336_v18 = vmax.f32 %v2334_v0, %v2335_v29  ;;  %v2451_v39 = vmax.f32 %v2449_v59, %v2450_v23  ;;  %v2473_v34 = vsel %vm364_vm0, %v270_v60, 4286644096  ;;  %11683 = vmatpush3.bf16.msra.mxu1 %v12186_v38 }
 0x268   :  { %v2439_v30 = vrot.slane %v2438_v37, 4  ;;  %v2464_v51 = vmax.f32 %v2462_v57, %v2463_v40  ;;  %v2475_v5 = vunpack.i.l.bf16 %v2473_v34  ;;  %v2476_v35 = vunpack.i.h.bf16 %v2473_v34  ;;  %11684 = vmatprep.subr.bf16.mxu1 %v12187_v13 }
 0x269   :  { %v4284_v53 = vunpack.c.l.b16 %v10986_v58  ;;  %v2337_v28 = vrot.slane %v2336_v18, 2  ;;  %v2452_v52 = vrot.slane %v2451_v39, 4  ;;  %v2486_v61 = vsel %vm364_vm0, %v271_v41, 4286644096 }
 0x26a   :  { %v2440_v24 = vmax.f32 %v2438_v37, %v2439_v30  ;;  %v2465_v43 = vrot.slane %v2464_v51, 4  ;;  %v2477_v32 = vmax.f32 %v2475_v5, %v2476_v35  ;;  %v2488_v44 = vunpack.i.l.bf16 %v2486_v61  ;;  %v275_v30 = vld [vmem:[#allocation4 + $0xa7] sm:$0x1] }
 0x26b   :  { %v4399_v12 = vsel %vm4344_vm10, %v4284_v53, %v4398_v4  ;;  %v2338_v15 = vmax.f32 %v2336_v18, %v2337_v28  ;;  %v2453_v22 = vmax.f32 %v2451_v39, %v2452_v52  ;;  %v2489_v1 = vunpack.i.h.bf16 %v2486_v61  ;;  %v276_v4 = vld [vmem:[#allocation4 + $0xa8] sm:$0x1]  ;;  %v277_v61 = vld [vmem:[#allocation4 + $0xa9] sm:$0x1] }
 0x26c   :  { %v4454_v36 = vpack.c.b16 %v4399_v12, %v4399_v12  ;;  %v2441_v31 = vrot.slane %v2440_v24, 2  ;;  %v2466_v55 = vmax.f32 %v2464_v51, %v2465_v43  ;;  %v2478_v46 = vrot.slane %v2477_v32, 4 }
 0x26d   :  { %v2499_v25 = vsel %vm364_vm0, %v272_v62, 4286644096  ;;  %v2339_v11 = vrot.slane %v2338_v15, 1  ;;  %v2454_v26 = vrot.slane %v2453_v22, 2  ;;  %v2490_v63 = vmax.f32 %v2488_v44, %v2489_v1 }
 0x26e   :  { %v4562_v49 = vsel %vm12666_vm13, %v4454_v36, %v4561_v8  ;;  %v2442_v6 = vmax.f32 %v2440_v24, %v2441_v31  ;;  %v2467_v17 = vrot.slane %v2466_v55, 2  ;;  %v2479_v50 = vmax.f32 %v2477_v32, %v2478_v46 }
 0x26f   :  { %4563 = vst [vmem:[#allocation2 + $0x60] sm:$0xf] %v4562_v49  ;;  %v2501_v19 = vunpack.i.l.bf16 %v2499_v25  ;;  %v13516_v10 = vmax.f32 %v2338_v15, %v2339_v11  ;;  %v2455_v16 = vmax.f32 %v2453_v22, %v2454_v26  ;;  %v2502_v33 = vunpack.i.h.bf16 %v2499_v25 }
 0x270   :  { %v2443_v27 = vrot.slane %v2442_v6, 1  ;;  %v2468_v0 = vmax.f32 %v2466_v55, %v2467_v17  ;;  %v2480_v47 = vrot.slane %v2479_v50, 2  ;;  %v2491_v56 = vrot.slane %v2490_v63, 4 }
 0x271   :  { %v2512_v14 = vsel %vm364_vm0, %v273_v7, 4286644096  ;;  %v2341_v21 = vpack.i.bf16 %v13516_v10, %v13516_v10  ;;  %v2456_v59 = vrot.slane %v2455_v16, 1  ;;  %v2503_v29 = vmax.f32 %v2501_v19, %v2502_v33  ;;  %v6091_v19 = vld [vmem:[#allocation3 + $0x128] sm:$0xff] }
 0x272   :  { %v13521_v60 = vmax.f32 %v2442_v6, %v2443_v27  ;;  %v2469_v37 = vrot.slane %v2468_v0, 1  ;;  %v2481_v23 = vmax.f32 %v2479_v50, %v2480_v47  ;;  %v2492_v20 = vmax.f32 %v2490_v63, %v2491_v56  ;;  %v278_v6 = vld [vmem:[#allocation4 + $0xaa] sm:$0x1]  ;;  %8374 = vst [vmem:[#allocation3 + $0x128] sm:$0xf] %v13494_v3 }
 0x273   :  { %v2514_v58 = vunpack.i.l.bf16 %v2512_v14  ;;  %v13525_v57 = vmax.f32 %v2455_v16, %v2456_v59  ;;  %v2504_v40 = vrot.slane %v2503_v29, 4  ;;  %v2515_v18 = vunpack.i.h.bf16 %v2512_v14 }
 0x274   :  { %v2445_v41 = vpack.i.bf16 %v13521_v60, %v13521_v60  ;;  %v13527_v39 = vmax.f32 %v2468_v0, %v2469_v37  ;;  %v2482_v34 = vrot.slane %v2481_v23, 1  ;;  %v2493_v53 = vrot.slane %v2492_v20, 2 }
 0x275   :  { %v2525_v51 = vsel %vm364_vm0, %v274_v2, 4286644096  ;;  %v2458_v35 = vpack.i.bf16 %v13525_v57, %v13525_v57  ;;  %v2505_v62 = vmax.f32 %v2503_v29, %v2504_v40  ;;  %v2516_v28 = vmax.f32 %v2514_v58, %v2515_v18  ;;  %v280_v58 = vld [vmem:[#allocation4 + $0xac] sm:$0x1] }
 0x276   :  { %v5098_v5 = vld [vmem:[#allocation2 + $0x60] sm:$0xf]  ;;  %v2527_v24 = vunpack.i.l.bf16 %v2525_v51  ;;  %v2471_v12 = vpack.i.bf16 %v13527_v39, %v13527_v39  ;;  %v13534_v8 = vmax.f32 %v2481_v23, %v2482_v34  ;;  %v2494_v43 = vmax.f32 %v2492_v20, %v2493_v53  ;;  %v279_v20 = vld [vmem:[#allocation4 + $0xab] sm:$0x1] }
 0x277   :  { %v4613_v52 = vld [vmem:[#allocation2 + $0x60] sm:$0xf]  ;;  %5114 = vst [vmem:[#allocation3 + $0x150] sm:$0xf] %v5098_v5  ;;  %v2528_v32 = vunpack.i.h.bf16 %v2525_v51  ;;  %v2506_v44 = vrot.slane %v2505_v62, 2  ;;  %v2517_v36 = vrot.slane %v2516_v28, 4 }
 0x278   :  { %4629 = vst [vmem:[#allocation3 + $0x168] sm:$0xf] %v4613_v52  ;;  %v2538_v15 = vsel %vm364_vm0, %v275_v30, 4286644096  ;;  %v2551_v31 = vsel %vm364_vm0, %v276_v4, 4286644096  ;;  %v2484_v22 = vpack.i.bf16 %v13534_v8, %v13534_v8 }
 0x279   :  { %v2495_v55 = vrot.slane %v2494_v43, 1  ;;  %v2529_v46 = vmax.f32 %v2527_v24, %v2528_v32  ;;  %v2540_v1 = vunpack.i.l.bf16 %v2538_v15  ;;  %v2507_v25 = vmax.f32 %v2505_v62, %v2506_v44 }
 0x27a   :  { %v2518_v49 = vmax.f32 %v2516_v28, %v2517_v36  ;;  %v2541_v7 = vunpack.i.h.bf16 %v2538_v15  ;;  %v2553_v11 = vunpack.i.l.bf16 %v2551_v31  ;;  %v2554_v50 = vunpack.i.h.bf16 %v2551_v31 }
 0x27b   :  { %v13540_v26 = vmax.f32 %v2494_v43, %v2495_v55  ;;  %v2530_v17 = vrot.slane %v2529_v46, 4  ;;  %v2564_v63 = vsel %vm364_vm0, %v277_v61, 4286644096  ;;  %v2508_v27 = vrot.slane %v2507_v25, 1 }
 0x27c   :  { %v2519_v16 = vrot.slane %v2518_v49, 2  ;;  %v2542_v33 = vmax.f32 %v2540_v1, %v2541_v7  ;;  %v2566_v54 = vunpack.i.l.bf16 %v2564_v63  ;;  %v2555_v0 = vmax.f32 %v2553_v11, %v2554_v50 }
 0x27d   :  { %v2497_v38 = vpack.i.bf16 %v13540_v26, %v13540_v26  ;;  %v2531_v13 = vmax.f32 %v2529_v46, %v2530_v17  ;;  %v2567_v47 = vunpack.i.h.bf16 %v2564_v63  ;;  %v13545_v2 = vmax.f32 %v2507_v25, %v2508_v27  ;;  %v281_v25 = vld [vmem:[#allocation4 + $0xad] sm:$0x1] }
 0x27e   :  { %v6096_v56 = vld [vmem:[#allocation3 + $0x14c] sm:$0xff]  ;;  %v2520_v59 = vmax.f32 %v2518_v49, %v2519_v16  ;;  %v2543_v29 = vrot.slane %v2542_v33, 4  ;;  %v2577_v37 = vsel %vm364_vm0, %v278_v6, 4286644096  ;;  %v2556_v40 = vrot.slane %v2555_v0, 4 }
 0x27f   :  { %v12171_v14 = vld [vmem:[#allocation3 + $0x12c] ss:$36 sps:$4 sm:$0xff]   ;;  %v11139_v23 = vcombine.low %v6091_v19, %v6096_v56  ;;  %v2532_v4 = vrot.slane %v2531_v13, 2  ;;  %v2568_v18 = vmax.f32 %v2566_v54, %v2567_v47  ;;  %v2510_v30 = vpack.i.bf16 %v13545_v2, %v13545_v2 }
 0x280   :  { %7242 = vmatprep.mubr.bf16.mxu1 %v12171_v14  ;;  %v2521_v34 = vrot.slane %v2520_v59, 1  ;;  %v2544_v53 = vmax.f32 %v2542_v33, %v2543_v29  ;;  %v2579_v51 = vunpack.i.l.bf16 %v2577_v37  ;;  %v2557_v62 = vmax.f32 %v2555_v0, %v2556_v40  ;;  %v285_v2 = vld [vmem:[#allocation4 + $0xb1] sm:$0x1] }
 0x281   :  { %7243 = vmatmul.mubr.bf16.gmra.mxu1 %v11139_v23  ;;  %v2533_v5 = vmax.f32 %v2531_v13, %v2532_v4  ;;  %v2569_v28 = vrot.slane %v2568_v18, 4  ;;  %v2580_v24 = vunpack.i.h.bf16 %v2577_v37  ;;  %v2590_v61 = vsel %vm364_vm0, %v279_v20, 4286644096  ;;  %v282_v13 = vld [vmem:[#allocation4 + $0xae] sm:$0x1] }
 0x282   :  { %v13551_v52 = vmax.f32 %v2520_v59, %v2521_v34  ;;  %v2545_v3 = vrot.slane %v2544_v53, 2  ;;  %v2603_v43 = vsel %vm364_vm0, %v280_v58, 4286644096  ;;  %v2558_v44 = vrot.slane %v2557_v62, 2  ;;  %v283_v20 = vld [vmem:[#allocation4 + $0xaf] sm:$0x1] }
 0x283   :  { %v2534_v32 = vrot.slane %v2533_v5, 1  ;;  %v2570_v36 = vmax.f32 %v2568_v18, %v2569_v28  ;;  %v2581_v15 = vmax.f32 %v2579_v51, %v2580_v24  ;;  %v2592_v46 = vunpack.i.l.bf16 %v2590_v61 }
 0x284   :  { %v2523_v31 = vpack.i.bf16 %v13551_v52, %v13551_v52  ;;  %v2546_v55 = vmax.f32 %v2544_v53, %v2545_v3  ;;  %v2593_v1 = vunpack.i.h.bf16 %v2590_v61  ;;  %v2559_v7 = vmax.f32 %v2557_v62, %v2558_v44 }
 0x285   :  { %v13557_v49 = vmax.f32 %v2533_v5, %v2534_v32  ;;  %v2571_v11 = vrot.slane %v2570_v36, 2  ;;  %v2582_v6 = vrot.slane %v2581_v15, 4  ;;  %v2605_v63 = vunpack.i.l.bf16 %v2603_v43 }
 0x286   :  { %v2547_v17 = vrot.slane %v2546_v55, 1  ;;  %v2594_v50 = vmax.f32 %v2592_v46, %v2593_v1  ;;  %v2606_v19 = vunpack.i.h.bf16 %v2603_v43  ;;  %v2560_v16 = vrot.slane %v2559_v7, 1 }
 0x287   :  { %v2536_v27 = vpack.i.bf16 %v13557_v49, %v13557_v49  ;;  %v2572_v33 = vmax.f32 %v2570_v36, %v2571_v11  ;;  %v2583_v54 = vmax.f32 %v2581_v15, %v2582_v6  ;;  %v2616_v14 = vsel %vm364_vm0, %v281_v25, 4286644096 }
 0x288   :  { %v13561_v0 = vmax.f32 %v2546_v55, %v2547_v17  ;;  %v2595_v47 = vrot.slane %v2594_v50, 4  ;;  %v2607_v56 = vmax.f32 %v2605_v63, %v2606_v19  ;;  %v2561_v59 = vmax.f32 %v2559_v7, %v2560_v16 }
 0x289   :  { %v2573_v29 = vrot.slane %v2572_v33, 1  ;;  %v2584_v37 = vrot.slane %v2583_v54, 2  ;;  %v2618_v23 = vunpack.i.l.bf16 %v2616_v14  ;;  %v2619_v18 = vunpack.i.h.bf16 %v2616_v14 }
 0x28a   :  { %v2549_v58 = vpack.i.bf16 %v13561_v0, %v13561_v0  ;;  %v2596_v4 = vmax.f32 %v2594_v50, %v2595_v47  ;;  %v2608_v40 = vrot.slane %v2607_v56, 4  ;;  %v2562_v34 = vpack.i.bf16 %v2561_v59, %v2561_v59 }
 0x28b   :  { %v2574_v53 = vmax.f32 %v2572_v33, %v2573_v29  ;;  %v2585_v51 = vmax.f32 %v2583_v54, %v2584_v37  ;;  %v2629_v5 = vsel %vm364_vm0, %v282_v13, 4286644096  ;;  %v2620_v24 = vmax.f32 %v2618_v23, %v2619_v18 }
 0x28c   :  { %v2597_v62 = vrot.slane %v2596_v4, 2  ;;  %v2609_v28 = vmax.f32 %v2607_v56, %v2608_v40  ;;  %v2631_v3 = vunpack.i.l.bf16 %v2629_v5  ;;  %v2632_v32 = vunpack.i.h.bf16 %v2629_v5 }
 0x28d   :  { %v2575_v61 = vpack.i.bf16 %v2574_v53, %v2574_v53  ;;  %v2586_v43 = vrot.slane %v2585_v51, 1  ;;  %v2642_v44 = vsel %vm364_vm0, %v283_v20, 4286644096  ;;  %v2621_v55 = vrot.slane %v2620_v24, 4  ;;  %v4655_v53 = vld [vmem:[#allocation2 + $0x60] sm:$0xf] }
 0x28e   :  { %v2598_v36 = vmax.f32 %v2596_v4, %v2597_v62  ;;  %v2610_v15 = vrot.slane %v2609_v28, 2  ;;  %v2644_v46 = vunpack.i.l.bf16 %v2642_v44  ;;  %v2633_v25 = vmax.f32 %v2631_v3, %v2632_v32 }
 0x28f   :  { %v2587_v1 = vmax.f32 %v2585_v51, %v2586_v43  ;;  %v2645_v7 = vunpack.i.h.bf16 %v2642_v44  ;;  %v3773_v11 = vmax.bf16 %v2445_v41, %v2341_v21  ;;  %v2622_v50 = vmax.f32 %v2620_v24, %v2621_v55 }
 0x290   :  { %v2599_v6 = vrot.slane %v2598_v36, 1  ;;  %v2611_v17 = vmax.f32 %v2609_v28, %v2610_v15  ;;  %v3774_v63 = vmax.bf16 %v2562_v34, %v2458_v35  ;;  %v2634_v16 = vrot.slane %v2633_v25, 4 }
 0x291   :  { %v2588_v19 = vpack.i.bf16 %v2587_v1, %v2587_v1  ;;  %v2646_v33 = vmax.f32 %v2644_v46, %v2645_v7  ;;  %v3775_v54 = vmax.bf16 %v2575_v61, %v2471_v12  ;;  %v2623_v47 = vrot.slane %v2622_v50, 2  ;;  %v4564_v12 = vld [vmem:[#allocation2 + $0x64] sm:$0x1]  ;;  %v284_v61 = vld [vmem:[#allocation4 + $0xb0] sm:$0x1] }
 0x292   :  { %v2600_v13 = vmax.f32 %v2598_v36, %v2599_v6  ;;  %v2612_v10 = vrot.slane %v2611_v17, 1  ;;  %v10988_v56 = vcombine.low %v3774_v63, %v3774_v63  ;;  %v2635_v60 = vmax.f32 %v2633_v25, %v2634_v16 }
 0x293   :  { %v2647_v21 = vrot.slane %v2646_v33, 4  ;;  %v3776_v41 = vmax.bf16 %v2588_v19, %v2484_v22  ;;  %v10989_v14 = vcombine.low %v3775_v54, %v3775_v54  ;;  %v2624_v59 = vmax.f32 %v2622_v50, %v2623_v47  ;;  %v286_v19 = vld [vmem:[#allocation4 + $0xb2] sm:$0x1] }
 0x294   :  { %v2601_v57 = vpack.i.bf16 %v2600_v13, %v2600_v13  ;;  %v2613_v35 = vmax.f32 %v2611_v17, %v2612_v10  ;;  %v4286_v29 = vunpack.c.l.b16 %v10988_v56  ;;  %v2636_v37 = vrot.slane %v2635_v60, 2 }
 0x295   :  { %v2648_v23 = vmax.f32 %v2646_v33, %v2647_v21  ;;  %v10990_v20 = vcombine.low %v3776_v41, %v3776_v41  ;;  %v4287_v39 = vunpack.c.l.b16 %v10989_v14  ;;  %v2625_v40 = vrot.slane %v2624_v59, 1 }
 0x296   :  { %v2614_v4 = vpack.i.bf16 %v2613_v35, %v2613_v35  ;;  %v3777_v18 = vmax.bf16 %v2601_v57, %v2497_v38  ;;  %v11463_v34 = vcombine.low %v3773_v11, %v3773_v11  ;;  %v2637_v8 = vmax.f32 %v2635_v60, %v2636_v37 }
 0x297   :  { %v2649_v22 = vrot.slane %v2648_v23, 2  ;;  %v4288_v51 = vunpack.c.l.b16 %v10990_v20  ;;  %v4400_v5 = vsel %vm4334_vm1, %v4287_v39, %v4286_v29  ;;  %v2626_v62 = vmax.f32 %v2624_v59, %v2625_v40  ;;  %v288_v20 = vld [vmem:[#allocation4 + $0xb4] sm:$0x1] }
 0x298   :  { %v3778_v28 = vmax.bf16 %v2614_v4, %v2510_v30  ;;  %v10991_v24 = vcombine.low %v3777_v18, %v3777_v18  ;;  %v4565_v3 = vsel %vm12680_vm14, %v11463_v34, %v4564_v12  ;;  %v2638_v43 = vrot.slane %v2637_v8, 1 }
 0x299   :  { %v2650_v26 = vmax.f32 %v2648_v23, %v2649_v22  ;;  %v4401_v38 = vsel %vm4336_vm2, %v4288_v51, %v4400_v5  ;;  %4566 = vst [vmem:[#allocation2 + $0x64] sm:$0x1] %v4565_v3  ;;  %v4811_v32 = vshrl.u32 %v4655_v53, 16  ;;  %v2627_v44 = vpack.i.bf16 %v2626_v62, %v2626_v62  ;;  %v287_v23 = vld [vmem:[#allocation4 + $0xb3] sm:$0x1] }
 0x29a   :  { %v10992_v36 = vcombine.low %v3778_v28, %v3778_v28  ;;  %v4289_v15 = vunpack.c.l.b16 %v10991_v24  ;;  %v4814_v55 = vshll.u32 %v4655_v53, 16  ;;  %v2639_v46 = vmax.f32 %v2637_v8, %v2638_v43  ;;  %v4567_v62 = vld [vmem:[#allocation2 + $0x68] sm:$0xf]  ;;  %v289_v3 = vld [vmem:[#allocation4 + $0xb5] sm:$0x1] }
 0x29b   :  { %v2651_v1 = vrot.slane %v2650_v26, 1  ;;  %v4813_v25 = vrot.slane %v4811_v32, 4  ;;  %v2655_v30 = vsel %vm364_vm0, %v284_v61, 4286644096  ;;  %v3779_v7 = vmax.bf16 %v2627_v44, %v2523_v31  ;;  %v290_v44 = vld [vmem:[#allocation4 + $0xb6] sm:$0x1] }
 0x29c   :  { %v4290_v11 = vunpack.c.l.b16 %v10992_v36  ;;  %v4402_v6 = vsel %vm4338_vm3, %v4289_v15, %v4401_v38  ;;  %v4816_v17 = vrot.slane %v4814_v55, 5  ;;  %v2640_v50 = vpack.i.bf16 %v2639_v46, %v2639_v46 }
 0x29d   :  { %v2652_v63 = vmax.f32 %v2650_v26, %v2651_v1  ;;  %v2657_v16 = vunpack.i.l.bf16 %v2655_v30  ;;  %v2658_v33 = vunpack.i.h.bf16 %v2655_v30  ;;  %v10993_v54 = vcombine.low %v3779_v7, %v3779_v7 }
 0x29e   :  { %v4403_v13 = vsel %vm4340_vm4, %v4290_v11, %v4402_v6  ;;  %v4817_v10 = vor.u32 %v4816_v17, %v4813_v25  ;;  %v2668_v47 = vsel %vm364_vm0, %v285_v2, 4286644096  ;;  %v3780_v52 = vmax.bf16 %v2640_v50, %v2536_v27  ;;  %v4570_v27 = vld [vmem:[#allocation2 + $0x6c] sm:$0x1]  ;;  %v292_v50 = vld [vmem:[#allocation4 + $0xb8] sm:$0x1] }
 0x29f   :  { %v2653_v56 = vpack.i.bf16 %v2652_v63, %v2652_v63  ;;  %v2659_v31 = vmax.f32 %v2657_v16, %v2658_v33  ;;  %v2670_v60 = vunpack.i.l.bf16 %v2668_v47  ;;  %v4291_v21 = vunpack.c.l.b16 %v10993_v54 }
 0x2a0   :  { %v4656_v41 = vld [vmem:[#allocation2 + $0x64] sm:$0x1]  ;;  %v4818_v14 = vrot.slane %v4817_v10, 4  ;;  %v2671_v57 = vunpack.i.h.bf16 %v2668_v47  ;;  %v2681_v35 = vsel %vm364_vm0, %v286_v19, 4286644096  ;;  %v10994_v29 = vcombine.low %v3780_v52, %v3780_v52 }
 0x2a1   :  { %v3781_v59 = vmax.bf16 %v2653_v56, %v2549_v58  ;;  %v4820_v37 = vshll.u32 %v4656_v41, 16  ;;  %v2660_v39 = vrot.slane %v2659_v31, 4  ;;  %v4404_v49 = vsel %vm4342_vm5, %v4291_v21, %v4403_v13 }
 0x2a2   :  { %v2672_v12 = vmax.f32 %v2670_v60, %v2671_v57  ;;  %v2683_v4 = vunpack.i.l.bf16 %v2681_v35  ;;  %v2684_v40 = vunpack.i.h.bf16 %v2681_v35  ;;  %v4292_v18 = vunpack.c.l.b16 %v10994_v29 }
 0x2a3   :  { %v11464_v34 = vcombine.low %v3781_v59, %v3781_v59  ;;  %v4822_v53 = vrot.slane %v4820_v37, 5  ;;  %v2661_v8 = vmax.f32 %v2659_v31, %v2660_v39  ;;  %v2694_v0 = vsel %vm364_vm0, %v287_v23, 4286644096 }
 0x2a4   :  { %v2673_v22 = vrot.slane %v2672_v12, 4  ;;  %v2685_v51 = vmax.f32 %v2683_v4, %v2684_v40  ;;  %v2707_v58 = vsel %vm364_vm0, %v288_v20, 4286644096  ;;  %v4405_v5 = vsel %vm4344_vm10, %v4292_v18, %v4404_v49  ;;  %v12191_v20 = vld [vmem:[#allocation7 + $0x1a0] sm:$0xff]  }
 0x2a5   :  { %v4571_v28 = vsel %vm12680_vm14, %v11464_v34, %v4570_v27  ;;  %v4823_v24 = vsel %vm12658_vm12, %v4818_v14, %v4822_v53  ;;  %v2662_v61 = vrot.slane %v2661_v8, 2  ;;  %v4456_v43 = vpack.c.b16 %v4405_v5, %v4405_v5  ;;  %11685 = vmatpush3.bf16.msra.mxu1 %v12191_v20 }
 0x2a6   :  { %4572 = vst [vmem:[#allocation2 + $0x6c] sm:$0x1] %v4571_v28  ;;  %4920 = vst [vmem:[#allocation3 + $0x16c] sm:$0xf] %v4823_v24  ;;  %v2674_v26 = vmax.f32 %v2672_v12, %v2673_v22  ;;  %v2686_v38 = vrot.slane %v2685_v51, 4  ;;  %v2696_v32 = vunpack.i.l.bf16 %v2694_v0  ;;  %v2697_v15 = vunpack.i.h.bf16 %v2694_v0  ;;  %v12190_v22 = vld [vmem:[#allocation7 + $0x148] sm:$0xff]  }
 0x2a7   :  { %v2663_v36 = vmax.f32 %v2661_v8, %v2662_v61  ;;  %v2709_v55 = vunpack.i.l.bf16 %v2707_v58  ;;  %v2710_v46 = vunpack.i.h.bf16 %v2707_v58  ;;  %v4568_v1 = vsel %vm12666_vm13, %v4456_v43, %v4567_v62  ;;  %v293_v58 = vld [vmem:[#allocation4 + $0xb9] sm:$0x1]  ;;  %11626 = vmatprep.subr.bf16.mxu0 %v12190_v22 }
 0x2a8   :  { %v2675_v25 = vrot.slane %v2674_v26, 2  ;;  %v2687_v2 = vmax.f32 %v2685_v51, %v2686_v38  ;;  %v2720_v30 = vsel %vm364_vm0, %v289_v3, 4286644096  ;;  %4569 = vst [vmem:[#allocation2 + $0x68] sm:$0xf] %v4568_v1  ;;  %v2698_v11 = vmax.f32 %v2696_v32, %v2697_v15 }
 0x2a9   :  { %v2664_v7 = vrot.slane %v2663_v36, 1  ;;  %v2711_v6 = vmax.f32 %v2709_v55, %v2710_v46  ;;  %v2722_v17 = vunpack.i.l.bf16 %v2720_v30  ;;  %v2723_v16 = vunpack.i.h.bf16 %v2720_v30  ;;  %v294_v15 = vld [vmem:[#allocation4 + $0xba] sm:$0x1] }
 0x2aa   :  { %v2676_v63 = vmax.f32 %v2674_v26, %v2675_v25  ;;  %v2688_v19 = vrot.slane %v2687_v2, 2  ;;  %v2733_v33 = vsel %vm364_vm0, %v290_v44, 4286644096  ;;  %v2699_v13 = vrot.slane %v2698_v11, 4  ;;  %v12193_v26 = vld [vmem:[#allocation7 + $0x108] sm:$0xff]  }
 0x2ab   :  { %v13619_v54 = vmax.f32 %v2663_v36, %v2664_v7  ;;  %v2712_v10 = vrot.slane %v2711_v6, 4  ;;  %v2735_v47 = vunpack.i.l.bf16 %v2733_v33  ;;  %v2724_v31 = vmax.f32 %v2722_v17, %v2723_v16  ;;  %11627 = vmatpush3.bf16.msra.mxu0 %v12193_v26 }
 0x2ac   :  { %v2677_v56 = vrot.slane %v2676_v63, 1  ;;  %v2689_v52 = vmax.f32 %v2687_v2, %v2688_v19  ;;  %v2736_v60 = vunpack.i.h.bf16 %v2733_v33  ;;  %v2700_v14 = vmax.f32 %v2698_v11, %v2699_v13 }
 0x2ad   :  { %v4658_v21 = vld [vmem:[#allocation2 + $0x6c] sm:$0x1]  ;;  %v2666_v41 = vpack.i.bf16 %v13619_v54, %v13619_v54  ;;  %v2713_v57 = vmax.f32 %v2711_v6, %v2712_v10  ;;  %v2759_v35 = vsel %vm364_vm0, %v292_v50, 4286644096  ;;  %v2725_v23 = vrot.slane %v2724_v31, 4 }
 0x2ae   :  { %v4834_v59 = vshll.u32 %v4658_v21, 16  ;;  %v13624_v29 = vmax.f32 %v2676_v63, %v2677_v56  ;;  %v2690_v37 = vrot.slane %v2689_v52, 1  ;;  %v2701_v39 = vrot.slane %v2700_v14, 2  ;;  %v295_v6 = vld [vmem:[#allocation4 + $0xbb] sm:$0x1] }
 0x2af   :  { %v2714_v49 = vrot.slane %v2713_v57, 2  ;;  %v2737_v27 = vmax.f32 %v2735_v47, %v2736_v60  ;;  %v2761_v12 = vunpack.i.l.bf16 %v2759_v35  ;;  %v4614_v4 = vld [vmem:[#allocation2 + $0x68] sm:$0xf]  ;;  %v2726_v8 = vmax.f32 %v2724_v31, %v2725_v23  ;;  %v296_v47 = vld [vmem:[#allocation4 + $0xbc] sm:$0x1] }
 0x2b0   :  { %v4657_v40 = vld [vmem:[#allocation2 + $0x68] sm:$0xf]  ;;  %v4836_v18 = vrot.slane %v4834_v59, 5  ;;  %v2679_v34 = vpack.i.bf16 %v13624_v29, %v13624_v29  ;;  %v13628_v53 = vmax.f32 %v2689_v52, %v2690_v37  ;;  %4630 = vst [vmem:[#allocation3 + $0x18c] sm:$0xf] %v4614_v4  ;;  %v2702_v5 = vmax.f32 %v2700_v14, %v2701_v39 }
 0x2b1   :  { %v4825_v51 = vshrl.u32 %v4657_v40, 16  ;;  %v4828_v0 = vshll.u32 %v4657_v40, 16  ;;  %v2715_v62 = vmax.f32 %v2713_v57, %v2714_v49  ;;  %v5099_v28 = vld [vmem:[#allocation2 + $0x68] sm:$0xf]  ;;  %v2727_v3 = vrot.slane %v2726_v8, 2 }
 0x2b2   :  { %v2692_v24 = vpack.i.bf16 %v13628_v53, %v13628_v53  ;;  %v2738_v61 = vrot.slane %v2737_v27, 4  ;;  %v2762_v43 = vunpack.i.h.bf16 %v2759_v35  ;;  %5115 = vst [vmem:[#allocation3 + $0x174] sm:$0xf] %v5099_v28  ;;  %v2703_v44 = vrot.slane %v2702_v5, 1  ;;  %v297_v59 = vld [vmem:[#allocation4 + $0xbd] sm:$0x1] }
 0x2b3   :  { %v4827_v38 = vrot.slane %v4825_v51, 4  ;;  %v4830_v32 = vrot.slane %v4828_v0, 5  ;;  %v2716_v36 = vrot.slane %v2715_v62, 1  ;;  %v2728_v55 = vmax.f32 %v2726_v8, %v2727_v3  ;;  %v298_v40 = vld [vmem:[#allocation4 + $0xbe] sm:$0x1] }
 0x2b4   :  { %v2739_v46 = vmax.f32 %v2737_v27, %v2738_v61  ;;  %v2763_v1 = vmax.f32 %v2761_v12, %v2762_v43  ;;  %v2772_v25 = vsel %vm364_vm0, %v293_v58, 4286644096  ;;  %v13633_v30 = vmax.f32 %v2702_v5, %v2703_v44  ;;  %v4946_v28 = vld [vmem:[#allocation2 + $0x60] sm:$0xe] }
 0x2b5   :  { %v4831_v2 = vor.u32 %v4830_v32, %v4827_v38  ;;  %v13635_v7 = vmax.f32 %v2715_v62, %v2716_v36  ;;  %v2774_v11 = vunpack.i.l.bf16 %v2772_v25  ;;  %v2729_v17 = vrot.slane %v2728_v55, 1 }
 0x2b6   :  { %v2740_v50 = vrot.slane %v2739_v46, 2  ;;  %v2764_v63 = vrot.slane %v2763_v1, 4  ;;  %v2775_v19 = vunpack.i.h.bf16 %v2772_v25  ;;  %v2705_v33 = vpack.i.bf16 %v13633_v30, %v13633_v30 }
 0x2b7   :  { %v4832_v16 = vrot.slane %v4831_v2, 4  ;;  %v2718_v13 = vpack.i.bf16 %v13635_v7, %v13635_v7  ;;  %v2785_v10 = vsel %vm364_vm0, %v294_v15, 4286644096  ;;  %v13642_v56 = vmax.f32 %v2728_v55, %v2729_v17 }
 0x2b8   :  { %v2741_v52 = vmax.f32 %v2739_v46, %v2740_v50  ;;  %v2765_v31 = vmax.f32 %v2763_v1, %v2764_v63  ;;  %v2776_v60 = vmax.f32 %v2774_v11, %v2775_v19  ;;  %v2787_v14 = vunpack.i.l.bf16 %v2785_v10  ;;  %v4947_v1 = vld [vmem:[#allocation2 + $0x64] sm:$0x1]  ;;  %v12180_v11 = vld [vmem:[#allocation3 + $0x168] ss:$36 sps:$4 sm:$0xff]  }
 0x2b9   :  { %v4837_v21 = vsel %vm12658_vm12, %v4832_v16, %v4836_v18  ;;  %v2788_v57 = vunpack.i.h.bf16 %v2785_v10  ;;  %v2798_v35 = vsel %vm364_vm0, %v295_v6, 4286644096  ;;  %v2731_v37 = vpack.i.bf16 %v13642_v56, %v13642_v56 }
 0x2ba   :  { %4921 = vst [vmem:[#allocation3 + $0x190] sm:$0xf] %v4837_v21  ;;  %v2742_v23 = vrot.slane %v2741_v52, 1  ;;  %v2766_v20 = vrot.slane %v2765_v31, 2  ;;  %v2777_v39 = vrot.slane %v2776_v60, 4  ;;  %v2800_v27 = vunpack.i.l.bf16 %v2798_v35 }
 0x2bb   :  { %v2789_v49 = vmax.f32 %v2787_v14, %v2788_v57  ;;  %v2801_v12 = vunpack.i.h.bf16 %v2798_v35  ;;  %v2811_v4 = vsel %vm364_vm0, %v296_v47, 4286644096  ;;  %v2824_v62 = vsel %vm364_vm0, %v297_v59, 4286644096 }
 0x2bc   :  { %v13650_v8 = vmax.f32 %v2741_v52, %v2742_v23  ;;  %v2767_v18 = vmax.f32 %v2765_v31, %v2766_v20  ;;  %v2778_v22 = vmax.f32 %v2776_v60, %v2777_v39  ;;  %v2813_v51 = vunpack.i.l.bf16 %v2811_v4  ;;  %v4948_v23 = vld [vmem:[#allocation2 + $0x68] sm:$0xe] }
 0x2bd   :  { %v2790_v0 = vrot.slane %v2789_v49, 4  ;;  %v2802_v58 = vmax.f32 %v2800_v27, %v2801_v12  ;;  %v2814_v5 = vunpack.i.h.bf16 %v2811_v4  ;;  %v2826_v26 = vunpack.i.l.bf16 %v2824_v62 }
 0x2be   :  { %v2744_v3 = vpack.i.bf16 %v13650_v8, %v13650_v8  ;;  %v2768_v61 = vrot.slane %v2767_v18, 1  ;;  %v2779_v43 = vrot.slane %v2778_v22, 2  ;;  %v2827_v36 = vunpack.i.h.bf16 %v2824_v62  ;;  %v291_v62 = vld [vmem:[#allocation4 + $0xb7] sm:$0x1] }
 0x2bf   :  { %v2791_v38 = vmax.f32 %v2789_v49, %v2790_v0  ;;  %v2803_v32 = vrot.slane %v2802_v58, 4  ;;  %v2815_v44 = vmax.f32 %v2813_v51, %v2814_v5  ;;  %v2837_v46 = vsel %vm364_vm0, %v298_v40, 4286644096 }
 0x2c0   :  { %v2769_v15 = vmax.f32 %v2767_v18, %v2768_v61  ;;  %v2780_v55 = vmax.f32 %v2778_v22, %v2779_v43  ;;  %v11062_v25 = vrot.slane %v4946_v28, 9  ;;  %v2828_v50 = vmax.f32 %v2826_v26, %v2827_v36  ;;  %v4949_v22 = vld [vmem:[#allocation2 + $0x6c] sm:$0x1] }
 0x2c1   :  { %v12176_v2 = vld [vmem:[#allocation3 + $0x16c] ss:$36 sps:$4 sm:$0xff]   ;;  %v2792_v6 = vrot.slane %v2791_v38, 2  ;;  %v2804_v17 = vmax.f32 %v2802_v58, %v2803_v32  ;;  %v2839_v63 = vunpack.i.l.bf16 %v2837_v46  ;;  %v2816_v10 = vrot.slane %v2815_v44, 4 }
 0x2c2   :  { %v2770_v19 = vpack.i.bf16 %v2769_v15, %v2769_v15  ;;  %v2781_v16 = vrot.slane %v2780_v55, 1  ;;  %v2840_v47 = vunpack.i.h.bf16 %v2837_v46  ;;  %7153 = vmatprep.mubr.bf16.mxu0 %v12176_v2  ;;  %v2829_v60 = vrot.slane %v2828_v50, 4 }
 0x2c3   :  { %v2793_v52 = vmax.f32 %v2791_v38, %v2792_v6  ;;  %v2805_v31 = vrot.slane %v2804_v17, 2  ;;  %v5035_v21 = vrot.slane %v4947_v1, 5  ;;  %7154 = vmatmul.mubr.bf16.gmra.mxu0 %v12180_v11  ;;  %v2817_v57 = vmax.f32 %v2815_v44, %v2816_v10 }
 0x2c4   :  { %v2782_v14 = vmax.f32 %v2780_v55, %v2781_v16  ;;  %v2841_v35 = vmax.f32 %v2839_v63, %v2840_v47  ;;  %v3782_v59 = vmax.bf16 %v2770_v19, %v2666_v41  ;;  %v2830_v49 = vmax.f32 %v2828_v50, %v2829_v60 }
 0x2c5   :  { %v2794_v20 = vrot.slane %v2793_v52, 1  ;;  %v2806_v39 = vmax.f32 %v2804_v17, %v2805_v31  ;;  %v5036_v27 = vsel %vm12746_vm7, %v11062_v25, %v5035_v21  ;;  %v2818_v4 = vrot.slane %v2817_v57, 2  ;;  %v300_v21 = vld [vmem:[#allocation4 + $0xc0] sm:$0x1] }
 0x2c6   :  { %v2783_v12 = vpack.i.bf16 %v2782_v14, %v2782_v14  ;;  %v2842_v40 = vrot.slane %v2841_v35, 4  ;;  %v10996_v18 = vcombine.low %v3782_v59, %v3782_v59  ;;  %5083 = vst [vmem:[#allocation3 + $0x170] sm:$0xf] %v5036_v27  ;;  %v2831_v58 = vrot.slane %v2830_v49, 2 }
 0x2c7   :  { %v2795_v51 = vmax.f32 %v2793_v52, %v2794_v20  ;;  %v2807_v0 = vrot.slane %v2806_v39, 1  ;;  %v11063_v5 = vrot.slane %v4948_v23, 9  ;;  %v2819_v54 = vmax.f32 %v2817_v57, %v2818_v4  ;;  %v302_v4 = vld [vmem:[#allocation4 + $0xc2] sm:$0x1] }
 0x2c8   :  { %v2843_v41 = vmax.f32 %v2841_v35, %v2842_v40  ;;  %v3783_v28 = vmax.bf16 %v2783_v12, %v2679_v34  ;;  %v4294_v61 = vunpack.c.l.b16 %v10996_v18  ;;  %v2832_v38 = vmax.f32 %v2830_v49, %v2831_v58  ;;  %v299_v34 = vld [vmem:[#allocation4 + $0xbf] sm:$0x1]  ;;  %v301_v12 = vld [vmem:[#allocation4 + $0xc1] sm:$0x1] }
 0x2c9   :  { %v2796_v43 = vpack.i.bf16 %v2795_v51, %v2795_v51  ;;  %v2808_v26 = vmax.f32 %v2806_v39, %v2807_v0  ;;  %v5039_v32 = vrot.slane %v4949_v22, 5  ;;  %v2820_v44 = vrot.slane %v2819_v54, 1 }
 0x2ca   :  { %v2844_v36 = vrot.slane %v2843_v41, 2  ;;  %v10997_v15 = vcombine.low %v3783_v28, %v3783_v28  ;;  %v2746_v55 = vsel %vm364_vm0, %v291_v62, 4286644096  ;;  %v2833_v1 = vrot.slane %v2832_v38, 1 }
 0x2cb   :  { %v2809_v46 = vpack.i.bf16 %v2808_v26, %v2808_v26  ;;  %v3784_v25 = vmax.bf16 %v2796_v43, %v2692_v24  ;;  %v5040_v29 = vsel %vm12746_vm7, %v11063_v5, %v5039_v32  ;;  %v2821_v2 = vmax.f32 %v2819_v54, %v2820_v44  ;;  %v303_v43 = vld [vmem:[#allocation4 + $0xc3] sm:$0x1] }
 0x2cc   :  { %v2845_v11 = vmax.f32 %v2843_v41, %v2844_v36  ;;  %v4295_v6 = vunpack.c.l.b16 %v10997_v15  ;;  %5084 = vst [vmem:[#allocation3 + $0x194] sm:$0xf] %v5040_v29  ;;  %v2748_v17 = vunpack.i.l.bf16 %v2746_v55  ;;  %v2834_v50 = vmax.f32 %v2832_v38, %v2833_v1  ;;  %v304_v1 = vld [vmem:[#allocation4 + $0xc4] sm:$0x1] }
 0x2cd   :  { %v3785_v63 = vmax.bf16 %v2809_v46, %v2705_v33  ;;  %v10998_v19 = vcombine.low %v3784_v25, %v3784_v25  ;;  %v2749_v16 = vunpack.i.h.bf16 %v2746_v55  ;;  %v2822_v10 = vpack.i.bf16 %v2821_v2, %v2821_v2 }
 0x2ce   :  { %v2846_v47 = vrot.slane %v2845_v11, 1  ;;  %v4406_v53 = vsel %vm4334_vm1, %v4295_v6, %v4294_v61  ;;  %v2850_v24 = vsel %vm364_vm0, %v299_v34, 4286644096  ;;  %v2835_v52 = vpack.i.bf16 %v2834_v50, %v2834_v50  ;;  %v4573_v6 = vld [vmem:[#allocation2 + $0x70] sm:$0xf] }
 0x2cf   :  { %v10999_v31 = vcombine.low %v3785_v63, %v3785_v63  ;;  %v4296_v60 = vunpack.c.l.b16 %v10998_v19  ;;  %v2750_v14 = vmax.f32 %v2748_v17, %v2749_v16  ;;  %v3786_v35 = vmax.bf16 %v2822_v10, %v2718_v13 }
 0x2d0   :  { %v2847_v57 = vmax.f32 %v2845_v11, %v2846_v47  ;;  %v2852_v30 = vunpack.i.l.bf16 %v2850_v24  ;;  %v2853_v33 = vunpack.i.h.bf16 %v2850_v24  ;;  %v3787_v59 = vmax.bf16 %v2835_v52, %v2731_v37 }
 0x2d1   :  { %v4297_v23 = vunpack.c.l.b16 %v10999_v31  ;;  %v4407_v20 = vsel %vm4336_vm2, %v4296_v60, %v4406_v53  ;;  %v2751_v39 = vrot.slane %v2750_v14, 4  ;;  %v11000_v27 = vcombine.low %v3786_v35, %v3786_v35  ;;  %v305_v53 = vld [vmem:[#allocation4 + $0xc5] sm:$0x1] }
 0x2d2   :  { %v2848_v49 = vpack.i.bf16 %v2847_v57, %v2847_v57  ;;  %v2854_v40 = vmax.f32 %v2852_v30, %v2853_v33  ;;  %v2863_v18 = vsel %vm364_vm0, %v300_v21, 4286644096  ;;  %v11001_v22 = vcombine.low %v3787_v59, %v3787_v59  ;;  %v12197_v30 = vld [vmem:[#allocation7 + $0x1d8] sm:$0xff]   ;;  %v12199_v59 = vld [vmem:[#allocation7 + $0x1d0] sm:$0xff]  }
 0x2d3   :  { %v4408_v7 = vsel %vm4338_vm3, %v4297_v23, %v4407_v20  ;;  %v2752_v13 = vmax.f32 %v2750_v14, %v2751_v39  ;;  %v2865_v51 = vunpack.i.l.bf16 %v2863_v18  ;;  %v4298_v37 = vunpack.c.l.b16 %v11000_v27  ;;  %v12198_v33 = vld [vmem:[#allocation7 + $0x198] sm:$0xff]   ;;  %v306_v23 = vld [vmem:[#allocation4 + $0xc6] sm:$0x1]  ;;  %11686 = vmatprep.subr.bf16.mxu1 %v12197_v30 }
 0x2d4   :  { %v3788_v56 = vmax.bf16 %v2848_v49, %v2744_v3  ;;  %v2855_v0 = vrot.slane %v2854_v40, 4  ;;  %v2866_v58 = vunpack.i.h.bf16 %v2863_v18  ;;  %v4299_v5 = vunpack.c.l.b16 %v11001_v22  ;;  %11687 = vmatpush3.bf16.msra.mxu1 %v12198_v33 }
 0x2d5   :  { %v2753_v62 = vrot.slane %v2752_v13, 2  ;;  %v2876_v54 = vsel %vm364_vm0, %v301_v12, 4286644096  ;;  %v2889_v41 = vsel %vm364_vm0, %v302_v4, 4286644096  ;;  %v4409_v61 = vsel %vm4340_vm4, %v4298_v37, %v4408_v7  ;;  %11688 = vmatprep.subr.bf16.mxu1 %v12199_v59 }
 0x2d6   :  { %v11002_v28 = vcombine.low %v3788_v56, %v3788_v56  ;;  %v2856_v26 = vmax.f32 %v2854_v40, %v2855_v0  ;;  %v2867_v38 = vmax.f32 %v2865_v51, %v2866_v58  ;;  %v4410_v32 = vsel %vm4342_vm5, %v4299_v5, %v4409_v61  ;;  %v307_v12 = vld [vmem:[#allocation4 + $0xc7] sm:$0x1] }
 0x2d7   :  { %v2754_v44 = vmax.f32 %v2752_v13, %v2753_v62  ;;  %v2878_v8 = vunpack.i.l.bf16 %v2876_v54  ;;  %v2879_v3 = vunpack.i.h.bf16 %v2876_v54  ;;  %v2891_v46 = vunpack.i.l.bf16 %v2889_v41 }
 0x2d8   :  { %v4300_v36 = vunpack.c.l.b16 %v11002_v28  ;;  %v2857_v15 = vrot.slane %v2856_v26, 2  ;;  %v2868_v55 = vrot.slane %v2867_v38, 4  ;;  %v2892_v34 = vunpack.i.h.bf16 %v2889_v41 }
 0x2d9   :  { %v2755_v25 = vrot.slane %v2754_v44, 1  ;;  %v2880_v29 = vmax.f32 %v2878_v8, %v2879_v3  ;;  %v2902_v2 = vsel %vm364_vm0, %v303_v43, 4286644096  ;;  %v2915_v60 = vsel %vm364_vm0, %v304_v1, 4286644096 }
 0x2da   :  { %v4411_v11 = vsel %vm4344_vm10, %v4300_v36, %v4410_v32  ;;  %v2858_v17 = vmax.f32 %v2856_v26, %v2857_v15  ;;  %v2869_v50 = vmax.f32 %v2867_v38, %v2868_v55  ;;  %v2904_v63 = vunpack.i.l.bf16 %v2902_v2  ;;  %v308_v32 = vld [vmem:[#allocation4 + $0xc8] sm:$0x1] }
 0x2db   :  { %v4458_v19 = vpack.c.b16 %v4411_v11, %v4411_v11  ;;  %v13693_v16 = vmax.f32 %v2754_v44, %v2755_v25  ;;  %v2881_v10 = vrot.slane %v2880_v29, 4  ;;  %v2893_v47 = vmax.f32 %v2891_v46, %v2892_v34 }
 0x2dc   :  { %v2859_v24 = vrot.slane %v2858_v17, 1  ;;  %v2870_v52 = vrot.slane %v2869_v50, 2  ;;  %v2905_v31 = vunpack.i.h.bf16 %v2902_v2  ;;  %v2917_v27 = vunpack.i.l.bf16 %v2915_v60 }
 0x2dd   :  { %v4574_v21 = vsel %vm12666_vm13, %v4458_v19, %v4573_v6  ;;  %v2757_v14 = vpack.i.bf16 %v13693_v16, %v13693_v16  ;;  %v2882_v57 = vmax.f32 %v2880_v29, %v2881_v10  ;;  %v2894_v35 = vrot.slane %v2893_v47, 4 }
 0x2de   :  { %4575 = vst [vmem:[#allocation2 + $0x70] sm:$0xf] %v4574_v21  ;;  %v13700_v20 = vmax.f32 %v2858_v17, %v2859_v24  ;;  %v2871_v39 = vmax.f32 %v2869_v50, %v2870_v52  ;;  %v2906_v49 = vmax.f32 %v2904_v63, %v2905_v31  ;;  %v2918_v18 = vunpack.i.h.bf16 %v2915_v60  ;;  %v309_v17 = vld [vmem:[#allocation4 + $0xc9] sm:$0x1] }
 0x2df   :  { %v2883_v4 = vrot.slane %v2882_v57, 2  ;;  %v2895_v40 = vmax.f32 %v2893_v47, %v2894_v35  ;;  %v2928_v22 = vsel %vm364_vm0, %v305_v53, 4286644096  ;;  %v2941_v41 = vsel %vm364_vm0, %v306_v23, 4286644096 }
 0x2e0   :  { %v2861_v7 = vpack.i.bf16 %v13700_v20, %v13700_v20  ;;  %v2872_v13 = vrot.slane %v2871_v39, 1  ;;  %v2907_v51 = vrot.slane %v2906_v49, 4  ;;  %v2930_v56 = vunpack.i.l.bf16 %v2928_v22  ;;  %v310_v47 = vld [vmem:[#allocation4 + $0xca] sm:$0x1] }
 0x2e1   :  { %v2884_v37 = vmax.f32 %v2882_v57, %v2883_v4  ;;  %v2896_v0 = vrot.slane %v2895_v40, 2  ;;  %v2919_v58 = vmax.f32 %v2917_v27, %v2918_v18  ;;  %v2931_v5 = vunpack.i.h.bf16 %v2928_v22  ;;  %v311_v4 = vld [vmem:[#allocation4 + $0xcb] sm:$0x1] }
 0x2e2   :  { %v13705_v62 = vmax.f32 %v2871_v39, %v2872_v13  ;;  %v2908_v54 = vmax.f32 %v2906_v49, %v2907_v51  ;;  %v2954_v28 = vsel %vm364_vm0, %v307_v12, 4286644096  ;;  %v2943_v3 = vunpack.i.l.bf16 %v2941_v41 }
 0x2e3   :  { %v2885_v61 = vrot.slane %v2884_v37, 1  ;;  %v2897_v43 = vmax.f32 %v2895_v40, %v2896_v0  ;;  %v2920_v26 = vrot.slane %v2919_v58, 4  ;;  %v2932_v38 = vmax.f32 %v2930_v56, %v2931_v5  ;;  %v12184_v56 = vld [vmem:[#allocation3 + $0x170] ss:$36 sps:$4 sm:$0xff]  }
 0x2e4   :  { %v2874_v44 = vpack.i.bf16 %v13705_v62, %v13705_v62  ;;  %v2909_v8 = vrot.slane %v2908_v54, 2  ;;  %v2944_v36 = vunpack.i.h.bf16 %v2941_v41  ;;  %v2956_v11 = vunpack.i.l.bf16 %v2954_v28 }
 0x2e5   :  { %v5100_v15 = vld [vmem:[#allocation2 + $0x70] sm:$0xf]  ;;  %v13711_v55 = vmax.f32 %v2884_v37, %v2885_v61  ;;  %v2898_v46 = vrot.slane %v2897_v43, 1  ;;  %v2921_v1 = vmax.f32 %v2919_v58, %v2920_v26  ;;  %v2933_v25 = vrot.slane %v2932_v38, 4 }
 0x2e6   :  { %v4615_v29 = vld [vmem:[#allocation2 + $0x70] sm:$0xf]  ;;  %5116 = vst [vmem:[#allocation3 + $0x198] sm:$0xf] %v5100_v15  ;;  %v2910_v34 = vmax.f32 %v2908_v54, %v2909_v8  ;;  %v2945_v2 = vmax.f32 %v2943_v3, %v2944_v36  ;;  %v2957_v6 = vunpack.i.h.bf16 %v2954_v28  ;;  %v2967_v31 = vsel %vm364_vm0, %v308_v32, 4286644096 }
 0x2e7   :  { %4631 = vst [vmem:[#allocation3 + $0x1b0] sm:$0xf] %v4615_v29  ;;  %v2887_v50 = vpack.i.bf16 %v13711_v55, %v13711_v55  ;;  %v13715_v63 = vmax.f32 %v2897_v43, %v2898_v46  ;;  %v2922_v19 = vrot.slane %v2921_v1, 2  ;;  %v2934_v10 = vmax.f32 %v2932_v38, %v2933_v25  ;;  %v312_v43 = vld [vmem:[#allocation4 + $0xcc] sm:$0x1] }
 0x2e8   :  { %v2911_v53 = vrot.slane %v2910_v34, 1  ;;  %v2946_v24 = vrot.slane %v2945_v2, 4  ;;  %v2958_v52 = vmax.f32 %v2956_v11, %v2957_v6  ;;  %v2969_v35 = vunpack.i.l.bf16 %v2967_v31  ;;  %v313_v3 = vld [vmem:[#allocation4 + $0xcd] sm:$0x1] }
 0x2e9   :  { %v2900_v60 = vpack.i.bf16 %v13715_v63, %v13715_v63  ;;  %v2923_v21 = vmax.f32 %v2921_v1, %v2922_v19  ;;  %v2935_v57 = vrot.slane %v2934_v10, 2  ;;  %v2970_v23 = vunpack.i.h.bf16 %v2967_v31 }
 0x2ea   :  { %v13720_v30 = vmax.f32 %v2910_v34, %v2911_v53  ;;  %v2947_v33 = vmax.f32 %v2945_v2, %v2946_v24  ;;  %v2959_v59 = vrot.slane %v2958_v52, 4  ;;  %v2980_v27 = vsel %vm364_vm0, %v309_v17, 4286644096 }
 0x2eb   :  { %v2924_v39 = vrot.slane %v2923_v21, 1  ;;  %v2936_v49 = vmax.f32 %v2934_v10, %v2935_v57  ;;  %v2993_v12 = vsel %vm364_vm0, %v310_v47, 4286644096  ;;  %v2971_v13 = vmax.f32 %v2969_v35, %v2970_v23  ;;  %v314_v35 = vld [vmem:[#allocation4 + $0xce] sm:$0x1] }
 0x2ec   :  { %v2913_v40 = vpack.i.bf16 %v13720_v30, %v13720_v30  ;;  %v2948_v18 = vrot.slane %v2947_v33, 2  ;;  %v2960_v22 = vmax.f32 %v2958_v52, %v2959_v59  ;;  %v2982_v58 = vunpack.i.l.bf16 %v2980_v27 }
 0x2ed   :  { %v12182_v51 = vld [vmem:[#allocation3 + $0x174] ss:$36 sps:$4 sm:$0xff]   ;;  %v13726_v37 = vmax.f32 %v2923_v21, %v2924_v39  ;;  %v2937_v0 = vrot.slane %v2936_v49, 1  ;;  %v2983_v5 = vunpack.i.h.bf16 %v2980_v27  ;;  %v2972_v28 = vrot.slane %v2971_v13, 4 }
 0x2ee   :  { %v2949_v54 = vmax.f32 %v2947_v33, %v2948_v18  ;;  %v2961_v41 = vrot.slane %v2960_v22, 2  ;;  %v2995_v61 = vunpack.i.l.bf16 %v2993_v12  ;;  %7250 = vmatprep.mubr.bf16.mxu1 %v12182_v51  ;;  %v2996_v8 = vunpack.i.h.bf16 %v2993_v12  ;;  %v315_v33 = vld [vmem:[#allocation4 + $0xcf] sm:$0x1] }
 0x2ef   :  { %v2926_v26 = vpack.i.bf16 %v13726_v37, %v13726_v37  ;;  %v13730_v38 = vmax.f32 %v2936_v49, %v2937_v0  ;;  %v2984_v32 = vmax.f32 %v2982_v58, %v2983_v5  ;;  %7251 = vmatmul.mubr.bf16.gmra.mxu1 %v12184_v56  ;;  %v2973_v46 = vmax.f32 %v2971_v13, %v2972_v28 }
 0x2f0   :  { %v2950_v36 = vrot.slane %v2949_v54, 1  ;;  %v2962_v15 = vmax.f32 %v2960_v22, %v2961_v41  ;;  %v3006_v1 = vsel %vm364_vm0, %v311_v4, 4286644096  ;;  %v2997_v34 = vmax.f32 %v2995_v61, %v2996_v8 }
 0x2f1   :  { %v2939_v25 = vpack.i.bf16 %v13730_v38, %v13730_v38  ;;  %v2985_v29 = vrot.slane %v2984_v32, 4  ;;  %v3008_v2 = vunpack.i.l.bf16 %v3006_v1  ;;  %v2974_v17 = vrot.slane %v2973_v46, 2 }
 0x2f2   :  { %v13735_v11 = vmax.f32 %v2949_v54, %v2950_v36  ;;  %v2963_v6 = vrot.slane %v2962_v15, 1  ;;  %v3009_v19 = vunpack.i.h.bf16 %v3006_v1  ;;  %v2998_v47 = vrot.slane %v2997_v34, 4 }
 0x2f3   :  { %v2986_v10 = vmax.f32 %v2984_v32, %v2985_v29  ;;  %v3019_v53 = vsel %vm364_vm0, %v312_v43, 4286644096  ;;  %v3032_v24 = vsel %vm364_vm0, %v313_v3, 4286644096  ;;  %v2975_v21 = vmax.f32 %v2973_v46, %v2974_v17 }
 0x2f4   :  { %v2952_v52 = vpack.i.bf16 %v13735_v11, %v13735_v11  ;;  %v13741_v31 = vmax.f32 %v2962_v15, %v2963_v6  ;;  %v3010_v57 = vmax.f32 %v3008_v2, %v3009_v19  ;;  %v2999_v23 = vmax.f32 %v2997_v34, %v2998_v47 }
 0x2f5   :  { %v2987_v59 = vrot.slane %v2986_v10, 2  ;;  %v3021_v39 = vunpack.i.l.bf16 %v3019_v53  ;;  %v3022_v49 = vunpack.i.h.bf16 %v3019_v53  ;;  %v2976_v12 = vrot.slane %v2975_v21, 1 }
 0x2f6   :  { %v2965_v27 = vpack.i.bf16 %v13741_v31, %v13741_v31  ;;  %v3011_v4 = vrot.slane %v3010_v57, 4  ;;  %v3034_v18 = vunpack.i.l.bf16 %v3032_v24  ;;  %v3000_v13 = vrot.slane %v2999_v23, 2 }
 0x2f7   :  { %v2988_v22 = vmax.f32 %v2986_v10, %v2987_v59  ;;  %v3023_v51 = vmax.f32 %v3021_v39, %v3022_v49  ;;  %v3035_v56 = vunpack.i.h.bf16 %v3032_v24  ;;  %v2977_v0 = vmax.f32 %v2975_v21, %v2976_v12 }
 0x2f8   :  { %v3012_v58 = vmax.f32 %v3010_v57, %v3011_v4  ;;  %v3045_v5 = vsel %vm364_vm0, %v314_v35, 4286644096  ;;  %v3058_v54 = vsel %vm364_vm0, %v315_v33, 4286644096  ;;  %v3001_v28 = vmax.f32 %v2999_v23, %v3000_v13 }
 0x2f9   :  { %v2989_v41 = vrot.slane %v2988_v22, 1  ;;  %v3024_v61 = vrot.slane %v3023_v51, 4  ;;  %v3036_v43 = vmax.f32 %v3034_v18, %v3035_v56  ;;  %v2978_v32 = vpack.i.bf16 %v2977_v0, %v2977_v0 }
 0x2fa   :  { %v3013_v8 = vrot.slane %v3012_v58, 2  ;;  %v3047_v3 = vunpack.i.l.bf16 %v3045_v5  ;;  %v3048_v36 = vunpack.i.h.bf16 %v3045_v5  ;;  %v3002_v46 = vrot.slane %v3001_v28, 1 }
 0x2fb   :  { %v2990_v15 = vmax.f32 %v2988_v22, %v2989_v41  ;;  %v3025_v1 = vmax.f32 %v3023_v51, %v3024_v61  ;;  %v3037_v29 = vrot.slane %v3036_v43, 4  ;;  %v3060_v6 = vunpack.i.l.bf16 %v3058_v54  ;;  %v4576_v41 = vld [vmem:[#allocation2 + $0x74] sm:$0x1] }
 0x2fc   :  { %v3014_v34 = vmax.f32 %v3012_v58, %v3013_v8  ;;  %v3049_v2 = vmax.f32 %v3047_v3, %v3048_v36  ;;  %v3061_v17 = vunpack.i.h.bf16 %v3058_v54  ;;  %v3003_v10 = vmax.f32 %v3001_v28, %v3002_v46 }
 0x2fd   :  { %v2991_v19 = vpack.i.bf16 %v2990_v15, %v2990_v15  ;;  %v3026_v47 = vrot.slane %v3025_v1, 2  ;;  %v3038_v53 = vmax.f32 %v3036_v43, %v3037_v29  ;;  %v3789_v35 = vmax.bf16 %v2861_v7, %v2757_v14  ;;  %v4659_v43 = vld [vmem:[#allocation2 + $0x70] sm:$0xf] }
 0x2fe   :  { %v3015_v24 = vrot.slane %v3014_v34, 1  ;;  %v3050_v21 = vrot.slane %v3049_v2, 4  ;;  %v3062_v57 = vmax.f32 %v3060_v6, %v3061_v17  ;;  %v3004_v33 = vpack.i.bf16 %v3003_v10, %v3003_v10  ;;  %v316_v15 = vld [vmem:[#allocation4 + $0xd0] sm:$0x1] }
 0x2ff   :  { %v3027_v59 = vmax.f32 %v3025_v1, %v3026_v47  ;;  %v3039_v23 = vrot.slane %v3038_v53, 2  ;;  %v3790_v39 = vmax.bf16 %v2978_v32, %v2874_v44  ;;  %v3791_v18 = vmax.bf16 %v2991_v19, %v2887_v50  ;;  %v317_v47 = vld [vmem:[#allocation4 + $0xd1] sm:$0x1] }
 0x300   :  { %v3016_v49 = vmax.f32 %v3014_v34, %v3015_v24  ;;  %v3051_v12 = vmax.f32 %v3049_v2, %v3050_v21  ;;  %v3063_v4 = vrot.slane %v3062_v57, 4  ;;  %v3792_v14 = vmax.bf16 %v3004_v33, %v2900_v60 }
 0x301   :  { %v3028_v22 = vrot.slane %v3027_v59, 1  ;;  %v3040_v16 = vmax.f32 %v3038_v53, %v3039_v23  ;;  %v11004_v20 = vcombine.low %v3790_v39, %v3790_v39  ;;  %v11005_v56 = vcombine.low %v3791_v18, %v3791_v18 }
 0x302   :  { %v3017_v7 = vpack.i.bf16 %v3016_v49, %v3016_v49  ;;  %v3052_v13 = vrot.slane %v3051_v12, 2  ;;  %v3064_v51 = vmax.f32 %v3062_v57, %v3063_v4  ;;  %v11006_v0 = vcombine.low %v3792_v14, %v3792_v14 }
 0x303   :  { %v3029_v62 = vmax.f32 %v3027_v59, %v3028_v22  ;;  %v3041_v44 = vrot.slane %v3040_v16, 1  ;;  %v4302_v58 = vunpack.c.l.b16 %v11004_v20  ;;  %v4303_v50 = vunpack.c.l.b16 %v11005_v56 }
 0x304   :  { %v3053_v5 = vmax.f32 %v3051_v12, %v3052_v13  ;;  %v3065_v54 = vrot.slane %v3064_v51, 2  ;;  %v3793_v55 = vmax.bf16 %v3017_v7, %v2913_v40  ;;  %v4304_v60 = vunpack.c.l.b16 %v11006_v0  ;;  %v13781_v12 = vld [vmem:[#allocation2 + $0x70] sm:$0xe]  ;;  %v4582_v7 = vld [vmem:[#allocation2 + $0x7c] sm:$0x1] }
 0x305   :  { %v3030_v28 = vpack.i.bf16 %v3029_v62, %v3029_v62  ;;  %v3042_v63 = vmax.f32 %v3040_v16, %v3041_v44  ;;  %v11465_v61 = vcombine.low %v3789_v35, %v3789_v35  ;;  %v4412_v36 = vsel %vm4334_vm1, %v4303_v50, %v4302_v58  ;;  %v319_v13 = vld [vmem:[#allocation4 + $0xd3] sm:$0x1]  ;;  %v320_v50 = vld [vmem:[#allocation4 + $0xd4] sm:$0x1] }
 0x306   :  { %v3054_v32 = vrot.slane %v3053_v5, 1  ;;  %v3066_v8 = vmax.f32 %v3064_v51, %v3065_v54  ;;  %v11007_v3 = vcombine.low %v3793_v55, %v3793_v55  ;;  %v4413_v30 = vsel %vm4336_vm2, %v4304_v60, %v4412_v36  ;;  %v4579_v60 = vld [vmem:[#allocation2 + $0x78] sm:$0xf] }
 0x307   :  { %v3043_v46 = vpack.i.bf16 %v3042_v63, %v3042_v63  ;;  %v3794_v1 = vmax.bf16 %v3030_v28, %v2926_v26  ;;  %v4577_v40 = vsel %vm12680_vm14, %v11465_v61, %v4576_v41  ;;  %v4839_v6 = vshrl.u32 %v4659_v43, 16 }
 0x308   :  { %v3055_v29 = vmax.f32 %v3053_v5, %v3054_v32  ;;  %v3067_v34 = vrot.slane %v3066_v8, 1  ;;  %v4305_v2 = vunpack.c.l.b16 %v11007_v3  ;;  %4578 = vst [vmem:[#allocation2 + $0x74] sm:$0x1] %v4577_v40  ;;  %v4842_v10 = vshll.u32 %v4659_v43, 16  ;;  %v321_v3 = vld [vmem:[#allocation4 + $0xd5] sm:$0x1] }
 0x309   :  { %v3795_v17 = vmax.bf16 %v3043_v46, %v2939_v25  ;;  %v11008_v19 = vcombine.low %v3794_v1, %v3794_v1  ;;  %v3071_v37 = vsel %vm364_vm0, %v316_v15, 4286644096  ;;  %v4841_v21 = vrot.slane %v4839_v6, 4  ;;  %v318_v25 = vld [vmem:[#allocation4 + $0xd2] sm:$0x1] }
 0x30a   :  { %v3056_v26 = vpack.i.bf16 %v3055_v29, %v3055_v29  ;;  %v3068_v53 = vmax.f32 %v3066_v8, %v3067_v34  ;;  %v4414_v24 = vsel %vm4338_vm3, %v4305_v2, %v4413_v30  ;;  %v4844_v33 = vrot.slane %v4842_v10, 5  ;;  %v322_v2 = vld [vmem:[#allocation4 + $0xd6] sm:$0x1] }
 0x30b   :  { %v11009_v57 = vcombine.low %v3795_v17, %v3795_v17  ;;  %v4306_v35 = vunpack.c.l.b16 %v11008_v19  ;;  %v3073_v59 = vunpack.i.l.bf16 %v3071_v37  ;;  %v3074_v39 = vunpack.i.h.bf16 %v3071_v37 }
 0x30c   :  { %v3069_v23 = vpack.i.bf16 %v3068_v53, %v3068_v53  ;;  %v3796_v38 = vmax.bf16 %v3056_v26, %v2952_v52  ;;  %v3084_v49 = vsel %vm364_vm0, %v317_v47, 4286644096  ;;  %v4845_v22 = vor.u32 %v4844_v33, %v4841_v21 }
 0x30d   :  { %v4307_v4 = vunpack.c.l.b16 %v11009_v57  ;;  %v4415_v18 = vsel %vm4340_vm4, %v4306_v35, %v4414_v24  ;;  %v3086_v16 = vunpack.i.l.bf16 %v3084_v49  ;;  %v3075_v11 = vmax.f32 %v3073_v59, %v3074_v39 }
 0x30e   :  { %v3797_v14 = vmax.bf16 %v3069_v23, %v2965_v27  ;;  %v11010_v20 = vcombine.low %v3796_v38, %v3796_v38  ;;  %v3087_v52 = vunpack.i.h.bf16 %v3084_v49  ;;  %v4846_v62 = vrot.slane %v4845_v22, 4 }
 0x30f   :  { %v4416_v51 = vsel %vm4342_vm5, %v4307_v4, %v4415_v18  ;;  %v4660_v56 = vld [vmem:[#allocation2 + $0x74] sm:$0x1]  ;;  %v3097_v44 = vsel %vm364_vm0, %v318_v25, 4286644096  ;;  %v11064_v0 = vrot.slane %v13781_v12, 9  ;;  %v3076_v55 = vrot.slane %v3075_v11, 4 }
 0x310   :  { %v4308_v58 = vunpack.c.l.b16 %v11010_v20  ;;  %v11466_v5 = vcombine.low %v3797_v14, %v3797_v14  ;;  %v4848_v54 = vshll.u32 %v4660_v56, 16  ;;  %v3088_v31 = vmax.f32 %v3086_v16, %v3087_v52 }
 0x311   :  { %v3099_v27 = vunpack.i.l.bf16 %v3097_v44  ;;  %v3100_v41 = vunpack.i.h.bf16 %v3097_v44  ;;  %v3110_v28 = vsel %vm364_vm0, %v319_v13, 4286644096  ;;  %v3077_v32 = vmax.f32 %v3075_v11, %v3076_v55  ;;  %v12203_v44 = vld [vmem:[#allocation7 + $0x190] sm:$0xff]  }
 0x312   :  { %v4417_v63 = vsel %vm4344_vm10, %v4308_v58, %v4416_v51  ;;  %v4583_v61 = vsel %vm12680_vm14, %v11466_v5, %v4582_v7  ;;  %v4850_v43 = vrot.slane %v4848_v54, 5  ;;  %v3089_v36 = vrot.slane %v3088_v31, 4  ;;  %11689 = vmatpush3.bf16.msra.mxu1 %v12203_v44 }
 0x313   :  { %v4460_v8 = vpack.c.b16 %v4417_v63, %v4417_v63  ;;  %4584 = vst [vmem:[#allocation2 + $0x7c] sm:$0x1] %v4583_v61  ;;  %v3101_v15 = vmax.f32 %v3099_v27, %v3100_v41  ;;  %v3112_v46 = vunpack.i.l.bf16 %v3110_v28  ;;  %v3078_v30 = vrot.slane %v3077_v32, 2  ;;  %v12202_v61 = vld [vmem:[#allocation7 + $0x140] sm:$0xff]  }
 0x314   :  { %v4851_v1 = vsel %vm12658_vm12, %v4846_v62, %v4850_v43  ;;  %v3113_v40 = vunpack.i.h.bf16 %v3110_v28  ;;  %v3123_v29 = vsel %vm364_vm0, %v320_v50, 4286644096  ;;  %v3090_v6 = vmax.f32 %v3088_v31, %v3089_v36  ;;  %v324_v28 = vld [vmem:[#allocation4 + $0xd8] sm:$0x1]  ;;  %11628 = vmatprep.subr.bf16.mxu0 %v12202_v61 }
 0x315   :  { %v4580_v34 = vsel %vm12666_vm13, %v4460_v8, %v4579_v60  ;;  %4922 = vst [vmem:[#allocation3 + $0x1b4] sm:$0xf] %v4851_v1  ;;  %v3102_v17 = vrot.slane %v3101_v15, 4  ;;  %v3125_v19 = vunpack.i.l.bf16 %v3123_v29  ;;  %v3079_v10 = vmax.f32 %v3077_v32, %v3078_v30  ;;  %v325_v30 = vld [vmem:[#allocation4 + $0xd9] sm:$0x1] }
 0x316   :  { %4581 = vst [vmem:[#allocation2 + $0x78] sm:$0xf] %v4580_v34  ;;  %v3114_v47 = vmax.f32 %v3112_v46, %v3113_v40  ;;  %v3126_v37 = vunpack.i.h.bf16 %v3123_v29  ;;  %v3136_v26 = vsel %vm364_vm0, %v321_v3, 4286644096  ;;  %v3091_v53 = vrot.slane %v3090_v6, 2 }
 0x317   :  { %v3103_v24 = vmax.f32 %v3101_v15, %v3102_v17  ;;  %v3138_v21 = vunpack.i.l.bf16 %v3136_v26  ;;  %v3139_v57 = vunpack.i.h.bf16 %v3136_v26  ;;  %v3080_v35 = vrot.slane %v3079_v10, 1  ;;  %v12205_v15 = vld [vmem:[#allocation7 + $0x100] sm:$0xff]  }
 0x318   :  { %v3115_v33 = vrot.slane %v3114_v47, 4  ;;  %v3127_v59 = vmax.f32 %v3125_v19, %v3126_v37  ;;  %v3149_v23 = vsel %vm364_vm0, %v322_v2, 4286644096  ;;  %v3092_v38 = vmax.f32 %v3090_v6, %v3091_v53  ;;  %11629 = vmatpush3.bf16.msra.mxu0 %v12205_v15  ;;  %v327_v53 = vld [vmem:[#allocation4 + $0xdb] sm:$0x1] }
 0x319   :  { %v3104_v25 = vrot.slane %v3103_v24, 2  ;;  %v3140_v39 = vmax.f32 %v3138_v21, %v3139_v57  ;;  %v3151_v49 = vunpack.i.l.bf16 %v3149_v23  ;;  %v13801_v18 = vmax.f32 %v3079_v10, %v3080_v35  ;;  %v326_v10 = vld [vmem:[#allocation4 + $0xda] sm:$0x1] }
 0x31a   :  { %v4662_v4 = vld [vmem:[#allocation2 + $0x7c] sm:$0x1]  ;;  %v3116_v22 = vmax.f32 %v3114_v47, %v3115_v33  ;;  %v3128_v16 = vrot.slane %v3127_v59, 4  ;;  %v3152_v14 = vunpack.i.h.bf16 %v3149_v23  ;;  %v3093_v7 = vrot.slane %v3092_v38, 1 }
 0x31b   :  { %v4862_v20 = vshll.u32 %v4662_v4, 16  ;;  %v3105_v13 = vmax.f32 %v3103_v24, %v3104_v25  ;;  %v3141_v11 = vrot.slane %v3140_v39, 4  ;;  %v3082_v52 = vpack.i.bf16 %v13801_v18, %v13801_v18 }
 0x31c   :  { %v3117_v51 = vrot.slane %v3116_v22, 2  ;;  %v3129_v56 = vmax.f32 %v3127_v59, %v3128_v16  ;;  %v3153_v62 = vmax.f32 %v3151_v49, %v3152_v14  ;;  %v13805_v55 = vmax.f32 %v3092_v38, %v3093_v7  ;;  %v328_v16 = vld [vmem:[#allocation4 + $0xdc] sm:$0x1] }
 0x31d   :  { %v4616_v58 = vld [vmem:[#allocation2 + $0x78] sm:$0xf]  ;;  %v4864_v54 = vrot.slane %v4862_v20, 5  ;;  %v3106_v50 = vrot.slane %v3105_v13, 1  ;;  %v3142_v31 = vmax.f32 %v3140_v39, %v3141_v11  ;;  %v3175_v17 = vsel %vm364_vm0, %v324_v28, 4286644096 }
 0x31e   :  { %v4661_v5 = vld [vmem:[#allocation2 + $0x78] sm:$0xf]  ;;  %4632 = vst [vmem:[#allocation3 + $0x1d4] sm:$0xf] %v4616_v58  ;;  %v3118_v63 = vmax.f32 %v3116_v22, %v3117_v51  ;;  %v3130_v60 = vrot.slane %v3129_v56, 2  ;;  %v3095_v43 = vpack.i.bf16 %v13805_v55, %v13805_v55  ;;  %v3154_v3 = vrot.slane %v3153_v62, 4 }
 0x31f   :  { %v4853_v27 = vshrl.u32 %v4661_v5, 16  ;;  %v4856_v41 = vshll.u32 %v4661_v5, 16  ;;  %v13809_v32 = vmax.f32 %v3105_v13, %v3106_v50  ;;  %v3143_v8 = vrot.slane %v3142_v31, 2  ;;  %v5101_v36 = vld [vmem:[#allocation2 + $0x78] sm:$0xf] }
 0x320   :  { %v3119_v40 = vrot.slane %v3118_v63, 1  ;;  %v3131_v29 = vmax.f32 %v3129_v56, %v3130_v60  ;;  %5117 = vst [vmem:[#allocation3 + $0x1bc] sm:$0xf] %v5101_v36  ;;  %v3155_v6 = vmax.f32 %v3153_v62, %v3154_v3  ;;  %v3177_v26 = vunpack.i.l.bf16 %v3175_v17  ;;  %v329_v62 = vld [vmem:[#allocation4 + $0xdd] sm:$0x1] }
 0x321   :  { %v4855_v46 = vrot.slane %v4853_v27, 4  ;;  %v4858_v1 = vrot.slane %v4856_v41, 5  ;;  %v3108_v34 = vpack.i.bf16 %v13809_v32, %v13809_v32  ;;  %v3144_v2 = vmax.f32 %v3142_v31, %v3143_v8  ;;  %v330_v28 = vld [vmem:[#allocation4 + $0xde] sm:$0x1] }
 0x322   :  { %v13814_v47 = vmax.f32 %v3118_v63, %v3119_v40  ;;  %v3132_v37 = vrot.slane %v3131_v29, 1  ;;  %v3156_v21 = vrot.slane %v3155_v6, 2  ;;  %v3178_v57 = vunpack.i.h.bf16 %v3175_v17 }
 0x323   :  { %v4859_v19 = vor.u32 %v4858_v1, %v4855_v46  ;;  %v3145_v24 = vrot.slane %v3144_v2, 1  ;;  %v3188_v35 = vsel %vm364_vm0, %v325_v30, 4286644096  ;;  %v3201_v20 = vsel %vm364_vm0, %v326_v10, 4286644096 }
 0x324   :  { %v3121_v59 = vpack.i.bf16 %v13814_v47, %v13814_v47  ;;  %v13819_v23 = vmax.f32 %v3131_v29, %v3132_v37  ;;  %v3190_v38 = vunpack.i.l.bf16 %v3188_v35  ;;  %v3157_v39 = vmax.f32 %v3155_v6, %v3156_v21  ;;  %v4951_v10 = vld [vmem:[#allocation2 + $0x74] sm:$0x1]  ;;  %v332_v47 = vld [vmem:[#allocation4 + $0xe0] sm:$0x1] }
 0x325   :  { %v4860_v33 = vrot.slane %v4859_v19, 4  ;;  %v13821_v25 = vmax.f32 %v3144_v2, %v3145_v24  ;;  %v3179_v49 = vmax.f32 %v3177_v26, %v3178_v57  ;;  %v3191_v4 = vunpack.i.h.bf16 %v3188_v35  ;;  %v12192_v26 = vld [vmem:[#allocation3 + $0x1b0] ss:$36 sps:$4 sm:$0xff]  }
 0x326   :  { %v3134_v14 = vpack.i.bf16 %v13819_v23, %v13819_v23  ;;  %v3214_v7 = vsel %vm364_vm0, %v327_v53, 4286644096  ;;  %v3158_v11 = vrot.slane %v3157_v39, 1  ;;  %v3203_v44 = vunpack.i.l.bf16 %v3201_v20 }
 0x327   :  { %v4865_v22 = vsel %vm12658_vm12, %v4860_v33, %v4864_v54  ;;  %v3147_v13 = vpack.i.bf16 %v13821_v25, %v13821_v25  ;;  %v3180_v51 = vrot.slane %v3179_v49, 4  ;;  %v3192_v56 = vmax.f32 %v3190_v38, %v3191_v4 }
 0x328   :  { %4923 = vst [vmem:[#allocation3 + $0x1d8] sm:$0xf] %v4865_v22  ;;  %v3204_v58 = vunpack.i.h.bf16 %v3201_v20  ;;  %v3216_v5 = vunpack.i.l.bf16 %v3214_v7  ;;  %v3217_v54 = vunpack.i.h.bf16 %v3214_v7  ;;  %v13831_v50 = vmax.f32 %v3157_v39, %v3158_v11 }
 0x329   :  { %v3181_v31 = vmax.f32 %v3179_v49, %v3180_v51  ;;  %v3193_v27 = vrot.slane %v3192_v56, 4  ;;  %v3227_v41 = vsel %vm364_vm0, %v328_v16, 4286644096  ;;  %v3240_v46 = vsel %vm364_vm0, %v329_v62, 4286644096 }
 0x32a   :  { %v3205_v63 = vmax.f32 %v3203_v44, %v3204_v58  ;;  %v3218_v60 = vmax.f32 %v3216_v5, %v3217_v54  ;;  %v3229_v61 = vunpack.i.l.bf16 %v3227_v41  ;;  %v3230_v8 = vunpack.i.h.bf16 %v3227_v41 }
 0x32b   :  { %v3160_v3 = vpack.i.bf16 %v13831_v50, %v13831_v50  ;;  %v3182_v36 = vrot.slane %v3181_v31, 2  ;;  %v3194_v15 = vmax.f32 %v3192_v56, %v3193_v27  ;;  %v3242_v29 = vunpack.i.l.bf16 %v3240_v46  ;;  %v4952_v56 = vld [vmem:[#allocation2 + $0x78] sm:$0xe] }
 0x32c   :  { %v3206_v1 = vrot.slane %v3205_v63, 4  ;;  %v3219_v30 = vrot.slane %v3218_v60, 4  ;;  %v3231_v40 = vmax.f32 %v3229_v61, %v3230_v8  ;;  %v3243_v17 = vunpack.i.h.bf16 %v3240_v46 }
 0x32d   :  { %v3183_v2 = vmax.f32 %v3181_v31, %v3182_v36  ;;  %v3195_v6 = vrot.slane %v3194_v15, 2  ;;  %v3253_v19 = vsel %vm364_vm0, %v330_v28, 4286644096  ;;  %v5043_v16 = vrot.slane %v4951_v10, 5  ;;  %v4953_v28 = vld [vmem:[#allocation2 + $0x7c] sm:$0x1] }
 0x32e   :  { %v3207_v53 = vmax.f32 %v3205_v63, %v3206_v1  ;;  %v3220_v24 = vmax.f32 %v3218_v60, %v3219_v30  ;;  %v3232_v21 = vrot.slane %v3231_v40, 4  ;;  %v3255_v57 = vunpack.i.l.bf16 %v3253_v19 }
 0x32f   :  { %v12188_v37 = vld [vmem:[#allocation3 + $0x1b4] ss:$36 sps:$4 sm:$0xff]   ;;  %v3184_v35 = vrot.slane %v3183_v2, 1  ;;  %v3196_v33 = vmax.f32 %v3194_v15, %v3195_v6  ;;  %v3244_v38 = vmax.f32 %v3242_v29, %v3243_v17  ;;  %v3256_v39 = vunpack.i.h.bf16 %v3253_v19 }
 0x330   :  { %7161 = vmatprep.mubr.bf16.mxu0 %v12188_v37  ;;  %v3208_v49 = vrot.slane %v3207_v53, 2  ;;  %v3221_v4 = vrot.slane %v3220_v24, 2  ;;  %v3233_v22 = vmax.f32 %v3231_v40, %v3232_v21  ;;  %v5044_v5 = vsel %vm12746_vm7, %v11064_v0, %v5043_v16  ;;  %v323_v19 = vld [vmem:[#allocation4 + $0xd7] sm:$0x1] }
 0x331   :  { %7162 = vmatmul.mubr.bf16.gmra.mxu0 %v12192_v26  ;;  %v3185_v20 = vmax.f32 %v3183_v2, %v3184_v35  ;;  %v3197_v7 = vrot.slane %v3196_v33, 1  ;;  %v3245_v11 = vrot.slane %v3244_v38, 4  ;;  %v3257_v51 = vmax.f32 %v3255_v57, %v3256_v39  ;;  %5085 = vst [vmem:[#allocation3 + $0x1b8] sm:$0xf] %v5044_v5 }
 0x332   :  { %v3209_v62 = vmax.f32 %v3207_v53, %v3208_v49  ;;  %v3222_v44 = vmax.f32 %v3220_v24, %v3221_v4  ;;  %v3234_v58 = vrot.slane %v3233_v22, 2  ;;  %v11065_v8 = vrot.slane %v4952_v56, 9 }
 0x333   :  { %v3186_v54 = vpack.i.bf16 %v3185_v20, %v3185_v20  ;;  %v3198_v31 = vmax.f32 %v3196_v33, %v3197_v7  ;;  %v3246_v27 = vmax.f32 %v3244_v38, %v3245_v11  ;;  %v3258_v41 = vrot.slane %v3257_v51, 4 }
 0x334   :  { %v3210_v63 = vrot.slane %v3209_v62, 1  ;;  %v3223_v60 = vrot.slane %v3222_v44, 1  ;;  %v3235_v61 = vmax.f32 %v3233_v22, %v3234_v58  ;;  %v5047_v40 = vrot.slane %v4953_v28, 5 }
 0x335   :  { %v3199_v36 = vpack.i.bf16 %v3198_v31, %v3198_v31  ;;  %v3247_v15 = vrot.slane %v3246_v27, 2  ;;  %v3259_v46 = vmax.f32 %v3257_v51, %v3258_v41  ;;  %v3798_v12 = vmax.bf16 %v3186_v54, %v3082_v52 }
 0x336   :  { %v3211_v1 = vmax.f32 %v3209_v62, %v3210_v63  ;;  %v3224_v30 = vmax.f32 %v3222_v44, %v3223_v60  ;;  %v3236_v0 = vrot.slane %v3235_v61, 1  ;;  %v5048_v53 = vsel %vm12746_vm7, %v11065_v8, %v5047_v40  ;;  %v335_v40 = vld [vmem:[#allocation4 + $0xe3] sm:$0x1] }
 0x337   :  { %v3248_v29 = vmax.f32 %v3246_v27, %v3247_v15  ;;  %v3260_v2 = vrot.slane %v3259_v46, 2  ;;  %v3799_v6 = vmax.bf16 %v3199_v36, %v3095_v43  ;;  %v11012_v17 = vcombine.low %v3798_v12, %v3798_v12  ;;  %5086 = vst [vmem:[#allocation3 + $0x1dc] sm:$0xf] %v5048_v53  ;;  %v331_v43 = vld [vmem:[#allocation4 + $0xdf] sm:$0x1] }
 0x338   :  { %v3212_v10 = vpack.i.bf16 %v3211_v1, %v3211_v1  ;;  %v3225_v37 = vpack.i.bf16 %v3224_v30, %v3224_v30  ;;  %v3237_v26 = vmax.f32 %v3235_v61, %v3236_v0  ;;  %v3162_v33 = vsel %vm364_vm0, %v323_v19, 4286644096  ;;  %v333_v27 = vld [vmem:[#allocation4 + $0xe1] sm:$0x1] }
 0x339   :  { %v3249_v18 = vrot.slane %v3248_v29, 1  ;;  %v3261_v52 = vmax.f32 %v3259_v46, %v3260_v2  ;;  %v11013_v24 = vcombine.low %v3799_v6, %v3799_v6  ;;  %v4310_v21 = vunpack.c.l.b16 %v11012_v17 }
 0x33a   :  { %v3238_v57 = vpack.i.bf16 %v3237_v26, %v3237_v26  ;;  %v3800_v35 = vmax.bf16 %v3212_v10, %v3108_v34  ;;  %v3801_v55 = vmax.bf16 %v3225_v37, %v3121_v59  ;;  %v3164_v4 = vunpack.i.l.bf16 %v3162_v33 }
 0x33b   :  { %v3250_v38 = vmax.f32 %v3248_v29, %v3249_v18  ;;  %v3262_v39 = vrot.slane %v3261_v52, 1  ;;  %v4311_v49 = vunpack.c.l.b16 %v11013_v24  ;;  %v3165_v7 = vunpack.i.h.bf16 %v3162_v33  ;;  %v4585_v24 = vld [vmem:[#allocation2 + $0x80] sm:$0xf] }
 0x33c   :  { %v3802_v22 = vmax.bf16 %v3238_v57, %v3134_v14  ;;  %v11014_v16 = vcombine.low %v3800_v35, %v3800_v35  ;;  %v11015_v20 = vcombine.low %v3801_v55, %v3801_v55  ;;  %v3266_v59 = vsel %vm364_vm0, %v331_v43, 4286644096  ;;  %v336_v43 = vld [vmem:[#allocation4 + $0xe4] sm:$0x1] }
 0x33d   :  { %v3251_v32 = vpack.i.bf16 %v3250_v38, %v3250_v38  ;;  %v3263_v34 = vmax.f32 %v3261_v52, %v3262_v39  ;;  %v4418_v11 = vsel %vm4334_vm1, %v4311_v49, %v4310_v21  ;;  %v3166_v44 = vmax.f32 %v3164_v4, %v3165_v7  ;;  %v337_v7 = vld [vmem:[#allocation4 + $0xe5] sm:$0x1] }
 0x33e   :  { %v11016_v51 = vcombine.low %v3802_v22, %v3802_v22  ;;  %v4312_v56 = vunpack.c.l.b16 %v11014_v16  ;;  %v4313_v62 = vunpack.c.l.b16 %v11015_v20  ;;  %v3268_v14 = vunpack.i.l.bf16 %v3266_v59 }
 0x33f   :  { %v3264_v58 = vpack.i.bf16 %v3263_v34, %v3263_v34  ;;  %v3803_v23 = vmax.bf16 %v3251_v32, %v3147_v13  ;;  %v3269_v5 = vunpack.i.h.bf16 %v3266_v59  ;;  %v3167_v41 = vrot.slane %v3166_v44, 4  ;;  %v334_v13 = vld [vmem:[#allocation4 + $0xe2] sm:$0x1]  ;;  %v338_v32 = vld [vmem:[#allocation4 + $0xe6] sm:$0x1] }
 0x340   :  { %v4314_v54 = vunpack.c.l.b16 %v11016_v51  ;;  %v4419_v31 = vsel %vm4336_vm2, %v4312_v56, %v4418_v11  ;;  %v3279_v28 = vsel %vm364_vm0, %v332_v47, 4286644096  ;;  %v3292_v0 = vsel %vm364_vm0, %v333_v27, 4286644096 }
 0x341   :  { %v3804_v63 = vmax.bf16 %v3264_v58, %v3160_v3  ;;  %v11017_v60 = vcombine.low %v3803_v23, %v3803_v23  ;;  %v4420_v61 = vsel %vm4338_vm3, %v4313_v62, %v4419_v31  ;;  %v3270_v8 = vmax.f32 %v3268_v14, %v3269_v5  ;;  %v5571_v31 = vld [vmem:[#allocation2 + $0x18] sm:$0xf] }
 0x342   :  { %v4421_v25 = vsel %vm4340_vm4, %v4314_v54, %v4420_v61  ;;  %v3168_v36 = vmax.f32 %v3166_v44, %v3167_v41  ;;  %v3281_v15 = vunpack.i.l.bf16 %v3279_v28  ;;  %v3282_v46 = vunpack.i.h.bf16 %v3279_v28  ;;  %v5570_v44 = vld [vmem:[#allocation2 + $0x10] sm:$0xf]  ;;  %v12209_v54 = vld [vmem:[#allocation7 + $0x1c8] sm:$0xff]   ;;  %5587 = vst [vmem:[#allocation3 + $0x3c] sm:$0xf] %v5571_v31 }
 0x343   :  { %v11018_v12 = vcombine.low %v3804_v63, %v3804_v63  ;;  %v4315_v1 = vunpack.c.l.b16 %v11017_v60  ;;  %v3271_v30 = vrot.slane %v3270_v8, 4  ;;  %v3294_v50 = vunpack.i.l.bf16 %v3292_v0  ;;  %5586 = vst [vmem:[#allocation3 + $0x18] sm:$0xf] %v5570_v44  ;;  %v12210_v60 = vld [vmem:[#allocation7 + $0x188] sm:$0xff]   ;;  %11690 = vmatprep.subr.bf16.mxu1 %v12209_v54 }
 0x344   :  { %v3169_v29 = vrot.slane %v3168_v36, 2  ;;  %v3283_v2 = vmax.f32 %v3281_v15, %v3282_v46  ;;  %v3295_v3 = vunpack.i.h.bf16 %v3292_v0  ;;  %v3305_v10 = vsel %vm364_vm0, %v334_v13, 4286644096  ;;  %11691 = vmatpush3.bf16.msra.mxu1 %v12210_v60  ;;  %v12215_v0 = vld [vmem:[#allocation7 + $0x238] sm:$0xff]   ;;  %v343_v54 = vld [vmem:[#allocation4 + $0xeb] sm:$0x1] }
 0x345   :  { %v4316_v6 = vunpack.c.l.b16 %v11018_v12  ;;  %v4422_v17 = vsel %vm4342_vm5, %v4315_v1, %v4421_v25  ;;  %v3272_v19 = vmax.f32 %v3270_v8, %v3271_v30  ;;  %v3307_v18 = vunpack.i.l.bf16 %v3305_v10  ;;  %v12214_v30 = vld [vmem:[#allocation7 + $0x180] sm:$0xff]   ;;  %12030 = vmatprep.subr.bf16.mxu0 %v12215_v0 }
 0x346   :  { %v3170_v37 = vmax.f32 %v3168_v36, %v3169_v29  ;;  %v3284_v26 = vrot.slane %v3283_v2, 4  ;;  %v3296_v53 = vmax.f32 %v3294_v50, %v3295_v3  ;;  %v3308_v57 = vunpack.i.h.bf16 %v3305_v10  ;;  %v12211_v36 = vld [vmem:[#allocation7 + $0x1c0] sm:$0xff]  }
 0x347   :  { %v4423_v52 = vsel %vm4344_vm10, %v4316_v6, %v4422_v17  ;;  %v3273_v21 = vrot.slane %v3272_v19, 2  ;;  %v3318_v35 = vsel %vm364_vm0, %v335_v40, 4286644096  ;;  %v3331_v62 = vsel %vm364_vm0, %v336_v43, 4286644096  ;;  %11692 = vmatprep.subr.bf16.mxu1 %v12211_v36 }
 0x348   :  { %v4462_v55 = vpack.c.b16 %v4423_v52, %v4423_v52  ;;  %v3171_v33 = vrot.slane %v3170_v37, 1  ;;  %v3285_v38 = vmax.f32 %v3283_v2, %v3284_v26  ;;  %v3297_v39 = vrot.slane %v3296_v53, 4  ;;  %v339_v40 = vld [vmem:[#allocation4 + $0xe7] sm:$0x1]  ;;  %v340_v26 = vld [vmem:[#allocation4 + $0xe8] sm:$0x1]  ;;  %11693 = vmatpush3.bf16.msra.mxu1 %v12214_v30 }
 0x349   :  { %v3274_v49 = vmax.f32 %v3272_v19, %v3273_v21  ;;  %v3309_v4 = vmax.f32 %v3307_v18, %v3308_v57  ;;  %v3320_v22 = vunpack.i.l.bf16 %v3318_v35  ;;  %v3321_v16 = vunpack.i.h.bf16 %v3318_v35  ;;  %v341_v57 = vld [vmem:[#allocation4 + $0xe9] sm:$0x1]  ;;  %v12196_v36 = vld [vmem:[#allocation3 + $0x1b8] ss:$36 sps:$4 sm:$0xff]  }
 0x34a   :  { %v4586_v20 = vsel %vm12666_vm13, %v4462_v55, %v4585_v24  ;;  %v13879_v34 = vmax.f32 %v3170_v37, %v3171_v33  ;;  %v3286_v11 = vrot.slane %v3285_v38, 2  ;;  %v3298_v47 = vmax.f32 %v3296_v53, %v3297_v39 }
 0x34b   :  { %4587 = vst [vmem:[#allocation2 + $0x80] sm:$0xf] %v4586_v20  ;;  %v3275_v59 = vrot.slane %v3274_v49, 1  ;;  %v3310_v51 = vrot.slane %v3309_v4, 4  ;;  %v3322_v56 = vmax.f32 %v3320_v22, %v3321_v16  ;;  %v3333_v5 = vunpack.i.l.bf16 %v3331_v62  ;;  %v5572_v22 = vld [vmem:[#allocation2 + $0x20] sm:$0xf] }
 0x34c   :  { %v3173_v58 = vpack.i.bf16 %v13879_v34, %v13879_v34  ;;  %v3287_v23 = vmax.f32 %v3285_v38, %v3286_v11  ;;  %v3299_v14 = vrot.slane %v3298_v47, 2  ;;  %v3334_v63 = vunpack.i.h.bf16 %v3331_v62  ;;  %v5573_v16 = vld [vmem:[#allocation2 + $0x28] sm:$0xf]  ;;  %5588 = vst [vmem:[#allocation3 + $0x60] sm:$0xf] %v5572_v22 }
 0x34d   :  { %v13884_v27 = vmax.f32 %v3274_v49, %v3275_v59  ;;  %v3311_v41 = vmax.f32 %v3309_v4, %v3310_v51  ;;  %v3323_v28 = vrot.slane %v3322_v56, 4  ;;  %v3344_v25 = vsel %vm364_vm0, %v337_v7, 4286644096  ;;  %5589 = vst [vmem:[#allocation3 + $0x84] sm:$0xf] %v5573_v16 }
 0x34e   :  { %v3288_v61 = vrot.slane %v3287_v23, 1  ;;  %v3300_v8 = vmax.f32 %v3298_v47, %v3299_v14  ;;  %v3357_v13 = vsel %vm364_vm0, %v338_v32, 4286644096  ;;  %v3335_v1 = vmax.f32 %v3333_v5, %v3334_v63  ;;  %v342_v5 = vld [vmem:[#allocation4 + $0xea] sm:$0x1] }
 0x34f   :  { %v3277_v15 = vpack.i.bf16 %v13884_v27, %v13884_v27  ;;  %v3312_v46 = vrot.slane %v3311_v41, 2  ;;  %v3324_v12 = vmax.f32 %v3322_v56, %v3323_v28  ;;  %v3346_v50 = vunpack.i.l.bf16 %v3344_v25  ;;  %v345_v16 = vld [vmem:[#allocation4 + $0xed] sm:$0x1] }
 0x350   :  { %v13890_v29 = vmax.f32 %v3287_v23, %v3288_v61  ;;  %v3301_v2 = vrot.slane %v3300_v8, 1  ;;  %v3347_v3 = vunpack.i.h.bf16 %v3344_v25  ;;  %v3336_v19 = vrot.slane %v3335_v1, 4 }
 0x351   :  { %v3313_v6 = vmax.f32 %v3311_v41, %v3312_v46  ;;  %v3325_v17 = vrot.slane %v3324_v12, 2  ;;  %v3359_v10 = vunpack.i.l.bf16 %v3357_v13  ;;  %v3360_v24 = vunpack.i.h.bf16 %v3357_v13 }
 0x352   :  { %v5102_v37 = vld [vmem:[#allocation2 + $0x80] sm:$0xf]  ;;  %v3290_v53 = vpack.i.bf16 %v13890_v29, %v13890_v29  ;;  %v13894_v18 = vmax.f32 %v3300_v8, %v3301_v2  ;;  %v3348_v52 = vmax.f32 %v3346_v50, %v3347_v3  ;;  %v3337_v43 = vmax.f32 %v3335_v1, %v3336_v19  ;;  %v5574_v3 = vld [vmem:[#allocation2 + $0x30] sm:$0xf] }
 0x353   :  { %v4617_v21 = vld [vmem:[#allocation2 + $0x80] sm:$0xf]  ;;  %5118 = vst [vmem:[#allocation3 + $0x1e0] sm:$0xf] %v5102_v37  ;;  %v3314_v35 = vrot.slane %v3313_v6, 1  ;;  %v3326_v55 = vmax.f32 %v3324_v12, %v3325_v17  ;;  %v3361_v49 = vmax.f32 %v3359_v10, %v3360_v24 }
 0x354   :  { %v3370_v33 = vsel %vm364_vm0, %v339_v40, 4286644096  ;;  %4633 = vst [vmem:[#allocation3 + $0x1f8] sm:$0xf] %v4617_v21  ;;  %v3303_v38 = vpack.i.bf16 %v13894_v18, %v13894_v18  ;;  %v3349_v39 = vrot.slane %v3348_v52, 4  ;;  %v3338_v32 = vrot.slane %v3337_v43, 2 }
 0x355   :  { %v3372_v4 = vunpack.i.l.bf16 %v3370_v33  ;;  %v13899_v20 = vmax.f32 %v3313_v6, %v3314_v35  ;;  %v3327_v7 = vrot.slane %v3326_v55, 1  ;;  %v3373_v11 = vunpack.i.h.bf16 %v3370_v33  ;;  %v5575_v37 = vld [vmem:[#allocation2 + $0x38] sm:$0xf]  ;;  %5590 = vst [vmem:[#allocation3 + $0xa8] sm:$0xf] %v5574_v3 }
 0x356   :  { %v3350_v47 = vmax.f32 %v3348_v52, %v3349_v39  ;;  %v3362_v59 = vrot.slane %v3361_v49, 4  ;;  %v3383_v51 = vsel %vm364_vm0, %v340_v26, 4286644096  ;;  %v3396_v56 = vsel %vm364_vm0, %v341_v57, 4286644096 }
 0x357   :  { %v3316_v62 = vpack.i.bf16 %v13899_v20, %v13899_v20  ;;  %v13905_v44 = vmax.f32 %v3326_v55, %v3327_v7  ;;  %v3339_v23 = vmax.f32 %v3337_v43, %v3338_v32  ;;  %v3374_v14 = vmax.f32 %v3372_v4, %v3373_v11  ;;  %5591 = vst [vmem:[#allocation3 + $0xcc] sm:$0xf] %v5575_v37  ;;  %v344_v57 = vld [vmem:[#allocation4 + $0xec] sm:$0x1] }
 0x358   :  { %v3351_v31 = vrot.slane %v3350_v47, 2  ;;  %v3363_v41 = vmax.f32 %v3361_v49, %v3362_v59  ;;  %v3385_v28 = vunpack.i.l.bf16 %v3383_v51  ;;  %v3386_v63 = vunpack.i.h.bf16 %v3383_v51  ;;  %v346_v59 = vld [vmem:[#allocation4 + $0xee] sm:$0x1] }
 0x359   :  { %v3329_v60 = vpack.i.bf16 %v13905_v44, %v13905_v44  ;;  %v3340_v61 = vrot.slane %v3339_v23, 1  ;;  %v3375_v8 = vrot.slane %v3374_v14, 4  ;;  %v3398_v25 = vunpack.i.l.bf16 %v3396_v56  ;;  %v348_v44 = vld [vmem:[#allocation4 + $0xf0] sm:$0x1] }
 0x35a   :  { %v12194_v13 = vld [vmem:[#allocation3 + $0x1bc] ss:$36 sps:$4 sm:$0xff]   ;;  %v3352_v46 = vmax.f32 %v3350_v47, %v3351_v31  ;;  %v3364_v12 = vrot.slane %v3363_v41, 2  ;;  %v3387_v1 = vmax.f32 %v3385_v28, %v3386_v63  ;;  %v3399_v30 = vunpack.i.h.bf16 %v3396_v56 }
 0x35b   :  { %v13909_v0 = vmax.f32 %v3339_v23, %v3340_v61  ;;  %v3376_v40 = vmax.f32 %v3374_v14, %v3375_v8  ;;  %v3409_v2 = vsel %vm364_vm0, %v342_v5, 4286644096  ;;  %v3422_v50 = vsel %vm364_vm0, %v343_v54, 4286644096  ;;  %7258 = vmatprep.mubr.bf16.mxu1 %v12194_v13 }
 0x35c   :  { %v3353_v6 = vrot.slane %v3352_v46, 1  ;;  %v3365_v17 = vmax.f32 %v3363_v41, %v3364_v12  ;;  %v3388_v19 = vrot.slane %v3387_v1, 4  ;;  %v3400_v10 = vmax.f32 %v3398_v25, %v3399_v30  ;;  %7259 = vmatmul.mubr.bf16.gmra.mxu1 %v12196_v36 }
 0x35d   :  { %v3342_v26 = vpack.i.bf16 %v13909_v0, %v13909_v0  ;;  %v3377_v52 = vrot.slane %v3376_v40, 2  ;;  %v3411_v24 = vunpack.i.l.bf16 %v3409_v2  ;;  %v3412_v21 = vunpack.i.h.bf16 %v3409_v2  ;;  %v347_v2 = vld [vmem:[#allocation4 + $0xef] sm:$0x1] }
 0x35e   :  { %v13915_v35 = vmax.f32 %v3352_v46, %v3353_v6  ;;  %v3366_v55 = vrot.slane %v3365_v17, 1  ;;  %v3389_v43 = vmax.f32 %v3387_v1, %v3388_v19  ;;  %v3401_v33 = vrot.slane %v3400_v10, 4 }
 0x35f   :  { %v3378_v39 = vmax.f32 %v3376_v40, %v3377_v52  ;;  %v3413_v49 = vmax.f32 %v3411_v24, %v3412_v21  ;;  %v3424_v4 = vunpack.i.l.bf16 %v3422_v50  ;;  %v3425_v22 = vunpack.i.h.bf16 %v3422_v50 }
 0x360   :  { %v3355_v7 = vpack.i.bf16 %v13915_v35, %v13915_v35  ;;  %v13919_v32 = vmax.f32 %v3365_v17, %v3366_v55  ;;  %v3390_v11 = vrot.slane %v3389_v43, 2  ;;  %v3402_v47 = vmax.f32 %v3400_v10, %v3401_v33 }
 0x361   :  { %v3379_v51 = vrot.slane %v3378_v39, 1  ;;  %v3414_v56 = vrot.slane %v3413_v49, 4  ;;  %v3426_v23 = vmax.f32 %v3424_v4, %v3425_v22  ;;  %v3435_v14 = vsel %vm364_vm0, %v344_v57, 4286644096 }
 0x362   :  { %v3368_v5 = vpack.i.bf16 %v13919_v32, %v13919_v32  ;;  %v3391_v54 = vmax.f32 %v3389_v43, %v3390_v11  ;;  %v3403_v31 = vrot.slane %v3402_v47, 2  ;;  %v3437_v41 = vunpack.i.l.bf16 %v3435_v14 }
 0x363   :  { %v13924_v28 = vmax.f32 %v3378_v39, %v3379_v51  ;;  %v3415_v63 = vmax.f32 %v3413_v49, %v3414_v56  ;;  %v3427_v61 = vrot.slane %v3426_v23, 4  ;;  %v3438_v8 = vunpack.i.h.bf16 %v3435_v14 }
 0x364   :  { %v3392_v25 = vrot.slane %v3391_v54, 1  ;;  %v3404_v13 = vmax.f32 %v3402_v47, %v3403_v31  ;;  %v3448_v36 = vsel %vm364_vm0, %v345_v16, 4286644096  ;;  %v3461_v46 = vsel %vm364_vm0, %v346_v59, 4286644096 }
 0x365   :  { %v3381_v12 = vpack.i.bf16 %v13924_v28, %v13924_v28  ;;  %v3416_v1 = vrot.slane %v3415_v63, 2  ;;  %v3428_v30 = vmax.f32 %v3426_v23, %v3427_v61  ;;  %v3439_v40 = vmax.f32 %v3437_v41, %v3438_v8 }
 0x366   :  { %v3393_v50 = vmax.f32 %v3391_v54, %v3392_v25  ;;  %v3405_v3 = vrot.slane %v3404_v13, 1  ;;  %v3450_v6 = vunpack.i.l.bf16 %v3448_v36  ;;  %v3451_v17 = vunpack.i.h.bf16 %v3448_v36 }
 0x367   :  { %v3417_v19 = vmax.f32 %v3415_v63, %v3416_v1  ;;  %v3429_v10 = vrot.slane %v3428_v30, 2  ;;  %v3440_v37 = vrot.slane %v3439_v40, 4  ;;  %v3463_v52 = vunpack.i.l.bf16 %v3461_v46 }
 0x368   :  { %v3394_v24 = vpack.i.bf16 %v3393_v50, %v3393_v50  ;;  %v3406_v21 = vmax.f32 %v3404_v13, %v3405_v3  ;;  %v3452_v57 = vmax.f32 %v3450_v6, %v3451_v17  ;;  %v3464_v55 = vunpack.i.h.bf16 %v3461_v46 }
 0x369   :  { %v3418_v43 = vrot.slane %v3417_v19, 1  ;;  %v3430_v33 = vmax.f32 %v3428_v30, %v3429_v10  ;;  %v3441_v39 = vmax.f32 %v3439_v40, %v3440_v37  ;;  %v3474_v49 = vsel %vm364_vm0, %v347_v2, 4286644096 }
 0x36a   :  { %v3407_v4 = vpack.i.bf16 %v3406_v21, %v3406_v21  ;;  %v3453_v22 = vrot.slane %v3452_v57, 4  ;;  %v3465_v16 = vmax.f32 %v3463_v52, %v3464_v55  ;;  %v3476_v11 = vunpack.i.l.bf16 %v3474_v49  ;;  %v4663_v52 = vld [vmem:[#allocation2 + $0x80] sm:$0xf] }
 0x36b   :  { %v3419_v47 = vmax.f32 %v3417_v19, %v3418_v43  ;;  %v3431_v59 = vrot.slane %v3430_v33, 1  ;;  %v3442_v51 = vrot.slane %v3441_v39, 2  ;;  %v3477_v56 = vunpack.i.h.bf16 %v3474_v49 }
 0x36c   :  { %v3454_v23 = vmax.f32 %v3452_v57, %v3453_v22  ;;  %v3466_v14 = vrot.slane %v3465_v16, 4  ;;  %v3805_v54 = vmax.bf16 %v3277_v15, %v3173_v58  ;;  %v3806_v31 = vmax.bf16 %v3394_v24, %v3290_v53 }
 0x36d   :  { %v3420_v41 = vpack.i.bf16 %v3419_v47, %v3419_v47  ;;  %v3432_v63 = vmax.f32 %v3430_v33, %v3431_v59  ;;  %v3443_v61 = vmax.f32 %v3441_v39, %v3442_v51  ;;  %v3478_v8 = vmax.f32 %v3476_v11, %v3477_v56  ;;  %v5576_v11 = vld [vmem:[#allocation2 + $0x40] sm:$0xf]  ;;  %v5577_v47 = vld [vmem:[#allocation2 + $0x48] sm:$0xf] }
 0x36e   :  { %v3455_v25 = vrot.slane %v3454_v23, 2  ;;  %v3467_v13 = vmax.f32 %v3465_v16, %v3466_v14  ;;  %v3807_v36 = vmax.bf16 %v3407_v4, %v3303_v38  ;;  %v11020_v46 = vcombine.low %v3806_v31, %v3806_v31  ;;  %v4588_v38 = vld [vmem:[#allocation2 + $0x84] sm:$0x1]  ;;  %5592 = vst [vmem:[#allocation3 + $0xf0] sm:$0xf] %v5576_v11 }
 0x36f   :  { %v3433_v34 = vpack.i.bf16 %v3432_v63, %v3432_v63  ;;  %v3444_v1 = vrot.slane %v3443_v61, 1  ;;  %v3479_v30 = vrot.slane %v3478_v8, 4  ;;  %v3808_v58 = vmax.bf16 %v3420_v41, %v3316_v62  ;;  %5593 = vst [vmem:[#allocation3 + $0x114] sm:$0xf] %v5577_v47  ;;  %v354_v47 = vld [vmem:[#allocation4 + $0xf6] sm:$0x1] }
 0x370   :  { %v3456_v27 = vmax.f32 %v3454_v23, %v3455_v25  ;;  %v3468_v15 = vrot.slane %v3467_v13, 2  ;;  %v11021_v29 = vcombine.low %v3807_v36, %v3807_v36  ;;  %v4318_v53 = vunpack.c.l.b16 %v11020_v46  ;;  %v349_v23 = vld [vmem:[#allocation4 + $0xf1] sm:$0x1]  ;;  %v350_v46 = vld [vmem:[#allocation4 + $0xf2] sm:$0x1] }
 0x371   :  { %v3445_v40 = vmax.f32 %v3443_v61, %v3444_v1  ;;  %v3480_v2 = vmax.f32 %v3478_v8, %v3479_v30  ;;  %v3809_v50 = vmax.bf16 %v3433_v34, %v3329_v60  ;;  %v11022_v18 = vcombine.low %v3808_v58, %v3808_v58 }
 0x372   :  { %v3457_v3 = vrot.slane %v3456_v27, 1  ;;  %v3469_v6 = vmax.f32 %v3467_v13, %v3468_v15  ;;  %v4319_v17 = vunpack.c.l.b16 %v11021_v29  ;;  %v11467_v19 = vcombine.low %v3805_v54, %v3805_v54 }
 0x373   :  { %v3446_v10 = vpack.i.bf16 %v3445_v40, %v3445_v40  ;;  %v3481_v37 = vrot.slane %v3480_v2, 2  ;;  %v11023_v20 = vcombine.low %v3809_v50, %v3809_v50  ;;  %v4320_v62 = vunpack.c.l.b16 %v11022_v18 }
 0x374   :  { %v3458_v24 = vmax.f32 %v3456_v27, %v3457_v3  ;;  %v3470_v21 = vrot.slane %v3469_v6, 1  ;;  %v4424_v57 = vsel %vm4334_vm1, %v4319_v17, %v4318_v53  ;;  %v4589_v55 = vsel %vm12680_vm14, %v11467_v19, %v4588_v38  ;;  %v351_v53 = vld [vmem:[#allocation4 + $0xf3] sm:$0x1] }
 0x375   :  { %v3482_v60 = vmax.f32 %v3480_v2, %v3481_v37  ;;  %v3810_v43 = vmax.bf16 %v3446_v10, %v3342_v26  ;;  %v4321_v33 = vunpack.c.l.b16 %v11023_v20  ;;  %v4425_v39 = vsel %vm4336_vm2, %v4320_v62, %v4424_v57  ;;  %4590 = vst [vmem:[#allocation2 + $0x84] sm:$0x1] %v4589_v55  ;;  %v352_v2 = vld [vmem:[#allocation4 + $0xf4] sm:$0x1]  ;;  %v5578_v10 = vld [vmem:[#allocation2 + $0x60] sm:$0xf] }
 0x376   :  { %v3459_v49 = vpack.i.bf16 %v3458_v24, %v3458_v24  ;;  %v3471_v4 = vmax.f32 %v3469_v6, %v3470_v21  ;;  %v4867_v22 = vshrl.u32 %v4663_v52, 16  ;;  %v4870_v16 = vshll.u32 %v4663_v52, 16  ;;  %v4594_v6 = vld [vmem:[#allocation2 + $0x8c] sm:$0x1]  ;;  %v5579_v37 = vld [vmem:[#allocation2 + $0x68] sm:$0xf] }
 0x377   :  { %v3483_v59 = vrot.slane %v3482_v60, 1  ;;  %v11024_v51 = vcombine.low %v3810_v43, %v3810_v43  ;;  %v4426_v56 = vsel %vm4338_vm3, %v4321_v33, %v4425_v39  ;;  %v3487_v14 = vsel %vm364_vm0, %v348_v44, 4286644096  ;;  %v4591_v62 = vld [vmem:[#allocation2 + $0x88] sm:$0xf] }
 0x378   :  { %v3472_v0 = vpack.i.bf16 %v3471_v4, %v3471_v4  ;;  %v3811_v26 = vmax.bf16 %v3459_v49, %v3355_v7  ;;  %v4869_v54 = vrot.slane %v4867_v22, 4  ;;  %v4872_v31 = vrot.slane %v4870_v16, 5  ;;  %5594 = vst [vmem:[#allocation3 + $0x138] sm:$0xf] %v5578_v10  ;;  %5595 = vst [vmem:[#allocation3 + $0x15c] sm:$0xf] %v5579_v37 }
 0x379   :  { %v3484_v41 = vmax.f32 %v3482_v60, %v3483_v59  ;;  %v4322_v63 = vunpack.c.l.b16 %v11024_v51  ;;  %v3489_v61 = vunpack.i.l.bf16 %v3487_v14  ;;  %v3490_v8 = vunpack.i.h.bf16 %v3487_v14  ;;  %v353_v33 = vld [vmem:[#allocation4 + $0xf5] sm:$0x1] }
 0x37a   :  { %v3812_v25 = vmax.bf16 %v3472_v0, %v3368_v5  ;;  %v11025_v13 = vcombine.low %v3811_v26, %v3811_v26  ;;  %v4873_v36 = vor.u32 %v4872_v31, %v4869_v54  ;;  %v3500_v34 = vsel %vm364_vm0, %v349_v23, 4286644096  ;;  %v356_v54 = vld [vmem:[#allocation4 + $0xf8] sm:$0x1] }
 0x37b   :  { %v3485_v1 = vpack.i.bf16 %v3484_v41, %v3484_v41  ;;  %v4427_v30 = vsel %vm4340_vm4, %v4322_v63, %v4426_v56  ;;  %v3491_v35 = vmax.f32 %v3489_v61, %v3490_v8  ;;  %v3502_v7 = vunpack.i.l.bf16 %v3500_v34 }
 0x37c   :  { %v11026_v58 = vcombine.low %v3812_v25, %v3812_v25  ;;  %v4323_v27 = vunpack.c.l.b16 %v11025_v13  ;;  %v4664_v15 = vld [vmem:[#allocation2 + $0x84] sm:$0x1]  ;;  %v4874_v29 = vrot.slane %v4873_v36, 4  ;;  %v3503_v40 = vunpack.i.h.bf16 %v3500_v34 }
 0x37d   :  { %v3813_v32 = vmax.bf16 %v3485_v1, %v3381_v12  ;;  %v4876_v5 = vshll.u32 %v4664_v15, 16  ;;  %v3492_v50 = vrot.slane %v3491_v35, 4  ;;  %v3513_v18 = vsel %vm364_vm0, %v350_v46, 4286644096  ;;  %v5580_v46 = vld [vmem:[#allocation2 + $0x70] sm:$0xf] }
 0x37e   :  { %v4324_v38 = vunpack.c.l.b16 %v11026_v58  ;;  %v4428_v3 = vsel %vm4342_vm5, %v4323_v27, %v4427_v30  ;;  %v3504_v17 = vmax.f32 %v3502_v7, %v3503_v40  ;;  %v3515_v19 = vunpack.i.l.bf16 %v3513_v18  ;;  %5596 = vst [vmem:[#allocation3 + $0x180] sm:$0xf] %v5580_v46 }
 0x37f   :  { %v11468_v20 = vcombine.low %v3813_v32, %v3813_v32  ;;  %v4878_v52 = vrot.slane %v4876_v5, 5  ;;  %v3493_v24 = vmax.f32 %v3491_v35, %v3492_v50  ;;  %v3516_v21 = vunpack.i.h.bf16 %v3513_v18  ;;  %v5581_v35 = vld [vmem:[#allocation2 + $0x78] sm:$0xf] }
 0x380   :  { %v4429_v28 = vsel %vm4344_vm10, %v4324_v38, %v4428_v3  ;;  %v3505_v12 = vrot.slane %v3504_v17, 4  ;;  %v3526_v57 = vsel %vm364_vm0, %v351_v53, 4286644096  ;;  %v3539_v55 = vsel %vm364_vm0, %v352_v2, 4286644096 }
 0x381   :  { %v4464_v44 = vpack.c.b16 %v4429_v28, %v4429_v28  ;;  %v4595_v60 = vsel %vm12680_vm14, %v11468_v20, %v4594_v6  ;;  %v4879_v43 = vsel %vm12658_vm12, %v4874_v29, %v4878_v52  ;;  %v3494_v39 = vrot.slane %v3493_v24, 2  ;;  %5597 = vst [vmem:[#allocation3 + $0x1a4] sm:$0xf] %v5581_v35 }
 0x382   :  { %4596 = vst [vmem:[#allocation2 + $0x8c] sm:$0x1] %v4595_v60  ;;  %4924 = vst [vmem:[#allocation3 + $0x1fc] sm:$0xf] %v4879_v43  ;;  %v3506_v49 = vmax.f32 %v3504_v17, %v3505_v12  ;;  %v3517_v4 = vmax.f32 %v3515_v19, %v3516_v21  ;;  %v3528_v22 = vunpack.i.l.bf16 %v3526_v57  ;;  %v3529_v16 = vunpack.i.h.bf16 %v3526_v57 }
 0x383   :  { %v4592_v11 = vsel %vm12666_vm13, %v4464_v44, %v4591_v62  ;;  %v3495_v59 = vmax.f32 %v3493_v24, %v3494_v39  ;;  %v3541_v51 = vunpack.i.l.bf16 %v3539_v55  ;;  %v3542_v56 = vunpack.i.h.bf16 %v3539_v55  ;;  %v357_v24 = vld [vmem:[#allocation4 + $0xf9] sm:$0x1] }
 0x384   :  { %4593 = vst [vmem:[#allocation2 + $0x88] sm:$0xf] %v4592_v11  ;;  %v3507_v23 = vrot.slane %v3506_v49, 2  ;;  %v3518_v14 = vrot.slane %v3517_v4, 4  ;;  %v3530_v0 = vmax.f32 %v3528_v22, %v3529_v16  ;;  %v3552_v26 = vsel %vm364_vm0, %v353_v33, 4286644096 }
 0x385   :  { %v3496_v31 = vrot.slane %v3495_v59, 1  ;;  %v3543_v41 = vmax.f32 %v3541_v51, %v3542_v56  ;;  %v3554_v63 = vunpack.i.l.bf16 %v3552_v26  ;;  %v3555_v61 = vunpack.i.h.bf16 %v3552_v26  ;;  %v5582_v51 = vld [vmem:[#allocation2 + $0x80] sm:$0xf]  ;;  %v358_v56 = vld [vmem:[#allocation4 + $0xfa] sm:$0x1] }
 0x386   :  { %v3508_v8 = vmax.f32 %v3506_v49, %v3507_v23  ;;  %v3519_v25 = vmax.f32 %v3517_v4, %v3518_v14  ;;  %v3531_v13 = vrot.slane %v3530_v0, 4  ;;  %v3565_v36 = vsel %vm364_vm0, %v354_v47, 4286644096  ;;  %5598 = vst [vmem:[#allocation3 + $0x1c8] sm:$0xf] %v5582_v51 }
 0x387   :  { %v3544_v34 = vrot.slane %v3543_v41, 4  ;;  %v3556_v1 = vmax.f32 %v3554_v63, %v3555_v61  ;;  %v3567_v30 = vunpack.i.l.bf16 %v3565_v36  ;;  %v3568_v15 = vunpack.i.h.bf16 %v3565_v36 }
 0x388   :  { %v3509_v7 = vrot.slane %v3508_v8, 1  ;;  %v3520_v58 = vrot.slane %v3519_v25, 2  ;;  %v3532_v27 = vmax.f32 %v3530_v0, %v3531_v13  ;;  %v3591_v32 = vsel %vm364_vm0, %v356_v54, 4286644096 }
 0x389   :  { %v4666_v29 = vld [vmem:[#allocation2 + $0x8c] sm:$0x1]  ;;  %v3545_v53 = vmax.f32 %v3543_v41, %v3544_v34  ;;  %v3557_v40 = vrot.slane %v3556_v1, 4  ;;  %v13983_v2 = vmax.f32 %v3495_v59, %v3496_v31  ;;  %v3569_v10 = vmax.f32 %v3567_v30, %v3568_v15 }
 0x38a   :  { %v4890_v5 = vshll.u32 %v4666_v29, 16  ;;  %v3521_v50 = vmax.f32 %v3519_v25, %v3520_v58  ;;  %v3533_v18 = vrot.slane %v3532_v27, 2  ;;  %v13985_v6 = vmax.f32 %v3508_v8, %v3509_v7  ;;  %v359_v8 = vld [vmem:[#allocation4 + $0xfb] sm:$0x1]  ;;  %v360_v25 = vld [vmem:[#allocation4 + $0xfc] sm:$0x1] }
 0x38b   :  { %v4618_v38 = vld [vmem:[#allocation2 + $0x88] sm:$0xf]  ;;  %v3546_v17 = vrot.slane %v3545_v53, 2  ;;  %v3558_v19 = vmax.f32 %v3556_v1, %v3557_v40  ;;  %v3593_v52 = vunpack.i.l.bf16 %v3591_v32  ;;  %v3570_v43 = vrot.slane %v3569_v10, 4  ;;  %v361_v58 = vld [vmem:[#allocation4 + $0xfd] sm:$0x1] }
 0x38c   :  { %v4665_v3 = vld [vmem:[#allocation2 + $0x88] sm:$0xf]  ;;  %4634 = vst [vmem:[#allocation3 + $0x21c] sm:$0xf] %v4618_v38  ;;  %v4892_v62 = vrot.slane %v4890_v5, 5  ;;  %v3522_v21 = vrot.slane %v3521_v50, 1  ;;  %v3534_v28 = vmax.f32 %v3532_v27, %v3533_v18  ;;  %v3594_v33 = vunpack.i.h.bf16 %v3591_v32 }
 0x38d   :  { %v4881_v37 = vshrl.u32 %v4665_v3, 16  ;;  %v4884_v20 = vshll.u32 %v4665_v3, 16  ;;  %v3547_v12 = vmax.f32 %v3545_v53, %v3546_v17  ;;  %v3559_v57 = vrot.slane %v3558_v19, 2  ;;  %v5103_v55 = vld [vmem:[#allocation2 + $0x88] sm:$0xf] }
 0x38e   :  { %5119 = vst [vmem:[#allocation3 + $0x204] sm:$0xf] %v5103_v55  ;;  %v13987_v39 = vmax.f32 %v3521_v50, %v3522_v21  ;;  %v3535_v49 = vrot.slane %v3534_v28, 1  ;;  %v3571_v11 = vmax.f32 %v3569_v10, %v3570_v43  ;;  %v3595_v47 = vmax.f32 %v3593_v52, %v3594_v33  ;;  %v5583_v54 = vld [vmem:[#allocation2 + $0x88] sm:$0xf] }
 0x38f   :  { %v4883_v44 = vrot.slane %v4881_v37, 4  ;;  %v4886_v60 = vrot.slane %v4884_v20, 5  ;;  %v3548_v4 = vrot.slane %v3547_v12, 1  ;;  %v3560_v22 = vmax.f32 %v3558_v19, %v3559_v57  ;;  %5599 = vst [vmem:[#allocation3 + $0x1ec] sm:$0xf] %v5583_v54 }
 0x390   :  { %v3604_v59 = vsel %vm364_vm0, %v357_v24, 4286644096  ;;  %v3498_v23 = vpack.i.bf16 %v13983_v2, %v13983_v2  ;;  %v3511_v14 = vpack.i.bf16 %v13985_v6, %v13985_v6  ;;  %v13994_v0 = vmax.f32 %v3534_v28, %v3535_v49 }
 0x391   :  { %v4887_v16 = vor.u32 %v4886_v60, %v4883_v44  ;;  %v3561_v26 = vrot.slane %v3560_v22, 1  ;;  %v3572_v41 = vrot.slane %v3571_v11, 2  ;;  %v3596_v63 = vrot.slane %v3595_v47, 4  ;;  %v362_v44 = vld [vmem:[#allocation4 + $0xfe] sm:$0x1] }
 0x392   :  { %v3606_v61 = vunpack.i.l.bf16 %v3604_v59  ;;  %v3524_v13 = vpack.i.bf16 %v13987_v39, %v13987_v39  ;;  %v3537_v36 = vpack.i.bf16 %v13994_v0, %v13994_v0  ;;  %v14000_v46 = vmax.f32 %v3547_v12, %v3548_v4  ;;  %v4954_v4 = vld [vmem:[#allocation2 + $0x80] sm:$0xe] }
 0x393   :  { %v4888_v31 = vrot.slane %v4887_v16, 4  ;;  %v3607_v34 = vunpack.i.h.bf16 %v3604_v59  ;;  %v3573_v30 = vmax.f32 %v3571_v11, %v3572_v41  ;;  %v3597_v35 = vmax.f32 %v3595_v47, %v3596_v63  ;;  %v12204_v16 = vld [vmem:[#allocation3 + $0x1f8] ss:$36 sps:$4 sm:$0xff]  }
 0x394   :  { %v3617_v7 = vsel %vm364_vm0, %v358_v56, 4286644096  ;;  %v14005_v27 = vmax.f32 %v3560_v22, %v3561_v26  ;;  %v3630_v5 = vsel %vm364_vm0, %v359_v8, 4286644096  ;;  %v3643_v50 = vsel %vm364_vm0, %v360_v25, 4286644096 }
 0x395   :  { %v4893_v1 = vsel %vm12658_vm12, %v4888_v31, %v4892_v62  ;;  %v3608_v15 = vmax.f32 %v3606_v61, %v3607_v34  ;;  %v3619_v29 = vunpack.i.l.bf16 %v3617_v7  ;;  %v3620_v53 = vunpack.i.h.bf16 %v3617_v7 }
 0x396   :  { %4925 = vst [vmem:[#allocation3 + $0x220] sm:$0xf] %v4893_v1  ;;  %v3574_v40 = vrot.slane %v3573_v30, 1  ;;  %v3598_v32 = vrot.slane %v3597_v35, 2  ;;  %v3632_v3 = vunpack.i.l.bf16 %v3630_v5  ;;  %v3633_v17 = vunpack.i.h.bf16 %v3630_v5 }
 0x397   :  { %v3609_v18 = vrot.slane %v3608_v15, 4  ;;  %v3621_v38 = vmax.f32 %v3619_v29, %v3620_v53  ;;  %v3645_v37 = vunpack.i.l.bf16 %v3643_v50  ;;  %v3646_v20 = vunpack.i.h.bf16 %v3643_v50 }
 0x398   :  { %v14009_v19 = vmax.f32 %v3573_v30, %v3574_v40  ;;  %v3599_v10 = vmax.f32 %v3597_v35, %v3598_v32  ;;  %v3634_v24 = vmax.f32 %v3632_v3, %v3633_v17  ;;  %v3656_v21 = vsel %vm364_vm0, %v361_v58, 4286644096  ;;  %v4955_v35 = vld [vmem:[#allocation2 + $0x84] sm:$0x1] }
 0x399   :  { %v3610_v62 = vmax.f32 %v3608_v15, %v3609_v18  ;;  %v3622_v52 = vrot.slane %v3621_v38, 4  ;;  %v3550_v28 = vpack.i.bf16 %v14000_v46, %v14000_v46  ;;  %v3647_v57 = vmax.f32 %v3645_v37, %v3646_v20 }
 0x39a   :  { %v3600_v12 = vrot.slane %v3599_v10, 1  ;;  %v3658_v55 = vunpack.i.l.bf16 %v3656_v21  ;;  %v3635_v33 = vrot.slane %v3634_v24, 4  ;;  %v3659_v49 = vunpack.i.h.bf16 %v3656_v21 }
 0x39b   :  { %v3611_v60 = vrot.slane %v3610_v62, 2  ;;  %v3623_v43 = vmax.f32 %v3621_v38, %v3622_v52  ;;  %v3563_v11 = vpack.i.bf16 %v14005_v27, %v14005_v27  ;;  %v3576_v47 = vpack.i.bf16 %v14009_v19, %v14009_v19  ;;  %v4957_v52 = vld [vmem:[#allocation2 + $0x8c] sm:$0x1] }
 0x39c   :  { %v3601_v59 = vmax.f32 %v3599_v10, %v3600_v12  ;;  %v3648_v51 = vrot.slane %v3647_v57, 4  ;;  %v3636_v54 = vmax.f32 %v3634_v24, %v3635_v33  ;;  %v3660_v31 = vmax.f32 %v3658_v55, %v3659_v49 }
 0x39d   :  { %v12200_v22 = vld [vmem:[#allocation3 + $0x1fc] ss:$36 sps:$4 sm:$0xff]   ;;  %v3612_v56 = vmax.f32 %v3610_v62, %v3611_v60  ;;  %v3624_v26 = vrot.slane %v3623_v43, 2  ;;  %v3669_v61 = vsel %vm364_vm0, %v362_v44, 4286644096  ;;  %v11066_v8 = vrot.slane %v4954_v4, 9 }
 0x39e   :  { %7169 = vmatprep.mubr.bf16.mxu0 %v12200_v22  ;;  %v3602_v41 = vpack.i.bf16 %v3601_v59, %v3601_v59  ;;  %v3649_v63 = vmax.f32 %v3647_v57, %v3648_v51  ;;  %v3637_v1 = vrot.slane %v3636_v54, 2  ;;  %v3661_v30 = vrot.slane %v3660_v31, 4  ;;  %v4956_v62 = vld [vmem:[#allocation2 + $0x88] sm:$0xe] }
 0x39f   :  { %7170 = vmatmul.mubr.bf16.gmra.mxu0 %v12204_v16  ;;  %v3613_v25 = vrot.slane %v3612_v56, 1  ;;  %v3625_v34 = vmax.f32 %v3623_v43, %v3624_v26  ;;  %v3671_v58 = vunpack.i.l.bf16 %v3669_v61  ;;  %v3672_v15 = vunpack.i.h.bf16 %v3669_v61  ;;  %v5121_v60 = vld [vmem:[#allocation2 + $0x8] sm:$0xf]  ;;  %v5122_v61 = vld [vmem:[#allocation2 + $0xc] sm:$0x1] }
 0x3a0   :  { %v3650_v7 = vrot.slane %v3649_v63, 2  ;;  %v3814_v29 = vmax.bf16 %v3602_v41, %v3498_v23  ;;  %v3638_v32 = vmax.f32 %v3636_v54, %v3637_v1  ;;  %v3662_v5 = vmax.f32 %v3660_v31, %v3661_v30 }
 0x3a1   :  { %v3614_v53 = vmax.f32 %v3612_v56, %v3613_v25  ;;  %v3626_v40 = vrot.slane %v3625_v34, 1  ;;  %v3673_v18 = vmax.f32 %v3671_v58, %v3672_v15  ;;  %v5051_v3 = vrot.slane %v4955_v35, 5 }
 0x3a2   :  { %v3651_v50 = vmax.f32 %v3649_v63, %v3650_v7  ;;  %v11028_v38 = vcombine.low %v3814_v29, %v3814_v29  ;;  %v3639_v37 = vrot.slane %v3638_v32, 1  ;;  %v3663_v20 = vrot.slane %v3662_v5, 2  ;;  %v5585_v29 = vld [vmem:[#allocation2 + $0x98] sm:$0xf] }
 0x3a3   :  { %v3615_v17 = vpack.i.bf16 %v3614_v53, %v3614_v53  ;;  %v3627_v10 = vmax.f32 %v3625_v34, %v3626_v40  ;;  %v3674_v21 = vrot.slane %v3673_v18, 4  ;;  %v5052_v2 = vsel %vm12746_vm7, %v11066_v8, %v5051_v3  ;;  %5601 = vst [vmem:[#allocation3 + $0x234] sm:$0xf] %v5585_v29  ;;  %v5409_v3 = vld [vmem:[#allocation2 + $0x8] sm:$0xe] }
 0x3a4   :  { %v3652_v24 = vrot.slane %v3651_v50, 1  ;;  %v4326_v12 = vunpack.c.l.b16 %v11028_v38  ;;  %v3640_v57 = vmax.f32 %v3638_v32, %v3639_v37  ;;  %v3664_v55 = vmax.f32 %v3662_v5, %v3663_v20  ;;  %5087 = vst [vmem:[#allocation3 + $0x200] sm:$0xf] %v5052_v2  ;;  %v5602_v2 = vld [vmem:[#allocation2 + $0x10] sm:$0xf] }
 0x3a5   :  { %v3628_v23 = vpack.i.bf16 %v3627_v10, %v3627_v10  ;;  %v3815_v44 = vmax.bf16 %v3615_v17, %v3511_v14  ;;  %v3675_v33 = vmax.f32 %v3673_v18, %v3674_v21  ;;  %v11067_v49 = vrot.slane %v4956_v62, 9  ;;  %v5410_v17 = vld [vmem:[#allocation2 + $0xc] sm:$0x1]  ;;  %v5128_v29 = vld [vmem:[#allocation2 + $0x24] sm:$0x1] }
 0x3a6   :  { %v3653_v43 = vmax.f32 %v3651_v50, %v3652_v24  ;;  %v5055_v4 = vrot.slane %v4957_v52, 5  ;;  %v3641_v22 = vpack.i.bf16 %v3640_v57, %v3640_v57  ;;  %v3665_v16 = vrot.slane %v3664_v55, 1  ;;  %v5411_v52 = vld [vmem:[#allocation2 + $0x10] sm:$0xe] }
 0x3a7   :  { %v3816_v59 = vmax.bf16 %v3628_v23, %v3524_v13  ;;  %v11029_v51 = vcombine.low %v3815_v44, %v3815_v44  ;;  %v3676_v26 = vrot.slane %v3675_v33, 2  ;;  %v5154_v6 = vshrl.u32 %v5121_v60, 16  ;;  %v5123_v13 = vld [vmem:[#allocation2 + $0x10] sm:$0xf] }
 0x3a8   :  { %v3654_v56 = vpack.i.bf16 %v3653_v43, %v3653_v43  ;;  %v5056_v54 = vsel %vm12746_vm7, %v11067_v49, %v5055_v4  ;;  %v3666_v14 = vmax.f32 %v3664_v55, %v3665_v16  ;;  %v3817_v31 = vmax.bf16 %v3641_v22, %v3537_v36  ;;  %v5604_v22 = vld [vmem:[#allocation2 + $0x18] sm:$0xf] }
 0x3a9   :  { %v11030_v41 = vcombine.low %v3816_v59, %v3816_v59  ;;  %v4327_v63 = vunpack.c.l.b16 %v11029_v51  ;;  %5088 = vst [vmem:[#allocation3 + $0x224] sm:$0xf] %v5056_v54  ;;  %v3677_v8 = vmax.f32 %v3675_v33, %v3676_v26  ;;  %v5156_v25 = vrot.slane %v5154_v6, 4  ;;  %v5605_v54 = vld [vmem:[#allocation2 + $0x1c] sm:$0x1] }
 0x3aa   :  { %v3818_v39 = vmax.bf16 %v3654_v56, %v3550_v28  ;;  %v5157_v34 = vshll.u32 %v5121_v60, 16  ;;  %v3667_v1 = vpack.i.bf16 %v3666_v14, %v3666_v14  ;;  %v11031_v30 = vcombine.low %v3817_v31, %v3817_v31  ;;  %v5124_v28 = vld [vmem:[#allocation2 + $0x14] sm:$0x1] }
 0x3ab   :  { %v4328_v35 = vunpack.c.l.b16 %v11030_v41  ;;  %v4430_v7 = vsel %vm4334_vm1, %v4327_v63, %v4326_v12  ;;  %v3678_v58 = vrot.slane %v3677_v8, 1  ;;  %v5163_v15 = vshll.u32 %v5122_v61, 16  ;;  %v5412_v12 = vld [vmem:[#allocation2 + $0x14] sm:$0x1]  ;;  %v5125_v61 = vld [vmem:[#allocation2 + $0x18] sm:$0xf] }
 0x3ac   :  { %v11032_v0 = vcombine.low %v3818_v39, %v3818_v39  ;;  %v5159_v36 = vrot.slane %v5157_v34, 5  ;;  %v3819_v53 = vmax.bf16 %v3667_v1, %v3563_v11  ;;  %v4329_v40 = vunpack.c.l.b16 %v11031_v30  ;;  %v5603_v60 = vld [vmem:[#allocation2 + $0x14] sm:$0x1]  ;;  %v5126_v34 = vld [vmem:[#allocation2 + $0x1c] sm:$0x1] }
 0x3ad   :  { %v4431_v46 = vsel %vm4336_vm2, %v4328_v35, %v4430_v7  ;;  %v5168_v32 = vshrl.u32 %v5123_v13, 16  ;;  %v3679_v5 = vmax.f32 %v3677_v8, %v3678_v58  ;;  %v5165_v38 = vrot.slane %v5163_v15, 5  ;;  %v5127_v58 = vld [vmem:[#allocation2 + $0x20] sm:$0xf] }
 0x3ae   :  { %v4330_v50 = vunpack.c.l.b16 %v11032_v0  ;;  %v5160_v18 = vor.u32 %v5159_v36, %v5156_v25  ;;  %v11033_v10 = vcombine.low %v3819_v53, %v3819_v53  ;;  %v4432_v37 = vsel %vm4338_vm3, %v4329_v40, %v4431_v46  ;;  %v4597_v36 = vld [vmem:[#allocation2 + $0x90] sm:$0xf] }
 0x3af   :  { %v5170_v20 = vrot.slane %v5168_v32, 4  ;;  %v5171_v62 = vshll.u32 %v5123_v13, 16  ;;  %v3680_v27 = vpack.i.bf16 %v3679_v5, %v3679_v5  ;;  %v5177_v21 = vshll.u32 %v5124_v28, 16 }
 0x3b0   :  { %v4433_v11 = vsel %vm4340_vm4, %v4330_v50, %v4432_v37  ;;  %v5161_v24 = vrot.slane %v5160_v18, 4  ;;  %v4331_v23 = vunpack.c.l.b16 %v11033_v10  ;;  %v11068_v55 = vrot.slane %v5409_v3, 9  ;;  %v5413_v50 = vld [vmem:[#allocation2 + $0x18] sm:$0xe]  ;;  %v5414_v18 = vld [vmem:[#allocation2 + $0x1c] sm:$0x1] }
 0x3b1   :  { %v5173_v57 = vrot.slane %v5171_v62, 5  ;;  %v5475_v44 = vrot.slane %v5410_v17, 5  ;;  %v3820_v43 = vmax.bf16 %v3680_v27, %v3576_v47  ;;  %v5179_v49 = vrot.slane %v5177_v21, 5  ;;  %v5415_v37 = vld [vmem:[#allocation2 + $0x20] sm:$0xe] }
 0x3b2   :  { %v5166_v33 = vsel %vm12658_vm12, %v5161_v24, %v5165_v38  ;;  %v11069_v4 = vrot.slane %v5411_v52, 9  ;;  %v4434_v16 = vsel %vm4342_vm5, %v4331_v23, %v4433_v11  ;;  %v5479_v56 = vrot.slane %v5412_v12, 5  ;;  %v5416_v24 = vld [vmem:[#allocation2 + $0x24] sm:$0x1] }
 0x3b3   :  { %v5174_v59 = vor.u32 %v5173_v57, %v5170_v20  ;;  %5393 = vst [vmem:[#allocation3 + $0x10] sm:$0xf] %v5166_v33  ;;  %v5476_v51 = vsel %vm12746_vm7, %v11068_v55, %v5475_v44  ;;  %v11034_v26 = vcombine.low %v3820_v43, %v3820_v43  ;;  %v5635_v6 = vshrl.u32 %v5602_v2, 16  ;;  %v5606_v20 = vld [vmem:[#allocation2 + $0x20] sm:$0xf] }
 0x3b4   :  { %5553 = vst [vmem:[#allocation3 + $0x14] sm:$0xf] %v5476_v51  ;;  %v5638_v19 = vshll.u32 %v5602_v2, 16  ;;  %v5644_v47 = vshll.u32 %v5603_v60, 16  ;;  %v5480_v31 = vsel %vm12746_vm7, %v11069_v4, %v5479_v56  ;;  %v5649_v41 = vshrl.u32 %v5604_v22, 16 }
 0x3b5   :  { %v5175_v14 = vrot.slane %v5174_v59, 4  ;;  %v5652_v63 = vshll.u32 %v5604_v22, 16  ;;  %v4332_v8 = vunpack.c.l.b16 %v11034_v26  ;;  %5554 = vst [vmem:[#allocation3 + $0x38] sm:$0xf] %v5480_v31  ;;  %v5637_v39 = vrot.slane %v5635_v6, 4  ;;  %v12222_v31 = vld [vmem:[#allocation7 + $0x230] sm:$0xff]  }
 0x3b6   :  { %v5640_v13 = vrot.slane %v5638_v19, 5  ;;  %v5646_v25 = vrot.slane %v5644_v47, 5  ;;  %v5651_v30 = vrot.slane %v5649_v41, 4  ;;  %v5658_v7 = vshll.u32 %v5605_v54, 16  ;;  %v5607_v57 = vld [vmem:[#allocation2 + $0x24] sm:$0x1] }
 0x3b7   :  { %v5180_v1 = vsel %vm12658_vm12, %v5175_v14, %v5179_v49  ;;  %v5654_v35 = vrot.slane %v5652_v63, 5  ;;  %v4435_v0 = vsel %vm4344_vm10, %v4332_v8, %v4434_v16  ;;  %v5182_v53 = vshrl.u32 %v5125_v61, 16  ;;  %v5608_v55 = vld [vmem:[#allocation2 + $0x28] sm:$0xf]  ;;  %v5609_v49 = vld [vmem:[#allocation2 + $0x2c] sm:$0x1] }
 0x3b8   :  { %5394 = vst [vmem:[#allocation3 + $0x34] sm:$0xf] %v5180_v1  ;;  %v5641_v15 = vor.u32 %v5640_v13, %v5637_v39  ;;  %v5185_v40 = vshll.u32 %v5125_v61, 16  ;;  %v4466_v46 = vpack.c.b16 %v4435_v0, %v4435_v0  ;;  %v5660_v32 = vrot.slane %v5658_v7, 5  ;;  %v5129_v51 = vld [vmem:[#allocation2 + $0x28] sm:$0xf] }
 0x3b9   :  { %v5655_v28 = vor.u32 %v5654_v35, %v5651_v30  ;;  %v5191_v5 = vshll.u32 %v5126_v34, 16  ;;  %v5184_v3 = vrot.slane %v5182_v53, 4  ;;  %v5196_v10 = vshrl.u32 %v5127_v58, 16  ;;  %v5130_v61 = vld [vmem:[#allocation2 + $0x2c] sm:$0x1] }
 0x3ba   :  { %v5642_v38 = vrot.slane %v5641_v15, 4  ;;  %v5187_v17 = vrot.slane %v5185_v40, 5  ;;  %v4598_v62 = vsel %vm12666_vm13, %v4466_v46, %v4597_v36  ;;  %v5199_v11 = vshll.u32 %v5127_v58, 16  ;;  %v5131_v34 = vld [vmem:[#allocation2 + $0x30] sm:$0xf]  ;;  %v12444_v36 = vld [vmem:[#allocation7 + $0x238] sm:$0xff]  }
 0x3bb   :  { %v5656_v52 = vrot.slane %v5655_v28, 4  ;;  %v5193_v27 = vrot.slane %v5191_v5, 5  ;;  %4599 = vst [vmem:[#allocation2 + $0x90] sm:$0xf] %v4598_v62  ;;  %v5198_v2 = vrot.slane %v5196_v10, 4  ;;  %v5205_v23 = vshll.u32 %v5128_v29, 16 }
 0x3bc   :  { %v5647_v21 = vsel %vm12658_vm12, %v5642_v38, %v5646_v25  ;;  %v5188_v12 = vor.u32 %v5187_v17, %v5184_v3  ;;  %v5201_v60 = vrot.slane %v5199_v11, 5  ;;  %v11070_v43 = vrot.slane %v5413_v50, 9  ;;  %v12212_v56 = vld [vmem:[#allocation3 + $0x14] ss:$36 sps:$4 sm:$0xff]   ;;  %v5417_v58 = vld [vmem:[#allocation2 + $0x28] sm:$0xe] }
 0x3bd   :  { %v5661_v44 = vsel %vm12658_vm12, %v5656_v52, %v5660_v32  ;;  %5874 = vst [vmem:[#allocation3 + $0x1c] sm:$0xf] %v5647_v21  ;;  %v5483_v33 = vrot.slane %v5414_v18, 5  ;;  %v5207_v22 = vrot.slane %v5205_v23, 5  ;;  %v11071_v16 = vrot.slane %v5415_v37, 9  ;;  %7307 = vmatprep.mubr.bf16.mxu0 %v12212_v56  ;;  %v12229_v38 = vld [vmem:[#allocation7 + $0x228] sm:$0xff]  }
 0x3be   :  { %5875 = vst [vmem:[#allocation3 + $0x40] sm:$0xf] %v5661_v44  ;;  %v5189_v4 = vrot.slane %v5188_v12, 4  ;;  %v5487_v59 = vrot.slane %v5416_v24, 5  ;;  %v5202_v54 = vor.u32 %v5201_v60, %v5198_v2  ;;  %v5663_v19 = vshrl.u32 %v5606_v20, 16 }
 0x3bf   :  { %v12216_v26 = vld [vmem:[#allocation3 + $0x10] ss:$36 sps:$4 sm:$0xff]   ;;  %v5484_v6 = vsel %vm12746_vm7, %v11070_v43, %v5483_v33  ;;  %v5666_v41 = vshll.u32 %v5606_v20, 16  ;;  %v5672_v63 = vshll.u32 %v5607_v57, 16  ;;  %v5677_v13 = vshrl.u32 %v5608_v55, 16  ;;  %v12236_v33 = vld [vmem:[#allocation7 + $0x220] sm:$0xff]  }
 0x3c0   :  { %v5194_v47 = vsel %vm12658_vm12, %v5189_v4, %v5193_v27  ;;  %v5488_v14 = vsel %vm12746_vm7, %v11071_v16, %v5487_v59  ;;  %5555 = vst [vmem:[#allocation3 + $0x5c] sm:$0xf] %v5484_v6  ;;  %v5203_v8 = vrot.slane %v5202_v54, 4  ;;  %v5665_v39 = vrot.slane %v5663_v19, 4  ;;  %7308 = vmatmul.mubr.bf16.vlgmr.msra.gmra.mxu0 %v12216_v26  ;;  %v5132_v35 = vld [vmem:[#allocation2 + $0x34] sm:$0x1] }
 0x3c1   :  { %5395 = vst [vmem:[#allocation3 + $0x58] sm:$0xf] %v5194_v47  ;;  %5556 = vst [vmem:[#allocation3 + $0x80] sm:$0xf] %v5488_v14  ;;  %v5680_v25 = vshll.u32 %v5608_v55, 16  ;;  %v5668_v1 = vrot.slane %v5666_v41, 5  ;;  %12031 = vmatpush3.bf16.msra.mxu0 %v12444_v36 }
 0x3c2   :  { %v5686_v30 = vshll.u32 %v5609_v49, 16  ;;  %v5210_v7 = vshrl.u32 %v5129_v51, 16  ;;  %v5104_v0 = vld [vmem:[#allocation2 + $0x90] sm:$0xf]  ;;  %v5208_v15 = vsel %vm12658_vm12, %v5203_v8, %v5207_v22  ;;  %v5679_v29 = vrot.slane %v5677_v13, 4  ;;  %12032 = vmatprep.subr.bf16.mxu0 %v12222_v31 }
 0x3c3   :  { %v5682_v53 = vrot.slane %v5680_v25, 5  ;;  %v5213_v40 = vshll.u32 %v5129_v51, 16  ;;  %v5418_v46 = vld [vmem:[#allocation2 + $0x2c] sm:$0x1]  ;;  %5120 = vst [vmem:[#allocation3 + $0x228] sm:$0xf] %v5104_v0  ;;  %v5669_v28 = vor.u32 %v5668_v1, %v5665_v39 }
 0x3c4   :  { %5396 = vst [vmem:[#allocation3 + $0x7c] sm:$0xf] %v5208_v15  ;;  %v5674_v32 = vrot.slane %v5672_v63, 5  ;;  %v5212_v5 = vrot.slane %v5210_v7, 4  ;;  %v5219_v50 = vshll.u32 %v5130_v61, 16  ;;  %v5688_v17 = vrot.slane %v5686_v30, 5 }
 0x3c5   :  { %v5419_v18 = vld [vmem:[#allocation2 + $0x30] sm:$0xe]  ;;  %v5683_v3 = vor.u32 %v5682_v53, %v5679_v29  ;;  %v5215_v10 = vrot.slane %v5213_v40, 5  ;;  %v5420_v37 = vld [vmem:[#allocation2 + $0x34] sm:$0x1]  ;;  %v5670_v20 = vrot.slane %v5669_v28, 4  ;;  %12033 = vmatpush3.bf16.msra.mxu0 %v12222_v31 }
 0x3c6   :  { %v5221_v62 = vrot.slane %v5219_v50, 5  ;;  %v5224_v52 = vshrl.u32 %v5131_v34, 16  ;;  %v5227_v27 = vshll.u32 %v5131_v34, 16  ;;  %v5610_v11 = vld [vmem:[#allocation2 + $0x30] sm:$0xf]  ;;  %v5233_v12 = vshll.u32 %v5132_v35, 16  ;;  %12034 = vmatprep.subr.bf16.mxu0 %v12229_v38 }
 0x3c7   :  { %v5684_v24 = vrot.slane %v5683_v3, 4  ;;  %v5216_v21 = vor.u32 %v5215_v10, %v5212_v5  ;;  %v11072_v2 = vrot.slane %v5417_v58, 9  ;;  %v5584_v23 = vld [vmem:[#allocation2 + $0x90] sm:$0xf]  ;;  %v5675_v57 = vsel %vm12658_vm12, %v5670_v20, %v5674_v32  ;;  %v5611_v43 = vld [vmem:[#allocation2 + $0x34] sm:$0x1] }
 0x3c8   :  { %v5226_v55 = vrot.slane %v5224_v52, 4  ;;  %v5229_v44 = vrot.slane %v5227_v27, 5  ;;  %v5491_v60 = vrot.slane %v5418_v46, 5  ;;  %5600 = vst [vmem:[#allocation3 + $0x210] sm:$0xf] %v5584_v23  ;;  %v5235_v22 = vrot.slane %v5233_v12, 5 }
 0x3c9   :  { %v5689_v49 = vsel %vm12658_vm12, %v5684_v24, %v5688_v17  ;;  %5876 = vst [vmem:[#allocation3 + $0x64] sm:$0xf] %v5675_v57  ;;  %v5217_v4 = vrot.slane %v5216_v21, 4  ;;  %v11073_v16 = vrot.slane %v5419_v18, 9  ;;  %v5612_v59 = vld [vmem:[#allocation2 + $0x38] sm:$0xf]  ;;  %12035 = vmatpush3.bf16.msra.mxu0 %v12229_v38 }
 0x3ca   :  { %v227_v51 = vld [vmem:[#allocation4 + $0x77] sm:$0x1]  ;;  %v12217_v56 = vld [vmem:[#allocation3 + $0x1c] ss:$36 sps:$4 sm:$0xff]   ;;  %5877 = vst [vmem:[#allocation3 + $0x88] sm:$0xf] %v5689_v49  ;;  %v5230_v26 = vor.u32 %v5229_v44, %v5226_v55  ;;  %v5492_v54 = vsel %vm12746_vm7, %v11072_v2, %v5491_v60  ;;  %12036 = vmatprep.subr.bf16.mxu0 %v12236_v33 }
 0x3cb   :  { %v5495_v6 = vrot.slane %v5420_v37, 5  ;;  %v5613_v19 = vld [vmem:[#allocation2 + $0x3c] sm:$0x1]  ;;  %v5691_v47 = vshrl.u32 %v5610_v11, 16  ;;  %v12206_v14 = vld [vmem:[#allocation3 + $0x204] ss:$36 sps:$4 sm:$0xff]   ;;  %v5222_v41 = vsel %vm12658_vm12, %v5217_v4, %v5221_v62 }
 0x3cc   :  { %v12208_v31 = vld [vmem:[#allocation3 + $0x200] ss:$36 sps:$4 sm:$0xff]   ;;  %5557 = vst [vmem:[#allocation3 + $0xa4] sm:$0xf] %v5492_v54  ;;  %v5694_v63 = vshll.u32 %v5610_v11, 16  ;;  %v5231_v13 = vrot.slane %v5230_v26, 4  ;;  %7266 = vmatprep.mubr.bf16.mxu1 %v12206_v14 }
 0x3cd   :  { %v235_v61 = vld [vmem:[#allocation4 + $0x7f] sm:$0x1]  ;;  %5397 = vst [vmem:[#allocation3 + $0xa0] sm:$0xf] %v5222_v41  ;;  %v5496_v25 = vsel %vm12746_vm7, %v11073_v16, %v5495_v6  ;;  %v5693_v34 = vrot.slane %v5691_v47, 4  ;;  %v5700_v30 = vshll.u32 %v5611_v43, 16  ;;  %7267 = vmatmul.mubr.bf16.gmra.mxu1 %v12208_v31  ;;  %12037 = vmatpush3.bf16.msra.mxu0 %v12236_v33  ;;  %v14090_v6 = vpop.f32.mrf.mxu0 }
 0x3ce   :  { %v12220_v8 = vld [vmem:[#allocation3 + $0x5c] ss:$36 sps:$4 sm:$0xff]   ;;  %5558 = vst [vmem:[#allocation3 + $0xc8] sm:$0xf] %v5496_v25  ;;  %v5696_v1 = vrot.slane %v5694_v63, 5  ;;  %v5705_v35 = vshrl.u32 %v5612_v59, 16  ;;  %v5236_v58 = vsel %vm12658_vm12, %v5231_v13, %v5235_v22  ;;  %7404 = vmatprep.mubr.bf16.mxu1 %v12217_v56 }
 0x3cf   :  { %v12223_v39 = vld [vmem:[#allocation3 + $0x58] ss:$36 sps:$4 sm:$0xff]   ;;  %7315 = vmatprep.mubr.bf16.mxu0 %v12220_v8  ;;  %v5708_v0 = vshll.u32 %v5612_v59, 16  ;;  %v5714_v36 = vshll.u32 %v5613_v19, 16  ;;  %v1914_v15 = vsel %vm364_vm0, %v227_v51, 4286644096  ;;  %v14092_v19 = vpop.f32.mrf.mxu1 }
 0x3d0   :  { %v12242_v7 = vld [vmem:[#allocation7 + $0x218] sm:$0xff]   ;;  %7316 = vmatmul.mubr.bf16.gmra.mxu0 %v12223_v39  ;;  %5398 = vst [vmem:[#allocation3 + $0xc4] sm:$0xf] %v5236_v58  ;;  %v5697_v29 = vor.u32 %v5696_v1, %v5693_v34  ;;  %v5702_v53 = vrot.slane %v5700_v30, 5  ;;  %v5707_v40 = vrot.slane %v5705_v35, 4  ;;  %v1916_v46 = vunpack.i.l.bf16 %v1914_v15  ;;  %v12249_v62 = vld [vmem:[#allocation7 + $0x210] sm:$0xff]   ;;  %v11503_v34 = vpop.f32.mrf.mxu0 }
 0x3d1   :  { %v5133_v28 = vld [vmem:[#allocation2 + $0x38] sm:$0xf]  ;;  %v5134_v32 = vld [vmem:[#allocation2 + $0x3c] sm:$0x1]  ;;  %v5710_v5 = vrot.slane %v5708_v0, 5  ;;  %v1917_v50 = vunpack.i.h.bf16 %v1914_v15  ;;  %v5716_v17 = vrot.slane %v5714_v36, 5  ;;  %12038 = vmatprep.subr.bf16.mxu0 %v12242_v7  ;;  %v11567_v1 = vpop.f32.mrf.mxu1 }
 0x3d2   :  { %v2018_v18 = vsel %vm364_vm0, %v235_v61, 4286644096  ;;  %v5135_v38 = vld [vmem:[#allocation2 + $0x40] sm:$0xf]  ;;  %v5698_v3 = vrot.slane %v5697_v29, 4  ;;  %v5238_v24 = vshrl.u32 %v5133_v28, 16  ;;  %12039 = vmatpush3.bf16.msra.mxu0 %v12242_v7 }
 0x3d3   :  { %v2020_v10 = vunpack.i.l.bf16 %v2018_v18  ;;  %v2021_v37 = vunpack.i.h.bf16 %v2018_v18  ;;  %v5421_v20 = vld [vmem:[#allocation2 + $0x38] sm:$0xe]  ;;  %v5711_v27 = vor.u32 %v5710_v5, %v5707_v40  ;;  %v1918_v11 = vmax.f32 %v1916_v46, %v1917_v50  ;;  %v5422_v12 = vld [vmem:[#allocation2 + $0x3c] sm:$0x1]  ;;  %v12224_v2 = vld [vmem:[#allocation3 + $0x64] ss:$36 sps:$4 sm:$0xff]   ;;  %12040 = vmatprep.subr.bf16.mxu0 %v12249_v62 }
 0x3d4   :  { %v12219_v52 = vld [vmem:[#allocation3 + $0x18] ss:$36 sps:$4 sm:$0xff]   ;;  %v5241_v21 = vshll.u32 %v5133_v28, 16  ;;  %v5703_v23 = vsel %vm12658_vm12, %v5698_v3, %v5702_v53  ;;  %v5247_v55 = vshll.u32 %v5134_v32, 16  ;;  %v5252_v44 = vshrl.u32 %v5135_v38, 16  ;;  %v12256_v54 = vld [vmem:[#allocation7 + $0x208] sm:$0xff]   ;;  %v14099_v28 = vpop.f32.mrf.mxu0  ;;  %v14101_v32 = vpop.f32.mrf.mxu1 }
 0x3d5   :  { %v2022_v57 = vmax.f32 %v2020_v10, %v2021_v37  ;;  %v5614_v60 = vld [vmem:[#allocation2 + $0x40] sm:$0xf]  ;;  %v5712_v43 = vrot.slane %v5711_v27, 4  ;;  %5878 = vst [vmem:[#allocation3 + $0xac] sm:$0xf] %v5703_v23  ;;  %v1919_v33 = vrot.slane %v1918_v11, 4  ;;  %7405 = vmatmul.mubr.bf16.vlgmr.msra.gmra.mxu1 %v12219_v52 }
 0x3d6   :  { %v5240_v49 = vrot.slane %v5238_v24, 4  ;;  %v5243_v4 = vrot.slane %v5241_v21, 5  ;;  %v14088_v22 = vld [vmem:[#allocation2 + $0x40] sm:$0xe]  ;;  %v5616_v16 = vld [vmem:[#allocation2 + $0x48] sm:$0xf]  ;;  %7412 = vmatprep.mubr.bf16.mxu1 %v12224_v2  ;;  %12041 = vmatpush3.bf16.msra.mxu0 %v12249_v62  ;;  %v14107_v52 = vpop.f32.mrf.mxu0  ;;  %v14109_v27 = vpop.f32.mrf.mxu1 }
 0x3d7   :  { %v2023_v59 = vrot.slane %v2022_v57, 4  ;;  %v5249_v51 = vrot.slane %v5247_v55, 5  ;;  %v5254_v56 = vrot.slane %v5252_v44, 4  ;;  %v5255_v26 = vshll.u32 %v5135_v38, 16  ;;  %v12227_v47 = vld [vmem:[#allocation3 + $0xa4] ss:$36 sps:$4 sm:$0xff]   ;;  %12042 = vmatprep.subr.bf16.mxu0 %v12256_v54 }
 0x3d8   :  { %v12230_v14 = vld [vmem:[#allocation3 + $0xa0] ss:$36 sps:$4 sm:$0xff]   ;;  %v5717_v31 = vsel %vm12658_vm12, %v5712_v43, %v5716_v17  ;;  %v1920_v41 = vmax.f32 %v1918_v11, %v1919_v33  ;;  %v5244_v63 = vor.u32 %v5243_v4, %v5240_v49  ;;  %v11074_v61 = vrot.slane %v5421_v20, 9  ;;  %7323 = vmatprep.mubr.bf16.mxu0 %v12227_v47  ;;  %v5617_v7 = vld [vmem:[#allocation2 + $0x4c] sm:$0x1]  ;;  %v14113_v43 = vpop.f32.mrf.mxu1 }
 0x3d9   :  { %5879 = vst [vmem:[#allocation3 + $0xd0] sm:$0xf] %v5717_v31  ;;  %v2024_v8 = vmax.f32 %v2022_v57, %v2023_v59  ;;  %v5257_v39 = vrot.slane %v5255_v26, 5  ;;  %v5499_v13 = vrot.slane %v5422_v12, 5  ;;  %v11075_v25 = vrot.slane %v14088_v22, 9  ;;  %7324 = vmatmul.mubr.bf16.gmra.mxu0 %v12230_v14  ;;  %v12263_v46 = vld [vmem:[#allocation7 + $0x200] sm:$0xff]  }
 0x3da   :  { %v1921_v30 = vrot.slane %v1920_v41, 2  ;;  %v5245_v35 = vrot.slane %v5244_v63, 4  ;;  %v5719_v58 = vshrl.u32 %v5614_v60, 16  ;;  %v5722_v0 = vshll.u32 %v5614_v60, 16  ;;  %v8908_v40 = vld [vmem:[#allocation2 + $0x48] sm:$0xf]  ;;  %12043 = vmatpush3.bf16.msra.mxu0 %v12256_v54  ;;  %v14111_v60 = vpop.f32.mrf.mxu0  ;;  %v14125_v63 = vpop.f32.mrf.mxu1 }
 0x3db   :  { %v2025_v36 = vrot.slane %v2024_v8, 2  ;;  %v5258_v15 = vor.u32 %v5257_v39, %v5254_v56  ;;  %v5500_v29 = vsel %vm12746_vm7, %v11074_v61, %v5499_v13  ;;  %v5733_v53 = vshrl.u32 %v5616_v16, 16  ;;  %v12226_v5 = vld [vmem:[#allocation3 + $0x60] ss:$36 sps:$4 sm:$0xff]   ;;  %v8909_v17 = vld [vmem:[#allocation2 + $0x4c] sm:$0x1]  ;;  %12044 = vmatprep.subr.bf16.mxu0 %v12263_v46 }
 0x3dc   :  { %v1922_v50 = vmax.f32 %v1920_v41, %v1921_v30  ;;  %v5250_v18 = vsel %vm12658_vm12, %v5245_v35, %v5249_v51  ;;  %5559 = vst [vmem:[#allocation3 + $0xec] sm:$0xf] %v5500_v29  ;;  %v5721_v38 = vrot.slane %v5719_v58, 4  ;;  %v5724_v3 = vrot.slane %v5722_v0, 5  ;;  %v5137_v44 = vld [vmem:[#allocation2 + $0x58] sm:$0xf]  ;;  %v14123_v41 = vpop.f32.mrf.mxu0  ;;  %v14131_v58 = vpop.f32.mrf.mxu1 }
 0x3dd   :  { %v2026_v10 = vmax.f32 %v2024_v8, %v2025_v36  ;;  %v14105_v37 = vrot.slane %v5258_v15, 4  ;;  %5399 = vst [vmem:[#allocation3 + $0xe8] sm:$0xf] %v5250_v18  ;;  %v5735_v20 = vrot.slane %v5733_v53, 4  ;;  %v5736_v62 = vshll.u32 %v5616_v16, 16  ;;  %7413 = vmatmul.mubr.bf16.gmra.mxu1 %v12226_v5 }
 0x3de   :  { %v1923_v11 = vrot.slane %v1922_v50, 1  ;;  %v5725_v24 = vor.u32 %v5724_v3, %v5721_v38  ;;  %v5742_v21 = vshll.u32 %v5617_v7, 16  ;;  %v9025_v12 = vshrl.u32 %v8908_v40, 16  ;;  %v5138_v16 = vld [vmem:[#allocation2 + $0x5c] sm:$0x1]  ;;  %12045 = vmatpush3.bf16.msra.mxu0 %v12263_v46  ;;  %v14129_v7 = vpop.f32.mrf.mxu0 }
 0x3df   :  { %v2027_v2 = vrot.slane %v2026_v10, 1  ;;  %v5738_v23 = vrot.slane %v5736_v62, 5  ;;  %v9028_v57 = vshll.u32 %v8908_v40, 16  ;;  %v9034_v55 = vshll.u32 %v8909_v17, 16  ;;  %v5139_v14 = vld [vmem:[#allocation2 + $0x60] sm:$0xf]  ;;  %v14137_v17 = vpop.f32.mrf.mxu1 }
 0x3e0   :  { %v12231_v33 = vld [vmem:[#allocation3 + $0xac] ss:$36 sps:$4 sm:$0xff]   ;;  %v1924_v49 = vmax.f32 %v1922_v50, %v1923_v11  ;;  %v14115_v4 = vrot.slane %v5725_v24, 4  ;;  %v14118_v59 = vadd.f32 %v11503_v34, %v14090_v6  ;;  %v14121_v51 = vadd.f32 %v11567_v1, %v14092_v19  ;;  %v5140_v31 = vld [vmem:[#allocation2 + $0x64] sm:$0x1]  ;;  %v14135_v3 = vpop.f32.mrf.mxu0 }
 0x3e1   :  { %v2028_v56 = vmax.f32 %v2026_v10, %v2027_v2  ;;  %v5739_v26 = vor.u32 %v5738_v23, %v5735_v20  ;;  %v5744_v54 = vrot.slane %v5742_v21, 5  ;;  %v9027_v47 = vrot.slane %v9025_v12, 4  ;;  %7420 = vmatprep.mubr.bf16.mxu1 %v12231_v33  ;;  %v5425_v13 = vld [vmem:[#allocation2 + $0x58] sm:$0xe]  ;;  %v5426_v35 = vld [vmem:[#allocation2 + $0x5c] sm:$0x1]  ;;  %v14143_v33 = vpop.f32.mrf.mxu1 }
 0x3e2   :  { %v1925_v61 = vpack.i.bf16 %v1924_v49, %v1924_v49  ;;  %v9030_v8 = vrot.slane %v9028_v57, 5  ;;  %v14127_v39 = vrot.slane %v9034_v55, 5  ;;  %v5266_v6 = vshrl.u32 %v5137_v44, 16  ;;  %v12233_v0 = vld [vmem:[#allocation3 + $0xa8] ss:$36 sps:$4 sm:$0xff]  }
 0x3e3   :  { %v2029_v19 = vpack.i.bf16 %v2028_v56, %v2028_v56  ;;  %v5740_v34 = vrot.slane %v5739_v26, 4  ;;  %v5269_v1 = vshll.u32 %v5137_v44, 16  ;;  %v5275_v30 = vshll.u32 %v5138_v16, 16  ;;  %v4552_v5 = vld [vmem:[#allocation2 + $0x44] sm:$0x1]  ;;  %v14141_v44 = vpop.f32.mrf.mxu0 }
 0x3e4   :  { %v9031_v36 = vor.u32 %v9030_v8, %v9027_v47  ;;  %v5268_v15 = vrot.slane %v5266_v6, 4  ;;  %v5280_v29 = vshrl.u32 %v5139_v14, 16  ;;  %v5283_v53 = vshll.u32 %v5139_v14, 16  ;;  %v5427_v38 = vld [vmem:[#allocation2 + $0x60] sm:$0xe] }
 0x3e5   :  { %v3757_v40 = vmax.bf16 %v2029_v19, %v1925_v61  ;;  %v5745_v50 = vsel %vm12658_vm12, %v5740_v34, %v5744_v54  ;;  %v5271_v46 = vrot.slane %v5269_v1, 5  ;;  %v5277_v18 = vrot.slane %v5275_v30, 5  ;;  %v5428_v24 = vld [vmem:[#allocation2 + $0x64] sm:$0x1]  ;;  %v5618_v57 = vld [vmem:[#allocation2 + $0x60] sm:$0xf]  ;;  %7421 = vmatmul.mubr.bf16.gmra.mxu1 %v12233_v0  ;;  %v14153_v6 = vpop.f32.mrf.mxu0 }
 0x3e6   :  { %5881 = vst [vmem:[#allocation3 + $0x118] sm:$0xf] %v5745_v50  ;;  %v14139_v10 = vrot.slane %v9031_v36, 4  ;;  %v5282_v20 = vrot.slane %v5280_v29, 4  ;;  %v5285_v62 = vrot.slane %v5283_v53, 5  ;;  %v5289_v11 = vshll.u32 %v5140_v31, 16 }
 0x3e7   :  { %v11461_v21 = vcombine.low %v3757_v40, %v3757_v40  ;;  %v5272_v12 = vor.u32 %v5271_v46, %v5268_v15  ;;  %v11076_v2 = vrot.slane %v5425_v13, 9  ;;  %v5507_v23 = vrot.slane %v5426_v35, 5  ;;  %v5619_v55 = vld [vmem:[#allocation2 + $0x64] sm:$0x1]  ;;  %v5620_v54 = vld [vmem:[#allocation2 + $0x68] sm:$0xf]  ;;  %v14155_v13 = vpop.f32.mrf.mxu1 }
 0x3e8   :  { %v9037_v49 = vsel %vm12658_vm12, %v14139_v10, %v14127_v39  ;;  %v5286_v16 = vor.u32 %v5285_v62, %v5282_v20  ;;  %v5291_v56 = vrot.slane %v5289_v11, 5  ;;  %v11077_v26 = vrot.slane %v5427_v38, 9  ;;  %v5621_v8 = vld [vmem:[#allocation2 + $0x6c] sm:$0x1]  ;;  %v5141_v35 = vld [vmem:[#allocation2 + $0x68] sm:$0xf] }
 0x3e9   :  { %v4553_v47 = vsel %vm12680_vm14, %v11461_v21, %v4552_v5  ;;  %v5273_v14 = vrot.slane %v5272_v12, 4  ;;  %v5508_v31 = vsel %vm12746_vm7, %v11076_v2, %v5507_v23  ;;  %v5511_v61 = vrot.slane %v5428_v24, 5  ;;  %v5142_v53 = vld [vmem:[#allocation2 + $0x6c] sm:$0x1]  ;;  %v5143_v40 = vld [vmem:[#allocation2 + $0x70] sm:$0xf]  ;;  %v14161_v5 = vpop.f32.mrf.mxu0  ;;  %v14165_v62 = vpop.f32.mrf.mxu1 }
 0x3ea   :  { %4554 = vst [vmem:[#allocation2 + $0x44] sm:$0x1] %v4553_v47  ;;  %v5287_v19 = vrot.slane %v5286_v16, 4  ;;  %5561 = vst [vmem:[#allocation3 + $0x134] sm:$0xf] %v5508_v31  ;;  %v5747_v34 = vshrl.u32 %v5618_v57, 16 }
 0x3eb   :  { %v5750_v1 = vshll.u32 %v5618_v57, 16  ;;  %v5756_v30 = vshll.u32 %v5619_v55, 16  ;;  %v5278_v0 = vsel %vm12658_vm12, %v5273_v14, %v5277_v18  ;;  %v5512_v36 = vsel %vm12746_vm7, %v11077_v26, %v5511_v61  ;;  %v14170_v55 = vld [vmem:[%s15120_s2] ss:$0 sm:$0xff]  ;;  %v5144_v26 = vld [vmem:[#allocation2 + $0x74] sm:$0x1]  ;;  %v14172_v14 = vpop.f32.mrf.mxu0 }
 0x3ec   :  { %v5761_v15 = vshrl.u32 %v5620_v54, 16  ;;  %v5764_v29 = vshll.u32 %v5620_v54, 16  ;;  %v5292_v50 = vsel %vm12658_vm12, %v5287_v19, %v5291_v56  ;;  %5401 = vst [vmem:[#allocation3 + $0x130] sm:$0xf] %v5278_v0  ;;  %5562 = vst [vmem:[#allocation3 + $0x158] sm:$0xf] %v5512_v36  ;;  %v14178_v36 = vadd.f32 %v14118_v59, %v14170_v55 }
 0x3ed   :  { %v5749_v46 = vrot.slane %v5747_v34, 4  ;;  %v5752_v38 = vrot.slane %v5750_v1, 5  ;;  %v5758_v20 = vrot.slane %v5756_v30, 5  ;;  %5402 = vst [vmem:[#allocation3 + $0x154] sm:$0xf] %v5292_v50  ;;  %v5770_v24 = vshll.u32 %v5621_v8, 16  ;;  %v14174_v1 = vpop.f32.mrf.mxu1 }
 0x3ee   :  { %v5763_v18 = vrot.slane %v5761_v15, 4  ;;  %v5766_v11 = vrot.slane %v5764_v29, 5  ;;  %v5294_v21 = vshrl.u32 %v5141_v35, 16  ;;  %v5297_v2 = vshll.u32 %v5141_v35, 16  ;;  %v5429_v34 = vld [vmem:[#allocation2 + $0x68] sm:$0xe] }
 0x3ef   :  { %v5753_v12 = vor.u32 %v5752_v38, %v5749_v46  ;;  %v5303_v23 = vshll.u32 %v5142_v53, 16  ;;  %v5308_v57 = vshrl.u32 %v5143_v40, 16  ;;  %v5772_v56 = vrot.slane %v5770_v24, 5  ;;  %v5430_v59 = vld [vmem:[#allocation2 + $0x6c] sm:$0x1] }
 0x3f0   :  { %v5767_v16 = vor.u32 %v5766_v11, %v5763_v18  ;;  %v5296_v54 = vrot.slane %v5294_v21, 4  ;;  %v5311_v47 = vshll.u32 %v5143_v40, 16  ;;  %v5299_v61 = vrot.slane %v5297_v2, 5  ;;  %v5622_v18 = vld [vmem:[#allocation2 + $0x70] sm:$0xf] }
 0x3f1   :  { %v5754_v31 = vrot.slane %v5753_v12, 4  ;;  %v5305_v8 = vrot.slane %v5303_v23, 5  ;;  %v5310_v19 = vrot.slane %v5308_v57, 4  ;;  %v5136_v30 = vld [vmem:[#allocation2 + $0x44] sm:$0x1]  ;;  %v14182_v15 = vadd.f32 %v14107_v52, %v14099_v28 }
 0x3f2   :  { %v5424_v35 = vld [vmem:[#allocation2 + $0x44] sm:$0x1]  ;;  %v14186_v29 = vadd.f32 %v14109_v27, %v14101_v32  ;;  %v14190_v53 = vadd.f32 %v14123_v41, %v14111_v60  ;;  %v5261_v40 = vshll.u32 %v5136_v30, 16  ;;  %v5768_v11 = vrot.slane %v5767_v16, 4  ;;  %v5431_v21 = vld [vmem:[#allocation2 + $0x70] sm:$0xe]  ;;  %v14194_v32 = vpop.f32.mrf.mxu0 }
 0x3f3   :  { %v5615_v0 = vld [vmem:[#allocation2 + $0x44] sm:$0x1]  ;;  %v5503_v50 = vrot.slane %v5424_v35, 5  ;;  %v5759_v38 = vsel %vm12658_vm12, %v5754_v31, %v5758_v20  ;;  %v5300_v28 = vor.u32 %v5299_v61, %v5296_v54  ;;  %v5313_v52 = vrot.slane %v5311_v47, 5  ;;  %v5432_v12 = vld [vmem:[#allocation2 + $0x74] sm:$0x1]  ;;  %v14200_v20 = vpop.f32.mrf.mxu1 }
 0x3f4   :  { %v5728_v46 = vshll.u32 %v5615_v0, 16  ;;  %5882 = vst [vmem:[#allocation3 + $0x13c] sm:$0xf] %v5759_v38  ;;  %v5317_v24 = vshll.u32 %v5144_v26, 16  ;;  %v5263_v27 = vrot.slane %v5261_v40, 5  ;;  %v11078_v2 = vrot.slane %v5429_v34, 9  ;;  %v14212_v40 = vpop.f32.mrf.mxu0 }
 0x3f5   :  { %v5504_v60 = vsel %vm12746_vm7, %v11075_v25, %v5503_v50  ;;  %v5773_v23 = vsel %vm12658_vm12, %v5768_v11, %v5772_v56  ;;  %v5301_v57 = vrot.slane %v5300_v28, 4  ;;  %v5314_v16 = vor.u32 %v5313_v52, %v5310_v19  ;;  %v5623_v54 = vld [vmem:[#allocation2 + $0x74] sm:$0x1]  ;;  %v5624_v47 = vld [vmem:[#allocation2 + $0x78] sm:$0xf] }
 0x3f6   :  { %v5730_v41 = vrot.slane %v5728_v46, 5  ;;  %5560 = vst [vmem:[#allocation3 + $0x110] sm:$0xf] %v5504_v60  ;;  %v5319_v26 = vrot.slane %v5317_v24, 5  ;;  %v5264_v22 = vsel %vm12658_vm12, %v14105_v37, %v5263_v27  ;;  %5883 = vst [vmem:[#allocation3 + $0x160] sm:$0xf] %v5773_v23 }
 0x3f7   :  { %v5515_v31 = vrot.slane %v5430_v59, 5  ;;  %v11079_v61 = vrot.slane %v5431_v21, 9  ;;  %v5625_v34 = vld [vmem:[#allocation2 + $0x7c] sm:$0x1]  ;;  %5400 = vst [vmem:[#allocation3 + $0x10c] sm:$0xf] %v5264_v22  ;;  %v5306_v56 = vsel %vm12658_vm12, %v5301_v57, %v5305_v8  ;;  %v14216_v59 = vpop.f32.mrf.mxu1 }
 0x3f8   :  { %v5731_v25 = vsel %vm12658_vm12, %v14115_v4, %v5730_v41  ;;  %v5315_v19 = vrot.slane %v5314_v16, 4  ;;  %v5519_v30 = vrot.slane %v5432_v12, 5  ;;  %v5775_v35 = vshrl.u32 %v5622_v18, 16  ;;  %v5145_v0 = vld [vmem:[#allocation2 + $0x78] sm:$0xf]  ;;  %v14222_v16 = vpop.f32.mrf.mxu0 }
 0x3f9   :  { %5880 = vst [vmem:[#allocation3 + $0xf4] sm:$0xf] %v5731_v25  ;;  %5403 = vst [vmem:[#allocation3 + $0x178] sm:$0xf] %v5306_v56  ;;  %v5516_v37 = vsel %vm12746_vm7, %v11078_v2, %v5515_v31  ;;  %v5778_v4 = vshll.u32 %v5622_v18, 16  ;;  %v5784_v50 = vshll.u32 %v5623_v54, 16 }
 0x3fa   :  { %v5789_v46 = vshrl.u32 %v5624_v47, 16  ;;  %v5146_v38 = vld [vmem:[#allocation2 + $0x7c] sm:$0x1]  ;;  %v5320_v11 = vsel %vm12658_vm12, %v5315_v19, %v5319_v26  ;;  %v5520_v8 = vsel %vm12746_vm7, %v11079_v61, %v5519_v30  ;;  %5563 = vst [vmem:[#allocation3 + $0x17c] sm:$0xf] %v5516_v37  ;;  %v5777_v28 = vrot.slane %v5775_v35, 4  ;;  %v14224_v61 = vpop.f32.mrf.mxu1 }
 0x3fb   :  { %v5792_v52 = vshll.u32 %v5624_v47, 16  ;;  %v5147_v24 = vld [vmem:[#allocation2 + $0x80] sm:$0xf]  ;;  %5404 = vst [vmem:[#allocation3 + $0x19c] sm:$0xf] %v5320_v11  ;;  %v5780_v21 = vrot.slane %v5778_v4, 5 }
 0x3fc   :  { %5564 = vst [vmem:[#allocation3 + $0x1a0] sm:$0xf] %v5520_v8  ;;  %v5786_v27 = vrot.slane %v5784_v50, 5  ;;  %v5791_v18 = vrot.slane %v5789_v46, 4  ;;  %v5798_v60 = vshll.u32 %v5625_v34, 16  ;;  %v5322_v2 = vshrl.u32 %v5145_v0, 16 }
 0x3fd   :  { %v8869_v41 = vld [vmem:[#allocation2 + $0x48] sm:$0xf]  ;;  %v5794_v12 = vrot.slane %v5792_v52, 5  ;;  %v5325_v23 = vshll.u32 %v5145_v0, 16  ;;  %v5331_v57 = vshll.u32 %v5146_v38, 16  ;;  %v6088_v26 = vld [vmem:[#allocation3 + $0x114] sm:$0xff]  ;;  %v5781_v54 = vor.u32 %v5780_v21, %v5777_v28 }
 0x3fe   :  { %v5800_v22 = vrot.slane %v5798_v60, 5  ;;  %v5148_v25 = vld [vmem:[#allocation2 + $0x84] sm:$0x1]  ;;  %v5336_v31 = vshrl.u32 %v5147_v24, 16  ;;  %v5339_v47 = vshll.u32 %v5147_v24, 16  ;;  %v5324_v35 = vrot.slane %v5322_v2, 4 }
 0x3ff   :  { %v12240_v56 = vld [vmem:[#allocation3 + $0x134] ss:$36 sps:$4 sm:$0xff]   ;;  %v12244_v19 = vld [vmem:[#allocation3 + $0x13c] ss:$36 sps:$4 sm:$0xff]   ;;  %v5795_v30 = vor.u32 %v5794_v12, %v5791_v18  ;;  %v14228_v0 = vadd.f32 %v14121_v51, %v14178_v36  ;;  %v7119_v50 = vadd.f32 %v14182_v15, %v14170_v55  ;;  %v12234_v46 = vld [vmem:[#allocation3 + $0xec] ss:$36 sps:$4 sm:$0xff]   ;;  %v7124_v28 = vadd.f32 %v14190_v53, %v14170_v55  ;;  %v14239_v36 = vpop.f32.mrf.mxu0 }
 0x400   :  { %v5433_v34 = vld [vmem:[#allocation2 + $0x78] sm:$0xe]  ;;  %v5434_v37 = vld [vmem:[#allocation2 + $0x7c] sm:$0x1]  ;;  %v5435_v4 = vld [vmem:[#allocation2 + $0x80] sm:$0xe]  ;;  %v11574_v52 = vadd.f32 %v14125_v63, %v14113_v43  ;;  %7331 = vmatprep.mubr.bf16.mxu0 %v12234_v46 }
 0x401   :  { %15144 = vst [vmem:[#allocation18_spill] sm:$0xff] %v14228_v0  ;;  %v12237_v38 = vld [vmem:[#allocation3 + $0xe8] ss:$36 sps:$4 sm:$0xff]   ;;  %v5782_v11 = vrot.slane %v5781_v54, 4  ;;  %v5436_v8 = vld [vmem:[#allocation2 + $0x84] sm:$0x1]  ;;  %v14237_v51 = vadd.f32 %v14186_v29, %v7119_v50 }
 0x402   :  { %v6083_v24 = vld [vmem:[#allocation3 + $0xf0] sm:$0xff]  ;;  %v5796_v18 = vrot.slane %v5795_v30, 4  ;;  %v5327_v60 = vrot.slane %v5325_v23, 5  ;;  %v5333_v12 = vrot.slane %v5331_v57, 5  ;;  %8885 = vst [vmem:[#allocation3 + $0x114] sm:$0xf] %v8869_v41  ;;  %v14248_v23 = vpop.f32.mrf.mxu1  ;;  %7332 = vmatmul.mubr.bf16.gmra.mxu0 %v12237_v38  ;;  %v14252_v39 = vadd.f32 %v11574_v52, %v7124_v28 }
 0x403   :  { %v12238_v21 = vld [vmem:[#allocation3 + $0xf4] ss:$36 sps:$4 sm:$0xff]   ;;  %15145 = vst [vmem:[#allocation19_spill] sm:$0xff] %v14237_v51  ;;  %v11134_v15 = vcombine.low %v6083_v24, %v6088_v26  ;;  %v5787_v43 = vsel %vm12658_vm12, %v5782_v11, %v5786_v27  ;;  %v5338_v63 = vrot.slane %v5336_v31, 4  ;;  %v5341_v53 = vrot.slane %v5339_v47, 5  ;;  %7339 = vmatprep.mubr.bf16.mxu0 %v12240_v56 }
 0x404   :  { %9173 = vst [vmem:[#allocation3 + $0x118] sm:$0xf] %v9037_v49  ;;  %v5626_v2 = vld [vmem:[#allocation2 + $0x80] sm:$0xf]  ;;  %7428 = vmatprep.mubr.bf16.mxu1 %v12238_v21  ;;  %v5801_v29 = vsel %vm12658_vm12, %v5796_v18, %v5800_v22  ;;  %5884 = vst [vmem:[#allocation3 + $0x184] sm:$0xf] %v5787_v43  ;;  %v5328_v41 = vor.u32 %v5327_v60, %v5324_v35  ;;  %v14254_v35 = vpop.f32.mrf.mxu0 }
 0x405   :  { %v5345_v57 = vshll.u32 %v5148_v25, 16  ;;  %v5627_v54 = vld [vmem:[#allocation2 + $0x84] sm:$0x1]  ;;  %15146 = vst [vmem:[#allocation20_spill] sm:$0xff] %v14252_v39  ;;  %7429 = vmatmul.mubr.bf16.gmra.mxu1 %v11134_v15  ;;  %5885 = vst [vmem:[#allocation3 + $0x1a8] sm:$0xf] %v5801_v29  ;;  %v5342_v10 = vor.u32 %v5341_v53, %v5338_v63 }
 0x406   :  { %v11080_v49 = vrot.slane %v5433_v34, 9  ;;  %v5523_v27 = vrot.slane %v5434_v37, 5  ;;  %v11081_v26 = vrot.slane %v5435_v4, 9  ;;  %v5628_v31 = vld [vmem:[#allocation2 + $0x88] sm:$0xf]  ;;  %7436 = vmatprep.mubr.bf16.mxu1 %v12244_v19  ;;  %v5329_v30 = vrot.slane %v5328_v41, 4  ;;  %v14258_v34 = vpop.f32.mrf.mxu1 }
 0x407   :  { %v355_v47 = vld [vmem:[#allocation4 + $0xf7] sm:$0x1]  ;;  %v5347_v50 = vrot.slane %v5345_v57, 5  ;;  %v5527_v46 = vrot.slane %v5436_v8, 5  ;;  %v5803_v22 = vshrl.u32 %v5626_v2, 16  ;;  %v5343_v25 = vrot.slane %v5342_v10, 4 }
 0x408   :  { %v363_v38 = vld [vmem:[#allocation4 + $0xff] sm:$0x1]  ;;  %v5524_v11 = vsel %vm12746_vm7, %v11080_v49, %v5523_v27  ;;  %v5629_v56 = vld [vmem:[#allocation2 + $0x8c] sm:$0x1]  ;;  %v5806_v28 = vshll.u32 %v5626_v2, 16  ;;  %v5812_v52 = vshll.u32 %v5627_v54, 16  ;;  %v5334_v19 = vsel %vm12658_vm12, %v5329_v30, %v5333_v12  ;;  %v14268_v54 = vpop.f32.mrf.mxu0 }
 0x409   :  { %v12243_v37 = vld [vmem:[#allocation3 + $0x130] ss:$36 sps:$4 sm:$0xff]   ;;  %v12246_v4 = vld [vmem:[#allocation3 + $0x138] ss:$36 sps:$4 sm:$0xff]   ;;  %v5528_v8 = vsel %vm12746_vm7, %v11081_v26, %v5527_v46  ;;  %5565 = vst [vmem:[#allocation3 + $0x1c4] sm:$0xf] %v5524_v11  ;;  %v5348_v15 = vsel %vm12658_vm12, %v5343_v25, %v5347_v50  ;;  %v14270_v50 = vpop.f32.mrf.mxu1  ;;  %v11513_v11 = vadd.f32 %v14135_v3, %v14129_v7 }
 0x40a   :  { %v5805_v24 = vrot.slane %v5803_v22, 4  ;;  %v5817_v21 = vshrl.u32 %v5628_v31, 16  ;;  %v5149_v18 = vld [vmem:[#allocation2 + $0x88] sm:$0xf]  ;;  %v12247_v60 = vld [vmem:[#allocation3 + $0x17c] ss:$36 sps:$4 sm:$0xff]   ;;  %7340 = vmatmul.mubr.bf16.gmra.mxu0 %v12243_v37 }
 0x40b   :  { %5405 = vst [vmem:[#allocation3 + $0x1c0] sm:$0xf] %v5334_v19  ;;  %5566 = vst [vmem:[#allocation3 + $0x1e8] sm:$0xf] %v5528_v8  ;;  %v5808_v43 = vrot.slane %v5806_v28, 5  ;;  %v5814_v63 = vrot.slane %v5812_v52, 5  ;;  %7347 = vmatprep.mubr.bf16.mxu0 %v12247_v60 }
 0x40c   :  { %v5820_v53 = vshll.u32 %v5628_v31, 16  ;;  %v5150_v2 = vld [vmem:[#allocation2 + $0x8c] sm:$0x1]  ;;  %5406 = vst [vmem:[#allocation3 + $0x1e4] sm:$0xf] %v5348_v15  ;;  %v5819_v29 = vrot.slane %v5817_v21, 4 }
 0x40d   :  { %v5826_v12 = vshll.u32 %v5629_v56, 16  ;;  %v3578_v41 = vsel %vm364_vm0, %v355_v47, 4286644096  ;;  %v3682_v57 = vsel %vm364_vm0, %v363_v38, 4286644096  ;;  %v5809_v10 = vor.u32 %v5808_v43, %v5805_v24  ;;  %7437 = vmatmul.mubr.bf16.gmra.mxu1 %v12246_v4  ;;  %v14274_v43 = vpop.f32.mrf.mxu0 }
 0x40e   :  { %v5822_v49 = vrot.slane %v5820_v53, 5  ;;  %v3580_v27 = vunpack.i.l.bf16 %v3578_v41  ;;  %v3581_v26 = vunpack.i.h.bf16 %v3578_v41  ;;  %v5151_v30 = vld [vmem:[#allocation2 + $0x90] sm:$0xf]  ;;  %v12251_v46 = vld [vmem:[#allocation3 + $0x184] ss:$36 sps:$4 sm:$0xff]   ;;  %v3684_v22 = vunpack.i.l.bf16 %v3682_v57 }
 0x40f   :  { %v5828_v31 = vrot.slane %v5826_v12, 5  ;;  %v3685_v25 = vunpack.i.h.bf16 %v3682_v57  ;;  %v5810_v47 = vrot.slane %v5809_v10, 4  ;;  %v5350_v28 = vshrl.u32 %v5149_v18, 16  ;;  %v5437_v52 = vld [vmem:[#allocation2 + $0x88] sm:$0xe]  ;;  %7444 = vmatprep.mubr.bf16.mxu1 %v12251_v46 }
 0x410   :  { %v5823_v38 = vor.u32 %v5822_v49, %v5819_v29  ;;  %v3582_v56 = vmax.f32 %v3580_v27, %v3581_v26  ;;  %v5438_v19 = vld [vmem:[#allocation2 + $0x8c] sm:$0x1]  ;;  %v5353_v24 = vshll.u32 %v5149_v18, 16  ;;  %v5359_v21 = vshll.u32 %v5150_v2, 16  ;;  %v5630_v15 = vld [vmem:[#allocation2 + $0x90] sm:$0xf]  ;;  %v14278_v29 = vpop.f32.mrf.mxu1 }
 0x411   :  { %v3686_v8 = vmax.f32 %v3684_v22, %v3685_v25  ;;  %v5364_v37 = vshrl.u32 %v5151_v30, 16  ;;  %v12250_v53 = vld [vmem:[#allocation3 + $0x178] ss:$36 sps:$4 sm:$0xff]   ;;  %v5815_v7 = vsel %vm12658_vm12, %v5810_v47, %v5814_v63  ;;  %v5352_v60 = vrot.slane %v5350_v28, 4  ;;  %v12253_v12 = vld [vmem:[#allocation3 + $0x180] ss:$36 sps:$4 sm:$0xff]   ;;  %v14283_v28 = vpop.f32.mrf.mxu0 }
 0x412   :  { %v5824_v3 = vrot.slane %v5823_v38, 4  ;;  %v3583_v4 = vrot.slane %v3582_v56, 4  ;;  %5886 = vst [vmem:[#allocation3 + $0x1cc] sm:$0xf] %v5815_v7  ;;  %v5355_v57 = vrot.slane %v5353_v24, 5  ;;  %v5361_v10 = vrot.slane %v5359_v21, 5  ;;  %v14287_v42 = vpop.f32.mrf.mxu1  ;;  %7348 = vmatmul.mubr.bf16.gmra.mxu0 %v12250_v53 }
 0x413   :  { %v3687_v41 = vrot.slane %v3686_v8, 4  ;;  %v7127_v18 = vadd.f32 %v11513_v11, %v14170_v55  ;;  %v12254_v2 = vld [vmem:[#allocation3 + $0x1c4] ss:$36 sps:$4 sm:$0xff]   ;;  %v5366_v26 = vrot.slane %v5364_v37, 4  ;;  %v5367_v46 = vshll.u32 %v5151_v30, 16 }
 0x414   :  { %v5829_v49 = vsel %vm12658_vm12, %v5824_v3, %v5828_v31  ;;  %v3584_v27 = vmax.f32 %v3582_v56, %v3583_v4  ;;  %v5356_v22 = vor.u32 %v5355_v57, %v5352_v60  ;;  %v11082_v25 = vrot.slane %v5437_v52, 9  ;;  %v5632_v38 = vld [vmem:[#allocation2 + $0x98] sm:$0xf]  ;;  %7355 = vmatprep.mubr.bf16.mxu0 %v12254_v2  ;;  %v14291_v3 = vld [vmem:[#allocation2 + $0x90] sm:$0xe] }
 0x415   :  { %5887 = vst [vmem:[#allocation3 + $0x1f0] sm:$0xf] %v5829_v49  ;;  %v3688_v63 = vmax.f32 %v3686_v8, %v3687_v41  ;;  %v5531_v47 = vrot.slane %v5438_v19, 5  ;;  %v5369_v24 = vrot.slane %v5367_v46, 5  ;;  %v5831_v21 = vshrl.u32 %v5630_v15, 16  ;;  %7445 = vmatmul.mubr.bf16.gmra.mxu1 %v12253_v12  ;;  %v14295_v46 = vpop.f32.mrf.mxu0 }
 0x416   :  { %v3585_v7 = vrot.slane %v3584_v27, 2  ;;  %v11577_v11 = vadd.f32 %v14137_v17, %v14131_v58  ;;  %v5357_v56 = vrot.slane %v5356_v22, 4  ;;  %v5633_v8 = vld [vmem:[#allocation2 + $0x9c] sm:$0x1]  ;;  %v5834_v52 = vshll.u32 %v5630_v15, 16  ;;  %15147 = vst [vmem:[#allocation21_spill] sm:$0xff] %v14295_v46  ;;  %v14297_v22 = vpop.f32.mrf.mxu1 }
 0x417   :  { %v3689_v31 = vrot.slane %v3688_v63, 2  ;;  %v5532_v30 = vsel %vm12746_vm7, %v11082_v25, %v5531_v47  ;;  %v5370_v37 = vor.u32 %v5369_v24, %v5366_v26  ;;  %v5833_v4 = vrot.slane %v5831_v21, 4  ;;  %v8924_v57 = vld [vmem:[#allocation2 + $0x98] sm:$0xf]  ;;  %v5890_v49 = vld [vmem:[#allocation2 + $0x10] sm:$0xe]  ;;  %v14310_v0 = vpop.f32.mrf.mxu0 }
 0x418   :  { %v3586_v19 = vmax.f32 %v3584_v27, %v3585_v7  ;;  %5567 = vst [vmem:[#allocation3 + $0x20c] sm:$0xf] %v5532_v30  ;;  %v5845_v60 = vshrl.u32 %v5632_v38, 16  ;;  %v5362_v17 = vsel %vm12658_vm12, %v5357_v56, %v5361_v10  ;;  %v5836_v53 = vrot.slane %v5834_v52, 5  ;;  %v5891_v27 = vld [vmem:[#allocation2 + $0x14] sm:$0x1] }
 0x419   :  { %v3690_v58 = vmax.f32 %v3688_v63, %v3689_v31  ;;  %v5848_v41 = vshll.u32 %v5632_v38, 16  ;;  %5407 = vst [vmem:[#allocation3 + $0x208] sm:$0xf] %v5362_v17  ;;  %v5854_v2 = vshll.u32 %v5633_v8, 16  ;;  %v5892_v26 = vld [vmem:[#allocation2 + $0x18] sm:$0xe]  ;;  %v14300_v17 = vadd.f32 %v11577_v11, %v7127_v18 }
 0x41a   :  { %v3587_v15 = vrot.slane %v3586_v19, 1  ;;  %v5847_v12 = vrot.slane %v5845_v60, 4  ;;  %15148 = vst [vmem:[#allocation22_spill] sm:$0xff] %v14297_v22  ;;  %v12257_v25 = vld [vmem:[#allocation3 + $0x1c0] ss:$36 sps:$4 sm:$0xff]   ;;  %v5837_v7 = vor.u32 %v5836_v53, %v5833_v4  ;;  %v9137_v30 = vshrl.u32 %v8924_v57, 16 }
 0x41b   :  { %v3691_v47 = vrot.slane %v3690_v58, 1  ;;  %v5850_v10 = vrot.slane %v5848_v41, 5  ;;  %v5893_v24 = vld [vmem:[#allocation2 + $0x1c] sm:$0x1]  ;;  %v5894_v38 = vld [vmem:[#allocation2 + $0x20] sm:$0xe]  ;;  %v14304_v8 = vadd.f32 %v14153_v6, %v14141_v44  ;;  %v14314_v6 = vpop.f32.mrf.mxu1  ;;  %7356 = vmatmul.mubr.bf16.gmra.mxu0 %v12257_v25 }
 0x41c   :  { %v12258_v21 = vld [vmem:[#allocation3 + $0x1cc] ss:$36 sps:$4 sm:$0xff]   ;;  %v3588_v56 = vmax.f32 %v3586_v19, %v3587_v15  ;;  %v5895_v52 = vld [vmem:[#allocation2 + $0x24] sm:$0x1]  ;;  %15149 = vst [vmem:[#allocation23_spill] sm:$0xff] %v14300_v17  ;;  %v14306_v39 = vrot.slane %v5370_v37, 4 }
 0x41d   :  { %v12260_v31 = vld [vmem:[#allocation3 + $0x1c8] ss:$36 sps:$4 sm:$0xff]   ;;  %v3692_v60 = vmax.f32 %v3690_v58, %v3691_v47  ;;  %v5851_v51 = vor.u32 %v5850_v10, %v5847_v12  ;;  %v5856_v63 = vrot.slane %v5854_v2, 5  ;;  %v14308_v4 = vld [vmem:[#allocation2 + $0x9c] sm:$0x1]  ;;  %15150 = vst [vmem:[#allocation24_spill] sm:$0xff] %v14310_v0  ;;  %7452 = vmatprep.mubr.bf16.mxu1 %v12258_v21 }
 0x41e   :  { %v5896_v53 = vld [vmem:[#allocation2 + $0x28] sm:$0xe]  ;;  %v5897_v41 = vld [vmem:[#allocation2 + $0x2c] sm:$0x1]  ;;  %v3589_v19 = vpack.i.bf16 %v3588_v56, %v3588_v56  ;;  %v14312_v15 = vrot.slane %v5837_v7, 4  ;;  %v9140_v18 = vshll.u32 %v8924_v57, 16  ;;  %7453 = vmatmul.mubr.bf16.gmra.mxu1 %v12260_v31 }
 0x41f   :  { %v11084_v11 = vrot.slane %v5890_v49, 9  ;;  %v5898_v17 = vld [vmem:[#allocation2 + $0x30] sm:$0xe]  ;;  %v5899_v44 = vld [vmem:[#allocation2 + $0x34] sm:$0x1]  ;;  %15151 = vst [vmem:[#allocation25_spill] sm:$0xff] %v14314_v6  ;;  %v3693_v37 = vpack.i.bf16 %v3692_v60, %v3692_v60  ;;  %v14324_v60 = vpop.f32.mrf.mxu0 }
 0x420   :  { %v5852_v58 = vrot.slane %v5851_v51, 4  ;;  %v5956_v12 = vrot.slane %v5891_v27, 5  ;;  %v11085_v2 = vrot.slane %v5892_v26, 9  ;;  %v5900_v47 = vld [vmem:[#allocation2 + $0x38] sm:$0xe]  ;;  %v14316_v0 = vrot.slane %v9137_v30, 4 }
 0x421   :  { %v5901_v10 = vld [vmem:[#allocation2 + $0x3c] sm:$0x1]  ;;  %v4600_v22 = vld [vmem:[#allocation2 + $0x94] sm:$0x1]  ;;  %v14318_v21 = vrot.slane %v9140_v18, 5  ;;  %v5960_v7 = vrot.slane %v5893_v24, 5  ;;  %v3821_v56 = vmax.bf16 %v3693_v37, %v3589_v19 }
 0x422   :  { %v11086_v57 = vrot.slane %v5894_v38, 9  ;;  %v5902_v49 = vld [vmem:[#allocation2 + $0x40] sm:$0xe]  ;;  %v5857_v6 = vsel %vm12658_vm12, %v5852_v58, %v5856_v63  ;;  %v5957_v51 = vsel %vm12746_vm7, %v11084_v11, %v5956_v12  ;;  %v5964_v27 = vrot.slane %v5895_v52, 5  ;;  %v5904_v26 = vld [vmem:[#allocation2 + $0x48] sm:$0xe]  ;;  %v14329_v63 = vpop.f32.mrf.mxu1 }
 0x423   :  { %v5905_v25 = vld [vmem:[#allocation2 + $0x4c] sm:$0x1]  ;;  %15152 = vst [vmem:[#allocation26_spill] sm:$0xff] %v14324_v60  ;;  %5889 = vst [vmem:[#allocation3 + $0x238] sm:$0xf] %v5857_v6  ;;  %v9146_v31 = vshll.u32 %v14308_v4, 16  ;;  %v5961_v24 = vsel %vm12746_vm7, %v11085_v2, %v5960_v7  ;;  %v11469_v37 = vcombine.low %v3821_v56, %v3821_v56 }
 0x424   :  { %6034 = vst [vmem:[#allocation3 + $0x20] sm:$0xf] %v5957_v51  ;;  %v11087_v38 = vrot.slane %v5896_v53, 9  ;;  %v5968_v30 = vrot.slane %v5897_v41, 5  ;;  %v5903_v19 = vld [vmem:[#allocation2 + $0x44] sm:$0x1]  ;;  %v5965_v52 = vsel %vm12746_vm7, %v11086_v57, %v5964_v27  ;;  %v9143_v53 = vor.u32 %v14318_v21, %v14316_v0  ;;  %v14341_v21 = vpop.f32.mrf.mxu0 }
 0x425   :  { %v5906_v18 = vld [vmem:[#allocation2 + $0x60] sm:$0xe]  ;;  %15153 = vst [vmem:[#allocation27_spill] sm:$0xff] %v14329_v63  ;;  %6035 = vst [vmem:[#allocation3 + $0x44] sm:$0xf] %v5961_v24  ;;  %v11088_v11 = vrot.slane %v5898_v17, 9  ;;  %v4601_v17 = vsel %vm12680_vm14, %v11469_v37, %v4600_v22 }
 0x426   :  { %v5972_v58 = vrot.slane %v5899_v44, 5  ;;  %v9196_v6 = vld [vmem:[#allocation2 + $0x48] sm:$0xe]  ;;  %v9197_v12 = vld [vmem:[#allocation2 + $0x4c] sm:$0x1]  ;;  %v5969_v41 = vsel %vm12746_vm7, %v11087_v38, %v5968_v30  ;;  %v11089_v2 = vrot.slane %v5900_v47, 9 }
 0x427   :  { %v5907_v4 = vld [vmem:[#allocation2 + $0x64] sm:$0x1]  ;;  %v5908_v60 = vld [vmem:[#allocation2 + $0x68] sm:$0xe]  ;;  %v5909_v46 = vld [vmem:[#allocation2 + $0x6c] sm:$0x1] }
 0x428   :  { %6036 = vst [vmem:[#allocation3 + $0x68] sm:$0xf] %v5965_v52  ;;  %v5976_v7 = vrot.slane %v5901_v10, 5  ;;  %v5910_v56 = vld [vmem:[#allocation2 + $0x70] sm:$0xe]  ;;  %v5973_v44 = vsel %vm12746_vm7, %v11088_v11, %v5972_v58  ;;  %v11090_v57 = vrot.slane %v5902_v49, 9  ;;  %v14347_v52 = vpop.f32.mrf.mxu1 }
 0x429   :  { %v5911_v51 = vld [vmem:[#allocation2 + $0x74] sm:$0x1]  ;;  %v5912_v24 = vld [vmem:[#allocation2 + $0x78] sm:$0xe]  ;;  %6037 = vst [vmem:[#allocation3 + $0x8c] sm:$0xf] %v5969_v41 }
 0x42a   :  { %v5980_v27 = vrot.slane %v5903_v19, 5  ;;  %v5913_v63 = vld [vmem:[#allocation2 + $0x7c] sm:$0x1]  ;;  %v5914_v0 = vld [vmem:[#allocation2 + $0x80] sm:$0xe]  ;;  %v14343_v38 = vrot.slane %v9146_v31, 5  ;;  %v5977_v47 = vsel %vm12746_vm7, %v11089_v2, %v5976_v7 }
 0x42b   :  { %4602 = vst [vmem:[#allocation2 + $0x94] sm:$0x1] %v4601_v17  ;;  %6038 = vst [vmem:[#allocation3 + $0xb0] sm:$0xf] %v5973_v44  ;;  %v11091_v10 = vrot.slane %v5904_v26, 9  ;;  %v5984_v30 = vrot.slane %v5905_v25, 5 }
 0x42c   :  { %15154 = vst [vmem:[#allocation28_spill] sm:$0xff] %v14343_v38  ;;  %v5915_v22 = vld [vmem:[#allocation2 + $0x84] sm:$0x1]  ;;  %v5916_v37 = vld [vmem:[#allocation2 + $0x88] sm:$0xe]  ;;  %v5981_v49 = vsel %vm12746_vm7, %v11090_v57, %v5980_v27  ;;  %v11300_v19 = vrot.slane %v9196_v6, 9  ;;  %v14355_v38 = vpop.f32.mrf.mxu0 }
 0x42d   :  { %6039 = vst [vmem:[#allocation3 + $0xd4] sm:$0xf] %v5977_v47  ;;  %v9276_v11 = vrot.slane %v9197_v12, 5  ;;  %v11092_v58 = vrot.slane %v5906_v18, 9  ;;  %v5917_v41 = vld [vmem:[#allocation2 + $0x8c] sm:$0x1]  ;;  %v5985_v31 = vsel %vm12746_vm7, %v11091_v10, %v5984_v30  ;;  %v7132_v30 = vadd.f32 %v14304_v8, %v14170_v55 }
 0x42e   :  { %6040 = vst [vmem:[#allocation3 + $0xf8] sm:$0xf] %v5981_v49  ;;  %v5988_v2 = vrot.slane %v5907_v4, 5  ;;  %v11093_v7 = vrot.slane %v5908_v60, 9  ;;  %v5992_v26 = vrot.slane %v5909_v46, 5  ;;  %v14353_v17 = vrot.slane %v9143_v53, 4  ;;  %v14361_v60 = vpop.f32.mrf.mxu1 }
 0x42f   :  { %v5920_v25 = vld [vmem:[#allocation2 + $0x98] sm:$0xe]  ;;  %6041 = vst [vmem:[#allocation3 + $0x11c] sm:$0xf] %v5985_v31  ;;  %v11094_v44 = vrot.slane %v5910_v56, 9  ;;  %v5996_v47 = vrot.slane %v5911_v51, 5 }
 0x430   :  { %v11095_v48 = vrot.slane %v5912_v24, 9  ;;  %v5989_v18 = vsel %vm12746_vm7, %v11092_v58, %v5988_v2  ;;  %v5993_v6 = vsel %vm12746_vm7, %v11093_v7, %v5992_v26  ;;  %v6000_v12 = vrot.slane %v5913_v63, 5  ;;  %v5921_v4 = vld [vmem:[#allocation2 + $0x9c] sm:$0x1]  ;;  %v5918_v63 = vld [vmem:[#allocation2 + $0x90] sm:$0xe]  ;;  %v11603_v26 = vpop.f32.mrf.mxu1 }
 0x431   :  { %v11096_v57 = vrot.slane %v5914_v0, 9  ;;  %6042 = vst [vmem:[#allocation3 + $0x140] sm:$0xf] %v5989_v18  ;;  %6043 = vst [vmem:[#allocation3 + $0x164] sm:$0xf] %v5993_v6  ;;  %v5997_v46 = vsel %vm12746_vm7, %v11094_v44, %v5996_v47  ;;  %v6004_v53 = vrot.slane %v5915_v22, 5  ;;  %v9277_v24 = vsel %vm12746_vm7, %v11300_v19, %v9276_v11  ;;  %v11539_v11 = vpop.f32.mrf.mxu0 }
 0x432   :  { %v11097_v56 = vrot.slane %v5916_v37, 9  ;;  %v6008_v51 = vrot.slane %v5917_v41, 5  ;;  %v6001_v27 = vsel %vm12746_vm7, %v11095_v48, %v6000_v12  ;;  %6044 = vst [vmem:[#allocation3 + $0x188] sm:$0xf] %v5997_v46  ;;  %v11099_v0 = vrot.slane %v5920_v25, 9 }
 0x433   :  { %v14369_v10 = vld [vmem:[#allocation2 + $0x98] sm:$0xe]  ;;  %v5152_v49 = vld [vmem:[#allocation2 + $0x94] sm:$0x1]  ;;  %6045 = vst [vmem:[#allocation3 + $0x1ac] sm:$0xf] %v6001_v27  ;;  %v6005_v22 = vsel %vm12746_vm7, %v11096_v57, %v6004_v53  ;;  %v11580_v48 = vadd.f32 %v14155_v13, %v14143_v33  ;;  %v11519_v19 = vadd.f32 %v14172_v14, %v14161_v5  ;;  %v11583_v33 = vadd.f32 %v14174_v1, %v14165_v62 }
 0x434   :  { %v5440_v58 = vld [vmem:[#allocation2 + $0x94] sm:$0x1]  ;;  %v6009_v37 = vsel %vm12746_vm7, %v11097_v56, %v6008_v51  ;;  %v5373_v41 = vshll.u32 %v5152_v49, 16  ;;  %6046 = vst [vmem:[#allocation3 + $0x1d0] sm:$0xf] %v6005_v22  ;;  %v6016_v7 = vrot.slane %v5921_v4, 5  ;;  %v11522_v13 = vadd.f32 %v14212_v40, %v14194_v32  ;;  %v11541_v40 = vpop.f32.mrf.mxu0 }
 0x435   :  { %v5631_v31 = vld [vmem:[#allocation2 + $0x94] sm:$0x1]  ;;  %v5535_v2 = vrot.slane %v5440_v58, 5  ;;  %6047 = vst [vmem:[#allocation3 + $0x1f4] sm:$0xf] %v6009_v37  ;;  %v14383_v44 = vadd.f32 %v11580_v48, %v7132_v30  ;;  %v7135_v47 = vadd.f32 %v11519_v19, %v14170_v55  ;;  %v15155_v14 = vrot.slane %v14291_v3, 9 }
 0x436   :  { %v5840_v8 = vshll.u32 %v5631_v31, 16  ;;  %v14381_v25 = vld [vmem:[#allocation2 + $0x9c] sm:$0x1]  ;;  %v5375_v5 = vrot.slane %v5373_v41, 5  ;;  %v6017_v57 = vsel %vm12746_vm7, %v11099_v0, %v6016_v7  ;;  %v5919_v4 = vld [vmem:[#allocation2 + $0x94] sm:$0x1]  ;;  %v7140_v32 = vadd.f32 %v11522_v13, %v14170_v55  ;;  %v11542_v30 = vpop.f32.mrf.mxu0 }
 0x437   :  { %v5536_v18 = vsel %vm12746_vm7, %v15155_v14, %v5535_v2  ;;  %v14394_v12 = vld [vmem:[#allocation3 + $0xf8] ss:$36 sps:$4 sm:$0xff]   ;;  %v11098_v46 = vrot.slane %v5918_v63, 9  ;;  %6049 = vst [vmem:[#allocation3 + $0x23c] sm:$0xf] %v6017_v57  ;;  %v11308_v62 = vrot.slane %v14369_v10, 9  ;;  %v14399_v1 = vadd.f32 %v11583_v33, %v7135_v47 }
 0x438   :  { %v5842_v6 = vrot.slane %v5840_v8, 5  ;;  %5568 = vst [vmem:[#allocation3 + $0x230] sm:$0xf] %v5536_v18  ;;  %9333 = vst [vmem:[#allocation3 + $0x11c] sm:$0xf] %v9277_v24  ;;  %v5376_v3 = vsel %vm12658_vm12, %v14306_v39, %v5375_v5  ;;  %v11586_v56 = vadd.f32 %v14216_v59, %v14200_v20  ;;  %v11525_v51 = vadd.f32 %v14239_v36, %v14222_v16  ;;  %v11605_v24 = vpop.f32.mrf.mxu1  ;;  %v15160_v58 = vld [vmem:[#allocation25_spill] sm:$0xff] }
 0x439   :  { %5408 = vst [vmem:[#allocation3 + $0x22c] sm:$0xf] %v5376_v3  ;;  %v6012_v27 = vrot.slane %v5919_v4, 5  ;;  %v9308_v63 = vrot.slane %v14381_v25, 5  ;;  %v11589_v0 = vadd.f32 %v14248_v23, %v14224_v61  ;;  %v11528_v39 = vadd.f32 %v14268_v54, %v14254_v35  ;;  %v15156_v23 = vld [vmem:[#allocation21_spill] sm:$0xff]  ;;  %v15157_v35 = vld [vmem:[#allocation24_spill] sm:$0xff] }
 0x43a   :  { %v5843_v53 = vsel %vm12658_vm12, %v14312_v15, %v5842_v6  ;;  %v14417_v10 = vadd.f32 %v11586_v56, %v7140_v32  ;;  %v7143_v15 = vadd.f32 %v11525_v51, %v14170_v55  ;;  %v11592_v20 = vadd.f32 %v14270_v50, %v14258_v34  ;;  %v15159_v50 = vld [vmem:[#allocation22_spill] sm:$0xff]  ;;  %v11606_v22 = vpop.f32.mrf.mxu1  ;;  %v6128_v25 = vld [vmem:[#allocation3 + $0x234] sm:$0xff] }
 0x43b   :  { %5888 = vst [vmem:[#allocation3 + $0x214] sm:$0xf] %v5843_v53  ;;  %v11531_v59 = vadd.f32 %v14283_v28, %v14274_v43  ;;  %v6013_v16 = vsel %vm12746_vm7, %v11098_v46, %v6012_v27  ;;  %v7148_v36 = vadd.f32 %v11528_v39, %v14170_v55  ;;  %v11595_v61 = vadd.f32 %v14287_v42, %v14278_v29  ;;  %v15161_v28 = vld [vmem:[#allocation26_spill] sm:$0xff]  ;;  %v15163_v29 = vld [vmem:[#allocation27_spill] sm:$0xff]  ;;  %v8877_v47 = vld [vmem:[#allocation2 + $0x98] sm:$0xf] }
 0x43c   :  { %v11534_v54 = vadd.f32 %v15157_v35, %v15156_v23  ;;  %6048 = vst [vmem:[#allocation3 + $0x218] sm:$0xf] %v6013_v16  ;;  %v14431_v49 = vadd.f32 %v11589_v0, %v7143_v15  ;;  %v11598_v43 = vadd.f32 %v15160_v58, %v15159_v50  ;;  %v11537_v31 = vadd.f32 %v14341_v21, %v15161_v28  ;;  %v15165_v21 = vld [vmem:[#allocation28_spill] sm:$0xff]  ;;  %v12267_v13 = vld [vmem:[#allocation3 + $0x20] ss:$36 sps:$4 sm:$0xff]   ;;  %v12275_v56 = vld [vmem:[#allocation9 + $0x78] sm:$0xff]  }
 0x43d   :  { %v7151_v34 = vadd.f32 %v11531_v59, %v14170_v55  ;;  %v14438_v37 = vadd.f32 %v11592_v20, %v7148_v36  ;;  %v11601_v48 = vadd.f32 %v14347_v52, %v15163_v29  ;;  %v11540_v19 = vadd.f32 %v11539_v11, %v14355_v38  ;;  %8893 = vst [vmem:[#allocation3 + $0x234] sm:$0xf] %v8877_v47  ;;  %v12271_v3 = vld [vmem:[#allocation3 + $0x140] ss:$36 sps:$4 sm:$0xff]   ;;  %v12273_v53 = vld [vmem:[#allocation3 + $0x1d0] ss:$36 sps:$4 sm:$0xff]  }
 0x43e   :  { %15158 = vst [vmem:[#allocation21_spill] sm:$0xff] %v14431_v49  ;;  %v7156_v42 = vadd.f32 %v11534_v54, %v14170_v55  ;;  %v7159_v2 = vadd.f32 %v11537_v31, %v14170_v55  ;;  %v11604_v8 = vadd.f32 %v11603_v26, %v14361_v60  ;;  %v11543_v7 = vadd.f32 %v11542_v30, %v11541_v40  ;;  %v12269_v40 = vld [vmem:[#allocation3 + $0xb0] ss:$36 sps:$4 sm:$0xff]   ;;  %v12276_v51 = vld [vmem:[#allocation9 + $0x38] sm:$0xff]   ;;  %v12279_v15 = vld [vmem:[#allocation9 + $0x68] sm:$0xff]  }
 0x43f   :  { %15162 = vst [vmem:[#allocation24_spill] sm:$0xff] %v14438_v37  ;;  %v14444_v41 = vadd.f32 %v11595_v61, %v7151_v34  ;;  %v9149_v33 = vsel %vm12658_vm12, %v14353_v17, %v15165_v21  ;;  %v7164_v52 = vadd.f32 %v11540_v19, %v14170_v55  ;;  %v11607_v38 = vadd.f32 %v11606_v22, %v11605_v24  ;;  %v12261_v11 = vld [vmem:[#allocation3 + $0x20c] ss:$36 sps:$4 sm:$0xff]   ;;  %v12283_v20 = vld [vmem:[#allocation9 + $0xf8] sm:$0xff]   ;;  %v12281_v54 = vld [vmem:[#allocation9 + $0x60] sm:$0xff]  }
 0x440   :  { %v14452_v5 = vadd.f32 %v11598_v43, %v7156_v42  ;;  %v12264_v14 = vld [vmem:[#allocation3 + $0x208] ss:$36 sps:$4 sm:$0xff]   ;;  %v14455_v18 = vadd.f32 %v11601_v48, %v7159_v2  ;;  %v7167_v60 = vadd.f32 %v11543_v7, %v14170_v55  ;;  %v9309_v57 = vsel %vm12746_vm7, %v11308_v62, %v9308_v63  ;;  %7363 = vmatprep.mubr.bf16.mxu0 %v12261_v11  ;;  %v12277_v24 = vld [vmem:[#allocation9 + $0x70] sm:$0xff]   ;;  %v12284_v59 = vld [vmem:[#allocation9 + $0xb8] sm:$0xff]  }
 0x441   :  { %15164 = vst [vmem:[#allocation22_spill] sm:$0xff] %v14444_v41  ;;  %v14460_v4 = vadd.f32 %v11604_v8, %v7164_v52  ;;  %7364 = vmatmul.mubr.bf16.gmra.mxu0 %v12264_v14  ;;  %v12268_v55 = vld [vmem:[#allocation3 + $0x68] ss:$36 sps:$4 sm:$0xff]   ;;  %11758 = vmatprep.subr.bf16.mxu1 %v12275_v56  ;;  %v12278_v27 = vld [vmem:[#allocation9 + $0x30] sm:$0xff]   ;;  %v12282_v43 = vld [vmem:[#allocation9 + $0x20] sm:$0xff]  }
 0x442   :  { %15166 = vst [vmem:[#allocation25_spill] sm:$0xff] %v14452_v5  ;;  %15167 = vst [vmem:[#allocation26_spill] sm:$0xff] %v14455_v18  ;;  %v6123_v26 = vld [vmem:[#allocation3 + $0x210] sm:$0xff]  ;;  %v14462_v46 = vadd.f32 %v11607_v38, %v7167_v60  ;;  %12046 = vmatprep.mubr.bf16.mxu0 %v12267_v13  ;;  %v12272_v62 = vld [vmem:[#allocation3 + $0x188] ss:$36 sps:$4 sm:$0xff]   ;;  %11759 = vmatpush3.bf16.msra.mxu1 %v12276_v51 }
 0x443   :  { %v12265_v6 = vld [vmem:[#allocation3 + $0x214] ss:$36 sps:$4 sm:$0xff]   ;;  %15168 = vst [vmem:[#allocation27_spill] sm:$0xff] %v14460_v4  ;;  %v11170_v17 = vcombine.low %v6123_v26, %v6128_v25  ;;  %11760 = vmatprep.subr.bf16.mxu1 %v12277_v24  ;;  %11822 = vmatprep.subr.bf16.mxu0 %v12283_v20  ;;  %v12289_v35 = vld [vmem:[#allocation9 + $0xe8] sm:$0xff]   ;;  %v12292_v28 = vld [vmem:[#allocation9 + $0xe0] sm:$0xff]  }
 0x444   :  { %9181 = vst [vmem:[#allocation3 + $0x238] sm:$0xf] %v9149_v33  ;;  %15169 = vst [vmem:[#allocation28_spill] sm:$0xff] %v14462_v46  ;;  %7460 = vmatprep.mubr.bf16.mxu1 %v12265_v6  ;;  %v12274_v32 = vld [vmem:[#allocation3 + $0x218] ss:$36 sps:$4 sm:$0xff]   ;;  %v12286_v36 = vld [vmem:[#allocation9 + $0xf0] sm:$0xff]  }
 0x445   :  { %7461 = vmatmul.mubr.bf16.gmra.mxu1 %v11170_v17  ;;  %9341 = vst [vmem:[#allocation3 + $0x23c] sm:$0xf] %v9309_v57  ;;  %v12288_v61 = vld [vmem:[#allocation9 + $0xb0] sm:$0xff]   ;;  %v12290_v34 = vld [vmem:[#allocation9 + $0xa8] sm:$0xff]   ;;  %v12294_v42 = vld [vmem:[#allocation9 + $0xa0] sm:$0xff]  }
 0x446   :  { %11761 = vmatpush3.bf16.msra.mxu1 %v12278_v27  ;;  %v12295_v19 = vld [vmem:[#allocation9 + $0xd8] sm:$0xff]   ;;  %v12298_v13 = vld [vmem:[#allocation9 + $0xd0] sm:$0xff]   ;;  %v12301_v6 = vld [vmem:[#allocation9 + $0xc8] sm:$0xff]  }
 0x447   :  { %11762 = vmatprep.subr.bf16.mxu1 %v12279_v15  ;;  %v12285_v8 = vld [vmem:[#allocation9 + $0x58] sm:$0xff]   ;;  %v12300_v38 = vld [vmem:[#allocation9 + $0x90] sm:$0xff]   ;;  %v12302_v57 = vld [vmem:[#allocation9 + $0x88] sm:$0xff]  }
 0x448   :  { %v12296_v25 = vld [vmem:[#allocation9 + $0x98] sm:$0xff]   ;;  %v12291_v11 = vld [vmem:[#allocation9 + $0x50] sm:$0xff]   ;;  %v12303_v51 = vld [vmem:[#allocation9 + $0x40] sm:$0xff]  }
 0x449   :  { %12047 = vmatmul.mubr.bf16.vlgmr.msra.gmra.mxu0 %v12268_v55  ;;  %v12287_v21 = vld [vmem:[#allocation9 + $0x18] sm:$0xff]   ;;  %v12293_v26 = vld [vmem:[#allocation9 + $0x10] sm:$0xff]   ;;  %v12297_v55 = vld [vmem:[#allocation9 + $0x48] sm:$0xff]  }
 0x44a   :  { %12050 = vmatprep.mubr.bf16.mxu0 %v12269_v40  ;;  %11823 = vmatpush3.bf16.msra.mxu0 %v12284_v59  ;;  %v12304_v40 = vld [vmem:[#allocation9 + $0xc0] sm:$0xff]   ;;  %v15184_v49 = vld [vmem:[#allocation19_spill] sm:$0xff] }
 0x44b   :  { %11824 = vmatprep.subr.bf16.mxu0 %v12286_v36  ;;  %v12305_v24 = vld [vmem:[#allocation9] sm:$0xff]  }
 0x44e   :  { %11825 = vmatpush3.bf16.msra.mxu0 %v12288_v61 }
 0x44f   :  { %11826 = vmatprep.subr.bf16.mxu0 %v12289_v35 }
 0x451   :  { %12051 = vmatmul.mubr.bf16.gmra.mxu0 %v14394_v12  ;;  %v12280_v12 = vld [vmem:[#allocation9 + $0x28] sm:$0xff]  }
 0x452   :  { %12054 = vmatprep.mubr.bf16.mxu0 %v12271_v3  ;;  %11763 = vmatpush3.bf16.msra.mxu1 %v12280_v12  ;;  %v12306_v3 = vld [vmem:[#allocation9 + $0x80] sm:$0xff]  }
 0x453   :  { %11764 = vmatprep.subr.bf16.mxu1 %v12281_v54  ;;  %11827 = vmatpush3.bf16.msra.mxu0 %v12290_v34  ;;  %v12315_v54 = vld [vmem:[#allocation9 + $0x178] sm:$0xff]  }
 0x454   :  { %11828 = vmatprep.subr.bf16.mxu0 %v12292_v28 }
 0x456   :  { %11765 = vmatpush3.bf16.msra.mxu1 %v12282_v43 }
 0x457   :  { %11829 = vmatpush3.bf16.msra.mxu0 %v12294_v42  ;;  %11766 = vmatprep.subr.bf16.mxu1 %v12285_v8 }
 0x458   :  { %11830 = vmatprep.subr.bf16.mxu0 %v12295_v19 }
 0x459   :  { %12055 = vmatmul.mubr.bf16.gmra.mxu0 %v12272_v62  ;;  %v12299_v62 = vld [vmem:[#allocation9 + $0x8] sm:$0xff]  }
 0x45a   :  { %12058 = vmatprep.mubr.bf16.mxu0 %v12273_v53  ;;  %11767 = vmatpush3.bf16.msra.mxu1 %v12287_v21 }
 0x45b   :  { %11831 = vmatpush3.bf16.msra.mxu0 %v12296_v25  ;;  %11768 = vmatprep.subr.bf16.mxu1 %v12291_v11 }
 0x45c   :  { %11832 = vmatprep.subr.bf16.mxu0 %v12298_v13 }
 0x45e   :  { %11769 = vmatpush3.bf16.msra.mxu1 %v12293_v26 }
 0x45f   :  { %v11544_v63 = vpop.f32.mrf.mxu0  ;;  %11833 = vmatpush3.bf16.msra.mxu0 %v12300_v38  ;;  %11770 = vmatprep.subr.bf16.mxu1 %v12297_v55 }
 0x460   :  { %11834 = vmatprep.subr.bf16.mxu0 %v12301_v6 }
 0x461   :  { %12059 = vmatmul.mubr.bf16.gmra.mxu0 %v12274_v32  ;;  %v11545_v0 = vpop.f32.mrf.mxu0 }
 0x462   :  { %v14465_v39 = vadd.f32 %v11545_v0, %v11544_v63  ;;  %11771 = vmatpush3.bf16.msra.mxu1 %v12299_v62 }
 0x463   :  { %v14467_v16 = vpop.f32.mrf.mxu0  ;;  %11835 = vmatpush3.bf16.msra.mxu0 %v12302_v57  ;;  %11772 = vmatprep.subr.bf16.mxu1 %v12303_v51  ;;  %v12340_v51 = vld [vmem:[#allocation9 + $0x1f8] sm:$0xff]  }
 0x464   :  { %11836 = vmatprep.subr.bf16.mxu0 %v12304_v40 }
 0x465   :  { %v14469_v23 = vpop.f32.mrf.mxu0 }
 0x466   :  { %11773 = vmatpush3.bf16.msra.mxu1 %v12305_v24 }
 0x467   :  { %11837 = vmatpush3.bf16.msra.mxu0 %v12306_v3  ;;  %11886 = vmatprep.subr.bf16.mxu1 %v12315_v54 }
 0x468   :  { %11950 = vmatprep.subr.bf16.mxu0 %v12340_v51 }
 0x480   :  { %v14473_v50 = vpop.f32.mrf.mxu0 }
 0x482   :  { %v14479_v22 = vpop.f32.mrf.mxu0 }
 0x483   :  { %v11632_v51 = vadd.f32 %v14479_v22, %v14473_v50  ;;  %v15183_v50 = vld [vmem:[#allocation18_spill] sm:$0xff] }
 0x484   :  { %v14485_v2 = vpop.f32.mrf.mxu0 }
 0x485   :  { %v7310_v22 = vadd.f32 %v11632_v51, %v15183_v50 }
 0x486   :  { %v14491_v33 = vpop.f32.mrf.mxu0 }
 0x48d   :  { %v14471_v30 = vpop.f32.mrf.mxu1 }
 0x48f   :  { %v14475_v58 = vpop.f32.mrf.mxu1 }
 0x490   :  { %v14495_v14 = vpop.f32.mrf.mxu0 }
 0x491   :  { %v14477_v31 = vpop.f32.mrf.mxu1 }
 0x492   :  { %v14499_v17 = vpop.f32.mrf.mxu0 }
 0x493   :  { %v14481_v29 = vpop.f32.mrf.mxu1 }
 0x494   :  { %v11639_v53 = vpop.f32.mrf.mxu0 }
 0x495   :  { %v14483_v48 = vpop.f32.mrf.mxu1 }
 0x496   :  { %v11640_v27 = vpop.f32.mrf.mxu0 }
 0x497   :  { %v14487_v7 = vpop.f32.mrf.mxu1 }
 0x499   :  { %v14489_v47 = vpop.f32.mrf.mxu1  ;;  %v11642_v0 = vpop.f32.mrf.mxu0 }
 0x49b   :  { %v14493_v52 = vpop.f32.mrf.mxu1  ;;  %v11643_v12 = vpop.f32.mrf.mxu0 }
 0x49d   :  { %v14497_v60 = vpop.f32.mrf.mxu1  ;;  %v11645_v59 = vpop.f32.mrf.mxu0 }
 0x49f   :  { %v14501_v32 = vpop.f32.mrf.mxu1  ;;  %v11646_v61 = vpop.f32.mrf.mxu0 }
 0x4a1   :  { %v14503_v56 = vpop.f32.mrf.mxu1 }
 0x4a3   :  { %v14505_v63 = vpop.f32.mrf.mxu1 }
 0x4a5   :  { %v14507_v15 = vpop.f32.mrf.mxu1 }
 0x4a7   :  { %v14509_v20 = vpop.f32.mrf.mxu1 }
 0x4a9   :  { %v14511_v36 = vpop.f32.mrf.mxu1 }
 0x4ab   :  { %v14513_v35 = vpop.f32.mrf.mxu1 }
 0x4c2   :  { %v11648_v34 = vpop.f32.mrf.mxu0 }
 0x4c4   :  { %v11649_v28 = vpop.f32.mrf.mxu0 }
 0x4c5   :  { %v14515_v43 = vpop.f32.mrf.mxu1 }
 0x4c6   :  { %15170 = vst [vmem:[#allocation29_spill] sm:$0xff] %v14515_v43  ;;  %v11651_v19 = vpop.f32.mrf.mxu0 }
 0x4c7   :  { %v11713_v42 = vpop.f32.mrf.mxu1 }
 0x4c8   :  { %v11652_v25 = vpop.f32.mrf.mxu0 }
 0x4c9   :  { %v11715_v8 = vpop.f32.mrf.mxu1  ;;  %v11653_v43 = vadd.f32 %v11652_v25, %v11651_v19 }
 0x4ca   :  { %v11654_v13 = vpop.f32.mrf.mxu0 }
 0x4cb   :  { %v11716_v21 = vpop.f32.mrf.mxu1 }
 0x4cc   :  { %v11655_v11 = vpop.f32.mrf.mxu0 }
 0x4cd   :  { %v14517_v38 = vpop.f32.mrf.mxu1 }
 0x4ce   :  { %15171 = vst [vmem:[#allocation30_spill] sm:$0xff] %v14517_v38  ;;  %v11657_v6 = vpop.f32.mrf.mxu0  ;;  %v11644_v38 = vadd.f32 %v11643_v12, %v11642_v0  ;;  %v15186_v0 = vld [vmem:[#allocation23_spill] sm:$0xff] }
 0x4cf   :  { %v14519_v26 = vpop.f32.mrf.mxu1 }
 0x4d0   :  { %15172 = vst [vmem:[#allocation31_spill] sm:$0xff] %v14519_v26  ;;  %v11658_v55 = vpop.f32.mrf.mxu0 }
 0x4d1   :  { %v14521_v57 = vpop.f32.mrf.mxu1  ;;  %v11659_v19 = vadd.f32 %v11658_v55, %v11657_v6 }
 0x4d2   :  { %15173 = vst [vmem:[#allocation32_spill] sm:$0xff] %v14521_v57  ;;  %v11660_v3 = vpop.f32.mrf.mxu0 }
 0x4d3   :  { %v14523_v40 = vpop.f32.mrf.mxu1 }
 0x4d4   :  { %15174 = vst [vmem:[#allocation33_spill] sm:$0xff] %v14523_v40  ;;  %v11661_v24 = vpop.f32.mrf.mxu0 }
 0x4d5   :  { %v14525_v62 = vpop.f32.mrf.mxu1 }
 0x4d6   :  { %15175 = vst [vmem:[#allocation34_spill] sm:$0xff] %v14525_v62  ;;  %v11663_v9 = vpop.f32.mrf.mxu0  ;;  %v11549_v62 = vadd.f32 %v14469_v23, %v14467_v16 }
 0x4d7   :  { %v14527_v54 = vpop.f32.mrf.mxu1  ;;  %v15191_v6 = vld [vmem:[#allocation31_spill] sm:$0xff] }
 0x4d8   :  { %15176 = vst [vmem:[#allocation35_spill] sm:$0xff] %v14527_v54  ;;  %v11664_v46 = vpop.f32.mrf.mxu0  ;;  %v11641_v54 = vadd.f32 %v11640_v27, %v11639_v53  ;;  %v15185_v53 = vld [vmem:[#allocation20_spill] sm:$0xff] }
 0x4d9   :  { %v14529_v45 = vpop.f32.mrf.mxu1  ;;  %v11665_v25 = vadd.f32 %v11664_v46, %v11663_v9  ;;  %v15192_v9 = vld [vmem:[#allocation22_spill] sm:$0xff] }
 0x4da   :  { %15177 = vst [vmem:[#allocation36_spill] sm:$0xff] %v14529_v45  ;;  %v11635_v45 = vadd.f32 %v14491_v33, %v14485_v2  ;;  %v11650_v33 = vadd.f32 %v11649_v28, %v11648_v34  ;;  %v7321_v12 = vadd.f32 %v11641_v54, %v15186_v0  ;;  %v7345_v46 = vadd.f32 %v11659_v19, %v15192_v9 }
 0x4db   :  { %v14531_v4 = vpop.f32.mrf.mxu1  ;;  %v11666_v18 = vpop.f32.mrf.mxu0  ;;  %v15194_v51 = vld [vmem:[#allocation33_spill] sm:$0xff] }
 0x4dc   :  { %15178 = vst [vmem:[#allocation37_spill] sm:$0xff] %v14531_v4  ;;  %v11638_v4 = vadd.f32 %v14499_v17, %v14495_v14  ;;  %v7313_v2 = vadd.f32 %v11635_v45, %v15184_v49  ;;  %v11610_v14 = vadd.f32 %v14475_v58, %v14471_v30  ;;  %v11613_v17 = vadd.f32 %v14481_v29, %v14477_v31 }
 0x4dd   :  { %v11667_v57 = vpop.f32.mrf.mxu0  ;;  %v11702_v45 = vadd.f32 %v14501_v32, %v14497_v60  ;;  %v7326_v49 = vadd.f32 %v11644_v38, %v14383_v44  ;;  %v11705_v58 = vadd.f32 %v14505_v63, %v14503_v56  ;;  %v11711_v29 = vadd.f32 %v14513_v35, %v14511_v36  ;;  %v15188_v60 = vld [vmem:[#allocation21_spill] sm:$0xff] }
 0x4de   :  { %v14533_v5 = vpop.f32.mrf.mxu1  ;;  %v7318_v27 = vadd.f32 %v11638_v4, %v15185_v53  ;;  %v11708_v4 = vadd.f32 %v14509_v20, %v14507_v15  ;;  %v7337_v32 = vadd.f32 %v11653_v43, %v15188_v60  ;;  %v11717_v44 = vadd.f32 %v11716_v21, %v11715_v8  ;;  %v15189_v21 = vld [vmem:[#allocation24_spill] sm:$0xff] }
 0x4df   :  { %15179 = vst [vmem:[#allocation38_spill] sm:$0xff] %v14533_v5  ;;  %v11669_v40 = vpop.f32.mrf.mxu0  ;;  %v11656_v56 = vadd.f32 %v11655_v11, %v11654_v13  ;;  %v7418_v35 = vadd.f32 %v11705_v58, %v7321_v12  ;;  %v15190_v11 = vld [vmem:[#allocation30_spill] sm:$0xff] }
 0x4e0   :  { %v14535_v41 = vpop.f32.mrf.mxu1  ;;  %v7415_v15 = vadd.f32 %v11702_v45, %v7318_v27  ;;  %v14578_v38 = vadd.f32 %v11708_v4, %v7326_v49  ;;  %v14580_v43 = vadd.f32 %v11717_v44, %v7337_v32  ;;  %v11720_v55 = vadd.f32 %v15191_v6, %v15190_v11  ;;  %v15204_v4 = vld [vmem:[#allocation28_spill] sm:$0xff] }
 0x4e1   :  { %15180 = vst [vmem:[#allocation39_spill] sm:$0xff] %v14535_v41  ;;  %v11670_v5 = vpop.f32.mrf.mxu0  ;;  %v11647_v41 = vadd.f32 %v11646_v61, %v11645_v59  ;;  %v11699_v59 = vadd.f32 %v14493_v52, %v14489_v47  ;;  %v15187_v47 = vld [vmem:[#allocation29_spill] sm:$0xff]  ;;  %v7342_v13 = vadd.f32 %v11656_v56, %v15189_v21 }
 0x4e2   :  { %v14537_v26 = vpop.f32.mrf.mxu1  ;;  %v11714_v52 = vadd.f32 %v11713_v42, %v15187_v47 }
 0x4e3   :  { %15181 = vst [vmem:[#allocation40_spill] sm:$0xff] %v14537_v26  ;;  %v12445_v26 = vld [vmem:[%s15120_s2] ss:$0 sm:$0xff]  ;;  %v7329_v31 = vadd.f32 %v11647_v41, %v14399_v1  ;;  %v7410_v1 = vadd.f32 %v11699_v59, %v7313_v2  ;;  %v11662_v41 = vadd.f32 %v11661_v24, %v11660_v3  ;;  %v15193_v24 = vld [vmem:[#allocation32_spill] sm:$0xff]  ;;  %v15200_v53 = vld [vmem:[#allocation37_spill] sm:$0xff] }
 0x4e4   :  { %v14547_v37 = vpop.f32.mrf.mxu1  ;;  %v7172_v16 = vadd.f32 %v12445_v26, %v14465_v39  ;;  %v7175_v23 = vadd.f32 %v12445_v26, %v11549_v62  ;;  %v11696_v39 = vadd.f32 %v14487_v7, %v14483_v48  ;;  %v7334_v7 = vadd.f32 %v11650_v33, %v14417_v10  ;;  %v15198_v33 = vld [vmem:[#allocation26_spill] sm:$0xff] }
 0x4e5   :  { %15182 = vst [vmem:[#allocation41_spill] sm:$0xff] %v14547_v37  ;;  %v11668_v10 = vadd.f32 %v11667_v57, %v11666_v18  ;;  %v14582_v8 = vadd.f32 %v11711_v29, %v7329_v31  ;;  %v11671_v62 = vadd.f32 %v11670_v5, %v11669_v40  ;;  %v15195_v18 = vld [vmem:[#allocation34_spill] sm:$0xff]  ;;  %v15196_v57 = vld [vmem:[#allocation35_spill] sm:$0xff] }
 0x4e6   :  { %v7269_v34 = vadd.f32 %v11610_v14, %v7172_v16  ;;  %v7272_v28 = vadd.f32 %v11613_v17, %v7175_v23  ;;  %v7407_v20 = vadd.f32 %v11696_v39, %v7310_v22  ;;  %v7431_v26 = vadd.f32 %v11714_v52, %v7334_v7  ;;  %v15197_v22 = vld [vmem:[#allocation25_spill] sm:$0xff]  ;;  %v15199_v17 = vld [vmem:[#allocation36_spill] sm:$0xff]  ;;  %v15202_v12 = vld [vmem:[#allocation38_spill] sm:$0xff] }
 0x4e7   :  { %v11723_v16 = vadd.f32 %v15194_v51, %v15193_v24  ;;  %v11726_v23 = vadd.f32 %v15196_v57, %v15195_v18  ;;  %v7350_v2 = vadd.f32 %v11662_v41, %v15197_v22  ;;  %v7353_v14 = vadd.f32 %v11665_v25, %v15198_v33 }
 0x4e8   :  { %v11729_v27 = vadd.f32 %v15200_v53, %v15199_v17  ;;  %v15203_v39 = vld [vmem:[#allocation39_spill] sm:$0xff]  ;;  %v7361_v31 = vadd.f32 %v11671_v62, %v15204_v4  ;;  %v7818_v62 = vld [vmem:[#allocation2 + $0x18] sm:$0xf]  ;;  %v7827_v4 = vld [vmem:[#allocation2 + $0x24] sm:$0x1] }
 0x4e9   :  { %v11732_v59 = vadd.f32 %v15203_v39, %v15202_v12  ;;  %v14604_v25 = vadd.f32 %v11726_v23, %v7350_v2  ;;  %v7806_v23 = vld [vmem:[#allocation2 + $0x8] sm:$0xf] }
 0x4ea   :  { %v15205_v29 = vld [vmem:[#allocation40_spill] sm:$0xff]  ;;  %v14608_v11 = vadd.f32 %v11729_v27, %v7353_v14 }
 0x501   :  { %v11672_v37 = vpop.f32.mrf.mxu0 }
 0x503   :  { %v11673_v48 = vpop.f32.mrf.mxu0 }
 0x504   :  { %v11674_v54 = vadd.f32 %v11673_v48, %v11672_v37  ;;  %v15201_v37 = vld [vmem:[#allocation27_spill] sm:$0xff]  ;;  %v15206_v48 = vld [vmem:[#allocation41_spill] sm:$0xff] }
 0x505   :  { %v11736_v30 = vpop.f32.mrf.mxu1  ;;  %v11675_v63 = vpop.f32.mrf.mxu0  ;;  %v7358_v40 = vadd.f32 %v11668_v10, %v15201_v37  ;;  %v11735_v7 = vadd.f32 %v15206_v48, %v15205_v29 }
 0x506   :  { %v7366_v47 = vadd.f32 %v11674_v54, %v7269_v34  ;;  %v7821_v54 = vld [vmem:[#allocation2 + $0x1c] sm:$0x1] }
 0x507   :  { %v11737_v61 = vpop.f32.mrf.mxu1  ;;  %v11676_v36 = vpop.f32.mrf.mxu0  ;;  %v14612_v6 = vadd.f32 %v11732_v59, %v7358_v40 }
 0x508   :  { %v11677_v0 = vadd.f32 %v11676_v36, %v11675_v63  ;;  %v11738_v52 = vadd.f32 %v11737_v61, %v11736_v30  ;;  %v14602_v63 = vadd.f32 %v11720_v55, %v7342_v13  ;;  %v14606_v36 = vadd.f32 %v11723_v16, %v7345_v46 }
 0x509   :  { %v11739_v42 = vpop.f32.mrf.mxu1  ;;  %v12048_v3 = vpop.f32.mrf.mxu0 }
 0x50a   :  { %v7512_v50 = vadd.f32 %v12048_v3, %v7415_v15  ;;  %v7369_v19 = vadd.f32 %v11677_v0, %v7272_v28  ;;  %v14610_v61 = vadd.f32 %v11738_v52, %v7366_v47 }
 0x50b   :  { %v7503_v5 = vpop.f32.mrf.mxu0  ;;  %v11740_v45 = vpop.f32.mrf.mxu1 }
 0x50c   :  { %v7568_v49 = vmax.f32 %v7512_v50, 0.0  ;;  %v7504_v58 = vadd.f32 %v7503_v5, %v7407_v20  ;;  %v11741_v15 = vadd.f32 %v11740_v45, %v11739_v42  ;;  %v7809_v50 = vld [vmem:[#allocation2 + $0xc] sm:$0x1] }
 0x50d   :  { %v12049_v60 = vpop.f32.mrf.mxu0 }
 0x50e   :  { %v11472_v32 = vpack.c.bf16 %v7568_v49, %v7568_v49  ;;  %v7566_v44 = vmax.f32 %v7504_v58, 0.0  ;;  %v7515_v56 = vadd.f32 %v12049_v60, %v7418_v35  ;;  %v14614_v35 = vadd.f32 %v11735_v7, %v7361_v31  ;;  %v7824_v58 = vld [vmem:[#allocation2 + $0x20] sm:$0xf] }
 0x50f   :  { %v7506_v41 = vpop.f32.mrf.mxu0  ;;  %v14616_v51 = vadd.f32 %v11741_v15, %v7369_v19 }
 0x510   :  { %v7663_v20 = vshrl.u32 %v11472_v32, 16  ;;  %v11470_v10 = vpack.c.bf16 %v7566_v44, %v7566_v44  ;;  %v7569_v21 = vmax.f32 %v7515_v56, 0.0  ;;  %v7507_v34 = vadd.f32 %v7506_v41, %v7410_v1  ;;  %v7815_v44 = vld [vmem:[#allocation2 + $0x14] sm:$0x1] }
 0x511   :  { %v12052_v30 = vpop.f32.mrf.mxu0  ;;  %v7666_v42 = vshll.u32 %v11472_v32, 16  ;;  %v7812_v32 = vld [vmem:[#allocation2 + $0x10] sm:$0xf] }
 0x512   :  { %v7665_v28 = vrot.slane %v7663_v20, 7  ;;  %v7647_v13 = vshrl.u32 %v11470_v10, 16  ;;  %v11473_v55 = vpack.c.bf16 %v7569_v21, %v7569_v21  ;;  %v7650_v3 = vshll.u32 %v11470_v10, 16 }
 0x513   :  { %v7567_v9 = vmax.f32 %v7507_v34, 0.0  ;;  %v7528_v46 = vadd.f32 %v12052_v30, %v7431_v26  ;;  %v7519_v24 = vpop.f32.mrf.mxu0 }
 0x514   :  { %v7668_v1 = vor.u32 %v7666_v42, %v7665_v28  ;;  %v7669_v16 = vrot.slane %v7665_v28, 4  ;;  %v7649_v18 = vrot.slane %v7647_v13, 7  ;;  %v7671_v57 = vshrl.u32 %v11473_v55, 16 }
 0x515   :  { %v7674_v22 = vshll.u32 %v11473_v55, 16  ;;  %v11471_v2 = vpack.c.bf16 %v7567_v9, %v7567_v9  ;;  %v7572_v33 = vmax.f32 %v7528_v46, 0.0  ;;  %v7520_v14 = vadd.f32 %v7519_v24, %v14578_v38  ;;  %v12053_v17 = vpop.f32.mrf.mxu0 }
 0x516   :  { %v7819_v27 = vsel %vm12666_vm13, %v7668_v1, %v7818_v62  ;;  %v7822_v26 = vsel %vm12680_vm14, %v7669_v16, %v7821_v54  ;;  %v7652_v5 = vor.u32 %v7650_v3, %v7649_v18  ;;  %v7653_v37 = vrot.slane %v7649_v18, 4  ;;  %v7842_v62 = vld [vmem:[#allocation2 + $0x38] sm:$0xf]  ;;  %v7845_v54 = vld [vmem:[#allocation2 + $0x3c] sm:$0x1] }
 0x517   :  { %7820 = vst [vmem:[#allocation2 + $0x18] sm:$0xf] %v7819_v27  ;;  %7823 = vst [vmem:[#allocation2 + $0x1c] sm:$0x1] %v7822_v26  ;;  %v7673_v40 = vrot.slane %v7671_v57, 7  ;;  %v7655_v12 = vshrl.u32 %v11471_v2, 16  ;;  %v11476_v59 = vpack.c.bf16 %v7572_v33, %v7572_v33  ;;  %v7522_v45 = vpop.f32.mrf.mxu0  ;;  %v7531_v29 = vadd.f32 %v12053_v17, %v14580_v43 }
 0x518   :  { %v7658_v39 = vshll.u32 %v11471_v2, 16  ;;  %v7807_v49 = vsel %vm12666_vm13, %v7652_v5, %v7806_v23  ;;  %v7810_v38 = vsel %vm12680_vm14, %v7653_v37, %v7809_v50  ;;  %v7570_v31 = vmax.f32 %v7520_v14, 0.0  ;;  %v7830_v18 = vld [vmem:[#allocation2 + $0x28] sm:$0xf]  ;;  %v7833_v23 = vld [vmem:[#allocation2 + $0x2c] sm:$0x1] }
 0x519   :  { %7808 = vst [vmem:[#allocation2 + $0x8] sm:$0xf] %v7807_v49  ;;  %7811 = vst [vmem:[#allocation2 + $0xc] sm:$0x1] %v7810_v38  ;;  %v7676_v48 = vor.u32 %v7674_v22, %v7673_v40  ;;  %v7677_v7 = vrot.slane %v7673_v40, 4  ;;  %v7657_v47 = vrot.slane %v7655_v12, 7  ;;  %v12056_v60 = vpop.f32.mrf.mxu0  ;;  %v7523_v41 = vadd.f32 %v7522_v45, %v14582_v8 }
 0x51a   :  { %v7695_v52 = vshrl.u32 %v11476_v59, 16  ;;  %v7698_v56 = vshll.u32 %v11476_v59, 16  ;;  %v11474_v19 = vpack.c.bf16 %v7570_v31, %v7570_v31  ;;  %v7573_v15 = vmax.f32 %v7531_v29, 0.0  ;;  %v7848_v37 = vld [vmem:[#allocation2 + $0x40] sm:$0xf] }
 0x51b   :  { %v7825_v20 = vsel %vm12666_vm13, %v7676_v48, %v7824_v58  ;;  %v7828_v43 = vsel %vm12680_vm14, %v7677_v7, %v7827_v4  ;;  %v7660_v10 = vor.u32 %v7658_v39, %v7657_v47  ;;  %v7661_v21 = vrot.slane %v7657_v47, 4  ;;  %v7535_v34 = vpop.f32.mrf.mxu0  ;;  %v7851_v40 = vld [vmem:[#allocation2 + $0x44] sm:$0x1]  ;;  %v7836_v4 = vld [vmem:[#allocation2 + $0x30] sm:$0xf] }
 0x51c   :  { %7826 = vst [vmem:[#allocation2 + $0x20] sm:$0xf] %v7825_v20  ;;  %7829 = vst [vmem:[#allocation2 + $0x24] sm:$0x1] %v7828_v43  ;;  %v7697_v30 = vrot.slane %v7695_v52, 7  ;;  %v7679_v28 = vshrl.u32 %v11474_v19, 16  ;;  %v11477_v13 = vpack.c.bf16 %v7573_v15, %v7573_v15  ;;  %v7544_v9 = vadd.f32 %v12056_v60, %v14604_v25 }
 0x51d   :  { %v7682_v42 = vshll.u32 %v11474_v19, 16  ;;  %v7813_v55 = vsel %vm12666_vm13, %v7660_v10, %v7812_v32  ;;  %v7816_v8 = vsel %vm12680_vm14, %v7661_v21, %v7815_v44  ;;  %v7571_v3 = vmax.f32 %v7523_v41, 0.0  ;;  %v12057_v46 = vpop.f32.mrf.mxu0 }
 0x51e   :  { %7814 = vst [vmem:[#allocation2 + $0x10] sm:$0xf] %v7813_v55  ;;  %7817 = vst [vmem:[#allocation2 + $0x14] sm:$0x1] %v7816_v8  ;;  %v7700_v24 = vor.u32 %v7698_v56, %v7697_v30  ;;  %v7701_v1 = vrot.slane %v7697_v30, 4  ;;  %v7681_v16 = vrot.slane %v7679_v28, 7  ;;  %v7536_v33 = vadd.f32 %v7535_v34, %v14602_v63 }
 0x51f   :  { %v7703_v57 = vshrl.u32 %v11477_v13, 16  ;;  %v7706_v50 = vshll.u32 %v11477_v13, 16  ;;  %v11475_v22 = vpack.c.bf16 %v7571_v3, %v7571_v3  ;;  %v7576_v2 = vmax.f32 %v7544_v9, 0.0  ;;  %v7538_v14 = vpop.f32.mrf.mxu0  ;;  %v8384_v17 = vld [vmem:[#allocation2 + $0x18] sm:$0xf] }
 0x520   :  { %v7843_v27 = vsel %vm12666_vm13, %v7700_v24, %v7842_v62  ;;  %v7846_v25 = vsel %vm12680_vm14, %v7701_v1, %v7845_v54  ;;  %v7684_v26 = vor.u32 %v7682_v42, %v7681_v16  ;;  %v7685_v5 = vrot.slane %v7681_v16, 4  ;;  %8400 = vst [vmem:[#allocation3 + $0x54] sm:$0xf] %v8384_v17  ;;  %v8382_v49 = vld [vmem:[#allocation2 + $0x8] sm:$0xf] }
 0x521   :  { %7844 = vst [vmem:[#allocation2 + $0x38] sm:$0xf] %v7843_v27  ;;  %7847 = vst [vmem:[#allocation2 + $0x3c] sm:$0x1] %v7846_v25  ;;  %v7705_v12 = vrot.slane %v7703_v57, 7  ;;  %v7687_v39 = vshrl.u32 %v11475_v22, 16  ;;  %v11480_v45 = vpack.c.bf16 %v7576_v2, %v7576_v2  ;;  %v12060_v63 = vpop.f32.mrf.mxu0  ;;  %v7547_v29 = vadd.f32 %v12057_v46, %v14608_v11 }
 0x522   :  { %v7690_v59 = vshll.u32 %v11475_v22, 16  ;;  %v7831_v38 = vsel %vm12666_vm13, %v7684_v26, %v7830_v18  ;;  %v7834_v58 = vsel %vm12680_vm14, %v7685_v5, %v7833_v23  ;;  %v7574_v31 = vmax.f32 %v7536_v33, 0.0  ;;  %8398 = vst [vmem:[#allocation3 + $0xc] sm:$0xf] %v8382_v49  ;;  %v7903_v48 = vld [vmem:[#allocation2 + $0x8] sm:$0xf] }
 0x523   :  { %7832 = vst [vmem:[#allocation2 + $0x28] sm:$0xf] %v7831_v38  ;;  %7835 = vst [vmem:[#allocation2 + $0x2c] sm:$0x1] %v7834_v58  ;;  %v7708_v7 = vor.u32 %v7706_v50, %v7705_v12  ;;  %v7709_v47 = vrot.slane %v7705_v12, 4  ;;  %v7689_v52 = vrot.slane %v7687_v39, 7  ;;  %v7551_v32 = vpop.f32.mrf.mxu0  ;;  %v7539_v20 = vadd.f32 %v7538_v14, %v14606_v36 }
 0x524   :  { %v7727_v60 = vshrl.u32 %v11480_v45, 16  ;;  %v8385_v44 = vld [vmem:[#allocation2 + $0x20] sm:$0xf]  ;;  %7919 = vst [vmem:[#allocation3 + $0x24] sm:$0xf] %v7903_v48  ;;  %v7730_v19 = vshll.u32 %v11480_v45, 16  ;;  %v11478_v15 = vpack.c.bf16 %v7574_v31, %v7574_v31  ;;  %v7560_v9 = vadd.f32 %v12060_v63, %v14610_v61 }
 0x525   :  { %v7839_v56 = vld [vmem:[#allocation2 + $0x34] sm:$0x1]  ;;  %v7577_v41 = vmax.f32 %v7547_v29, 0.0  ;;  %8401 = vst [vmem:[#allocation3 + $0x78] sm:$0xf] %v8385_v44  ;;  %v7849_v11 = vsel %vm12666_vm13, %v7708_v7, %v7848_v37  ;;  %v7852_v10 = vsel %vm12680_vm14, %v7709_v47, %v7851_v40  ;;  %v7692_v21 = vor.u32 %v7690_v59, %v7689_v52  ;;  %v12061_v46 = vpop.f32.mrf.mxu0 }
 0x526   :  { %v7905_v43 = vld [vmem:[#allocation2 + $0x18] sm:$0xf]  ;;  %v7693_v34 = vrot.slane %v7689_v52, 4  ;;  %v8383_v30 = vld [vmem:[#allocation2 + $0x10] sm:$0xf]  ;;  %v7729_v28 = vrot.slane %v7727_v60, 7  ;;  %v7552_v14 = vadd.f32 %v7551_v32, %v14612_v6  ;;  %v7563_v58 = vadd.f32 %v12061_v46, %v14616_v51 }
 0x527   :  { %7921 = vst [vmem:[#allocation3 + $0x6c] sm:$0xf] %v7905_v43  ;;  %7850 = vst [vmem:[#allocation2 + $0x40] sm:$0xf] %v7849_v11  ;;  %v7866_v42 = vld [vmem:[#allocation2 + $0x68] sm:$0xf]  ;;  %v11481_v8 = vpack.c.bf16 %v7577_v41, %v7577_v41  ;;  %v7837_v36 = vsel %vm12666_vm13, %v7692_v21, %v7836_v4  ;;  %v7554_v59 = vpop.f32.mrf.mxu0 }
 0x528   :  { %7853 = vst [vmem:[#allocation2 + $0x44] sm:$0x1] %v7852_v10  ;;  %v7711_v13 = vshrl.u32 %v11478_v15, 16  ;;  %v7714_v55 = vshll.u32 %v11478_v15, 16  ;;  %8399 = vst [vmem:[#allocation3 + $0x30] sm:$0xf] %v8383_v30  ;;  %v7840_v62 = vsel %vm12680_vm14, %v7693_v34, %v7839_v56  ;;  %v7732_v1 = vor.u32 %v7730_v19, %v7729_v28 }
 0x529   :  { %v7869_v54 = vld [vmem:[#allocation2 + $0x6c] sm:$0x1]  ;;  %v7575_v3 = vmax.f32 %v7539_v20, 0.0  ;;  %v7904_v24 = vld [vmem:[#allocation2 + $0x10] sm:$0xf]  ;;  %v7733_v16 = vrot.slane %v7729_v28, 4  ;;  %v7555_v44 = vadd.f32 %v7554_v59, %v14614_v35 }
 0x52a   :  { %7838 = vst [vmem:[#allocation2 + $0x30] sm:$0xf] %v7837_v36  ;;  %7841 = vst [vmem:[#allocation2 + $0x34] sm:$0x1] %v7840_v62  ;;  %v7713_v18 = vrot.slane %v7711_v13, 7  ;;  %v7735_v23 = vshrl.u32 %v11481_v8, 16  ;;  %v7867_v17 = vsel %vm12666_vm13, %v7732_v1, %v7866_v42 }
 0x52b   :  { %v7854_v57 = vld [vmem:[#allocation2 + $0x58] sm:$0xf]  ;;  %7920 = vst [vmem:[#allocation3 + $0x48] sm:$0xf] %v7904_v24  ;;  %v7857_v50 = vld [vmem:[#allocation2 + $0x5c] sm:$0x1]  ;;  %v11479_v2 = vpack.c.bf16 %v7575_v3, %v7575_v3  ;;  %v7870_v61 = vsel %vm12680_vm14, %v7733_v16, %v7869_v54 }
 0x52c   :  { %v7738_v22 = vshll.u32 %v11481_v8, 16  ;;  %v7580_v33 = vmax.f32 %v7560_v9, 0.0  ;;  %v7716_v27 = vor.u32 %v7714_v55, %v7713_v18  ;;  %v7717_v25 = vrot.slane %v7713_v18, 4  ;;  %v7872_v26 = vld [vmem:[#allocation2 + $0x70] sm:$0xf] }
 0x52d   :  { %7868 = vst [vmem:[#allocation2 + $0x68] sm:$0xf] %v7867_v17  ;;  %7871 = vst [vmem:[#allocation2 + $0x6c] sm:$0x1] %v7870_v61  ;;  %v7737_v5 = vrot.slane %v7735_v23, 7  ;;  %v7719_v40 = vshrl.u32 %v11479_v2, 16 }
 0x52e   :  { %v7875_v37 = vld [vmem:[#allocation2 + $0x74] sm:$0x1]  ;;  %v7722_v12 = vshll.u32 %v11479_v2, 16  ;;  %v11484_v39 = vpack.c.bf16 %v7580_v33, %v7580_v33  ;;  %v7855_v6 = vsel %vm12666_vm13, %v7716_v27, %v7854_v57  ;;  %v7858_v45 = vsel %vm12680_vm14, %v7717_v25, %v7857_v50  ;;  %v7860_v63 = vld [vmem:[#allocation2 + $0x60] sm:$0xf] }
 0x52f   :  { %v7863_v49 = vld [vmem:[#allocation2 + $0x64] sm:$0x1]  ;;  %v7578_v38 = vmax.f32 %v7552_v14, 0.0  ;;  %v14668_v4 = vld [vmem:[#allocation2 + $0x8] sm:$0xe]  ;;  %v7740_v31 = vor.u32 %v7738_v22, %v7737_v5  ;;  %v7741_v29 = vrot.slane %v7737_v5, 4 }
 0x530   :  { %7856 = vst [vmem:[#allocation2 + $0x58] sm:$0xf] %v7855_v6  ;;  %7859 = vst [vmem:[#allocation2 + $0x5c] sm:$0x1] %v7858_v45  ;;  %v7721_v48 = vrot.slane %v7719_v40, 7  ;;  %v7759_v7 = vshrl.u32 %v11484_v39, 16 }
 0x531   :  { %v8386_v47 = vld [vmem:[#allocation2 + $0x28] sm:$0xf]  ;;  %v7762_v52 = vshll.u32 %v11484_v39, 16  ;;  %v11482_v60 = vpack.c.bf16 %v7578_v38, %v7578_v38  ;;  %v7581_v32 = vmax.f32 %v7563_v58, 0.0  ;;  %v7906_v56 = vld [vmem:[#allocation2 + $0x20] sm:$0xf]  ;;  %v7873_v51 = vsel %vm12666_vm13, %v7740_v31, %v7872_v26 }
 0x532   :  { %8402 = vst [vmem:[#allocation3 + $0x9c] sm:$0xf] %v8386_v47  ;;  %v7907_v19 = vld [vmem:[#allocation2 + $0x28] sm:$0xf]  ;;  %v7876_v15 = vsel %vm12680_vm14, %v7741_v29, %v7875_v37  ;;  %v7724_v41 = vor.u32 %v7722_v12, %v7721_v48  ;;  %v7725_v20 = vrot.slane %v7721_v48, 4  ;;  %v7761_v35 = vrot.slane %v7759_v7, 7 }
 0x533   :  { %v7890_v43 = vld [vmem:[#allocation2 + $0x88] sm:$0xf]  ;;  %v7893_v11 = vld [vmem:[#allocation2 + $0x8c] sm:$0x1]  ;;  %v8387_v21 = vld [vmem:[#allocation2 + $0x30] sm:$0xf]  ;;  %v11485_v28 = vpack.c.bf16 %v7581_v32, %v7581_v32 }
 0x534   :  { %v8225_v10 = vld [vmem:[#allocation2 + $0xc] sm:$0x1]  ;;  %7922 = vst [vmem:[#allocation3 + $0x90] sm:$0xf] %v7906_v56  ;;  %7923 = vst [vmem:[#allocation3 + $0xb4] sm:$0xf] %v7907_v19  ;;  %v7861_v13 = vsel %vm12666_vm13, %v7724_v41, %v7860_v63  ;;  %v7864_v55 = vsel %vm12680_vm14, %v7725_v20, %v7863_v49  ;;  %v7764_v9 = vor.u32 %v7762_v52, %v7761_v35 }
 0x535   :  { %7874 = vst [vmem:[#allocation2 + $0x70] sm:$0xf] %v7873_v51  ;;  %7877 = vst [vmem:[#allocation2 + $0x74] sm:$0x1] %v7876_v15  ;;  %v7743_v34 = vshrl.u32 %v11482_v60, 16  ;;  %v7746_v30 = vshll.u32 %v11482_v60, 16 }
 0x536   :  { %v8226_v42 = vld [vmem:[#allocation2 + $0x10] sm:$0xe]  ;;  %8403 = vst [vmem:[#allocation3 + $0xc0] sm:$0xf] %v8387_v21  ;;  %v7878_v8 = vld [vmem:[#allocation2 + $0x78] sm:$0xf]  ;;  %v7891_v2 = vsel %vm12666_vm13, %v7764_v9, %v7890_v43 }
 0x537   :  { %v7881_v36 = vld [vmem:[#allocation2 + $0x7c] sm:$0x1]  ;;  %v7579_v62 = vmax.f32 %v7555_v44, 0.0  ;;  %v11262_v54 = vrot.slane %v14668_v4, 9  ;;  %v14680_v3 = vld [vmem:[#allocation2 + $0x18] sm:$0xe] }
 0x538   :  { %7862 = vst [vmem:[#allocation2 + $0x60] sm:$0xf] %v7861_v13  ;;  %7865 = vst [vmem:[#allocation2 + $0x64] sm:$0x1] %v7864_v55  ;;  %v7765_v46 = vrot.slane %v7761_v35, 4  ;;  %v7745_v24 = vrot.slane %v7743_v34, 7 }
 0x539   :  { %v7767_v1 = vshrl.u32 %v11485_v28, 16  ;;  %v8229_v16 = vld [vmem:[#allocation2 + $0x1c] sm:$0x1]  ;;  %v7770_v18 = vshll.u32 %v11485_v28, 16  ;;  %v11483_v57 = vpack.c.bf16 %v7579_v62, %v7579_v62  ;;  %v8292_v23 = vrot.slane %v8225_v10, 5 }
 0x53a   :  { %v8227_v50 = vld [vmem:[#allocation2 + $0x14] sm:$0x1]  ;;  %v11263_v22 = vrot.slane %v8226_v42, 9  ;;  %v7894_v33 = vsel %vm12680_vm14, %v7765_v46, %v7893_v11  ;;  %v7748_v14 = vor.u32 %v7746_v30, %v7745_v24  ;;  %v7749_v17 = vrot.slane %v7745_v24, 4  ;;  %v7896_v61 = vld [vmem:[#allocation2 + $0x90] sm:$0xf] }
 0x53b   :  { %v7899_v27 = vld [vmem:[#allocation2 + $0x94] sm:$0x1]  ;;  %v7936_v25 = vld [vmem:[#allocation2 + $0x8] sm:$0xf]  ;;  %v7937_v26 = vld [vmem:[#allocation2 + $0xc] sm:$0x1]  ;;  %v8293_v39 = vsel %vm12746_vm7, %v11262_v54, %v8292_v23 }
 0x53c   :  { %7892 = vst [vmem:[#allocation2 + $0x88] sm:$0xf] %v7891_v2  ;;  %7895 = vst [vmem:[#allocation2 + $0x8c] sm:$0x1] %v7894_v33  ;;  %v7769_v5 = vrot.slane %v7767_v1, 7  ;;  %v7751_v37 = vshrl.u32 %v11483_v57, 16  ;;  %v7879_v6 = vsel %vm12666_vm13, %v7748_v14, %v7878_v8  ;;  %v7882_v45 = vsel %vm12680_vm14, %v7749_v17, %v7881_v36 }
 0x53d   :  { %v7754_v40 = vshll.u32 %v11483_v57, 16  ;;  %v8388_v59 = vld [vmem:[#allocation2 + $0x38] sm:$0xf]  ;;  %v7884_v63 = vld [vmem:[#allocation2 + $0x80] sm:$0xf]  ;;  %v8296_v38 = vrot.slane %v8227_v50, 5 }
 0x53e   :  { %v7887_v49 = vld [vmem:[#allocation2 + $0x84] sm:$0x1]  ;;  %8367 = vst [vmem:[#allocation3 + $0x2c] sm:$0xf] %v8293_v39  ;;  %v11264_v58 = vrot.slane %v14680_v3, 9  ;;  %v7772_v29 = vor.u32 %v7770_v18, %v7769_v5  ;;  %v7773_v48 = vrot.slane %v7769_v5, 4 }
 0x53f   :  { %v8389_v4 = vld [vmem:[#allocation2 + $0x40] sm:$0xf]  ;;  %8404 = vst [vmem:[#allocation3 + $0xe4] sm:$0xf] %v8388_v59  ;;  %v7908_v31 = vld [vmem:[#allocation2 + $0x30] sm:$0xf]  ;;  %v8297_v60 = vsel %vm12746_vm7, %v11263_v22, %v8296_v38 }
 0x540   :  { %7880 = vst [vmem:[#allocation2 + $0x78] sm:$0xf] %v7879_v6  ;;  %7883 = vst [vmem:[#allocation2 + $0x7c] sm:$0x1] %v7882_v45  ;;  %v7753_v7 = vrot.slane %v7751_v37, 7  ;;  %v8300_v47 = vrot.slane %v8229_v16, 5  ;;  %v7897_v51 = vsel %vm12666_vm13, %v7772_v29, %v7896_v61  ;;  %v7900_v15 = vsel %vm12680_vm14, %v7773_v48, %v7899_v27 }
 0x541   :  { %8405 = vst [vmem:[#allocation3 + $0x108] sm:$0xf] %v8389_v4  ;;  %v7909_v52 = vld [vmem:[#allocation2 + $0x38] sm:$0xf]  ;;  %7924 = vst [vmem:[#allocation3 + $0xd8] sm:$0xf] %v7908_v31 }
 0x542   :  { %v7981_v32 = vshrl.u32 %v7936_v25, 16  ;;  %v7984_v44 = vshll.u32 %v7936_v25, 16  ;;  %v7990_v56 = vshll.u32 %v7937_v26, 16  ;;  %v7938_v19 = vld [vmem:[#allocation2 + $0x10] sm:$0xf]  ;;  %v7756_v41 = vor.u32 %v7754_v40, %v7753_v7  ;;  %v12343_v3 = vld [vmem:[#allocation9 + $0x1b8] sm:$0xff]  }
 0x543   :  { %7925 = vst [vmem:[#allocation3 + $0xfc] sm:$0xf] %v7909_v52  ;;  %v7757_v20 = vrot.slane %v7753_v7, 4  ;;  %8368 = vst [vmem:[#allocation3 + $0x50] sm:$0xf] %v8297_v60  ;;  %v8301_v10 = vsel %vm12746_vm7, %v11264_v58, %v8300_v47  ;;  %v7995_v8 = vshrl.u32 %v7938_v19, 16 }
 0x544   :  { %v7939_v43 = vld [vmem:[#allocation2 + $0x14] sm:$0x1]  ;;  %v7940_v11 = vld [vmem:[#allocation2 + $0x18] sm:$0xf]  ;;  %7898 = vst [vmem:[#allocation2 + $0x90] sm:$0xf] %v7897_v51  ;;  %v7885_v13 = vsel %vm12666_vm13, %v7756_v41, %v7884_v63 }
 0x545   :  { %7901 = vst [vmem:[#allocation2 + $0x94] sm:$0x1] %v7900_v15  ;;  %v7983_v21 = vrot.slane %v7981_v32, 4  ;;  %v7986_v35 = vrot.slane %v7984_v44, 5  ;;  %v7992_v34 = vrot.slane %v7990_v56, 5  ;;  %v7888_v55 = vsel %vm12680_vm14, %v7757_v20, %v7887_v49  ;;  %v12345_v57 = vld [vmem:[#allocation9 + $0x1f0] sm:$0xff]  }
 0x546   :  { %v7941_v30 = vld [vmem:[#allocation2 + $0x1c] sm:$0x1]  ;;  %v8230_v28 = vld [vmem:[#allocation2 + $0x20] sm:$0xe]  ;;  %v8231_v42 = vld [vmem:[#allocation2 + $0x24] sm:$0x1] }
 0x547   :  { %8369 = vst [vmem:[#allocation3 + $0x74] sm:$0xf] %v8301_v10  ;;  %v7998_v36 = vshll.u32 %v7938_v19, 16  ;;  %v8232_v62 = vld [vmem:[#allocation2 + $0x28] sm:$0xe]  ;;  %v7987_v9 = vor.u32 %v7986_v35, %v7983_v21  ;;  %v8004_v46 = vshll.u32 %v7939_v43, 16 }
 0x548   :  { %v8233_v54 = vld [vmem:[#allocation2 + $0x2c] sm:$0x1]  ;;  %7886 = vst [vmem:[#allocation2 + $0x80] sm:$0xf] %v7885_v13  ;;  %7889 = vst [vmem:[#allocation2 + $0x84] sm:$0x1] %v7888_v55 }
 0x549   :  { %v8009_v24 = vshrl.u32 %v7940_v11, 16  ;;  %v8012_v1 = vshll.u32 %v7940_v11, 16  ;;  %v7942_v16 = vld [vmem:[#allocation2 + $0x20] sm:$0xf]  ;;  %v8390_v18 = vld [vmem:[#allocation2 + $0x58] sm:$0xf] }
 0x54a   :  { %v12307_v53 = vld [vmem:[#allocation3 + $0x8] ss:$36 sps:$4 sm:$0xff]   ;;  %v7997_v50 = vrot.slane %v7995_v8, 4  ;;  %v7943_v0 = vld [vmem:[#allocation2 + $0x24] sm:$0x1]  ;;  %v7988_v22 = vrot.slane %v7987_v9, 4 }
 0x54b   :  { %v12309_v23 = vld [vmem:[#allocation3 + $0xc] ss:$36 sps:$4 sm:$0xff]   ;;  %8406 = vst [vmem:[#allocation3 + $0x12c] sm:$0xf] %v8390_v18  ;;  %v8000_v2 = vrot.slane %v7998_v36, 5  ;;  %v8006_v33 = vrot.slane %v8004_v46, 5 }
 0x54c   :  { %v8011_v14 = vrot.slane %v8009_v24, 4  ;;  %v7944_v17 = vld [vmem:[#allocation2 + $0x28] sm:$0xf]  ;;  %v8391_v61 = vld [vmem:[#allocation2 + $0x60] sm:$0xf]  ;;  %10502 = vmatprep.mubr.bf16.mxu0 %v12309_v23  ;;  %v8014_v27 = vrot.slane %v8012_v1, 5  ;;  %v7993_v6 = vsel %vm12658_vm12, %v7988_v22, %v7992_v34 }
 0x54d   :  { %v8018_v25 = vshll.u32 %v7941_v30, 16  ;;  %v11265_v26 = vrot.slane %v8230_v28, 9  ;;  %v8304_v5 = vrot.slane %v8231_v42, 5  ;;  %8407 = vst [vmem:[#allocation3 + $0x150] sm:$0xf] %v8391_v61  ;;  %v12348_v40 = vld [vmem:[#allocation9 + $0x1b0] sm:$0xff]   ;;  %10503 = vmatmul.mubr.bf16.vlgmr.msra.gmra.mxu0 %v12307_v53  ;;  %v8001_v45 = vor.u32 %v8000_v2, %v7997_v50 }
 0x54e   :  { %v7911_v37 = vld [vmem:[#allocation2 + $0x58] sm:$0xf]  ;;  %v14705_v39 = vld [vmem:[#allocation3 + $0x50] sm:$0xff]  ;;  %v11266_v63 = vrot.slane %v8232_v62, 9  ;;  %v8308_v49 = vrot.slane %v8233_v54, 5  ;;  %v12351_v4 = vld [vmem:[#allocation9 + $0x1e8] sm:$0xff]   ;;  %v8015_v31 = vor.u32 %v8014_v27, %v8011_v14  ;;  %11951 = vmatpush3.bf16.msra.mxu0 %v12343_v3 }
 0x54f   :  { %v7945_v38 = vld [vmem:[#allocation2 + $0x2c] sm:$0x1]  ;;  %v14709_v58 = vld [vmem:[#allocation2 + $0x30] sm:$0xe]  ;;  %7927 = vst [vmem:[#allocation3 + $0x144] sm:$0xf] %v7911_v37  ;;  %v8305_v48 = vsel %vm12746_vm7, %v11265_v26, %v8304_v5  ;;  %11952 = vmatprep.subr.bf16.mxu0 %v12345_v57 }
 0x550   :  { %8207 = vst [vmem:[#allocation3 + $0x28] sm:$0xf] %v7993_v6  ;;  %v8020_v29 = vrot.slane %v8018_v25, 5  ;;  %v8023_v7 = vshrl.u32 %v7942_v16, 16  ;;  %v8235_v47 = vld [vmem:[#allocation2 + $0x34] sm:$0x1]  ;;  %v8309_v56 = vsel %vm12746_vm7, %v11266_v63, %v8308_v49 }
 0x551   :  { %v8236_v52 = vld [vmem:[#allocation2 + $0x38] sm:$0xe]  ;;  %v8002_v44 = vrot.slane %v8001_v45, 4  ;;  %8370 = vst [vmem:[#allocation3 + $0x98] sm:$0xf] %v8305_v48  ;;  %v8026_v19 = vshll.u32 %v7942_v16, 16 }
 0x552   :  { %v9358_v60 = vld [vmem:[#allocation3 + $0x74] sm:$0xff]  ;;  %v8032_v51 = vshll.u32 %v7943_v0, 16  ;;  %v8237_v15 = vld [vmem:[#allocation2 + $0x3c] sm:$0x1]  ;;  %v8016_v41 = vrot.slane %v8015_v31, 4  ;;  %v8025_v43 = vrot.slane %v8023_v7, 4  ;;  %11953 = vmatpush3.bf16.msra.mxu0 %v12348_v40 }
 0x553   :  { %v12310_v32 = vld [vmem:[#allocation3 + $0x54] ss:$36 sps:$4 sm:$0xff]   ;;  %v11321_v20 = vcombine.low %v14705_v39, %v9358_v60  ;;  %8371 = vst [vmem:[#allocation3 + $0xbc] sm:$0xf] %v8309_v56  ;;  %v8037_v11 = vshrl.u32 %v7944_v17, 16  ;;  %v8007_v21 = vsel %vm12658_vm12, %v8002_v44, %v8006_v33  ;;  %v8028_v35 = vrot.slane %v8026_v19, 5  ;;  %11954 = vmatprep.subr.bf16.mxu0 %v12351_v4 }
 0x554   :  { %v7946_v10 = vld [vmem:[#allocation2 + $0x30] sm:$0xf]  ;;  %10510 = vmatprep.mubr.bf16.mxu0 %v12310_v32  ;;  %v8034_v34 = vrot.slane %v8032_v51, 5  ;;  %v8040_v30 = vshll.u32 %v7944_v17, 16  ;;  %v14718_v28 = vld [vmem:[#allocation2 + $0x34] sm:$0x1]  ;;  %v8021_v42 = vsel %vm12658_vm12, %v8016_v41, %v8020_v29 }
 0x555   :  { %8208 = vst [vmem:[#allocation3 + $0x4c] sm:$0xf] %v8007_v21  ;;  %v8039_v13 = vrot.slane %v8037_v11, 4  ;;  %v8046_v55 = vshll.u32 %v7945_v38, 16  ;;  %v11267_v8 = vrot.slane %v14709_v58, 9  ;;  %v12354_v62 = vld [vmem:[#allocation9 + $0x1a8] sm:$0xff]   ;;  %v8029_v3 = vor.u32 %v8028_v35, %v8025_v43  ;;  %10511 = vmatmul.mubr.bf16.gmra.mxu0 %v11321_v20 }
 0x556   :  { %v14723_v36 = vld [vmem:[#allocation2 + $0x38] sm:$0xf]  ;;  %8209 = vst [vmem:[#allocation3 + $0x70] sm:$0xf] %v8021_v42  ;;  %v8042_v9 = vrot.slane %v8040_v30, 5  ;;  %v8312_v46 = vrot.slane %v8235_v47, 5  ;;  %11955 = vmatpush3.bf16.msra.mxu0 %v12354_v62 }
 0x557   :  { %v12316_v54 = vld [vmem:[#allocation9 + $0x138] sm:$0xff]   ;;  %v11268_v24 = vrot.slane %v8236_v52, 9  ;;  %v8392_v16 = vld [vmem:[#allocation2 + $0x68] sm:$0xf]  ;;  %v12356_v18 = vld [vmem:[#allocation9 + $0x1e0] sm:$0xff]   ;;  %v8048_v53 = vrot.slane %v8046_v55, 5 }
 0x558   :  { %v14725_v1 = vld [vmem:[#allocation2 + $0x3c] sm:$0x1]  ;;  %v12321_v57 = vld [vmem:[#allocation9 + $0x170] sm:$0xff]   ;;  %v8316_v23 = vrot.slane %v8237_v15, 5  ;;  %v8051_v50 = vshrl.u32 %v7946_v10, 16  ;;  %v8054_v0 = vshll.u32 %v7946_v10, 16  ;;  %v8043_v27 = vor.u32 %v8042_v9, %v8039_v13  ;;  %11956 = vmatprep.subr.bf16.mxu0 %v12356_v18 }
 0x559   :  { %v14727_v22 = vld [vmem:[#allocation2 + $0x58] sm:$0xe]  ;;  %v8393_v2 = vld [vmem:[#allocation2 + $0x70] sm:$0xf]  ;;  %8408 = vst [vmem:[#allocation3 + $0x174] sm:$0xf] %v8392_v16  ;;  %v8313_v25 = vsel %vm12746_vm7, %v11267_v8, %v8312_v46 }
 0x55a   :  { %v12359_v33 = vld [vmem:[#allocation9 + $0x1a0] sm:$0xff]   ;;  %v8030_v61 = vrot.slane %v8029_v3, 4  ;;  %8409 = vst [vmem:[#allocation3 + $0x198] sm:$0xf] %v8393_v2  ;;  %v8317_v26 = vsel %vm12746_vm7, %v11268_v24, %v8316_v23  ;;  %8372 = vst [vmem:[#allocation3 + $0xe0] sm:$0xf] %v8313_v25 }
 0x55b   :  { %v12312_v14 = vld [vmem:[#allocation3] ss:$36 sps:$4 sm:$0xff]   ;;  %v8053_v5 = vrot.slane %v8051_v50, 4  ;;  %v8056_v37 = vrot.slane %v8054_v0, 5  ;;  %v8060_v40 = vshll.u32 %v14718_v28, 16  ;;  %v12362_v63 = vld [vmem:[#allocation9 + $0x1d8] sm:$0xff]   ;;  %11957 = vmatpush3.bf16.msra.mxu0 %v12359_v33 }
 0x55c   :  { %v12314_v17 = vld [vmem:[#allocation3 + $0x4] ss:$36 sps:$4 sm:$0xff]   ;;  %v14734_v39 = vld [vmem:[#allocation2 + $0x5c] sm:$0x1]  ;;  %v14736_v6 = vld [vmem:[#allocation2 + $0x58] sm:$0xf]  ;;  %v8035_v58 = vsel %vm12658_vm12, %v8030_v61, %v8034_v34  ;;  %11958 = vmatprep.subr.bf16.mxu0 %v12362_v63 }
 0x55d   :  { %v7912_v45 = vld [vmem:[#allocation2 + $0x60] sm:$0xf]  ;;  %10405 = vmatprep.mubr.bf16.mxu1 %v12314_v17  ;;  %v8044_v4 = vrot.slane %v8043_v27, 4  ;;  %8373 = vst [vmem:[#allocation3 + $0x104] sm:$0xf] %v8317_v26  ;;  %v8065_v31 = vshrl.u32 %v14723_v36, 16  ;;  %v8057_v52 = vor.u32 %v8056_v37, %v8053_v5 }
 0x55e   :  { %v9368_v49 = vld [vmem:[#allocation3 + $0xbc] sm:$0xff]  ;;  %v8068_v29 = vshll.u32 %v14723_v36, 16  ;;  %7928 = vst [vmem:[#allocation3 + $0x168] sm:$0xf] %v7912_v45  ;;  %10406 = vmatmul.mubr.bf16.vlgmr.msra.gmra.mxu1 %v12312_v14  ;;  %v12323_v47 = vld [vmem:[#allocation9 + $0x130] sm:$0xff]   ;;  %v8074_v60 = vshll.u32 %v14725_v1, 16 }
 0x55f   :  { %v12319_v38 = vld [vmem:[#allocation3 + $0x9c] ss:$36 sps:$4 sm:$0xff]   ;;  %8210 = vst [vmem:[#allocation3 + $0x94] sm:$0xf] %v8035_v58  ;;  %v8243_v32 = vld [vmem:[#allocation2 + $0x64] sm:$0x1]  ;;  %11887 = vmatpush3.bf16.msra.mxu1 %v12316_v54  ;;  %v8049_v19 = vsel %vm12658_vm12, %v8044_v4, %v8048_v53 }
 0x560   :  { %v14742_v48 = vld [vmem:[#allocation2 + $0x5c] sm:$0x1]  ;;  %v14744_v7 = vld [vmem:[#allocation2 + $0x60] sm:$0xe]  ;;  %v7913_v44 = vld [vmem:[#allocation2 + $0x68] sm:$0xf]  ;;  %10518 = vmatprep.mubr.bf16.mxu0 %v12319_v38  ;;  %11888 = vmatprep.subr.bf16.mxu1 %v12321_v57 }
 0x561   :  { %v9363_v56 = vld [vmem:[#allocation3 + $0x98] sm:$0xff]  ;;  %v12328_v51 = vld [vmem:[#allocation9 + $0x168] sm:$0xff]   ;;  %v8067_v15 = vrot.slane %v8065_v31, 4  ;;  %v8070_v41 = vrot.slane %v8068_v29, 5  ;;  %v11270_v20 = vrot.slane %v14727_v22, 9  ;;  %v8058_v21 = vrot.slane %v8057_v52, 4 }
 0x562   :  { %v14750_v43 = vld [vmem:[#allocation2 + $0x68] sm:$0xe]  ;;  %7929 = vst [vmem:[#allocation3 + $0x18c] sm:$0xf] %v7913_v44  ;;  %v12317_v11 = vld [vmem:[#allocation3 + $0x4c] ss:$36 sps:$4 sm:$0xff]   ;;  %v11330_v10 = vcombine.low %v9363_v56, %v9368_v49 }
 0x563   :  { %8211 = vst [vmem:[#allocation3 + $0xb8] sm:$0xf] %v8049_v19  ;;  %v8062_v35 = vrot.slane %v8060_v40, 5  ;;  %v12365_v34 = vld [vmem:[#allocation9 + $0x198] sm:$0xff]   ;;  %v12330_v30 = vld [vmem:[#allocation9 + $0x128] sm:$0xff]   ;;  %v8071_v28 = vor.u32 %v8070_v41, %v8067_v15  ;;  %v8076_v42 = vrot.slane %v8074_v60, 5  ;;  %10413 = vmatprep.mubr.bf16.mxu1 %v12317_v11  ;;  %11889 = vmatpush3.bf16.msra.mxu1 %v12323_v47 }
 0x564   :  { %v8324_v13 = vrot.slane %v14734_v39, 5  ;;  %v8093_v55 = vshrl.u32 %v14736_v6, 16  ;;  %v8245_v8 = vld [vmem:[#allocation2 + $0x6c] sm:$0x1]  ;;  %v12367_v36 = vld [vmem:[#allocation9 + $0x1d0] sm:$0xff]   ;;  %v12335_v54 = vld [vmem:[#allocation9 + $0x160] sm:$0xff]   ;;  %10519 = vmatmul.mubr.bf16.gmra.mxu0 %v11330_v10  ;;  %11890 = vmatprep.subr.bf16.mxu1 %v12328_v51 }
 0x565   :  { %v8063_v62 = vsel %vm12658_vm12, %v8058_v21, %v8062_v35  ;;  %v8096_v3 = vshll.u32 %v14736_v6, 16  ;;  %v8102_v9 = vshll.u32 %v14742_v48, 16  ;;  %v11271_v46 = vrot.slane %v14744_v7, 9  ;;  %v7954_v24 = vld [vmem:[#allocation2 + $0x60] sm:$0xf]  ;;  %v12370_v1 = vld [vmem:[#allocation9 + $0x190] sm:$0xff]   ;;  %11959 = vmatpush3.bf16.msra.mxu0 %v12365_v34 }
 0x566   :  { %v12322_v16 = vld [vmem:[#allocation3 + $0x48] ss:$36 sps:$4 sm:$0xff]   ;;  %v8072_v18 = vrot.slane %v8071_v28, 4  ;;  %8212 = vst [vmem:[#allocation3 + $0xdc] sm:$0xf] %v8063_v62  ;;  %v8325_v57 = vsel %vm12746_vm7, %v11270_v20, %v8324_v13  ;;  %v8095_v53 = vrot.slane %v8093_v55, 4  ;;  %11960 = vmatprep.subr.bf16.mxu0 %v12367_v36 }
 0x567   :  { %v8328_v23 = vrot.slane %v8243_v32, 5  ;;  %v14761_v50 = vld [vmem:[#allocation2 + $0x64] sm:$0x1]  ;;  %v12373_v0 = vld [vmem:[#allocation9 + $0x1c8] sm:$0xff]   ;;  %8375 = vst [vmem:[#allocation3 + $0x14c] sm:$0xf] %v8325_v57  ;;  %10414 = vmatmul.mubr.bf16.gmra.mxu1 %v12322_v16 }
 0x568   :  { %v12326_v22 = vld [vmem:[#allocation3 + $0xe4] ss:$36 sps:$4 sm:$0xff]   ;;  %v8098_v2 = vrot.slane %v8096_v3, 5  ;;  %v11272_v33 = vrot.slane %v14750_v43, 9  ;;  %v8077_v61 = vsel %vm12658_vm12, %v8072_v18, %v8076_v42  ;;  %v8104_v25 = vrot.slane %v8102_v9, 5  ;;  %v12344_v6 = vld [vmem:[#allocation9 + $0x158] sm:$0xff]   ;;  %11891 = vmatpush3.bf16.msra.mxu1 %v12330_v30 }
 0x569   :  { %v7956_v14 = vld [vmem:[#allocation2 + $0x68] sm:$0xf]  ;;  %v9373_v17 = vld [vmem:[#allocation3 + $0xe0] sm:$0xff]  ;;  %v8329_v26 = vsel %vm12746_vm7, %v11271_v46, %v8328_v23  ;;  %v8332_v5 = vrot.slane %v8245_v8, 5  ;;  %v8246_v37 = vld [vmem:[#allocation2 + $0x70] sm:$0xe]  ;;  %10526 = vmatprep.mubr.bf16.mxu0 %v12326_v22  ;;  %11892 = vmatprep.subr.bf16.mxu1 %v12335_v54 }
 0x56a   :  { %v12337_v27 = vld [vmem:[#allocation9 + $0x120] sm:$0xff]   ;;  %8213 = vst [vmem:[#allocation3 + $0x100] sm:$0xf] %v8077_v61  ;;  %v8099_v39 = vor.u32 %v8098_v2, %v8095_v53  ;;  %8376 = vst [vmem:[#allocation3 + $0x170] sm:$0xf] %v8329_v26  ;;  %v8107_v63 = vshrl.u32 %v7954_v24, 16  ;;  %11961 = vmatpush3.bf16.msra.mxu0 %v12370_v1 }
 0x56b   :  { %v9378_v40 = vld [vmem:[#allocation3 + $0x104] sm:$0xff]  ;;  %v14768_v45 = vld [vmem:[#allocation2 + $0x6c] sm:$0x1]  ;;  %v8110_v49 = vshll.u32 %v7954_v24, 16  ;;  %v8247_v38 = vld [vmem:[#allocation2 + $0x74] sm:$0x1]  ;;  %v8333_v29 = vsel %vm12746_vm7, %v11272_v33, %v8332_v5  ;;  %11962 = vmatprep.subr.bf16.mxu0 %v12373_v0 }
 0x56c   :  { %v8248_v58 = vld [vmem:[#allocation2 + $0x78] sm:$0xe]  ;;  %v12374_v4 = vld [vmem:[#allocation9 + $0x188] sm:$0xff]   ;;  %v8121_v48 = vshrl.u32 %v7956_v14, 16  ;;  %v8249_v7 = vld [vmem:[#allocation2 + $0x7c] sm:$0x1]  ;;  %v11339_v56 = vcombine.low %v9373_v17, %v9378_v40  ;;  %11893 = vmatpush3.bf16.msra.mxu1 %v12337_v27 }
 0x56d   :  { %v12324_v31 = vld [vmem:[#allocation3 + $0x94] ss:$36 sps:$4 sm:$0xff]   ;;  %v8100_v47 = vrot.slane %v8099_v39, 4  ;;  %8377 = vst [vmem:[#allocation3 + $0x194] sm:$0xf] %v8333_v29  ;;  %v8109_v52 = vrot.slane %v8107_v63, 4  ;;  %11894 = vmatprep.subr.bf16.mxu1 %v12344_v6 }
 0x56e   :  { %v8112_v60 = vrot.slane %v8110_v49, 5  ;;  %v8116_v32 = vshll.u32 %v14761_v50, 16  ;;  %v8394_v44 = vld [vmem:[#allocation2 + $0x78] sm:$0xf]  ;;  %10421 = vmatprep.mubr.bf16.mxu1 %v12324_v31  ;;  %v8123_v51 = vrot.slane %v8121_v48, 4  ;;  %v8124_v15 = vshll.u32 %v7956_v14, 16  ;;  %10527 = vmatmul.mubr.bf16.gmra.mxu0 %v11339_v56 }
 0x56f   :  { %v12347_v19 = vld [vmem:[#allocation9 + $0x118] sm:$0xff]   ;;  %v11273_v41 = vrot.slane %v8246_v37, 9  ;;  %v8395_v20 = vld [vmem:[#allocation2 + $0x80] sm:$0xf]  ;;  %8410 = vst [vmem:[#allocation3 + $0x1bc] sm:$0xf] %v8394_v44  ;;  %v8105_v10 = vsel %vm12658_vm12, %v8100_v47, %v8104_v25  ;;  %11963 = vmatpush3.bf16.msra.mxu0 %v12374_v4 }
 0x570   :  { %v12379_v43 = vld [vmem:[#allocation9 + $0x1c0] sm:$0xff]   ;;  %v12329_v11 = vld [vmem:[#allocation3 + $0x90] ss:$36 sps:$4 sm:$0xff]   ;;  %v8113_v21 = vor.u32 %v8112_v60, %v8109_v52  ;;  %v8336_v35 = vrot.slane %v8247_v38, 5  ;;  %v11274_v34 = vrot.slane %v8248_v58, 9  ;;  %v8126_v13 = vrot.slane %v8124_v15, 5  ;;  %11895 = vmatpush3.bf16.msra.mxu1 %v12347_v19 }
 0x571   :  { %8411 = vst [vmem:[#allocation3 + $0x1e0] sm:$0xf] %v8395_v20  ;;  %v12355_v30 = vld [vmem:[#allocation9 + $0x150] sm:$0xff]   ;;  %8215 = vst [vmem:[#allocation3 + $0x148] sm:$0xf] %v8105_v10  ;;  %v8130_v55 = vshll.u32 %v14768_v45, 16  ;;  %11964 = vmatprep.subr.bf16.mxu0 %v12379_v43  ;;  %10422 = vmatmul.mubr.bf16.gmra.mxu1 %v12329_v11 }
 0x572   :  { %v7914_v28 = vld [vmem:[#allocation2 + $0x70] sm:$0xf]  ;;  %v8340_v8 = vrot.slane %v8249_v7, 5  ;;  %v12382_v36 = vld [vmem:[#allocation9 + $0x180] sm:$0xff]   ;;  %v8114_v62 = vrot.slane %v8113_v21, 4  ;;  %v8118_v54 = vrot.slane %v8116_v32, 5  ;;  %v8337_v3 = vsel %vm12746_vm7, %v11273_v41, %v8336_v35  ;;  %11896 = vmatprep.subr.bf16.mxu1 %v12355_v30 }
 0x573   :  { %v12333_v42 = vld [vmem:[#allocation3 + $0x12c] ss:$36 sps:$4 sm:$0xff]   ;;  %7930 = vst [vmem:[#allocation3 + $0x1b0] sm:$0xf] %v7914_v28  ;;  %v7915_v9 = vld [vmem:[#allocation2 + $0x78] sm:$0xf]  ;;  %v8127_v1 = vor.u32 %v8126_v13, %v8123_v51  ;;  %11965 = vmatpush3.bf16.msra.mxu0 %v12382_v36 }
 0x574   :  { %v7958_v46 = vld [vmem:[#allocation2 + $0x70] sm:$0xf]  ;;  %v12331_v24 = vld [vmem:[#allocation3 + $0xdc] ss:$36 sps:$4 sm:$0xff]   ;;  %10534 = vmatprep.mubr.bf16.mxu0 %v12333_v42  ;;  %v8341_v16 = vsel %vm12746_vm7, %v11274_v34, %v8340_v8  ;;  %8378 = vst [vmem:[#allocation3 + $0x1b8] sm:$0xf] %v8337_v3  ;;  %v8119_v53 = vsel %vm12658_vm12, %v8114_v62, %v8118_v54 }
 0x575   :  { %7931 = vst [vmem:[#allocation3 + $0x1d4] sm:$0xf] %v7915_v9  ;;  %v8135_v18 = vshrl.u32 %v7958_v46, 16  ;;  %v9388_v57 = vld [vmem:[#allocation3 + $0x14c] sm:$0xff]  ;;  %8379 = vst [vmem:[#allocation3 + $0x1dc] sm:$0xf] %v8341_v16  ;;  %10429 = vmatprep.mubr.bf16.mxu1 %v12331_v24 }
 0x576   :  { %v7959_v23 = vld [vmem:[#allocation2 + $0x74] sm:$0x1]  ;;  %v7960_v50 = vld [vmem:[#allocation2 + $0x78] sm:$0xf]  ;;  %v8138_v0 = vshll.u32 %v7958_v46, 16  ;;  %v8128_v22 = vrot.slane %v8127_v1, 4 }
 0x577   :  { %v8132_v2 = vrot.slane %v8130_v55, 5  ;;  %8216 = vst [vmem:[#allocation3 + $0x16c] sm:$0xf] %v8119_v53  ;;  %v12358_v33 = vld [vmem:[#allocation9 + $0x110] sm:$0xff]   ;;  %v7961_v14 = vld [vmem:[#allocation2 + $0x7c] sm:$0x1] }
 0x578   :  { %v12366_v17 = vld [vmem:[#allocation9 + $0x148] sm:$0xff]   ;;  %v8137_v27 = vrot.slane %v8135_v18, 4  ;;  %v8140_v25 = vrot.slane %v8138_v0, 5  ;;  %v8144_v26 = vshll.u32 %v7959_v23, 16  ;;  %v8250_v5 = vld [vmem:[#allocation2 + $0x80] sm:$0xe]  ;;  %11897 = vmatpush3.bf16.msra.mxu1 %v12358_v33 }
 0x579   :  { %v9383_v61 = vld [vmem:[#allocation3 + $0x128] sm:$0xff]  ;;  %v8133_v40 = vsel %vm12658_vm12, %v8128_v22, %v8132_v2  ;;  %v8149_v39 = vshrl.u32 %v7960_v50, 16  ;;  %v8152_v6 = vshll.u32 %v7960_v50, 16  ;;  %v8251_v45 = vld [vmem:[#allocation2 + $0x84] sm:$0x1]  ;;  %v8158_v48 = vshll.u32 %v7961_v14, 16  ;;  %11898 = vmatprep.subr.bf16.mxu1 %v12366_v17 }
 0x57a   :  { %v11348_v37 = vcombine.low %v9383_v61, %v9388_v57  ;;  %v12369_v63 = vld [vmem:[#allocation9 + $0x108] sm:$0xff]   ;;  %v12336_v49 = vld [vmem:[#allocation3 + $0xd8] ss:$36 sps:$4 sm:$0xff]   ;;  %8217 = vst [vmem:[#allocation3 + $0x190] sm:$0xf] %v8133_v40  ;;  %v8141_v58 = vor.u32 %v8140_v25, %v8137_v27  ;;  %v12378_v4 = vld [vmem:[#allocation9 + $0x140] sm:$0xff]  }
 0x57b   :  { %v12341_v38 = vld [vmem:[#allocation3 + $0x174] ss:$36 sps:$4 sm:$0xff]   ;;  %v8151_v31 = vrot.slane %v8149_v39, 4  ;;  %v8154_v29 = vrot.slane %v8152_v6, 5  ;;  %v8252_v7 = vld [vmem:[#allocation2 + $0x88] sm:$0xe]  ;;  %10430 = vmatmul.mubr.bf16.gmra.mxu1 %v12336_v49 }
 0x57c   :  { %10535 = vmatmul.mubr.bf16.gmra.mxu0 %v11348_v37  ;;  %v11275_v47 = vrot.slane %v8250_v5, 9  ;;  %v8142_v52 = vrot.slane %v8141_v58, 4  ;;  %v8146_v60 = vrot.slane %v8144_v26, 5  ;;  %v8253_v32 = vld [vmem:[#allocation2 + $0x8c] sm:$0x1]  ;;  %v8344_v44 = vrot.slane %v8251_v45, 5  ;;  %11899 = vmatpush3.bf16.msra.mxu1 %v12369_v63 }
 0x57d   :  { %10542 = vmatprep.mubr.bf16.mxu0 %v12341_v38  ;;  %v11276_v56 = vrot.slane %v8252_v7, 9  ;;  %v12338_v19 = vld [vmem:[#allocation3 + $0x124] ss:$36 sps:$4 sm:$0xff]   ;;  %v9393_v51 = vld [vmem:[#allocation3 + $0x170] sm:$0xff]  ;;  %v8155_v15 = vor.u32 %v8154_v29, %v8151_v31  ;;  %v8348_v41 = vrot.slane %v8253_v32, 5  ;;  %v14788_v34 = vld [vmem:[#allocation9 + $0x238] sm:$0xff]   ;;  %11900 = vmatprep.subr.bf16.mxu1 %v12378_v4 }
 0x57e   :  { %v8396_v20 = vld [vmem:[#allocation2 + $0x88] sm:$0xf]  ;;  %v12381_v43 = vld [vmem:[#allocation9 + $0x100] sm:$0xff]   ;;  %v8147_v11 = vsel %vm12658_vm12, %v8142_v52, %v8146_v60  ;;  %v8345_v10 = vsel %vm12746_vm7, %v11275_v47, %v8344_v44  ;;  %v8397_v21 = vld [vmem:[#allocation2 + $0x90] sm:$0xf]  ;;  %10437 = vmatprep.mubr.bf16.mxu1 %v12338_v19  ;;  %v8160_v28 = vrot.slane %v8158_v48, 5 }
 0x57f   :  { %8412 = vst [vmem:[#allocation3 + $0x204] sm:$0xf] %v8396_v20  ;;  %v7916_v35 = vld [vmem:[#allocation2 + $0x80] sm:$0xf]  ;;  %v8156_v30 = vrot.slane %v8155_v15, 4  ;;  %v8349_v42 = vsel %vm12746_vm7, %v11276_v56, %v8348_v41  ;;  %v9398_v8 = vld [vmem:[#allocation3 + $0x194] sm:$0xff] }
 0x580   :  { %8218 = vst [vmem:[#allocation3 + $0x1b4] sm:$0xf] %v8147_v11  ;;  %8380 = vst [vmem:[#allocation3 + $0x200] sm:$0xf] %v8345_v10  ;;  %v7917_v13 = vld [vmem:[#allocation2 + $0x88] sm:$0xf]  ;;  %v11357_v54 = vcombine.low %v9393_v51, %v9398_v8  ;;  %11901 = vmatpush3.bf16.msra.mxu1 %v12381_v43 }
 0x581   :  { %8413 = vst [vmem:[#allocation3 + $0x228] sm:$0xf] %v8397_v21  ;;  %7932 = vst [vmem:[#allocation3 + $0x1f8] sm:$0xf] %v7916_v35  ;;  %v7962_v55 = vld [vmem:[#allocation2 + $0x80] sm:$0xf]  ;;  %v8161_v9 = vsel %vm12658_vm12, %v8156_v30, %v8160_v28  ;;  %12062 = vmatprep.subr.bf16.mxu1 %v14788_v34 }
 0x582   :  { %8381 = vst [vmem:[#allocation3 + $0x224] sm:$0xf] %v8349_v42  ;;  %7933 = vst [vmem:[#allocation3 + $0x21c] sm:$0xf] %v7917_v13  ;;  %v7963_v36 = vld [vmem:[#allocation2 + $0x84] sm:$0x1] }
 0x583   :  { %v7964_v62 = vld [vmem:[#allocation2 + $0x88] sm:$0xf]  ;;  %v12352_v3 = vld [vmem:[#allocation3 + $0x1bc] ss:$36 sps:$4 sm:$0xff]   ;;  %v7965_v46 = vld [vmem:[#allocation2 + $0x8c] sm:$0x1] }
 0x584   :  { %v8163_v24 = vshrl.u32 %v7962_v55, 16  ;;  %v12346_v1 = vld [vmem:[#allocation3 + $0x120] ss:$36 sps:$4 sm:$0xff]   ;;  %8219 = vst [vmem:[#allocation3 + $0x1d8] sm:$0xf] %v8161_v9  ;;  %v8166_v16 = vshll.u32 %v7962_v55, 16  ;;  %10543 = vmatmul.mubr.bf16.gmra.mxu0 %v11357_v54 }
 0x585   :  { %v8177_v18 = vshrl.u32 %v7964_v62, 16  ;;  %v8180_v57 = vshll.u32 %v7964_v62, 16  ;;  %v8862_v53 = vld [vmem:[#allocation2 + $0x10] sm:$0xf]  ;;  %v8172_v50 = vshll.u32 %v7963_v36, 16  ;;  %10550 = vmatprep.mubr.bf16.mxu0 %v12352_v3  ;;  %v8186_v17 = vshll.u32 %v7965_v46, 16  ;;  %10438 = vmatmul.mubr.bf16.gmra.mxu1 %v12346_v1 }
 0x586   :  { %v8165_v23 = vrot.slane %v8163_v24, 4  ;;  %v8863_v0 = vld [vmem:[#allocation2 + $0x18] sm:$0xf]  ;;  %8878 = vst [vmem:[#allocation3 + $0x18] sm:$0xf] %v8862_v53  ;;  %v8168_v2 = vrot.slane %v8166_v16, 5 }
 0x587   :  { %v8894_v22 = vld [vmem:[#allocation2 + $0x10] sm:$0xf]  ;;  %v8179_v33 = vrot.slane %v8177_v18, 4  ;;  %v8182_v14 = vrot.slane %v8180_v57, 5  ;;  %8879 = vst [vmem:[#allocation3 + $0x3c] sm:$0xf] %v8863_v0 }
 0x588   :  { %v8895_v61 = vld [vmem:[#allocation2 + $0x14] sm:$0x1]  ;;  %v12349_v27 = vld [vmem:[#allocation3 + $0x16c] ss:$36 sps:$4 sm:$0xff]   ;;  %v8896_v25 = vld [vmem:[#allocation2 + $0x18] sm:$0xf]  ;;  %v8169_v40 = vor.u32 %v8168_v2, %v8165_v23 }
 0x589   :  { %v8927_v26 = vshrl.u32 %v8894_v22, 16  ;;  %v9403_v5 = vld [vmem:[#allocation3 + $0x1b8] sm:$0xff]  ;;  %v8183_v39 = vor.u32 %v8182_v14, %v8179_v33  ;;  %v8930_v6 = vshll.u32 %v8894_v22, 16  ;;  %v8936_v45 = vshll.u32 %v8895_v61, 16  ;;  %10445 = vmatprep.mubr.bf16.mxu1 %v12349_v27  ;;  %v8414_v47 = vld [vmem:[#allocation2 + $0x8] sm:$0xf] }
 0x58a   :  { %v9408_v37 = vld [vmem:[#allocation3 + $0x1dc] sm:$0xff]  ;;  %v8174_v63 = vrot.slane %v8172_v50, 5  ;;  %v8941_v58 = vshrl.u32 %v8896_v25, 16  ;;  %v8944_v4 = vshll.u32 %v8896_v25, 16  ;;  %v8170_v31 = vrot.slane %v8169_v40, 4  ;;  %v9418_v33 = vld [vmem:[#allocation3 + $0x224] sm:$0xff] }
 0x58b   :  { %v8897_v49 = vld [vmem:[#allocation2 + $0x1c] sm:$0x1]  ;;  %v8929_v38 = vrot.slane %v8927_v26, 4  ;;  %v8184_v29 = vrot.slane %v8183_v39, 4  ;;  %v8188_v48 = vrot.slane %v8186_v17, 5  ;;  %v8932_v7 = vrot.slane %v8930_v6, 5 }
 0x58c   :  { %v11366_v52 = vcombine.low %v9403_v5, %v9408_v37  ;;  %v12363_v60 = vld [vmem:[#allocation3 + $0x204] ss:$36 sps:$4 sm:$0xff]   ;;  %v8938_v32 = vrot.slane %v8936_v45, 5  ;;  %v8415_v44 = vld [vmem:[#allocation2 + $0xc] sm:$0x1]  ;;  %v8175_v19 = vsel %vm12658_vm12, %v8170_v31, %v8174_v63  ;;  %v8943_v41 = vrot.slane %v8941_v58, 4 }
 0x58d   :  { %v12357_v56 = vld [vmem:[#allocation3 + $0x168] ss:$36 sps:$4 sm:$0xff]   ;;  %v8189_v51 = vsel %vm12658_vm12, %v8184_v29, %v8188_v48  ;;  %v8933_v15 = vor.u32 %v8932_v7, %v8929_v38  ;;  %v8416_v20 = vld [vmem:[#allocation2 + $0x10] sm:$0xf]  ;;  %v8417_v43 = vld [vmem:[#allocation2 + $0x14] sm:$0x1] }
 0x58e   :  { %v12360_v11 = vld [vmem:[#allocation3 + $0x1b4] ss:$36 sps:$4 sm:$0xff]   ;;  %10551 = vmatmul.mubr.bf16.gmra.mxu0 %v11366_v52  ;;  %8220 = vst [vmem:[#allocation3 + $0x1fc] sm:$0xf] %v8175_v19  ;;  %8221 = vst [vmem:[#allocation3 + $0x220] sm:$0xf] %v8189_v51  ;;  %10446 = vmatmul.mubr.bf16.gmra.mxu1 %v12357_v56 }
 0x58f   :  { %v8946_v10 = vrot.slane %v8944_v4, 5  ;;  %v8950_v21 = vshll.u32 %v8897_v49, 16  ;;  %v8447_v35 = vshrl.u32 %v8414_v47, 16  ;;  %v8450_v30 = vshll.u32 %v8414_v47, 16  ;;  %v8702_v28 = vld [vmem:[#allocation2 + $0x8] sm:$0xe]  ;;  %10558 = vmatprep.mubr.bf16.mxu0 %v12363_v60  ;;  %10453 = vmatprep.mubr.bf16.mxu1 %v12360_v11 }
 0x590   :  { %v8934_v42 = vrot.slane %v8933_v15, 4  ;;  %v8456_v13 = vshll.u32 %v8415_v44, 16  ;;  %v8461_v55 = vshrl.u32 %v8416_v20, 16  ;;  %v8464_v8 = vshll.u32 %v8416_v20, 16  ;;  %v8703_v36 = vld [vmem:[#allocation2 + $0xc] sm:$0x1] }
 0x591   :  { %v8947_v62 = vor.u32 %v8946_v10, %v8943_v41  ;;  %v8952_v54 = vrot.slane %v8950_v21, 5  ;;  %v8449_v3 = vrot.slane %v8447_v35, 4  ;;  %v8452_v9 = vrot.slane %v8450_v30, 5  ;;  %v8704_v46 = vld [vmem:[#allocation2 + $0x10] sm:$0xe]  ;;  %v9413_v24 = vld [vmem:[#allocation3 + $0x200] sm:$0xff] }
 0x592   :  { %v8939_v1 = vsel %vm12658_vm12, %v8934_v42, %v8938_v32  ;;  %v8458_v16 = vrot.slane %v8456_v13, 5  ;;  %v8463_v18 = vrot.slane %v8461_v55, 4  ;;  %v8466_v57 = vrot.slane %v8464_v8, 5  ;;  %v8705_v53 = vld [vmem:[#allocation2 + $0x14] sm:$0x1] }
 0x593   :  { %v8948_v23 = vrot.slane %v8947_v62, 4  ;;  %9166 = vst [vmem:[#allocation3 + $0x1c] sm:$0xf] %v8939_v1  ;;  %v8453_v50 = vor.u32 %v8452_v9, %v8449_v3  ;;  %v8470_v0 = vshll.u32 %v8417_v43, 16  ;;  %v11277_v22 = vrot.slane %v8702_v28, 9 }
 0x594   :  { %v8864_v2 = vld [vmem:[#allocation2 + $0x20] sm:$0xf]  ;;  %v8467_v14 = vor.u32 %v8466_v57, %v8463_v18  ;;  %v8768_v17 = vrot.slane %v8703_v36, 5  ;;  %v11278_v61 = vrot.slane %v8704_v46, 9  ;;  %v8772_v27 = vrot.slane %v8705_v53, 5 }
 0x595   :  { %v8865_v25 = vld [vmem:[#allocation2 + $0x28] sm:$0xf]  ;;  %8880 = vst [vmem:[#allocation3 + $0x60] sm:$0xf] %v8864_v2  ;;  %v11375_v26 = vcombine.low %v9413_v24, %v9418_v33  ;;  %v8953_v5 = vsel %vm12658_vm12, %v8948_v23, %v8952_v54  ;;  %v8454_v37 = vrot.slane %v8453_v50, 4  ;;  %v8472_v40 = vrot.slane %v8470_v0, 5 }
 0x596   :  { %8881 = vst [vmem:[#allocation3 + $0x84] sm:$0xf] %v8865_v25  ;;  %v8898_v39 = vld [vmem:[#allocation2 + $0x20] sm:$0xf]  ;;  %v8899_v6 = vld [vmem:[#allocation2 + $0x24] sm:$0x1]  ;;  %v8769_v49 = vsel %vm12746_vm7, %v11277_v22, %v8768_v17  ;;  %v8773_v38 = vsel %vm12746_vm7, %v11278_v61, %v8772_v27 }
 0x597   :  { %v12368_v45 = vld [vmem:[#allocation3 + $0x1b0] ss:$36 sps:$4 sm:$0xff]   ;;  %9167 = vst [vmem:[#allocation3 + $0x40] sm:$0xf] %v8953_v5  ;;  %v8468_v63 = vrot.slane %v8467_v14, 4  ;;  %v8955_v58 = vshrl.u32 %v8898_v39, 16  ;;  %10559 = vmatmul.mubr.bf16.gmra.mxu0 %v11375_v26  ;;  %v8459_v31 = vsel %vm12658_vm12, %v8454_v37, %v8458_v16 }
 0x598   :  { %v12371_v4 = vld [vmem:[#allocation3 + $0x1fc] ss:$36 sps:$4 sm:$0xff]   ;;  %8846 = vst [vmem:[#allocation3 + $0x14] sm:$0xf] %v8769_v49  ;;  %8847 = vst [vmem:[#allocation3 + $0x38] sm:$0xf] %v8773_v38  ;;  %10454 = vmatmul.mubr.bf16.gmra.mxu1 %v12368_v45 }
 0x599   :  { %v8900_v29 = vld [vmem:[#allocation2 + $0x28] sm:$0xf]  ;;  %v8901_v48 = vld [vmem:[#allocation2 + $0x2c] sm:$0x1]  ;;  %v8473_v7 = vsel %vm12658_vm12, %v8468_v63, %v8472_v40  ;;  %8686 = vst [vmem:[#allocation3 + $0x10] sm:$0xf] %v8459_v31  ;;  %10461 = vmatprep.mubr.bf16.mxu1 %v12371_v4 }
 0x59a   :  { %v8957_v47 = vrot.slane %v8955_v58, 4  ;;  %v8958_v52 = vshll.u32 %v8898_v39, 16  ;;  %v8964_v60 = vshll.u32 %v8899_v6, 16  ;;  %v8418_v32 = vld [vmem:[#allocation2 + $0x18] sm:$0xf]  ;;  %v8969_v44 = vshrl.u32 %v8900_v29, 16 }
 0x59b   :  { %8687 = vst [vmem:[#allocation3 + $0x34] sm:$0xf] %v8473_v7  ;;  %v8972_v56 = vshll.u32 %v8900_v29, 16  ;;  %v8978_v19 = vshll.u32 %v8901_v48, 16  ;;  %v8419_v51 = vld [vmem:[#allocation2 + $0x1c] sm:$0x1] }
 0x59c   :  { %v8475_v15 = vshrl.u32 %v8418_v32, 16  ;;  %v8960_v41 = vrot.slane %v8958_v52, 5  ;;  %v8966_v20 = vrot.slane %v8964_v60, 5  ;;  %v8420_v43 = vld [vmem:[#allocation2 + $0x20] sm:$0xf]  ;;  %v8478_v11 = vshll.u32 %v8418_v32, 16 }
 0x59d   :  { %v8971_v10 = vrot.slane %v8969_v44, 4  ;;  %v8974_v21 = vrot.slane %v8972_v56, 5  ;;  %v8980_v35 = vrot.slane %v8978_v19, 5  ;;  %v8421_v42 = vld [vmem:[#allocation2 + $0x24] sm:$0x1]  ;;  %v8484_v55 = vshll.u32 %v8419_v51, 16 }
 0x59e   :  { %v8477_v30 = vrot.slane %v8475_v15, 4  ;;  %v8961_v28 = vor.u32 %v8960_v41, %v8957_v47  ;;  %v8480_v13 = vrot.slane %v8478_v11, 5  ;;  %v8489_v8 = vshrl.u32 %v8420_v43, 16  ;;  %v12377_v36 = vld [vmem:[#allocation3 + $0x1c] ss:$36 sps:$4 sm:$0xff]   ;;  %v12395_v11 = vld [vmem:[#allocation9 + $0x230] sm:$0xff]  }
 0x59f   :  { %v8975_v62 = vor.u32 %v8974_v21, %v8971_v10  ;;  %v8492_v54 = vshll.u32 %v8420_v43, 16  ;;  %v8706_v3 = vld [vmem:[#allocation2 + $0x18] sm:$0xe]  ;;  %v8707_v18 = vld [vmem:[#allocation2 + $0x1c] sm:$0x1]  ;;  %10696 = vmatprep.mubr.bf16.mxu0 %v12377_v36  ;;  %v8498_v23 = vshll.u32 %v8421_v42, 16 }
 0x5a0   :  { %v12375_v9 = vld [vmem:[#allocation3 + $0x18] ss:$36 sps:$4 sm:$0xff]   ;;  %v8962_v24 = vrot.slane %v8961_v28, 4  ;;  %v8481_v1 = vor.u32 %v8480_v13, %v8477_v30  ;;  %v8491_v16 = vrot.slane %v8489_v8, 4  ;;  %v8708_v50 = vld [vmem:[#allocation2 + $0x20] sm:$0xe] }
 0x5a1   :  { %v12380_v46 = vld [vmem:[#allocation3 + $0x1f8] ss:$36 sps:$4 sm:$0xff]   ;;  %v8976_v57 = vrot.slane %v8975_v62, 4  ;;  %v8494_v53 = vrot.slane %v8492_v54, 5  ;;  %10697 = vmatmul.mubr.bf16.vlgmr.msra.gmra.mxu0 %v12375_v9  ;;  %v8486_v33 = vrot.slane %v8484_v55, 5  ;;  %v11279_v27 = vrot.slane %v8706_v3, 9 }
 0x5a2   :  { %v12385_v0 = vld [vmem:[#allocation3 + $0x14] ss:$36 sps:$4 sm:$0xff]   ;;  %v8967_v22 = vsel %vm12658_vm12, %v8962_v24, %v8966_v20  ;;  %v8482_v2 = vrot.slane %v8481_v1, 4  ;;  %v8709_v61 = vld [vmem:[#allocation2 + $0x24] sm:$0x1]  ;;  %10462 = vmatmul.mubr.bf16.gmra.mxu1 %v12380_v46  ;;  %v8776_v5 = vrot.slane %v8707_v18, 5 }
 0x5a3   :  { %v8981_v14 = vsel %vm12658_vm12, %v8976_v57, %v8980_v35  ;;  %9168 = vst [vmem:[#allocation3 + $0x64] sm:$0xf] %v8967_v22  ;;  %v8495_v17 = vor.u32 %v8494_v53, %v8491_v16  ;;  %v8866_v25 = vld [vmem:[#allocation2 + $0x30] sm:$0xf]  ;;  %v11280_v37 = vrot.slane %v8708_v50, 9  ;;  %v8780_v40 = vrot.slane %v8709_v61, 5  ;;  %10599 = vmatprep.mubr.bf16.mxu1 %v12385_v0 }
 0x5a4   :  { %9169 = vst [vmem:[#allocation3 + $0x88] sm:$0xf] %v8981_v14  ;;  %v8487_v26 = vsel %vm12658_vm12, %v8482_v2, %v8486_v33  ;;  %v8867_v39 = vld [vmem:[#allocation2 + $0x38] sm:$0xf]  ;;  %8882 = vst [vmem:[#allocation3 + $0xa8] sm:$0xf] %v8866_v25  ;;  %v8777_v38 = vsel %vm12746_vm7, %v11279_v27, %v8776_v5 }
 0x5a5   :  { %v8496_v6 = vrot.slane %v8495_v17, 4  ;;  %v8500_v45 = vrot.slane %v8498_v23, 5  ;;  %8688 = vst [vmem:[#allocation3 + $0x58] sm:$0xf] %v8487_v26  ;;  %8883 = vst [vmem:[#allocation3 + $0xcc] sm:$0xf] %v8867_v39  ;;  %v8781_v58 = vsel %vm12746_vm7, %v11280_v37, %v8780_v40 }
 0x5a6   :  { %v8902_v63 = vld [vmem:[#allocation2 + $0x30] sm:$0xf]  ;;  %v8903_v49 = vld [vmem:[#allocation2 + $0x34] sm:$0x1]  ;;  %v8904_v4 = vld [vmem:[#allocation2 + $0x38] sm:$0xf] }
 0x5a7   :  { %v8905_v31 = vld [vmem:[#allocation2 + $0x3c] sm:$0x1]  ;;  %v8983_v29 = vshrl.u32 %v8902_v63, 16  ;;  %v8986_v48 = vshll.u32 %v8902_v63, 16  ;;  %v8501_v7 = vsel %vm12658_vm12, %v8496_v6, %v8500_v45  ;;  %8848 = vst [vmem:[#allocation3 + $0x5c] sm:$0xf] %v8777_v38 }
 0x5a8   :  { %8849 = vst [vmem:[#allocation3 + $0x80] sm:$0xf] %v8781_v58  ;;  %v8992_v47 = vshll.u32 %v8903_v49, 16  ;;  %v8997_v52 = vshrl.u32 %v8904_v4, 16  ;;  %v9000_v60 = vshll.u32 %v8904_v4, 16  ;;  %v9006_v51 = vshll.u32 %v8905_v31, 16 }
 0x5a9   :  { %v8422_v32 = vld [vmem:[#allocation2 + $0x28] sm:$0xf]  ;;  %v12383_v44 = vld [vmem:[#allocation3 + $0x10] ss:$36 sps:$4 sm:$0xff]   ;;  %8689 = vst [vmem:[#allocation3 + $0x7c] sm:$0xf] %v8501_v7 }
 0x5aa   :  { %v8985_v56 = vrot.slane %v8983_v29, 4  ;;  %v8988_v19 = vrot.slane %v8986_v48, 5  ;;  %v8423_v15 = vld [vmem:[#allocation2 + $0x2c] sm:$0x1]  ;;  %v8503_v41 = vshrl.u32 %v8422_v32, 16  ;;  %v8999_v20 = vrot.slane %v8997_v52, 4  ;;  %10600 = vmatmul.mubr.bf16.vlgmr.msra.gmra.mxu1 %v12383_v44 }
 0x5ab   :  { %v9002_v43 = vrot.slane %v9000_v60, 5  ;;  %v8424_v10 = vld [vmem:[#allocation2 + $0x30] sm:$0xf]  ;;  %v8506_v21 = vshll.u32 %v8422_v32, 16  ;;  %v8994_v30 = vrot.slane %v8992_v47, 5  ;;  %v8512_v13 = vshll.u32 %v8423_v15, 16  ;;  %12063 = vmatpush3.bf16.msra.mxu1 %v14788_v34 }
 0x5ac   :  { %v8989_v35 = vor.u32 %v8988_v19, %v8985_v56  ;;  %v8425_v28 = vld [vmem:[#allocation2 + $0x34] sm:$0x1]  ;;  %v8505_v42 = vrot.slane %v8503_v41, 4  ;;  %v12386_v55 = vld [vmem:[#allocation3 + $0x60] ss:$36 sps:$4 sm:$0xff]   ;;  %v9008_v3 = vrot.slane %v9006_v51, 5  ;;  %12064 = vmatprep.subr.bf16.mxu1 %v12395_v11 }
 0x5ad   :  { %v12388_v8 = vld [vmem:[#allocation3 + $0x64] ss:$36 sps:$4 sm:$0xff]   ;;  %v9003_v36 = vor.u32 %v9002_v43, %v8999_v20  ;;  %v8508_v62 = vrot.slane %v8506_v21, 5  ;;  %v8517_v9 = vshrl.u32 %v8424_v10, 16  ;;  %v8520_v46 = vshll.u32 %v8424_v10, 16  ;;  %v12417_v15 = vld [vmem:[#allocation9 + $0x218] sm:$0xff]  }
 0x5ae   :  { %v8990_v54 = vrot.slane %v8989_v35, 4  ;;  %v8710_v24 = vld [vmem:[#allocation2 + $0x28] sm:$0xe]  ;;  %10704 = vmatprep.mubr.bf16.mxu0 %v12388_v8  ;;  %v8526_v57 = vshll.u32 %v8425_v28, 16  ;;  %v8711_v53 = vld [vmem:[#allocation2 + $0x2c] sm:$0x1] }
 0x5af   :  { %v12402_v1 = vld [vmem:[#allocation9 + $0x228] sm:$0xff]   ;;  %v9004_v16 = vrot.slane %v9003_v36, 4  ;;  %v8509_v18 = vor.u32 %v8508_v62, %v8505_v42  ;;  %v8712_v23 = vld [vmem:[#allocation2 + $0x30] sm:$0xe]  ;;  %10705 = vmatmul.mubr.bf16.gmra.mxu0 %v12386_v55  ;;  %v8519_v0 = vrot.slane %v8517_v9, 4  ;;  %v8522_v22 = vrot.slane %v8520_v46, 5  ;;  %12065 = vmatpush3.bf16.msra.mxu1 %v12395_v11 }
 0x5b0   :  { %v8995_v50 = vsel %vm12658_vm12, %v8990_v54, %v8994_v30  ;;  %v8713_v2 = vld [vmem:[#allocation2 + $0x34] sm:$0x1]  ;;  %v11281_v33 = vrot.slane %v8710_v24, 9  ;;  %v12390_v14 = vld [vmem:[#allocation3 + $0x5c] ss:$36 sps:$4 sm:$0xff]   ;;  %v8514_v61 = vrot.slane %v8512_v13, 5  ;;  %12066 = vmatprep.subr.bf16.mxu1 %v12402_v1 }
 0x5b1   :  { %v9009_v17 = vsel %vm12658_vm12, %v9004_v16, %v9008_v3  ;;  %9170 = vst [vmem:[#allocation3 + $0xac] sm:$0xf] %v8995_v50  ;;  %v8510_v34 = vrot.slane %v8509_v18, 4  ;;  %v12396_v27 = vld [vmem:[#allocation3 + $0x58] ss:$36 sps:$4 sm:$0xff]   ;;  %v8523_v25 = vor.u32 %v8522_v22, %v8519_v0  ;;  %v8784_v26 = vrot.slane %v8711_v53, 5  ;;  %10607 = vmatprep.mubr.bf16.mxu1 %v12390_v14 }
 0x5b2   :  { %9171 = vst [vmem:[#allocation3 + $0xd0] sm:$0xf] %v9009_v17  ;;  %v11282_v5 = vrot.slane %v8712_v23, 9  ;;  %v8868_v37 = vld [vmem:[#allocation2 + $0x40] sm:$0xf]  ;;  %v8528_v39 = vrot.slane %v8526_v57, 5  ;;  %10608 = vmatmul.mubr.bf16.gmra.mxu1 %v12396_v27 }
 0x5b3   :  { %v8515_v40 = vsel %vm12658_vm12, %v8510_v34, %v8514_v61  ;;  %v8788_v6 = vrot.slane %v8713_v2, 5  ;;  %8884 = vst [vmem:[#allocation3 + $0xf0] sm:$0xf] %v8868_v37  ;;  %v8906_v45 = vld [vmem:[#allocation2 + $0x40] sm:$0xf]  ;;  %v8524_v49 = vrot.slane %v8523_v25, 4  ;;  %v8785_v38 = vsel %vm12746_vm7, %v11281_v33, %v8784_v26  ;;  %12067 = vmatpush3.bf16.msra.mxu1 %v12402_v1 }
 0x5b4   :  { %v8907_v63 = vld [vmem:[#allocation2 + $0x44] sm:$0x1]  ;;  %8690 = vst [vmem:[#allocation3 + $0xa0] sm:$0xf] %v8515_v40  ;;  %v9011_v58 = vshrl.u32 %v8906_v45, 16  ;;  %v9014_v4 = vshll.u32 %v8906_v45, 16 }
 0x5b5   :  { %v8426_v31 = vld [vmem:[#allocation2 + $0x38] sm:$0xf]  ;;  %v12409_v29 = vld [vmem:[#allocation9 + $0x220] sm:$0xff]   ;;  %v8789_v48 = vsel %vm12746_vm7, %v11282_v5, %v8788_v6  ;;  %8850 = vst [vmem:[#allocation3 + $0xa4] sm:$0xf] %v8785_v38  ;;  %v9020_v7 = vshll.u32 %v8907_v63, 16  ;;  %v8529_v32 = vsel %vm12658_vm12, %v8524_v49, %v8528_v39 }
 0x5b6   :  { %v8427_v47 = vld [vmem:[#allocation2 + $0x3c] sm:$0x1]  ;;  %v8428_v52 = vld [vmem:[#allocation2 + $0x40] sm:$0xf]  ;;  %v8531_v60 = vshrl.u32 %v8426_v31, 16  ;;  %v9013_v44 = vrot.slane %v9011_v58, 4  ;;  %12068 = vmatprep.subr.bf16.mxu1 %v12409_v29 }
 0x5b7   :  { %8851 = vst [vmem:[#allocation3 + $0xc8] sm:$0xf] %v8789_v48  ;;  %v9016_v56 = vrot.slane %v9014_v4, 5  ;;  %v8429_v19 = vld [vmem:[#allocation2 + $0x44] sm:$0x1]  ;;  %v8534_v51 = vshll.u32 %v8426_v31, 16  ;;  %12069 = vmatpush3.bf16.msra.mxu1 %v12409_v29 }
 0x5b8   :  { %8691 = vst [vmem:[#allocation3 + $0xc4] sm:$0xf] %v8529_v32  ;;  %v9022_v41 = vrot.slane %v9020_v7, 5  ;;  %v8533_v20 = vrot.slane %v8531_v60, 4  ;;  %v8540_v43 = vshll.u32 %v8427_v47, 16  ;;  %v8545_v11 = vshrl.u32 %v8428_v52, 16  ;;  %12070 = vmatprep.subr.bf16.mxu1 %v12417_v15 }
 0x5b9   :  { %v8714_v10 = vld [vmem:[#allocation2 + $0x38] sm:$0xe]  ;;  %v9017_v21 = vor.u32 %v9016_v56, %v9013_v44  ;;  %v8536_v35 = vrot.slane %v8534_v51, 5  ;;  %v8548_v30 = vshll.u32 %v8428_v52, 16  ;;  %v8554_v28 = vshll.u32 %v8429_v19, 16  ;;  %v12424_v22 = vld [vmem:[#allocation9 + $0x210] sm:$0xff]  }
 0x5ba   :  { %v8715_v42 = vld [vmem:[#allocation2 + $0x3c] sm:$0x1]  ;;  %v12392_v13 = vld [vmem:[#allocation3 + $0xa8] ss:$36 sps:$4 sm:$0xff]   ;;  %v8542_v8 = vrot.slane %v8540_v43, 5  ;;  %v8547_v54 = vrot.slane %v8545_v11, 4 }
 0x5bb   :  { %v12394_v55 = vld [vmem:[#allocation3 + $0xac] ss:$36 sps:$4 sm:$0xff]   ;;  %v9018_v36 = vrot.slane %v9017_v21, 4  ;;  %v8537_v62 = vor.u32 %v8536_v35, %v8533_v20  ;;  %v8550_v3 = vrot.slane %v8548_v30, 5  ;;  %v8716_v9 = vld [vmem:[#allocation2 + $0x40] sm:$0xe]  ;;  %12071 = vmatpush3.bf16.msra.mxu1 %v12417_v15 }
 0x5bc   :  { %10712 = vmatprep.mubr.bf16.mxu0 %v12394_v55  ;;  %v8556_v46 = vrot.slane %v8554_v28, 5  ;;  %v8717_v24 = vld [vmem:[#allocation2 + $0x44] sm:$0x1]  ;;  %v11283_v1 = vrot.slane %v8714_v10, 9  ;;  %v8792_v16 = vrot.slane %v8715_v42, 5  ;;  %v11284_v18 = vrot.slane %v8716_v9, 9  ;;  %12072 = vmatprep.subr.bf16.mxu1 %v12424_v22 }
 0x5bd   :  { %10713 = vmatmul.mubr.bf16.gmra.mxu0 %v12392_v13  ;;  %v9023_v57 = vsel %vm12658_vm12, %v9018_v36, %v9022_v41  ;;  %v8538_v53 = vrot.slane %v8537_v62, 4  ;;  %v8551_v23 = vor.u32 %v8550_v3, %v8547_v54  ;;  %v8796_v50 = vrot.slane %v8717_v24, 5  ;;  %v8870_v0 = vld [vmem:[#allocation2 + $0x60] sm:$0xf]  ;;  %v8871_v33 = vld [vmem:[#allocation2 + $0x68] sm:$0xf] }
 0x5be   :  { %9172 = vst [vmem:[#allocation3 + $0xf4] sm:$0xf] %v9023_v57  ;;  %v8793_v2 = vsel %vm12746_vm7, %v11283_v1, %v8792_v16  ;;  %8886 = vst [vmem:[#allocation3 + $0x138] sm:$0xf] %v8870_v0  ;;  %v8910_v14 = vld [vmem:[#allocation2 + $0x60] sm:$0xf] }
 0x5bf   :  { %v8911_v17 = vld [vmem:[#allocation2 + $0x64] sm:$0x1]  ;;  %v8543_v27 = vsel %vm12658_vm12, %v8538_v53, %v8542_v8  ;;  %v8552_v25 = vrot.slane %v8551_v23, 4  ;;  %v8797_v26 = vsel %vm12746_vm7, %v11284_v18, %v8796_v50  ;;  %8852 = vst [vmem:[#allocation3 + $0xec] sm:$0xf] %v8793_v2  ;;  %v9039_v40 = vshrl.u32 %v8910_v14, 16  ;;  %12073 = vmatpush3.bf16.msra.mxu1 %v12424_v22 }
 0x5c0   :  { %v12397_v34 = vld [vmem:[#allocation3 + $0xa4] ss:$36 sps:$4 sm:$0xff]   ;;  %8887 = vst [vmem:[#allocation3 + $0x15c] sm:$0xf] %v8871_v33  ;;  %8692 = vst [vmem:[#allocation3 + $0xe8] sm:$0xf] %v8543_v27 }
 0x5c1   :  { %v12403_v61 = vld [vmem:[#allocation3 + $0xa0] ss:$36 sps:$4 sm:$0xff]   ;;  %8853 = vst [vmem:[#allocation3 + $0x110] sm:$0xf] %v8797_v26  ;;  %v8912_v5 = vld [vmem:[#allocation2 + $0x68] sm:$0xf]  ;;  %10615 = vmatprep.mubr.bf16.mxu1 %v12397_v34  ;;  %v8557_v6 = vsel %vm12658_vm12, %v8552_v25, %v8556_v46 }
 0x5c2   :  { %v8913_v37 = vld [vmem:[#allocation2 + $0x6c] sm:$0x1]  ;;  %v9042_v39 = vshll.u32 %v8910_v14, 16  ;;  %v9048_v45 = vshll.u32 %v8911_v17, 16  ;;  %v9053_v63 = vshrl.u32 %v8912_v5, 16  ;;  %v9056_v49 = vshll.u32 %v8912_v5, 16  ;;  %10616 = vmatmul.mubr.bf16.gmra.mxu1 %v12403_v61 }
 0x5c3   :  { %v8430_v38 = vld [vmem:[#allocation2 + $0x58] sm:$0xf]  ;;  %v12431_v58 = vld [vmem:[#allocation9 + $0x208] sm:$0xff]   ;;  %8693 = vst [vmem:[#allocation3 + $0x10c] sm:$0xf] %v8557_v6  ;;  %v9041_v4 = vrot.slane %v9039_v40, 4 }
 0x5c4   :  { %v9044_v31 = vrot.slane %v9042_v39, 5  ;;  %v9062_v29 = vshll.u32 %v8913_v37, 16  ;;  %v8431_v48 = vld [vmem:[#allocation2 + $0x5c] sm:$0x1]  ;;  %v8559_v7 = vshrl.u32 %v8430_v38, 16  ;;  %v9055_v47 = vrot.slane %v9053_v63, 4  ;;  %12074 = vmatprep.subr.bf16.mxu1 %v12431_v58 }
 0x5c5   :  { %v9058_v52 = vrot.slane %v9056_v49, 5  ;;  %v8432_v60 = vld [vmem:[#allocation2 + $0x60] sm:$0xf]  ;;  %v8562_v32 = vshll.u32 %v8430_v38, 16  ;;  %v9050_v56 = vrot.slane %v9048_v45, 5  ;;  %v8568_v15 = vshll.u32 %v8431_v48, 16  ;;  %12075 = vmatpush3.bf16.msra.mxu1 %v12431_v58 }
 0x5c6   :  { %v9045_v44 = vor.u32 %v9044_v31, %v9041_v4  ;;  %v8433_v19 = vld [vmem:[#allocation2 + $0x64] sm:$0x1]  ;;  %v8561_v51 = vrot.slane %v8559_v7, 4  ;;  %v12399_v20 = vld [vmem:[#allocation3 + $0xf0] ss:$36 sps:$4 sm:$0xff]   ;;  %v9064_v35 = vrot.slane %v9062_v29, 5 }
 0x5c7   :  { %v12435_v41 = vld [vmem:[#allocation9 + $0x200] sm:$0xff]   ;;  %v12401_v43 = vld [vmem:[#allocation3 + $0xf4] ss:$36 sps:$4 sm:$0xff]   ;;  %v9059_v11 = vor.u32 %v9058_v52, %v9055_v47  ;;  %v8564_v10 = vrot.slane %v8562_v32, 5  ;;  %v8573_v30 = vshrl.u32 %v8432_v60, 16  ;;  %v8576_v28 = vshll.u32 %v8432_v60, 16 }
 0x5c8   :  { %v9046_v21 = vrot.slane %v9045_v44, 4  ;;  %v8718_v42 = vld [vmem:[#allocation2 + $0x58] sm:$0xe]  ;;  %10720 = vmatprep.mubr.bf16.mxu0 %v12401_v43  ;;  %v8582_v8 = vshll.u32 %v8433_v19, 16  ;;  %v8719_v36 = vld [vmem:[#allocation2 + $0x5c] sm:$0x1]  ;;  %12076 = vmatprep.subr.bf16.mxu1 %v12435_v41 }
 0x5c9   :  { %v9060_v13 = vrot.slane %v9059_v11, 4  ;;  %v8565_v55 = vor.u32 %v8564_v10, %v8561_v51  ;;  %v11285_v62 = vrot.slane %v8718_v42, 9  ;;  %10721 = vmatmul.mubr.bf16.gmra.mxu0 %v12399_v20  ;;  %v8575_v3 = vrot.slane %v8573_v30, 4  ;;  %v8720_v46 = vld [vmem:[#allocation2 + $0x60] sm:$0xe]  ;;  %12077 = vmatpush3.bf16.msra.mxu1 %v12435_v41 }
 0x5ca   :  { %v9051_v54 = vsel %vm12658_vm12, %v9046_v21, %v9050_v56  ;;  %v8578_v9 = vrot.slane %v8576_v28, 5  ;;  %v8721_v24 = vld [vmem:[#allocation2 + $0x64] sm:$0x1]  ;;  %v12404_v1 = vld [vmem:[#allocation3 + $0xec] ss:$36 sps:$4 sm:$0xff]   ;;  %v8570_v57 = vrot.slane %v8568_v15, 5 }
 0x5cb   :  { %v9065_v16 = vsel %vm12658_vm12, %v9060_v13, %v9064_v35  ;;  %9174 = vst [vmem:[#allocation3 + $0x13c] sm:$0xf] %v9051_v54  ;;  %v8566_v18 = vrot.slane %v8565_v55, 4  ;;  %v12410_v53 = vld [vmem:[#allocation3 + $0xe8] ss:$36 sps:$4 sm:$0xff]   ;;  %v8800_v50 = vrot.slane %v8719_v36, 5  ;;  %10623 = vmatprep.mubr.bf16.mxu1 %v12404_v1 }
 0x5cc   :  { %9175 = vst [vmem:[#allocation3 + $0x160] sm:$0xf] %v9065_v16  ;;  %v8579_v23 = vor.u32 %v8578_v9, %v8575_v3  ;;  %v11286_v0 = vrot.slane %v8720_v46, 9  ;;  %v8872_v22 = vld [vmem:[#allocation2 + $0x70] sm:$0xf]  ;;  %v8584_v33 = vrot.slane %v8582_v8, 5  ;;  %10624 = vmatmul.mubr.bf16.gmra.mxu1 %v12410_v53 }
 0x5cd   :  { %v8571_v2 = vsel %vm12658_vm12, %v8566_v18, %v8570_v57  ;;  %v8804_v14 = vrot.slane %v8721_v24, 5  ;;  %v8873_v17 = vld [vmem:[#allocation2 + $0x78] sm:$0xf]  ;;  %8888 = vst [vmem:[#allocation3 + $0x180] sm:$0xf] %v8872_v22  ;;  %v8801_v27 = vsel %vm12746_vm7, %v11285_v62, %v8800_v50 }
 0x5ce   :  { %v8914_v34 = vld [vmem:[#allocation2 + $0x70] sm:$0xf]  ;;  %v8580_v61 = vrot.slane %v8579_v23, 4  ;;  %8694 = vst [vmem:[#allocation3 + $0x130] sm:$0xf] %v8571_v2 }
 0x5cf   :  { %8889 = vst [vmem:[#allocation3 + $0x1a4] sm:$0xf] %v8873_v17  ;;  %v8915_v25 = vld [vmem:[#allocation2 + $0x74] sm:$0x1]  ;;  %v8916_v26 = vld [vmem:[#allocation2 + $0x78] sm:$0xf]  ;;  %v8805_v37 = vsel %vm12746_vm7, %v11286_v0, %v8804_v14 }
 0x5d0   :  { %v9067_v5 = vshrl.u32 %v8914_v34, 16  ;;  %8854 = vst [vmem:[#allocation3 + $0x134] sm:$0xf] %v8801_v27  ;;  %v8917_v40 = vld [vmem:[#allocation2 + $0x7c] sm:$0x1]  ;;  %v9070_v39 = vshll.u32 %v8914_v34, 16  ;;  %v8585_v45 = vsel %vm12658_vm12, %v8580_v61, %v8584_v33 }
 0x5d1   :  { %v9081_v6 = vshrl.u32 %v8916_v26, 16  ;;  %8855 = vst [vmem:[#allocation3 + $0x158] sm:$0xf] %v8805_v37  ;;  %v9076_v49 = vshll.u32 %v8915_v25, 16  ;;  %v9084_v38 = vshll.u32 %v8916_v26, 16  ;;  %v9090_v29 = vshll.u32 %v8917_v40, 16 }
 0x5d2   :  { %v9069_v63 = vrot.slane %v9067_v5, 4  ;;  %v8434_v58 = vld [vmem:[#allocation2 + $0x68] sm:$0xf]  ;;  %8695 = vst [vmem:[#allocation3 + $0x154] sm:$0xf] %v8585_v45  ;;  %v9072_v4 = vrot.slane %v9070_v39, 5 }
 0x5d3   :  { %v9083_v31 = vrot.slane %v9081_v6, 4  ;;  %v8435_v48 = vld [vmem:[#allocation2 + $0x6c] sm:$0x1]  ;;  %v8587_v7 = vshrl.u32 %v8434_v58, 16  ;;  %v9086_v47 = vrot.slane %v9084_v38, 5  ;;  %v8590_v60 = vshll.u32 %v8434_v58, 16 }
 0x5d4   :  { %v8436_v52 = vld [vmem:[#allocation2 + $0x70] sm:$0xf]  ;;  %v12406_v32 = vld [vmem:[#allocation3 + $0x138] ss:$36 sps:$4 sm:$0xff]   ;;  %v9073_v56 = vor.u32 %v9072_v4, %v9069_v63  ;;  %v8437_v15 = vld [vmem:[#allocation2 + $0x74] sm:$0x1] }
 0x5d5   :  { %v12408_v44 = vld [vmem:[#allocation3 + $0x13c] ss:$36 sps:$4 sm:$0xff]   ;;  %v8589_v19 = vrot.slane %v8587_v7, 4  ;;  %v9087_v51 = vor.u32 %v9086_v47, %v9083_v31  ;;  %v8592_v41 = vrot.slane %v8590_v60, 5  ;;  %v8596_v20 = vshll.u32 %v8435_v48, 16 }
 0x5d6   :  { %v8601_v43 = vshrl.u32 %v8436_v52, 16  ;;  %10728 = vmatprep.mubr.bf16.mxu0 %v12408_v44  ;;  %v9074_v11 = vrot.slane %v9073_v56, 4  ;;  %v9078_v10 = vrot.slane %v9076_v49, 5  ;;  %v9092_v21 = vrot.slane %v9090_v29, 5  ;;  %v8722_v30 = vld [vmem:[#allocation2 + $0x68] sm:$0xe] }
 0x5d7   :  { %v8604_v35 = vshll.u32 %v8436_v52, 16  ;;  %10729 = vmatmul.mubr.bf16.gmra.mxu0 %v12406_v32  ;;  %v9088_v28 = vrot.slane %v9087_v51, 4  ;;  %v8593_v42 = vor.u32 %v8592_v41, %v8589_v19  ;;  %v8610_v55 = vshll.u32 %v8437_v15, 16  ;;  %v8723_v8 = vld [vmem:[#allocation2 + $0x6c] sm:$0x1] }
 0x5d8   :  { %v8603_v13 = vrot.slane %v8601_v43, 4  ;;  %v9079_v36 = vsel %vm12658_vm12, %v9074_v11, %v9078_v10  ;;  %v8598_v62 = vrot.slane %v8596_v20, 5  ;;  %v8724_v3 = vld [vmem:[#allocation2 + $0x70] sm:$0xe]  ;;  %v8725_v9 = vld [vmem:[#allocation2 + $0x74] sm:$0x1] }
 0x5d9   :  { %v8606_v54 = vrot.slane %v8604_v35, 5  ;;  %v12411_v46 = vld [vmem:[#allocation3 + $0x130] ss:$36 sps:$4 sm:$0xff]   ;;  %v9093_v1 = vsel %vm12658_vm12, %v9088_v28, %v9092_v21  ;;  %9176 = vst [vmem:[#allocation3 + $0x184] sm:$0xf] %v9079_v36  ;;  %v8594_v16 = vrot.slane %v8593_v42, 4 }
 0x5da   :  { %v12413_v24 = vld [vmem:[#allocation3 + $0x134] ss:$36 sps:$4 sm:$0xff]   ;;  %9177 = vst [vmem:[#allocation3 + $0x1a8] sm:$0xf] %v9093_v1  ;;  %v11287_v57 = vrot.slane %v8722_v30, 9  ;;  %v8808_v53 = vrot.slane %v8723_v8, 5 }
 0x5db   :  { %v8607_v18 = vor.u32 %v8606_v54, %v8603_v13  ;;  %v11288_v23 = vrot.slane %v8724_v3, 9  ;;  %v8874_v50 = vld [vmem:[#allocation2 + $0x80] sm:$0xf]  ;;  %10631 = vmatprep.mubr.bf16.mxu1 %v12413_v24  ;;  %v8599_v0 = vsel %vm12658_vm12, %v8594_v16, %v8598_v62  ;;  %v8612_v22 = vrot.slane %v8610_v55, 5  ;;  %v8875_v33 = vld [vmem:[#allocation2 + $0x88] sm:$0xf] }
 0x5dc   :  { %v8812_v2 = vrot.slane %v8725_v9, 5  ;;  %8890 = vst [vmem:[#allocation3 + $0x1c8] sm:$0xf] %v8874_v50  ;;  %v8918_v14 = vld [vmem:[#allocation2 + $0x80] sm:$0xf]  ;;  %10632 = vmatmul.mubr.bf16.gmra.mxu1 %v12411_v46  ;;  %v8809_v34 = vsel %vm12746_vm7, %v11287_v57, %v8808_v53 }
 0x5dd   :  { %v8608_v17 = vrot.slane %v8607_v18, 4  ;;  %8696 = vst [vmem:[#allocation3 + $0x178] sm:$0xf] %v8599_v0  ;;  %8891 = vst [vmem:[#allocation3 + $0x1ec] sm:$0xf] %v8875_v33  ;;  %v9095_v25 = vshrl.u32 %v8918_v14, 16 }
 0x5de   :  { %v8919_v61 = vld [vmem:[#allocation2 + $0x84] sm:$0x1]  ;;  %v8920_v27 = vld [vmem:[#allocation2 + $0x88] sm:$0xf]  ;;  %v8813_v26 = vsel %vm12746_vm7, %v11288_v23, %v8812_v2  ;;  %8856 = vst [vmem:[#allocation3 + $0x17c] sm:$0xf] %v8809_v34 }
 0x5df   :  { %v8921_v5 = vld [vmem:[#allocation2 + $0x8c] sm:$0x1]  ;;  %v9098_v37 = vshll.u32 %v8918_v14, 16  ;;  %v9109_v40 = vshrl.u32 %v8920_v27, 16  ;;  %v8613_v39 = vsel %vm12658_vm12, %v8608_v17, %v8612_v22  ;;  %8857 = vst [vmem:[#allocation3 + $0x1a0] sm:$0xf] %v8813_v26 }
 0x5e0   :  { %v9097_v6 = vrot.slane %v9095_v25, 4  ;;  %v9104_v45 = vshll.u32 %v8919_v61, 16  ;;  %v9112_v63 = vshll.u32 %v8920_v27, 16  ;;  %v8438_v49 = vld [vmem:[#allocation2 + $0x78] sm:$0xf]  ;;  %v9118_v4 = vshll.u32 %v8921_v5, 16 }
 0x5e1   :  { %8697 = vst [vmem:[#allocation3 + $0x19c] sm:$0xf] %v8613_v39  ;;  %v9100_v38 = vrot.slane %v9098_v37, 5  ;;  %v9111_v58 = vrot.slane %v9109_v40, 4  ;;  %v8439_v31 = vld [vmem:[#allocation2 + $0x7c] sm:$0x1] }
 0x5e2   :  { %v8615_v29 = vshrl.u32 %v8438_v49, 16  ;;  %v9114_v48 = vrot.slane %v9112_v63, 5  ;;  %v8440_v7 = vld [vmem:[#allocation2 + $0x80] sm:$0xf]  ;;  %v8618_v47 = vshll.u32 %v8438_v49, 16  ;;  %v8624_v15 = vshll.u32 %v8439_v31, 16 }
 0x5e3   :  { %v12414_v52 = vld [vmem:[#allocation3 + $0x180] ss:$36 sps:$4 sm:$0xff]   ;;  %v9101_v32 = vor.u32 %v9100_v38, %v9097_v6  ;;  %v8629_v41 = vshrl.u32 %v8440_v7, 16  ;;  %v9106_v43 = vrot.slane %v9104_v45, 5  ;;  %v9120_v11 = vrot.slane %v9118_v4, 5 }
 0x5e4   :  { %v12416_v60 = vld [vmem:[#allocation3 + $0x184] ss:$36 sps:$4 sm:$0xff]   ;;  %v8617_v44 = vrot.slane %v8615_v29, 4  ;;  %v9115_v56 = vor.u32 %v9114_v48, %v9111_v58  ;;  %v8620_v51 = vrot.slane %v8618_v47, 5  ;;  %v8632_v10 = vshll.u32 %v8440_v7, 16 }
 0x5e5   :  { %v8441_v19 = vld [vmem:[#allocation2 + $0x84] sm:$0x1]  ;;  %10736 = vmatprep.mubr.bf16.mxu0 %v12416_v60  ;;  %v9102_v20 = vrot.slane %v9101_v32, 4  ;;  %v8726_v21 = vld [vmem:[#allocation2 + $0x78] sm:$0xe]  ;;  %v8631_v28 = vrot.slane %v8629_v41, 4 }
 0x5e6   :  { %10737 = vmatmul.mubr.bf16.gmra.mxu0 %v12414_v52  ;;  %v9116_v35 = vrot.slane %v9115_v56, 4  ;;  %v8621_v30 = vor.u32 %v8620_v51, %v8617_v44  ;;  %v8638_v42 = vshll.u32 %v8441_v19, 16  ;;  %v8727_v13 = vld [vmem:[#allocation2 + $0x7c] sm:$0x1]  ;;  %v8626_v8 = vrot.slane %v8624_v15, 5 }
 0x5e7   :  { %v9107_v55 = vsel %vm12658_vm12, %v9102_v20, %v9106_v43  ;;  %v8634_v36 = vrot.slane %v8632_v10, 5  ;;  %v8728_v62 = vld [vmem:[#allocation2 + $0x80] sm:$0xe]  ;;  %v8729_v54 = vld [vmem:[#allocation2 + $0x84] sm:$0x1]  ;;  %v11289_v16 = vrot.slane %v8726_v21, 9 }
 0x5e8   :  { %v12418_v3 = vld [vmem:[#allocation3 + $0x178] ss:$36 sps:$4 sm:$0xff]   ;;  %v9121_v46 = vsel %vm12658_vm12, %v9116_v35, %v9120_v11  ;;  %9178 = vst [vmem:[#allocation3 + $0x1cc] sm:$0xf] %v9107_v55  ;;  %v8622_v24 = vrot.slane %v8621_v30, 4  ;;  %v8816_v18 = vrot.slane %v8727_v13, 5 }
 0x5e9   :  { %v12420_v9 = vld [vmem:[#allocation3 + $0x17c] ss:$36 sps:$4 sm:$0xff]   ;;  %9179 = vst [vmem:[#allocation3 + $0x1f0] sm:$0xf] %v9121_v46  ;;  %v8635_v1 = vor.u32 %v8634_v36, %v8631_v28  ;;  %v11290_v57 = vrot.slane %v8728_v62, 9  ;;  %v8640_v50 = vrot.slane %v8638_v42, 5 }
 0x5ea   :  { %v8876_v53 = vld [vmem:[#allocation2 + $0x90] sm:$0xf]  ;;  %10639 = vmatprep.mubr.bf16.mxu1 %v12420_v9  ;;  %v8627_v23 = vsel %vm12658_vm12, %v8622_v24, %v8626_v8  ;;  %v8820_v0 = vrot.slane %v8729_v54, 5  ;;  %v8923_v2 = vld [vmem:[#allocation2 + $0x94] sm:$0x1]  ;;  %v8817_v14 = vsel %vm12746_vm7, %v11289_v16, %v8816_v18 }
 0x5eb   :  { %8892 = vst [vmem:[#allocation3 + $0x210] sm:$0xf] %v8876_v53  ;;  %v8922_v22 = vld [vmem:[#allocation2 + $0x90] sm:$0xf]  ;;  %10640 = vmatmul.mubr.bf16.gmra.mxu1 %v12418_v3  ;;  %v8636_v33 = vrot.slane %v8635_v1, 4  ;;  %v9132_v25 = vshll.u32 %v8923_v2, 16 }
 0x5ec   :  { %8698 = vst [vmem:[#allocation3 + $0x1c0] sm:$0xf] %v8627_v23  ;;  %v9123_v17 = vshrl.u32 %v8922_v22, 16  ;;  %v9126_v34 = vshll.u32 %v8922_v22, 16  ;;  %v8442_v61 = vld [vmem:[#allocation2 + $0x88] sm:$0xf]  ;;  %v8821_v27 = vsel %vm12746_vm7, %v11290_v57, %v8820_v0 }
 0x5ed   :  { %8858 = vst [vmem:[#allocation3 + $0x1c4] sm:$0xf] %v8817_v14  ;;  %v8443_v26 = vld [vmem:[#allocation2 + $0x8c] sm:$0x1]  ;;  %v8444_v5 = vld [vmem:[#allocation2 + $0x90] sm:$0xf]  ;;  %v8641_v40 = vsel %vm12658_vm12, %v8636_v33, %v8640_v50 }
 0x5ee   :  { %v8643_v37 = vshrl.u32 %v8442_v61, 16  ;;  %8859 = vst [vmem:[#allocation3 + $0x1e8] sm:$0xf] %v8821_v27  ;;  %v9125_v39 = vrot.slane %v9123_v17, 4  ;;  %v9128_v6 = vrot.slane %v9126_v34, 5  ;;  %v8646_v63 = vshll.u32 %v8442_v61, 16 }
 0x5ef   :  { %v8445_v45 = vld [vmem:[#allocation2 + $0x94] sm:$0x1]  ;;  %8699 = vst [vmem:[#allocation3 + $0x1e4] sm:$0xf] %v8641_v40  ;;  %v9134_v49 = vrot.slane %v9132_v25, 5  ;;  %v8652_v58 = vshll.u32 %v8443_v26, 16 }
 0x5f0   :  { %v8645_v38 = vrot.slane %v8643_v37, 4  ;;  %v8657_v4 = vshrl.u32 %v8444_v5, 16  ;;  %v8730_v31 = vld [vmem:[#allocation2 + $0x88] sm:$0xe]  ;;  %v9129_v29 = vor.u32 %v9128_v6, %v9125_v39  ;;  %v8648_v48 = vrot.slane %v8646_v63, 5 }
 0x5f1   :  { %v8660_v7 = vshll.u32 %v8444_v5, 16  ;;  %v8666_v47 = vshll.u32 %v8445_v45, 16  ;;  %v8731_v52 = vld [vmem:[#allocation2 + $0x8c] sm:$0x1]  ;;  %v8654_v44 = vrot.slane %v8652_v58, 5  ;;  %v11291_v11 = vrot.slane %v8730_v31, 9 }
 0x5f2   :  { %v12421_v60 = vld [vmem:[#allocation3 + $0x1c8] ss:$36 sps:$4 sm:$0xff]   ;;  %v9130_v56 = vrot.slane %v9129_v29, 4  ;;  %v8649_v19 = vor.u32 %v8648_v48, %v8645_v38  ;;  %v8659_v51 = vrot.slane %v8657_v4, 4  ;;  %v8732_v41 = vld [vmem:[#allocation2 + $0x90] sm:$0xe] }
 0x5f3   :  { %v12423_v32 = vld [vmem:[#allocation3 + $0x1cc] ss:$36 sps:$4 sm:$0xff]   ;;  %v8662_v15 = vrot.slane %v8660_v7, 5  ;;  %v8668_v20 = vrot.slane %v8666_v47, 5  ;;  %v8733_v43 = vld [vmem:[#allocation2 + $0x94] sm:$0x1] }
 0x5f4   :  { %10744 = vmatprep.mubr.bf16.mxu0 %v12423_v32  ;;  %v8824_v10 = vrot.slane %v8731_v52, 5  ;;  %v11292_v21 = vrot.slane %v8732_v41, 9  ;;  %v9135_v35 = vsel %vm12658_vm12, %v9130_v56, %v9134_v49  ;;  %v8650_v30 = vrot.slane %v8649_v19, 4  ;;  %v9182_v13 = vld [vmem:[#allocation2 + $0x10] sm:$0xe] }
 0x5f5   :  { %10745 = vmatmul.mubr.bf16.gmra.mxu0 %v12421_v60  ;;  %v8663_v28 = vor.u32 %v8662_v15, %v8659_v51  ;;  %v8828_v42 = vrot.slane %v8733_v43, 5  ;;  %9180 = vst [vmem:[#allocation3 + $0x214] sm:$0xf] %v9135_v35  ;;  %v9183_v8 = vld [vmem:[#allocation2 + $0x14] sm:$0x1]  ;;  %v11293_v1 = vrot.slane %v9182_v13, 9 }
 0x5f6   :  { %v8825_v55 = vsel %vm12746_vm7, %v11291_v11, %v8824_v10  ;;  %v9184_v36 = vld [vmem:[#allocation2 + $0x18] sm:$0xe]  ;;  %v9185_v62 = vld [vmem:[#allocation2 + $0x1c] sm:$0x1]  ;;  %v12425_v54 = vld [vmem:[#allocation3 + $0x1c0] ss:$36 sps:$4 sm:$0xff]   ;;  %v8655_v9 = vsel %vm12658_vm12, %v8650_v30, %v8654_v44 }
 0x5f7   :  { %v12427_v3 = vld [vmem:[#allocation3 + $0x1c4] ss:$36 sps:$4 sm:$0xff]   ;;  %v8664_v46 = vrot.slane %v8663_v28, 4  ;;  %v8829_v24 = vsel %vm12746_vm7, %v11292_v21, %v8828_v42  ;;  %8860 = vst [vmem:[#allocation3 + $0x20c] sm:$0xf] %v8825_v55  ;;  %v9248_v16 = vrot.slane %v9183_v8, 5 }
 0x5f8   :  { %8700 = vst [vmem:[#allocation3 + $0x208] sm:$0xf] %v8655_v9  ;;  %8861 = vst [vmem:[#allocation3 + $0x230] sm:$0xf] %v8829_v24  ;;  %v11294_v18 = vrot.slane %v9184_v36, 9  ;;  %v9252_v57 = vrot.slane %v9185_v62, 5  ;;  %10647 = vmatprep.mubr.bf16.mxu1 %v12427_v3 }
 0x5f9   :  { %v9186_v53 = vld [vmem:[#allocation2 + $0x20] sm:$0xe]  ;;  %v8669_v23 = vsel %vm12658_vm12, %v8664_v46, %v8668_v20  ;;  %v9187_v50 = vld [vmem:[#allocation2 + $0x24] sm:$0x1]  ;;  %v9188_v0 = vld [vmem:[#allocation2 + $0x28] sm:$0xe]  ;;  %10648 = vmatmul.mubr.bf16.gmra.mxu1 %v12425_v54  ;;  %v9249_v2 = vsel %vm12746_vm7, %v11293_v1, %v9248_v16 }
 0x5fa   :  { %v9189_v22 = vld [vmem:[#allocation2 + $0x2c] sm:$0x1]  ;;  %8701 = vst [vmem:[#allocation3 + $0x22c] sm:$0xf] %v8669_v23  ;;  %v9253_v33 = vsel %vm12746_vm7, %v11294_v18, %v9252_v57  ;;  %v11295_v14 = vrot.slane %v9186_v53, 9  ;;  %v9256_v17 = vrot.slane %v9187_v50, 5 }
 0x5fb   :  { %v9190_v34 = vld [vmem:[#allocation2 + $0x30] sm:$0xe]  ;;  %v9191_v61 = vld [vmem:[#allocation2 + $0x34] sm:$0x1]  ;;  %9326 = vst [vmem:[#allocation3 + $0x20] sm:$0xf] %v9249_v2 }
 0x5fc   :  { %9327 = vst [vmem:[#allocation3 + $0x44] sm:$0xf] %v9253_v33  ;;  %v11296_v27 = vrot.slane %v9188_v0, 9  ;;  %v9260_v59 = vrot.slane %v9189_v22, 5  ;;  %v9192_v25 = vld [vmem:[#allocation2 + $0x38] sm:$0xe]  ;;  %v9257_v5 = vsel %vm12746_vm7, %v11295_v14, %v9256_v17 }
 0x5fd   :  { %v9193_v26 = vld [vmem:[#allocation2 + $0x3c] sm:$0x1]  ;;  %v11297_v37 = vrot.slane %v9190_v34, 9  ;;  %v9264_v40 = vrot.slane %v9191_v61, 5  ;;  %v11298_v39 = vrot.slane %v9192_v25, 9 }
 0x5fe   :  { %v9194_v6 = vld [vmem:[#allocation2 + $0x40] sm:$0xe]  ;;  %v12428_v45 = vld [vmem:[#allocation3 + $0x210] ss:$36 sps:$4 sm:$0xff]   ;;  %v9261_v49 = vsel %vm12746_vm7, %v11296_v27, %v9260_v59  ;;  %9328 = vst [vmem:[#allocation3 + $0x68] sm:$0xf] %v9257_v5 }
 0x5ff   :  { %v12430_v63 = vld [vmem:[#allocation3 + $0x214] ss:$36 sps:$4 sm:$0xff]   ;;  %v9268_v38 = vrot.slane %v9193_v26, 5  ;;  %9329 = vst [vmem:[#allocation3 + $0x8c] sm:$0xf] %v9261_v49  ;;  %v9265_v58 = vsel %vm12746_vm7, %v11297_v37, %v9264_v40  ;;  %v11299_v31 = vrot.slane %v9194_v6, 9 }
 0x600   :  { %v9195_v4 = vld [vmem:[#allocation2 + $0x44] sm:$0x1]  ;;  %v9198_v29 = vld [vmem:[#allocation2 + $0x60] sm:$0xe]  ;;  %10752 = vmatprep.mubr.bf16.mxu0 %v12430_v63  ;;  %9330 = vst [vmem:[#allocation3 + $0xb0] sm:$0xf] %v9265_v58 }
 0x601   :  { %v9269_v48 = vsel %vm12746_vm7, %v11298_v39, %v9268_v38  ;;  %v9272_v7 = vrot.slane %v9195_v4, 5  ;;  %v9199_v47 = vld [vmem:[#allocation2 + $0x64] sm:$0x1]  ;;  %v9200_v52 = vld [vmem:[#allocation2 + $0x68] sm:$0xe]  ;;  %10753 = vmatmul.mubr.bf16.gmra.mxu0 %v12428_v45  ;;  %v11301_v32 = vrot.slane %v9198_v29, 9 }
 0x602   :  { %9331 = vst [vmem:[#allocation3 + $0xd4] sm:$0xf] %v9269_v48  ;;  %v9201_v60 = vld [vmem:[#allocation2 + $0x6c] sm:$0x1]  ;;  %v9280_v44 = vrot.slane %v9199_v47, 5  ;;  %v11302_v56 = vrot.slane %v9200_v52, 9 }
 0x603   :  { %v12432_v19 = vld [vmem:[#allocation3 + $0x208] ss:$36 sps:$4 sm:$0xff]   ;;  %v9273_v15 = vsel %vm12746_vm7, %v11299_v31, %v9272_v7  ;;  %v9284_v41 = vrot.slane %v9201_v60, 5  ;;  %v12436_v20 = vld [vmem:[#allocation3 + $0x20] ss:$36 sps:$4 sm:$0xff]  }
 0x604   :  { %v12434_v51 = vld [vmem:[#allocation3 + $0x20c] ss:$36 sps:$4 sm:$0xff]   ;;  %9332 = vst [vmem:[#allocation3 + $0xf8] sm:$0xf] %v9273_v15  ;;  %v9281_v43 = vsel %vm12746_vm7, %v11301_v32, %v9280_v44  ;;  %v9203_v21 = vld [vmem:[#allocation2 + $0x74] sm:$0x1] }
 0x605   :  { %10655 = vmatprep.mubr.bf16.mxu1 %v12434_v51  ;;  %v9285_v11 = vsel %vm12746_vm7, %v11302_v56, %v9284_v41  ;;  %9334 = vst [vmem:[#allocation3 + $0x140] sm:$0xf] %v9281_v43  ;;  %v9202_v10 = vld [vmem:[#allocation2 + $0x70] sm:$0xe]  ;;  %v9204_v35 = vld [vmem:[#allocation2 + $0x78] sm:$0xe] }
 0x606   :  { %10656 = vmatmul.mubr.bf16.gmra.mxu1 %v12432_v19  ;;  %9335 = vst [vmem:[#allocation3 + $0x164] sm:$0xf] %v9285_v11  ;;  %v9205_v30 = vld [vmem:[#allocation2 + $0x7c] sm:$0x1]  ;;  %v11303_v28 = vrot.slane %v9202_v10, 9  ;;  %v9288_v42 = vrot.slane %v9203_v21, 5 }
 0x607   :  { %12078 = vmatprep.mubr.bf16.mxu1 %v12436_v20  ;;  %v11304_v13 = vrot.slane %v9204_v35, 9  ;;  %v9292_v55 = vrot.slane %v9205_v30, 5  ;;  %v9206_v36 = vld [vmem:[#allocation2 + $0x80] sm:$0xe]  ;;  %v9207_v62 = vld [vmem:[#allocation2 + $0x84] sm:$0x1] }
 0x608   :  { %v9289_v8 = vsel %vm12746_vm7, %v11303_v28, %v9288_v42  ;;  %v9208_v3 = vld [vmem:[#allocation2 + $0x88] sm:$0xe]  ;;  %v9209_v9 = vld [vmem:[#allocation2 + $0x8c] sm:$0x1]  ;;  %v11305_v46 = vrot.slane %v9206_v36, 9  ;;  %v9296_v24 = vrot.slane %v9207_v62, 5 }
 0x609   :  { %v9293_v54 = vsel %vm12746_vm7, %v11304_v13, %v9292_v55  ;;  %9336 = vst [vmem:[#allocation3 + $0x188] sm:$0xf] %v9289_v8  ;;  %v11306_v1 = vrot.slane %v9208_v3, 9  ;;  %v12437_v16 = vld [vmem:[#allocation3 + $0x68] ss:$36 sps:$4 sm:$0xff]   ;;  %v9300_v18 = vrot.slane %v9209_v9, 5 }
 0x60a   :  { %9337 = vst [vmem:[#allocation3 + $0x1ac] sm:$0xf] %v9293_v54  ;;  %v9297_v57 = vsel %vm12746_vm7, %v11305_v46, %v9296_v24  ;;  %v9210_v53 = vld [vmem:[#allocation2 + $0x90] sm:$0xe]  ;;  %v9211_v23 = vld [vmem:[#allocation2 + $0x94] sm:$0x1] }
 0x60b   :  { %v12438_v50 = vld [vmem:[#allocation3 + $0xb0] ss:$36 sps:$4 sm:$0xff]   ;;  %v9301_v0 = vsel %vm12746_vm7, %v11306_v1, %v9300_v18  ;;  %9338 = vst [vmem:[#allocation3 + $0x1d0] sm:$0xf] %v9297_v57  ;;  %v11307_v22 = vrot.slane %v9210_v53, 9  ;;  %v9304_v2 = vrot.slane %v9211_v23, 5 }
 0x60c   :  { %9339 = vst [vmem:[#allocation3 + $0x1f4] sm:$0xf] %v9301_v0  ;;  %v12439_v14 = vld [vmem:[#allocation3 + $0xf8] ss:$36 sps:$4 sm:$0xff]   ;;  %v14923_v49 = vld [vmem:[%s15122_s4] ss:$0 sm:$0xff] }
 0x60d   :  { %v9305_v33 = vsel %vm12746_vm7, %v11307_v22, %v9304_v2  ;;  %v12440_v17 = vld [vmem:[#allocation3 + $0x140] ss:$36 sps:$4 sm:$0xff]   ;;  %v11838_v59 = vpop.f32.mrf.mxu0  ;;  %s12540_s4 = smov [#allocation10]  }
 0x60e   :  { %12079 = vmatmul.mubr.bf16.vlgmr.msra.gmra.mxu1 %v12437_v16  ;;  %9340 = vst [vmem:[#allocation3 + $0x218] sm:$0xf] %v9305_v33  ;;  %s10895_s14 = sshll.u32 %s12540_s4, 4  ;;  %s10896_s14 = int_to_ptr.vmem [resolvable:$true] %s10895_s14 }
 0x60f   :  { %12082 = vmatprep.mubr.bf16.mxu1 %v12438_v50  ;;  %v11839_v25 = vpop.f32.mrf.mxu0  ;;  %s12506_s15 = scalar_lea.vmem %s10896_s14, 2048  ;;  %p12511_p2 = scmp.lt.s32.totalorder %s10896_s14, %s10896_s14 }
 0x610   :  { %v11840_v26 = vadd.f32 %v11839_v25, %v11838_v59  ;;  %p12507_p1 = scmp.ne.s32.totalorder %s10896_s14, %s12506_s15  ;;  %p12512_p3 = scmp.lt.s32.totalorder %s12506_s15, %s12506_s15 }
 0x611   :  { %v12441_v34 = vld [vmem:[#allocation3 + $0x188] ss:$36 sps:$4 sm:$0xff]   ;;  %v11841_v5 = vpop.f32.mrf.mxu0 }
 0x612   :  { %p12513_p4 = por %p12512_p3, %p12511_p2 }
 0x613   :  { %v12442_v61 = vld [vmem:[#allocation3 + $0x1d0] ss:$36 sps:$4 sm:$0xff]   ;;  %v11842_v37 = vpop.f32.mrf.mxu0 }
 0x614   :  { %v11843_v40 = vadd.f32 %v11842_v37, %v11841_v5  ;;  %p12514_p5 = pnand %p12513_p4, %p12507_p1 }
 0x615   :  { %v12443_v27 = vld [vmem:[#allocation3 + $0x218] ss:$36 sps:$4 sm:$0xff]   ;;  %v11844_v39 = vpop.f32.mrf.mxu0 }
 0x616   :  { %12083 = vmatmul.mubr.bf16.gmra.mxu1 %v12439_v14 }
 0x617   :  { %12086 = vmatprep.mubr.bf16.mxu1 %v12440_v17  ;;  %v11845_v12 = vpop.f32.mrf.mxu0 }
 0x618   :  { %v11846_v45 = vadd.f32 %v11845_v12, %v11844_v39 }
 0x619   :  { %v11847_v63 = vpop.f32.mrf.mxu0 }
 0x61b   :  { %v11848_v4 = vpop.f32.mrf.mxu0 }
 0x61c   :  { %v11849_v29 = vadd.f32 %v11848_v4, %v11847_v63 }
 0x61e   :  { %12087 = vmatmul.mubr.bf16.gmra.mxu1 %v12441_v34  ;;  %v11774_v6 = vpop.f32.mrf.mxu1 }
 0x61f   :  { %12090 = vmatprep.mubr.bf16.mxu1 %v12442_v61 }
 0x620   :  { %v11775_v38 = vpop.f32.mrf.mxu1 }
 0x621   :  { %v11776_v58 = vadd.f32 %v11775_v38, %v11774_v6 }
 0x622   :  { %v11777_v31 = vpop.f32.mrf.mxu1 }
 0x623   :  { %v10408_v48 = vadd.f32 %v11776_v58, %v14923_v49 }
 0x624   :  { %v11850_v7 = vpop.f32.mrf.mxu0  ;;  %v11778_v47 = vpop.f32.mrf.mxu1 }
 0x625   :  { %v11779_v52 = vadd.f32 %v11778_v47, %v11777_v31  ;;  %v14926_v32 = vadd.f32 %v11840_v26, %v10408_v48 }
 0x626   :  { %12091 = vmatmul.mubr.bf16.gmra.mxu1 %v12443_v27  ;;  %v11851_v60 = vpop.f32.mrf.mxu0 }
 0x627   :  { %v11780_v44 = vpop.f32.mrf.mxu1  ;;  %v11852_v56 = vadd.f32 %v11851_v60, %v11850_v7  ;;  %v10411_v19 = vadd.f32 %v11779_v52, %v14923_v49 }
 0x628   :  { %v11853_v51 = vpop.f32.mrf.mxu0 }
 0x629   :  { %v11781_v15 = vpop.f32.mrf.mxu1  ;;  %v14929_v43 = vadd.f32 %v11843_v40, %v10411_v19 }
 0x62a   :  { %v11782_v41 = vadd.f32 %v11781_v15, %v11780_v44  ;;  %v11854_v20 = vpop.f32.mrf.mxu0 }
 0x62b   :  { %v11783_v11 = vpop.f32.mrf.mxu1  ;;  %v11855_v10 = vadd.f32 %v11854_v20, %v11853_v51 }
 0x62c   :  { %v10416_v21 = vadd.f32 %v11782_v41, %v14923_v49 }
 0x62d   :  { %v11784_v30 = vpop.f32.mrf.mxu1 }
 0x62e   :  { %v11856_v35 = vpop.f32.mrf.mxu0  ;;  %v11785_v28 = vadd.f32 %v11784_v30, %v11783_v11  ;;  %v14932_v13 = vadd.f32 %v11846_v45, %v10416_v21 }
 0x630   :  { %v11857_v42 = vpop.f32.mrf.mxu0  ;;  %v10419_v36 = vadd.f32 %v11785_v28, %v14923_v49 }
 0x631   :  { %v11786_v55 = vpop.f32.mrf.mxu1  ;;  %v11858_v8 = vadd.f32 %v11857_v42, %v11856_v35 }
 0x632   :  { %v11859_v62 = vpop.f32.mrf.mxu0  ;;  %v14935_v46 = vadd.f32 %v11849_v29, %v10419_v36 }
 0x633   :  { %v11787_v54 = vpop.f32.mrf.mxu1 }
 0x634   :  { %v11788_v3 = vadd.f32 %v11787_v54, %v11786_v55  ;;  %v11860_v9 = vpop.f32.mrf.mxu0 }
 0x635   :  { %v11789_v24 = vpop.f32.mrf.mxu1  ;;  %v11861_v1 = vadd.f32 %v11860_v9, %v11859_v62 }
 0x636   :  { %v10424_v16 = vadd.f32 %v11788_v3, %v14923_v49 }
 0x637   :  { %v11790_v57 = vpop.f32.mrf.mxu1 }
 0x638   :  { %v11791_v53 = vadd.f32 %v11790_v57, %v11789_v24  ;;  %v14938_v50 = vadd.f32 %v11852_v56, %v10424_v16 }
 0x63a   :  { %v10427_v2 = vadd.f32 %v11791_v53, %v14923_v49 }
 0x63b   :  { %v11792_v0 = vpop.f32.mrf.mxu1 }
 0x63c   :  { %v11862_v18 = vpop.f32.mrf.mxu0  ;;  %v14941_v61 = vadd.f32 %v11855_v10, %v10427_v2 }
 0x63d   :  { %v11793_v14 = vpop.f32.mrf.mxu1 }
 0x63e   :  { %v11863_v23 = vpop.f32.mrf.mxu0  ;;  %v11794_v17 = vadd.f32 %v11793_v14, %v11792_v0 }
 0x63f   :  { %v11864_v22 = vadd.f32 %v11863_v23, %v11862_v18  ;;  %v11795_v27 = vpop.f32.mrf.mxu1 }
 0x640   :  { %v11865_v33 = vpop.f32.mrf.mxu0  ;;  %v10432_v25 = vadd.f32 %v11794_v17, %v14923_v49 }
 0x641   :  { %v11796_v5 = vpop.f32.mrf.mxu1 }
 0x642   :  { %v11866_v34 = vpop.f32.mrf.mxu0  ;;  %v11797_v37 = vadd.f32 %v11796_v5, %v11795_v27  ;;  %v14944_v39 = vadd.f32 %v11858_v8, %v10432_v25 }
 0x643   :  { %v11867_v59 = vadd.f32 %v11866_v34, %v11865_v33 }
 0x644   :  { %v11868_v26 = vpop.f32.mrf.mxu0  ;;  %v10435_v45 = vadd.f32 %v11797_v37, %v14923_v49 }
 0x645   :  { %v11798_v12 = vpop.f32.mrf.mxu1 }
 0x646   :  { %v11869_v40 = vpop.f32.mrf.mxu0  ;;  %v14947_v31 = vadd.f32 %v11861_v1, %v10435_v45 }
 0x647   :  { %v11870_v6 = vadd.f32 %v11869_v40, %v11868_v26  ;;  %v11799_v38 = vpop.f32.mrf.mxu1 }
 0x648   :  { %v11871_v63 = vpop.f32.mrf.mxu0  ;;  %v11800_v58 = vadd.f32 %v11799_v38, %v11798_v12 }
 0x649   :  { %v11801_v29 = vpop.f32.mrf.mxu1 }
 0x64a   :  { %v11872_v4 = vpop.f32.mrf.mxu0  ;;  %v10440_v7 = vadd.f32 %v11800_v58, %v14923_v49 }
 0x64b   :  { %v11873_v48 = vadd.f32 %v11872_v4, %v11871_v63  ;;  %v11802_v52 = vpop.f32.mrf.mxu1 }
 0x64c   :  { %v11803_v60 = vadd.f32 %v11802_v52, %v11801_v29  ;;  %v14950_v56 = vadd.f32 %v11864_v22, %v10440_v7 }
 0x64e   :  { %v11874_v47 = vpop.f32.mrf.mxu0  ;;  %15211 = vst [vmem:[#allocation18_spill] sm:$0xff] %v14950_v56  ;;  %v11804_v19 = vpop.f32.mrf.mxu1  ;;  %v10443_v15 = vadd.f32 %v11803_v60, %v14923_v49 }
 0x650   :  { %v11875_v44 = vpop.f32.mrf.mxu0  ;;  %v11805_v20 = vpop.f32.mrf.mxu1  ;;  %v14953_v21 = vadd.f32 %v11867_v59, %v10443_v15 }
 0x651   :  { %v11876_v51 = vadd.f32 %v11875_v44, %v11874_v47  ;;  %v11806_v11 = vadd.f32 %v11805_v20, %v11804_v19 }
 0x652   :  { %v11877_v41 = vpop.f32.mrf.mxu0  ;;  %15212 = vst [vmem:[#allocation19_spill] sm:$0xff] %v14953_v21  ;;  %v11807_v35 = vpop.f32.mrf.mxu1 }
 0x653   :  { %v10448_v28 = vadd.f32 %v11806_v11, %v14923_v49 }
 0x654   :  { %v11878_v10 = vpop.f32.mrf.mxu0  ;;  %v11808_v55 = vpop.f32.mrf.mxu1 }
 0x655   :  { %v11879_v30 = vadd.f32 %v11878_v10, %v11877_v41  ;;  %v11809_v8 = vadd.f32 %v11808_v55, %v11807_v35  ;;  %v14960_v62 = vadd.f32 %v11870_v6, %v10448_v28 }
 0x657   :  { %v14956_v42 = vpop.f32.mrf.mxu0  ;;  %v10451_v3 = vadd.f32 %v11809_v8, %v14923_v49 }
 0x658   :  { %15213 = vst [vmem:[#allocation20_spill] sm:$0xff] %v14956_v42  ;;  %v11810_v54 = vpop.f32.mrf.mxu1 }
 0x659   :  { %v14958_v36 = vpop.f32.mrf.mxu0  ;;  %v14967_v18 = vadd.f32 %v11873_v48, %v10451_v3 }
 0x65a   :  { %15214 = vst [vmem:[#allocation23_spill] sm:$0xff] %v14958_v36  ;;  %v11811_v24 = vpop.f32.mrf.mxu1 }
 0x65b   :  { %v14963_v9 = vpop.f32.mrf.mxu0  ;;  %v11812_v1 = vadd.f32 %v11811_v24, %v11810_v54  ;;  %15217 = vst [vmem:[#allocation24_spill] sm:$0xff] %v14967_v18 }
 0x65c   :  { %15215 = vst [vmem:[#allocation29_spill] sm:$0xff] %v14963_v9  ;;  %v11813_v57 = vpop.f32.mrf.mxu1 }
 0x65d   :  { %v14965_v16 = vpop.f32.mrf.mxu0  ;;  %v10456_v53 = vadd.f32 %v11812_v1, %v14923_v49 }
 0x65e   :  { %15216 = vst [vmem:[#allocation21_spill] sm:$0xff] %v14965_v16  ;;  %v11814_v23 = vpop.f32.mrf.mxu1 }
 0x65f   :  { %v11815_v22 = vadd.f32 %v11814_v23, %v11813_v57  ;;  %v14972_v2 = vadd.f32 %v11876_v51, %v10456_v53 }
 0x661   :  { %v14970_v0 = vpop.f32.mrf.mxu0  ;;  %15218 = vst [vmem:[#allocation30_spill] sm:$0xff] %v14972_v2  ;;  %v10459_v17 = vadd.f32 %v11815_v22, %v14923_v49 }
 0x662   :  { %v11816_v33 = vpop.f32.mrf.mxu1 }
 0x663   :  { %v14974_v14 = vpop.f32.mrf.mxu0  ;;  %v14981_v25 = vadd.f32 %v11879_v30, %v10459_v17 }
 0x664   :  { %v11817_v34 = vpop.f32.mrf.mxu1 }
 0x665   :  { %v14977_v27 = vpop.f32.mrf.mxu0  ;;  %v14979_v59 = vadd.f32 %v11817_v34, %v11816_v33  ;;  %15219 = vst [vmem:[#allocation31_spill] sm:$0xff] %v14981_v25 }
 0x666   :  { %v11819_v26 = vpop.f32.mrf.mxu1 }
 0x667   :  { %v14983_v37 = vpop.f32.mrf.mxu0 }
 0x668   :  { %v11820_v5 = vpop.f32.mrf.mxu1 }
 0x669   :  { %v14985_v40 = vadd.f32 %v11820_v5, %v11819_v26 }
 0x66a   :  { %v11902_v12 = vpop.f32.mrf.mxu1 }
 0x66b   :  { %15220 = vst [vmem:[#allocation22_spill] sm:$0xff] %v14985_v40 }
 0x66c   :  { %v11903_v6 = vpop.f32.mrf.mxu1 }
 0x66d   :  { %v11904_v36 = vadd.f32 %v11903_v6, %v11902_v12  ;;  %v11968_v12 = vadd.f32 %v14974_v14, %v14970_v0 }
 0x66e   :  { %v11905_v63 = vpop.f32.mrf.mxu1 }
 0x66f   :  { %v11972_v45 = vpop.f32.mrf.mxu0 }
 0x670   :  { %v11906_v58 = vpop.f32.mrf.mxu1 }
 0x671   :  { %v11973_v38 = vpop.f32.mrf.mxu0  ;;  %v11907_v56 = vadd.f32 %v11906_v58, %v11905_v63 }
 0x672   :  { %v11908_v29 = vpop.f32.mrf.mxu1 }
 0x673   :  { %v11975_v4 = vpop.f32.mrf.mxu0 }
 0x674   :  { %v11909_v48 = vpop.f32.mrf.mxu1 }
 0x675   :  { %v11976_v7 = vpop.f32.mrf.mxu0 }
 0x676   :  { %v11911_v47 = vpop.f32.mrf.mxu1 }
 0x678   :  { %v11912_v52 = vpop.f32.mrf.mxu1 }
 0x67d   :  { %v14987_v60 = vpop.f32.mrf.mxu0 }
 0x67f   :  { %v14989_v19 = vpop.f32.mrf.mxu0 }
 0x681   :  { %v14993_v41 = vpop.f32.mrf.mxu0 }
 0x682   :  { %v11914_v44 = vpop.f32.mrf.mxu1 }
 0x683   :  { %v14997_v11 = vpop.f32.mrf.mxu0 }
 0x684   :  { %v11915_v51 = vpop.f32.mrf.mxu1 }
 0x686   :  { %v14991_v15 = vpop.f32.mrf.mxu1 }
 0x688   :  { %v14995_v20 = vpop.f32.mrf.mxu1 }
 0x689   :  { %v11984_v30 = vpop.f32.mrf.mxu0 }
 0x68b   :  { %v11985_v55 = vpop.f32.mrf.mxu0 }
 0x68c   :  { %v11920_v10 = vpop.f32.mrf.mxu1 }
 0x68d   :  { %v14999_v54 = vpop.f32.mrf.mxu0 }
 0x68e   :  { %v11921_v35 = vpop.f32.mrf.mxu1 }
 0x68f   :  { %v15003_v24 = vpop.f32.mrf.mxu0 }
 0x690   :  { %v11923_v28 = vpop.f32.mrf.mxu1 }
 0x692   :  { %v11924_v8 = vpop.f32.mrf.mxu1 }
 0x693   :  { %v11925_v58 = vadd.f32 %v11924_v8, %v11923_v28 }
 0x697   :  { %v15009_v53 = vpop.f32.mrf.mxu0 }
 0x698   :  { %15221 = vst [vmem:[#allocation32_spill] sm:$0xff] %v15009_v53 }
 0x699   :  { %v15013_v22 = vpop.f32.mrf.mxu0 }
 0x69a   :  { %15223 = vst [vmem:[#allocation34_spill] sm:$0xff] %v15013_v22 }
 0x69b   :  { %v15015_v17 = vpop.f32.mrf.mxu0 }
 0x69c   :  { %v15001_v3 = vpop.f32.mrf.mxu1  ;;  %15224 = vst [vmem:[#allocation35_spill] sm:$0xff] %v15015_v17 }
 0x69d   :  { %v15017_v26 = vpop.f32.mrf.mxu0 }
 0x69e   :  { %v15005_v1 = vpop.f32.mrf.mxu1  ;;  %15225 = vst [vmem:[#allocation25_spill] sm:$0xff] %v15017_v26  ;;  %v11910_v26 = vadd.f32 %v11909_v48, %v11908_v29 }
 0x6a0   :  { %v15007_v57 = vpop.f32.mrf.mxu1 }
 0x6a2   :  { %v15011_v23 = vpop.f32.mrf.mxu1 }
 0x6a3   :  { %15222 = vst [vmem:[#allocation33_spill] sm:$0xff] %v15011_v23 }
 0x6a6   :  { %v15021_v25 = vpop.f32.mrf.mxu0 }
 0x6a7   :  { %15226 = vst [vmem:[#allocation26_spill] sm:$0xff] %v15021_v25 }
 0x6a8   :  { %v15025_v16 = vpop.f32.mrf.mxu0 }
 0x6a9   :  { %15227 = vst [vmem:[#allocation36_spill] sm:$0xff] %v15025_v16  ;;  %v11913_v16 = vadd.f32 %v11912_v52, %v11911_v47  ;;  %v10605_v47 = vadd.f32 %v11907_v56, %v14929_v43  ;;  %v11977_v52 = vadd.f32 %v11976_v7, %v11975_v4  ;;  %v11919_v43 = vadd.f32 %v14995_v20, %v14991_v15 }
 0x6aa   :  { %v15031_v40 = vpop.f32.mrf.mxu0 }
 0x6ab   :  { %v11932_v33 = vpop.f32.mrf.mxu1  ;;  %15230 = vst [vmem:[#allocation38_spill] sm:$0xff] %v15031_v40  ;;  %v10602_v40 = vadd.f32 %v11904_v36, %v14926_v32  ;;  %v10613_v6 = vadd.f32 %v11913_v16, %v14935_v46  ;;  %v11971_v36 = vadd.f32 %v14983_v37, %v14977_v27  ;;  %v11986_v16 = vadd.f32 %v11985_v55, %v11984_v30 }
 0x6ac   :  { %v15037_v22 = vpop.f32.mrf.mxu0  ;;  %v10621_v15 = vadd.f32 %v11919_v43, %v14941_v61  ;;  %v15244_v43 = vld [vmem:[#allocation19_spill] sm:$0xff] }
 0x6ad   :  { %v11933_v34 = vpop.f32.mrf.mxu1  ;;  %v10699_v32 = vadd.f32 %v11968_v12, %v10602_v40  ;;  %v10710_v46 = vadd.f32 %v11977_v52, %v10613_v6  ;;  %v10702_v27 = vadd.f32 %v11971_v36, %v10605_v47  ;;  %v15239_v47 = vld [vmem:[#allocation23_spill] sm:$0xff] }
 0x6ae   :  { %v15236_v6 = vld [vmem:[#allocation26_spill] sm:$0xff] }
 0x6af   :  { %v15019_v5 = vpop.f32.mrf.mxu1 }
 0x6b1   :  { %v15023_v2 = vpop.f32.mrf.mxu1 }
 0x6b2   :  { %v11937_v28 = vadd.f32 %v15023_v2, %v15019_v5  ;;  %v15237_v2 = vld [vmem:[#allocation36_spill] sm:$0xff] }
 0x6b3   :  { %v11998_v5 = vadd.f32 %v15237_v2, %v15236_v6 }
 0x6b5   :  { %v15041_v42 = vpop.f32.mrf.mxu0 }
 0x6b6   :  { %15233 = vst [vmem:[#allocation40_spill] sm:$0xff] %v15041_v42  ;;  %v11916_v42 = vadd.f32 %v11915_v51, %v11914_v44  ;;  %v10629_v44 = vadd.f32 %v11925_v58, %v14947_v31  ;;  %v11934_v51 = vadd.f32 %v11933_v34, %v11932_v33  ;;  %v11983_v31 = vadd.f32 %v14997_v11, %v14993_v41  ;;  %v15235_v41 = vld [vmem:[#allocation18_spill] sm:$0xff] }
 0x6b7   :  { %v15049_v23 = vpop.f32.mrf.mxu0 }
 0x6b8   :  { %v10642_v61 = vadd.f32 %v11934_v51, %v14960_v62  ;;  %v10718_v12 = vadd.f32 %v11983_v31, %v10621_v15 }
 0x6b9   :  { %v15027_v9 = vpop.f32.mrf.mxu1  ;;  %v15060_v63 = vpop.f32.mrf.mxu0 }
 0x6ba   :  { %15228 = vst [vmem:[#allocation37_spill] sm:$0xff] %v15027_v9  ;;  %v10610_v9 = vadd.f32 %v11910_v26, %v14932_v13 }
 0x6bb   :  { %v15029_v21 = vpop.f32.mrf.mxu1  ;;  %v15067_v37 = vpop.f32.mrf.mxu0 }
 0x6bc   :  { %15229 = vst [vmem:[#allocation27_spill] sm:$0xff] %v15029_v21 }
 0x6bd   :  { %v15033_v18 = vpop.f32.mrf.mxu1 }
 0x6be   :  { %15231 = vst [vmem:[#allocation39_spill] sm:$0xff] %v15033_v18  ;;  %v11974_v18 = vadd.f32 %v11973_v38, %v11972_v45 }
 0x6bf   :  { %v15035_v17 = vpop.f32.mrf.mxu1 }
 0x6c0   :  { %15232 = vst [vmem:[#allocation28_spill] sm:$0xff] %v15035_v17  ;;  %v11922_v17 = vadd.f32 %v11921_v35, %v11920_v10  ;;  %v10707_v48 = vadd.f32 %v11974_v18, %v10610_v9  ;;  %v10618_v9 = vadd.f32 %v11916_v42, %v14938_v50  ;;  %v11989_v35 = vadd.f32 %v15003_v24, %v14999_v54  ;;  %v15234_v24 = vld [vmem:[#allocation33_spill] sm:$0xff] }
 0x6c1   :  { %v12008_v55 = vpop.f32.mrf.mxu0 }
 0x6c2   :  { %v10626_v45 = vadd.f32 %v11922_v17, %v14944_v39  ;;  %v11980_v39 = vadd.f32 %v14989_v19, %v14987_v60  ;;  %v11928_v60 = vadd.f32 %v15005_v1, %v15001_v3  ;;  %v10726_v54 = vadd.f32 %v11989_v35, %v10629_v44 }
 0x6c3   :  { %v10464_v3 = vadd.f32 %v14979_v59, %v14923_v49  ;;  %v11931_v1 = vadd.f32 %v15234_v24, %v15007_v57  ;;  %v15242_v59 = vld [vmem:[#allocation24_spill] sm:$0xff] }
 0x6c4   :  { %v10723_v7 = vadd.f32 %v11986_v16, %v10626_v45  ;;  %v10715_v10 = vadd.f32 %v11980_v39, %v10618_v9  ;;  %v10634_v11 = vadd.f32 %v11928_v60, %v15235_v41  ;;  %v10645_v45 = vadd.f32 %v11937_v28, %v15242_v59  ;;  %v15243_v9 = vld [vmem:[#allocation22_spill] sm:$0xff]  ;;  %v15247_v39 = vld [vmem:[#allocation27_spill] sm:$0xff] }
 0x6c5   :  { %v10467_v16 = vadd.f32 %v15243_v9, %v14923_v49  ;;  %v15253_v24 = vld [vmem:[#allocation39_spill] sm:$0xff] }
 0x6c6   :  { %v15039_v53 = vpop.f32.mrf.mxu1 }
 0x6c8   :  { %v15043_v25 = vpop.f32.mrf.mxu1 }
 0x6c9   :  { %v11946_v58 = vadd.f32 %v15043_v25, %v15039_v53 }
 0x6ca   :  { %v15046_v21 = vpop.f32.mrf.mxu1 }
 0x6cc   :  { %v15051_v29 = vpop.f32.mrf.mxu1 }
 0x6ce   :  { %v12080_v13 = vpop.f32.mrf.mxu1 }
 0x6cf   :  { %v10804_v26 = vadd.f32 %v12080_v13, %v10707_v48  ;;  %v15238_v13 = vld [vmem:[#allocation20_spill] sm:$0xff] }
 0x6d0   :  { %v10795_v38 = vpop.f32.mrf.mxu1  ;;  %v11882_v52 = vadd.f32 %v15239_v47, %v15238_v13 }
 0x6d1   :  { %v10860_v0 = vmax.f32 %v10804_v26, 0.0  ;;  %v10796_v14 = vadd.f32 %v10795_v38, %v10699_v32  ;;  %v15240_v26 = vld [vmem:[#allocation32_spill] sm:$0xff]  ;;  %v15241_v32 = vld [vmem:[#allocation34_spill] sm:$0xff]  ;;  %v12009_v38 = vpop.f32.mrf.mxu0 }
 0x6d2   :  { %v12081_v56 = vpop.f32.mrf.mxu1  ;;  %v11992_v36 = vadd.f32 %v15241_v32, %v15240_v26  ;;  %v10561_v44 = vadd.f32 %v11882_v52, %v10464_v3  ;;  %v12010_v3 = vadd.f32 %v12009_v38, %v12008_v55  ;;  %v15256_v52 = vld [vmem:[#allocation31_spill] sm:$0xff] }
 0x6d3   :  { %10876 = vst [vmem:[#allocation10 + $0x10] sm:$0xff] %v10860_v0  ;;  %v10858_v18 = vmax.f32 %v10796_v14, 0.0  ;;  %v10807_v40 = vadd.f32 %v12081_v56, %v10710_v46  ;;  %v10739_v46 = vadd.f32 %v11998_v5, %v10642_v61  ;;  %v10637_v56 = vadd.f32 %v11931_v1, %v15244_v43  ;;  %v12011_v35 = vpop.f32.mrf.mxu0  ;;  %v15254_v1 = vld [vmem:[#allocation28_spill] sm:$0xff] }
 0x6d4   :  { %v10798_v4 = vpop.f32.mrf.mxu1  ;;  %v10731_v53 = vadd.f32 %v11992_v36, %v10634_v11  ;;  %v15255_v11 = vld [vmem:[#allocation40_spill] sm:$0xff] }
 0x6d5   :  { %10874 = vst [vmem:[#allocation10] sm:$0xff] %v10858_v18  ;;  %v10861_v50 = vmax.f32 %v10807_v40, 0.0  ;;  %v10799_v42 = vadd.f32 %v10798_v4, %v10702_v27  ;;  %v15245_v18 = vld [vmem:[#allocation38_spill] sm:$0xff]  ;;  %v15246_v27 = vld [vmem:[#allocation37_spill] sm:$0xff]  ;;  %v12004_v6 = vadd.f32 %v15049_v23, %v15255_v11  ;;  %v12012_v2 = vpop.f32.mrf.mxu0 }
 0x6d6   :  { %v12084_v20 = vpop.f32.mrf.mxu1  ;;  %v12001_v40 = vadd.f32 %v15037_v22, %v15245_v18  ;;  %v11940_v4 = vadd.f32 %v15247_v39, %v15246_v27  ;;  %v11949_v22 = vadd.f32 %v15051_v29, %v15046_v21  ;;  %v12013_v26 = vadd.f32 %v12012_v2, %v12011_v35 }
 0x6d7   :  { %10877 = vst [vmem:[#allocation10 + $0x18] sm:$0xff] %v10861_v50  ;;  %v10859_v19 = vmax.f32 %v10799_v42, 0.0  ;;  %v10820_v30 = vadd.f32 %v12084_v20, %v10723_v7  ;;  %v15248_v50 = vld [vmem:[#allocation29_spill] sm:$0xff]  ;;  %v15250_v20 = vld [vmem:[#allocation35_spill] sm:$0xff] }
 0x6d8   :  { %v10811_v8 = vpop.f32.mrf.mxu1  ;;  %v15249_v42 = vld [vmem:[#allocation21_spill] sm:$0xff] }
 0x6d9   :  { %10875 = vst [vmem:[#allocation10 + $0x8] sm:$0xff] %v10859_v19  ;;  %v10864_v33 = vmax.f32 %v10820_v30, 0.0  ;;  %v10812_v17 = vadd.f32 %v10811_v8, %v10715_v10  ;;  %v11885_v15 = vadd.f32 %v15249_v42, %v15248_v50  ;;  %v15251_v10 = vld [vmem:[#allocation25_spill] sm:$0xff]  ;;  %v10742_v19 = vadd.f32 %v12001_v40, %v10645_v45  ;;  %v15252_v8 = vld [vmem:[#allocation30_spill] sm:$0xff] }
 0x6da   :  { %v12085_v34 = vpop.f32.mrf.mxu1  ;;  %v11995_v49 = vadd.f32 %v15251_v10, %v15250_v20  ;;  %v10658_v30 = vadd.f32 %v11946_v58, %v10561_v44  ;;  %v10650_v61 = vadd.f32 %v11940_v4, %v15252_v8  ;;  %v12007_v45 = vadd.f32 %v15067_v37, %v15060_v63 }
 0x6db   :  { %10880 = vst [vmem:[#allocation10 + $0x30] sm:$0xff] %v10864_v33  ;;  %v10862_v48 = vmax.f32 %v10812_v17, 0.0  ;;  %v10823_v62 = vadd.f32 %v12085_v34, %v10726_v54  ;;  %v10564_v33 = vadd.f32 %v11885_v15, %v10467_v16  ;;  %v11943_v34 = vadd.f32 %v15254_v1, %v15253_v24 }
 0x6dc   :  { %v10814_v57 = vpop.f32.mrf.mxu1  ;;  %v10734_v54 = vadd.f32 %v11995_v49, %v10637_v56  ;;  %v10747_v47 = vadd.f32 %v12004_v6, %v10650_v61 }
 0x6dd   :  { %10878 = vst [vmem:[#allocation10 + $0x20] sm:$0xff] %v10862_v48  ;;  %v10865_v0 = vmax.f32 %v10823_v62, 0.0  ;;  %v10815_v14 = vadd.f32 %v10814_v57, %v10718_v12  ;;  %v10661_v29 = vadd.f32 %v11949_v22, %v10564_v33  ;;  %v10755_v62 = vadd.f32 %v12010_v3, %v10658_v30 }
 0x6de   :  { %v12088_v7 = vpop.f32.mrf.mxu1  ;;  %v10653_v55 = vadd.f32 %v11943_v34, %v15256_v52 }
 0x6df   :  { %10881 = vst [vmem:[#allocation10 + $0x38] sm:$0xff] %v10865_v0  ;;  %v10863_v51 = vmax.f32 %v10815_v14, 0.0  ;;  %v10836_v25 = vadd.f32 %v12088_v7, %v10739_v46  ;;  %v10758_v57 = vadd.f32 %v12013_v26, %v10661_v29 }
 0x6e0   :  { %v10827_v60 = vpop.f32.mrf.mxu1  ;;  %v10750_v46 = vadd.f32 %v12007_v45, %v10653_v55 }
 0x6e1   :  { %10879 = vst [vmem:[#allocation10 + $0x28] sm:$0xff] %v10863_v51  ;;  %v10868_v31 = vmax.f32 %v10836_v25, 0.0  ;;  %v10828_v28 = vadd.f32 %v10827_v60, %v10731_v53 }
 0x6e2   :  { %v12089_v17 = vpop.f32.mrf.mxu1 }
 0x6e3   :  { %10884 = vst [vmem:[#allocation10 + $0x50] sm:$0xff] %v10868_v31  ;;  %v10866_v12 = vmax.f32 %v10828_v28, 0.0  ;;  %v10839_v41 = vadd.f32 %v12089_v17, %v10742_v19 }
 0x6e4   :  { %v10830_v21 = vpop.f32.mrf.mxu1 }
 0x6e5   :  { %10882 = vst [vmem:[#allocation10 + $0x40] sm:$0xff] %v10866_v12  ;;  %v10869_v5 = vmax.f32 %v10839_v41, 0.0  ;;  %v10831_v48 = vadd.f32 %v10830_v21, %v10734_v54 }
 0x6e6   :  { %v12092_v13 = vpop.f32.mrf.mxu1 }
 0x6e7   :  { %10885 = vst [vmem:[#allocation10 + $0x58] sm:$0xff] %v10869_v5  ;;  %v10867_v32 = vmax.f32 %v10831_v48, 0.0  ;;  %v10852_v36 = vadd.f32 %v12092_v13, %v10755_v62 }
 0x6e8   :  { %v10843_v59 = vpop.f32.mrf.mxu1 }
 0x6e9   :  { %10883 = vst [vmem:[#allocation10 + $0x48] sm:$0xff] %v10867_v32  ;;  %v10872_v23 = vmax.f32 %v10852_v36, 0.0  ;;  %v10844_v38 = vadd.f32 %v10843_v59, %v10747_v47 }
 0x6ea   :  { %v12093_v58 = vpop.f32.mrf.mxu1 }
 0x6eb   :  { %10888 = vst [vmem:[#allocation10 + $0x70] sm:$0xff] %v10872_v23  ;;  %v10870_v0 = vmax.f32 %v10844_v38, 0.0  ;;  %v10855_v14 = vadd.f32 %v12093_v58, %v10758_v57 }
 0x6ec   :  { %v10846_v9 = vpop.f32.mrf.mxu1 }
 0x6ed   :  { %10886 = vst [vmem:[#allocation10 + $0x60] sm:$0xff] %v10870_v0  ;;  %v10873_v16 = vmax.f32 %v10855_v14, 0.0  ;;  %v10847_v43 = vadd.f32 %v10846_v9, %v10750_v46 }
 0x6ef   :  { %10889 = vst [vmem:[#allocation10 + $0x78] sm:$0xff] %v10873_v16  ;;  %v10871_v56 = vmax.f32 %v10847_v43, 0.0 }
 0x6f1   :  { %10887 = vst [vmem:[#allocation10 + $0x68] sm:$0xff] %v10871_v56 }
 0x6f2   :  { %12517 = shalt.err (!%p12514_p5)
}
 0x6f3   :  { %s12541_s16 = smov 128   ;;  %s12542_s17 = smov 8  }
 0x6f4   :  { %10901 = dma.vmem_to_hbm [thread:$0]  %s10896_s14, 2048, %s15123_s5, [#allocation6], %s12541_s16, %s12541_s16, %s12542_s17  }
 0x6f5   :  { %12530 = dma.done.wait [#allocation6], 2048  }
 0x6f6   :  { %12531 = vsyncadd [#allocation6], 4294965248 }
 0x6f7   :  { %10905 = vsyncpa [#allocation5], 1 }
 0x6f8   :  { %10906 = vsyncpa [#allocation8], 1 }
 0x6f9   :  { %10907 = vsyncpa [#allocation6], 1 }

</bundles_post_ra>
